<compile_context>
chip_gen: v7x
topology: tpu7x:2x2x1
jax: 0.10.0
libtpu: 0.0.40
codegen_flags: <defaults>
</compile_context>

<pallas_src>
import jax
import jax.numpy as jnp
from jax.experimental import pallas as pl
from jax.experimental.pallas import tpu as pltpu

_NPAD = 128  # fused head output lanes (3 pos + 4 ori = 7, zero-padded to 128)


def posenet_head_kernel(x_ref, w_ref, b_ref, out_ref):
    # x_ref  : (TB, C/2, 2*HW) native dtype -- lane-dense contiguous view of NCHW:
    #          row r = channel 2r on lanes [0,HW), channel 2r+1 on lanes [HW,2*HW).
    # w_ref  : (C, 128) f32 -- fused [pos;ori] weight.T / HW, rows permuted to
    #          [even channels ; odd channels], zero-padded to 128 output lanes.
    # b_ref  : (1, 128) f32 -- [concat(pos_b, ori_b), zero pad]
    # out_ref: (TB, 128) f32 -- [:, :3] = pos, [:, 3:7] = ori
    hw = x_ref.shape[-1] // 2
    ch = w_ref.shape[0] // 2
    x = x_ref[...]
    # 8x8 avg-pool (1/HW folded into w): accumulate in f32 directly from the
    # native dtype -- no full-width f32 temporary before the reduce.
    s_even = jnp.sum(x[..., :hw], axis=-1, dtype=jnp.float32)   # (TB, C/2) chans 0,2,...
    s_odd = jnp.sum(x[..., hw:], axis=-1, dtype=jnp.float32)    # (TB, C/2) chans 1,3,...
    # F.dropout with p=0.0 (module default) is the identity -> nothing to do.
    out = jnp.dot(s_even, w_ref[:ch, :], preferred_element_type=jnp.float32)
    out = out + jnp.dot(s_odd, w_ref[ch:, :], preferred_element_type=jnp.float32)
    out_ref[...] = out + b_ref[...]


def pack_head_params(w_pos, b_pos, w_ori, b_ori, hw):
    """One-time packing (hoisted out of the per-call path): fuse both Linear
    heads, fold the 1/HW pooling scale into the weight, permute rows into the
    kernel's lane-dense [even channels ; odd channels] order, zero-pad N to 128."""
    w = jnp.concatenate([w_pos, w_ori], axis=0).T.astype(jnp.float32) * (1.0 / hw)  # (C, 7)
    w = jnp.pad(w, ((0, 0), (0, _NPAD - w.shape[1])))                               # (C, 128)
    C = w.shape[0]
    perm = jnp.concatenate([jnp.arange(0, C, 2), jnp.arange(1, C, 2)])               # even, odd
    w = w[perm]                                                                      # (C, 128)
    b = jnp.concatenate([b_pos, b_ori], axis=0).astype(jnp.float32)                  # (7,)
    b = jnp.pad(b, (0, _NPAD - b.shape[0]))[None, :]                                 # (1, 128)
    return w, b


def posenet_head(x_nchw, w_packed, b_packed, *, tb=None):
    """x_nchw: (B, 2048, 8, 8) backbone features (f32 or bf16).
    Returns (pos (B,3), ori (B,4))."""
    B, C, H, W = x_nchw.shape
    assert C == 2048 and H == 8 and W == 8, "head expects Inception-V3 Mixed_7c output"
    HW = H * W
    dsize = jnp.dtype(x_nchw.dtype).itemsize

    # Free contiguous lane-dense view of NCHW: (B, C/2, 2*HW) = (B, 1024, 128).
    x = x_nchw.reshape(B, C // 2, 2 * HW)

    if tb is None:
        # ~8 MiB input block regardless of dtype; shrink while keeping >= 2
        # batch tiles (v7x megacore split) and an 8-aligned sublane count.
        tb = 32 if dsize <= 2 else 16
        while tb > 8 and B <= tb:
            tb //= 2
    TB = min(tb, B)  # TB is a multiple of 8, or TB == B (full-dim block).
    grid = (pl.cdiv(B, TB),)

    in_block_bytes = TB * (C // 2) * (2 * HW) * dsize
    params_bytes = C * _NPAD * 4 + _NPAD * 4
    out_block_bytes = TB * _NPAD * 4
    vmem_limit = 2 * (in_block_bytes + params_bytes + out_block_bytes) + (8 << 20)
    vmem_limit = int(min(max(vmem_limit, 16 << 20), 64 << 20))

    cost = pl.CostEstimate(
        flops=2 * B * C * _NPAD + B * C * HW,
        transcendentals=0,
        bytes_accessed=B * C * HW * dsize + params_bytes + B * _NPAD * 4,
    )

    out = pl.pallas_call(
        posenet_head_kernel,
        out_shape=jax.ShapeDtypeStruct((B, _NPAD), jnp.float32),
        grid_spec=pltpu.PrefetchScalarGridSpec(
            num_scalar_prefetch=0,
            grid=grid,
            in_specs=[
                pl.BlockSpec((TB, C // 2, 2 * HW), lambda i: (i, 0, 0)),
                pl.BlockSpec((C, _NPAD), lambda i: (0, 0)),
                pl.BlockSpec((1, _NPAD), lambda i: (0, 0)),
            ],
            out_specs=pl.BlockSpec((TB, _NPAD), lambda i: (i, 0)),
        ),
        compiler_params=pltpu.CompilerParams(
            dimension_semantics=("parallel",),   # batch tiles -> both TCs on v7x
            vmem_limit_bytes=vmem_limit,
        ),
        cost_estimate=cost,
    )(x, w_packed, b_packed)

    pos = out[:, :3]
    ori = out[:, 3:7]
    return pos, ori


if __name__ == "__main__":
    key = jax.random.PRNGKey(0)
    kx, kx2, kwp, kbp, kwo, kbo = jax.random.split(key, 6)

    # Deterministic nn.Linear-style init: U(-1/sqrt(fan_in), 1/sqrt(fan_in)).
    lim = float(1.0 / jnp.sqrt(2048.0))
    w_pos = jax.random.uniform(kwp, (3, 2048), jnp.float32, -lim, lim)
    b_pos = jax.random.uniform(kbp, (3,), jnp.float32, -lim, lim)
    w_ori = jax.random.uniform(kwo, (4, 2048), jnp.float32, -lim, lim)
    b_ori = jax.random.uniform(kbo, (4,), jnp.float32, -lim, lim)

    # Pack fused head params once (hoisted out of the per-call path).
    w_packed, b_packed = pack_head_params(w_pos, b_pos, w_ori, b_ori, hw=64)

    head = jax.jit(posenet_head, static_argnames=("tb",))

    def reference(x):
        pooled = jnp.mean(x.astype(jnp.float32).reshape(x.shape[0], 2048, 64), axis=-1)
        hi = jax.lax.Precision.HIGHEST
        pos_r = jnp.matmul(pooled, w_pos.T, precision=hi) + b_pos
        ori_r = jnp.matmul(pooled, w_ori.T, precision=hi) + b_ori
        return pos_r, ori_r

    # --- Test 1: bf16 backbone features (halves HBM bytes; f32 accumulation). ---
    B = 2
    x_bf16 = jax.random.normal(kx, (B, 2048, 8, 8), jnp.float32).astype(jnp.bfloat16)
    pos, ori = jax.block_until_ready(head(x_bf16, w_packed, b_packed))
    pos_ref, ori_ref = reference(x_bf16)
    assert pos.shape == (B, 3) and ori.shape == (B, 4)
    assert jnp.allclose(pos, pos_ref, atol=1e-3, rtol=1e-3)
    assert jnp.allclose(ori, ori_ref, atol=1e-3, rtol=1e-3)

    # --- Test 2: f32 features with a ragged batch (B % TB != 0, masked last tile). ---
    B2 = 11
    x_f32 = jax.random.normal(kx2, (B2, 2048, 8, 8), jnp.float32)
    pos2, ori2 = jax.block_until_ready(head(x_f32, w_packed, b_packed, tb=8))
    pos2_ref, ori2_ref = reference(x_f32)
    assert pos2.shape == (B2, 3) and ori2.shape == (B2, 4)
    assert jnp.allclose(pos2, pos2_ref, atol=1e-4, rtol=1e-4)
    assert jnp.allclose(ori2, ori2_ref, atol=1e-4, rtol=1e-4)

    print("KERNEL_OK")
</pallas_src>

<mosaic_0001>
module attributes {stable_mosaic.version = 11 : i64} {
  func.func @posenet_head_kernel(%arg0: i32, %arg1: memref<2x1024x128xbf16, #tpu.memory_space<vmem>>, %arg2: memref<2048x128xf32, #tpu.memory_space<vmem>>, %arg3: memref<1x128xf32, #tpu.memory_space<vmem>>, %arg4: memref<2x128xf32, #tpu.memory_space<vmem>>) attributes {dimension_semantics = [#tpu.dimension_semantics<parallel>], iteration_bounds = array<i64: 1>, scalar_prefetch = 0 : i64, scratch_operands = 0 : i64, tpu.core_type = #tpu.core_type<tc>, window_params = [{transform_indices = @transform_0, window_bounds = array<i64: 2, 1024, 128>}, {pipeline_mode = #tpu.pipeline_mode<synchronous>, transform_indices = @transform_1, window_bounds = array<i64: 2048, 128>}, {pipeline_mode = #tpu.pipeline_mode<synchronous>, transform_indices = @transform_2, window_bounds = array<i64: 1, 128>}, {transform_indices = @transform_3, window_bounds = array<i64: 2, 128>}]} {
    %c0 = arith.constant 0 : index
    %c0_0 = arith.constant 0 : index
    %c0_1 = arith.constant 0 : index
    %0 = vector.load %arg1[%c0, %c0_0, %c0_1] : memref<2x1024x128xbf16, #tpu.memory_space<vmem>>, vector<2x1024x128xbf16>
    %1 = vector.extract_strided_slice %0 {offsets = [0, 0, 0], sizes = [2, 1024, 64], strides = [1, 1, 1]} : vector<2x1024x128xbf16> to vector<2x1024x64xbf16>
    %2 = arith.extf %1 : vector<2x1024x64xbf16> to vector<2x1024x64xf32>
    %cst = arith.constant dense<0.000000e+00> : vector<2x1024xf32>
    %3 = vector.multi_reduction <add>, %2, %cst [2] : vector<2x1024x64xf32> to vector<2x1024xf32>
    %4 = vector.extract_strided_slice %0 {offsets = [0, 0, 64], sizes = [2, 1024, 64], strides = [1, 1, 1]} : vector<2x1024x128xbf16> to vector<2x1024x64xbf16>
    %5 = arith.extf %4 : vector<2x1024x64xbf16> to vector<2x1024x64xf32>
    %cst_2 = arith.constant dense<0.000000e+00> : vector<2x1024xf32>
    %6 = vector.multi_reduction <add>, %5, %cst_2 [2] : vector<2x1024x64xf32> to vector<2x1024xf32>
    %c0_3 = arith.constant 0 : index
    %c0_4 = arith.constant 0 : index
    %7 = vector.load %arg2[%c0_3, %c0_4] : memref<2048x128xf32, #tpu.memory_space<vmem>>, vector<1024x128xf32>
    %cst_5 = arith.constant dense<0.000000e+00> : vector<2x128xf32>
    %8 = tpu.matmul %3, %7, %cst_5 {dimension_numbers = #tpu.dot_dimension_numbers<[1], [0], [0], [1], [0, 0, 1, 1], [], []>} : vector<2x1024xf32>, vector<1024x128xf32>, vector<2x128xf32> -> vector<2x128xf32>
    %c1024 = arith.constant 1024 : index
    %c0_6 = arith.constant 0 : index
    %9 = vector.load %arg2[%c1024, %c0_6] : memref<2048x128xf32, #tpu.memory_space<vmem>>, vector<1024x128xf32>
    %cst_7 = arith.constant dense<0.000000e+00> : vector<2x128xf32>
    %10 = tpu.matmul %6, %9, %cst_7 {dimension_numbers = #tpu.dot_dimension_numbers<[1], [0], [0], [1], [0, 0, 1, 1], [], []>} : vector<2x1024xf32>, vector<1024x128xf32>, vector<2x128xf32> -> vector<2x128xf32>
    %11 = arith.addf %8, %10 : vector<2x128xf32>
    %c0_8 = arith.constant 0 : index
    %c0_9 = arith.constant 0 : index
    %12 = vector.load %arg3[%c0_8, %c0_9] : memref<1x128xf32, #tpu.memory_space<vmem>>, vector<1x128xf32>
    %13 = vector.broadcast %12 : vector<1x128xf32> to vector<2x128xf32>
    %14 = arith.addf %11, %13 : vector<2x128xf32>
    %c0_10 = arith.constant 0 : index
    %c0_11 = arith.constant 0 : index
    %15 = vector.load %arg4[%c0_10, %c0_11] : memref<2x128xf32, #tpu.memory_space<vmem>>, vector<2x128xf32>
    tpu.vector_store %arg4[%c0_10, %c0_11], %14 {strides = array<i32>} : memref<2x128xf32, #tpu.memory_space<vmem>>, vector<2x128xf32>,
    return
  }
  func.func @transform_0(%arg0: i32) -> (i32, i32, i32) {
    %c0_i32 = arith.constant 0 : i32
    %c0_i32_0 = arith.constant 0 : i32
    %c0_i32_1 = arith.constant 0 : i32
    return %arg0, %c0_i32, %c0_i32_0 : i32, i32, i32
  }
  func.func @transform_1(%arg0: i32) -> (i32, i32) {
    %c0_i32 = arith.constant 0 : i32
    %c0_i32_0 = arith.constant 0 : i32
    %c0_i32_1 = arith.constant 0 : i32
    return %c0_i32, %c0_i32_0 : i32, i32
  }
  func.func @transform_2(%arg0: i32) -> (i32, i32) {
    %c0_i32 = arith.constant 0 : i32
    %c0_i32_0 = arith.constant 0 : i32
    %c0_i32_1 = arith.constant 0 : i32
    return %c0_i32, %c0_i32_0 : i32, i32
  }
  func.func @transform_3(%arg0: i32) -> (i32, i32) {
    %c0_i32 = arith.constant 0 : i32
    %c0_i32_0 = arith.constant 0 : i32
    return %arg0, %c0_i32 : i32, i32
  }
}

</mosaic_0001>

<bundles_post_ra>
// kernel: posenet_head.1
= control target key start
LH: loop header
LB: loop body
LE: loop exit
PB: predicated region body
PF: predicated region fallthrough
CT: control target
= control target key end

     0   :  { %vm526_vm0 = vcmask 523264   ;;  %vm3610_vm1 = vcmask 130112   ;;  %vm3617_vm2 = vcmask 195712   ;;  %vm3624_vm3 = vcmask 261312   ;;  %s14751_s0 = inlined_call_operand.vmem [shape: bf16[2,1024,128], index: 0, kind: input, shape index: {}]   ;;  %s14752_s1 = inlined_call_operand.vmem [shape: f32[2048,128], index: 1, kind: input, shape index: {}]   ;;  %s14753_s2 = inlined_call_operand.vmem [shape: f32[1,128], index: 2, kind: input, shape index: {}]   ;;  %s14754_s3 = inlined_call_operand.vmem [shape: f32[2,128], index: 3, kind: output, shape index: {}]  }
   0x1   :  { %v7534_v0 = vld [vmem:[%s14751_s0 + $0x8] sm:$0xff]   ;;  %v7023_v1 = vld [vmem:[%s14751_s0] sm:$0xff]   ;;  %v7535_v2 = vld [vmem:[%s14751_s0 + $0x10] sm:$0xff]   ;;  %vm3631_vm4 = vcmask 326912   ;;  %vm3638_vm5 = vcmask 392512   ;;  %vm3645_vm6 = vcmask 458112  }
   0x2   :  { %v7028_v3 = vunpack.c.l.bf16 %v7534_v0  ;;  %v7024_v4 = vunpack.c.l.bf16 %v7023_v1  ;;  %v7029_v5 = vunpack.c.h.bf16 %v7534_v0  ;;  %v7025_v6 = vunpack.c.h.bf16 %v7023_v1  ;;  %v7536_v7 = vld [vmem:[%s14751_s0 + $0x18] sm:$0xff]   ;;  %v7537_v15 = vld [vmem:[%s14751_s0 + $0x20] sm:$0xff]   ;;  %v8885_v18 = vld [vmem:[%s14751_s0 + $0x28] sm:$0xff]  }
   0x3   :  { %v7033_v8 = vunpack.c.h.bf16 %v7535_v2  ;;  %v7032_v9 = vunpack.c.l.bf16 %v7535_v2  ;;  %v7037_v10 = vunpack.c.h.bf16 %v7536_v7  ;;  %v7036_v14 = vunpack.c.l.bf16 %v7536_v7  ;;  %v8890_v19 = vld [vmem:[%s14751_s0 + $0x30] sm:$0xff]   ;;  %v8899_v23 = vld [vmem:[%s14751_s0 + $0x38] sm:$0xff]   ;;  %v8912_v33 = vld [vmem:[%s14751_s0 + $0x40] sm:$0xff]  }
   0x4   :  { %v533_v11 = vsel %vm526_vm0, %v7028_v3, 0.0  ;;  %v527_v12 = vsel %vm526_vm0, %v7024_v4, 0.0  ;;  %v8873_v13 = vpack.i.bf16 %v7029_v5, %v7028_v3  ;;  %v8878_v16 = vpack.i.bf16 %v7025_v6, %v7024_v4  ;;  %v8927_v38 = vld [vmem:[%s14751_s0 + $0x48] sm:$0xff]   ;;  %v8932_v39 = vld [vmem:[%s14751_s0 + $0x50] sm:$0xff]   ;;  %v8943_v41 = vld [vmem:[%s14751_s0 + $0x58] sm:$0xff]  }
   0x5   :  { %534 = vadd.xlane.f32.xlu1 %v533_v11  ;;  %528 = vadd.xlane.f32.xlu0 %v527_v12  ;;  %v8880_v17 = vpack.i.bf16 %v7033_v8, %v7032_v9  ;;  %v536_v20 = vsel %vm526_vm0, %v7029_v5, 0.0  ;;  %v530_v21 = vsel %vm526_vm0, %v7025_v6, 0.0  ;;  %v8894_v22 = vpack.i.bf16 %v7037_v10, %v7036_v14  ;;  %v8964_v53 = vld [vmem:[%s14751_s0 + $0x60] sm:$0xff]   ;;  %v8981_v56 = vld [vmem:[%s14751_s0 + $0x68] sm:$0xff]   ;;  %v8986_v57 = vld [vmem:[%s14751_s0 + $0x70] sm:$0xff]  }
   0x6   :  { %15060 = vst [vmem:[#allocation2_spill] sm:$0xff] %v8873_v13  ;;  %15061 = vst [vmem:[#allocation3_spill] sm:$0xff] %v8878_v16  ;;  %v7041_v24 = vunpack.c.h.bf16 %v7537_v15  ;;  %v7040_v25 = vunpack.c.l.bf16 %v7537_v15  ;;  %v7045_v26 = vunpack.c.h.bf16 %v8885_v18  ;;  %v7044_v27 = vunpack.c.l.bf16 %v8885_v18  ;;  %v8997_v59 = vld [vmem:[%s14751_s0 + $0x78] sm:$0xff]   ;;  %v9018_v7 = vld [vmem:[%s14751_s0 + $0x80] sm:$0xff]  }
   0x7   :  { %15062 = vst [vmem:[#allocation4_spill] sm:$0xff] %v8880_v17  ;;  %15063 = vst [vmem:[#allocation5_spill] sm:$0xff] %v8894_v22  ;;  %v7049_v28 = vunpack.c.h.bf16 %v8890_v19  ;;  %v7048_v29 = vunpack.c.l.bf16 %v8890_v19  ;;  %v7053_v31 = vunpack.c.h.bf16 %v8899_v23  ;;  %v7052_v32 = vunpack.c.l.bf16 %v8899_v23  ;;  %v9040_v11 = vld [vmem:[%s14751_s0 + $0x90] sm:$0xff]  }
   0x8   :  { %v8905_v30 = vpack.i.bf16 %v7041_v24, %v7040_v25  ;;  %v542_v34 = vsel %vm526_vm0, %v7033_v8, 0.0  ;;  %v539_v35 = vsel %vm526_vm0, %v7032_v9, 0.0  ;;  %v8916_v36 = vpack.i.bf16 %v7045_v26, %v7044_v27  ;;  %v9158_v23 = vld [vmem:[%s14751_s0 + $0xd0] sm:$0xff]  }
   0x9   :  { %537 = vadd.xlane.f32.xlu1 %v536_v20  ;;  %531 = vadd.xlane.f32.xlu0 %v530_v21  ;;  %v8922_v37 = vpack.i.bf16 %v7049_v28, %v7048_v29  ;;  %v8938_v40 = vpack.i.bf16 %v7053_v31, %v7052_v32  ;;  %v548_v42 = vsel %vm526_vm0, %v7037_v10, 0.0  ;;  %v7057_v43 = vunpack.c.h.bf16 %v8912_v33  ;;  %v9035_v10 = vld [vmem:[%s14751_s0 + $0x88] sm:$0xff]  }
   0xa   :  { %15064 = vst [vmem:[#allocation6_spill] sm:$0xff] %v8905_v30  ;;  %15065 = vst [vmem:[#allocation7_spill] sm:$0xff] %v8916_v36  ;;  %v7056_v44 = vunpack.c.l.bf16 %v8912_v33  ;;  %v7061_v45 = vunpack.c.h.bf16 %v8927_v38  ;;  %v7060_v46 = vunpack.c.l.bf16 %v8927_v38  ;;  %v14792_v47 = vunpack.c.h.bf16 %v8932_v39 }
   0xb   :  { %15066 = vst [vmem:[#allocation8_spill] sm:$0xff] %v8922_v37  ;;  %15067 = vst [vmem:[#allocation9_spill] sm:$0xff] %v8938_v40  ;;  %v14789_v48 = vunpack.c.l.bf16 %v8932_v39  ;;  %v545_v49 = vsel %vm526_vm0, %v7036_v14, 0.0  ;;  %v14788_v51 = vunpack.c.h.bf16 %v8943_v41  ;;  %v14787_v52 = vunpack.c.l.bf16 %v8943_v41  ;;  %v9051_v14 = vld [vmem:[%s14751_s0 + $0x98] sm:$0xff]  }
   0xc   :  { %v8957_v50 = vpack.i.bf16 %v7057_v43, %v7056_v44  ;;  %v8970_v54 = vpack.i.bf16 %v7061_v45, %v7060_v46  ;;  %v554_v60 = vsel %vm526_vm0, %v7041_v24, 0.0  ;;  %v551_v61 = vsel %vm526_vm0, %v7040_v25, 0.0 }
   0xd   :  { %543 = vadd.xlane.f32.xlu1 %v542_v34  ;;  %540 = vadd.xlane.f32.xlu0 %v539_v35  ;;  %v8976_v55 = vpack.i.bf16 %v14792_v47, %v14789_v48  ;;  %v8992_v58 = vpack.i.bf16 %v14788_v51, %v14787_v52  ;;  %v14784_v62 = vunpack.c.h.bf16 %v8964_v53  ;;  %v14777_v63 = vunpack.c.l.bf16 %v8964_v53  ;;  %v9274_v47 = vld [vmem:[%s14751_s0 + $0x110] sm:$0xff]  }
   0xe   :  { %15068 = vst [vmem:[#allocation10_spill] sm:$0xff] %v8957_v50  ;;  %15069 = vst [vmem:[#allocation11_spill] sm:$0xff] %v8970_v54  ;;  %v14776_v0 = vunpack.c.h.bf16 %v8981_v56  ;;  %v14775_v1 = vunpack.c.l.bf16 %v8981_v56  ;;  %v14772_v2 = vunpack.c.h.bf16 %v8986_v57  ;;  %v14765_v3 = vunpack.c.l.bf16 %v8986_v57 }
   0xf   :  { %15070 = vst [vmem:[#allocation12_spill] sm:$0xff] %v8976_v55  ;;  %15071 = vst [vmem:[#allocation13_spill] sm:$0xff] %v8992_v58  ;;  %v9011_v4 = vpack.i.bf16 %v14784_v62, %v14777_v63  ;;  %v14764_v5 = vunpack.c.h.bf16 %v8997_v59  ;;  %v14761_v6 = vunpack.c.l.bf16 %v8997_v59  ;;  %v560_v15 = vsel %vm526_vm0, %v7045_v26, 0.0  ;;  %v9194_v63 = vld [vmem:[%s14751_s0 + $0xe0] sm:$0xff]  }
  0x10   :  { %v9024_v8 = vpack.i.bf16 %v14776_v0, %v14775_v1  ;;  %v9030_v9 = vpack.i.bf16 %v14772_v2, %v14765_v3  ;;  %v557_v18 = vsel %vm526_vm0, %v7044_v27, 0.0  ;;  %v14760_v20 = vunpack.c.h.bf16 %v9018_v7  ;;  %v9130_v3 = vld [vmem:[%s14751_s0 + $0xc0] sm:$0xff]  }
  0x11   :  { %549 = vadd.xlane.f32.xlu1 %v548_v42  ;;  %546 = vadd.xlane.f32.xlu0 %v545_v49  ;;  %15072 = vst [vmem:[#allocation14_spill] sm:$0xff] %v9011_v4  ;;  %v9046_v12 = vpack.i.bf16 %v14764_v5, %v14761_v6  ;;  %v14755_v21 = vunpack.c.l.bf16 %v9018_v7  ;;  %v14759_v24 = vunpack.c.h.bf16 %v9035_v10  ;;  %v14756_v25 = vunpack.c.l.bf16 %v9035_v10  ;;  %v9072_v49 = vld [vmem:[%s14751_s0 + $0xa0] sm:$0xff]  }
  0x12   :  { %15073 = vst [vmem:[#allocation15_spill] sm:$0xff] %v9024_v8  ;;  %15074 = vst [vmem:[#allocation16_spill] sm:$0xff] %v9030_v9  ;;  %v14758_v34 = vunpack.c.h.bf16 %v9040_v11  ;;  %v14757_v35 = vunpack.c.l.bf16 %v9040_v11  ;;  %v14763_v26 = vunpack.c.h.bf16 %v9051_v14  ;;  %v14762_v27 = vunpack.c.l.bf16 %v9051_v14 }
  0x13   :  { %15075 = vst [vmem:[#allocation17_spill] sm:$0xff] %v9046_v12  ;;  %v9065_v42 = vpack.i.bf16 %v14760_v20, %v14755_v21  ;;  %v9089_v21 = vld [vmem:[%s14751_s0 + $0xa8] sm:$0xff]   ;;  %v14766_v20 = vunpack.c.l.bf16 %v9072_v49  ;;  %v14781_v1 = vunpack.c.l.bf16 %v9158_v23  ;;  %v575_v0 = vsel %vm526_vm0, %v7056_v44, 0.0 }
  0x14   :  { %v14770_v19 = vunpack.c.l.bf16 %v9089_v21  ;;  %v14791_v62 = vunpack.c.h.bf16 %v9194_v63  ;;  %vm15057_vm7 = vcmask 523712   ;;  %vm14977_vm8 = vcmask 589312  }
  0x15   :  { %555 = vadd.xlane.f32.xlu1 %v554_v60  ;;  %552 = vadd.xlane.f32.xlu0 %v551_v61  ;;  %15076 = vst [vmem:[#allocation18_spill] sm:$0xff] %v9065_v42  ;;  %v9078_v60 = vpack.i.bf16 %v14759_v24, %v14756_v25  ;;  %v9084_v61 = vpack.i.bf16 %v14758_v34, %v14757_v35  ;;  %v563_v25 = vsel %vm526_vm0, %v7048_v29, 0.0  ;;  %v9111_v34 = vld [vmem:[%s14751_s0 + $0xb8] sm:$0xff]   ;;  %v14767_v24 = vunpack.c.h.bf16 %v9072_v49 }
  0x16   :  { %v9106_v35 = vpack.i.bf16 %v14763_v26, %v14762_v27  ;;  %v14774_v26 = vunpack.c.h.bf16 %v9111_v34  ;;  %v14773_v5 = vunpack.c.l.bf16 %v9111_v34  ;;  %vm15058_vm9 = vcmask 654912  }
  0x17   :  { %15077 = vst [vmem:[#allocation19_spill] sm:$0xff] %v9078_v60  ;;  %15078 = vst [vmem:[#allocation20_spill] sm:$0xff] %v9084_v61  ;;  %v9123_v27 = vpack.i.bf16 %v14767_v24, %v14766_v20  ;;  %vm3673_vm10 = vcmask 720512   ;;  %vm14976_vm11 = vcmask 786112   ;;  %vm3687_vm12 = vcmask 851712  }
  0x18   :  { %15079 = vst [vmem:[#allocation21_spill] sm:$0xff] %v9106_v35  ;;  %vm3694_vm13 = vcmask 917312   ;;  %vm3701_vm14 = vcmask 982912   ;;  %vm3708_vm15 = vcmask 1048512  }
  0x19   :  { %561 = vadd.xlane.f32.xlu1 %v560_v15  ;;  %558 = vadd.xlane.f32.xlu0 %v557_v18  ;;  %v9094_v15 = vld [vmem:[%s14751_s0 + $0xb0] sm:$0xff]   ;;  %v566_v18 = vsel %vm526_vm0, %v7049_v28, 0.0  ;;  %v14771_v28 = vunpack.c.h.bf16 %v9089_v21  ;;  %15080 = vst [vmem:[#allocation22_spill] sm:$0xff] %v9123_v27 }
  0x1a   :  { %v14769_v29 = vunpack.c.h.bf16 %v9094_v15  ;;  %v14768_v6 = vunpack.c.l.bf16 %v9094_v15 }
  0x1b   :  { %v9142_v20 = vpack.i.bf16 %v14771_v28, %v14770_v19  ;;  %v14779_v19 = vunpack.c.h.bf16 %v9130_v3  ;;  %v14778_v28 = vunpack.c.l.bf16 %v9130_v3 }
  0x1c   :  { %v9148_v24 = vpack.i.bf16 %v14769_v29, %v14768_v6  ;;  %v9169_v6 = vld [vmem:[%s14751_s0 + $0xd8] sm:$0xff]   ;;  %v578_v29 = vsel %vm526_vm0, %v7057_v43, 0.0 }
  0x1d   :  { %567 = vadd.xlane.f32.xlu1 %v566_v18  ;;  %564 = vadd.xlane.f32.xlu0 %v563_v25  ;;  %v572_v18 = vsel %vm526_vm0, %v7053_v31, 0.0  ;;  %v569_v25 = vsel %vm526_vm0, %v7052_v32, 0.0  ;;  %15081 = vst [vmem:[#allocation23_spill] sm:$0xff] %v9142_v20  ;;  %v9153_v31 = vld [vmem:[%s14751_s0 + $0xc8] sm:$0xff]   ;;  %v9164_v32 = vpack.i.bf16 %v14774_v26, %v14773_v5  ;;  %v14782_v26 = vunpack.c.h.bf16 %v9158_v23 }
  0x1e   :  { %15082 = vst [vmem:[#allocation24_spill] sm:$0xff] %v9148_v24  ;;  %v14783_v2 = vunpack.c.h.bf16 %v9153_v31  ;;  %v14780_v5 = vunpack.c.l.bf16 %v9153_v31  ;;  %v9187_v43 = vpack.i.bf16 %v14779_v19, %v14778_v28  ;;  %v9211_v28 = vld [vmem:[%s14751_s0 + $0xe8] sm:$0xff]   ;;  %v9216_v19 = vld [vmem:[%s14751_s0 + $0xf0] sm:$0xff]  }
  0x1f   :  { %15083 = vst [vmem:[#allocation25_spill] sm:$0xff] %v9164_v32  ;;  %v9206_v44 = vpack.i.bf16 %v14782_v26, %v14781_v1  ;;  %v9227_v1 = vld [vmem:[%s14751_s0 + $0xf8] sm:$0xff]   ;;  %v584_v26 = vsel %vm526_vm0, %v7061_v45, 0.0  ;;  %v14793_v52 = vunpack.c.l.bf16 %v9211_v28  ;;  %v14795_v51 = vunpack.c.h.bf16 %v9216_v19  ;;  %v9532_v24 = vld [vmem:[%s14751_s0 + $0x190] sm:$0xff]  }
  0x20   :  { %15084 = vst [vmem:[#allocation26_spill] sm:$0xff] %v9187_v43  ;;  %v9200_v33 = vpack.i.bf16 %v14783_v2, %v14780_v5  ;;  %v581_v2 = vsel %vm526_vm0, %v7060_v46, 0.0  ;;  %v14798_v38 = vunpack.c.h.bf16 %v9227_v1  ;;  %v14797_v46 = vunpack.c.l.bf16 %v9227_v1 }
  0x21   :  { %573 = vadd.xlane.f32.xlu1 %v572_v18  ;;  %570 = vadd.xlane.f32.xlu0 %v569_v25  ;;  %v14786_v18 = vunpack.c.h.bf16 %v9169_v6  ;;  %v14785_v25 = vunpack.c.l.bf16 %v9169_v6  ;;  %15086 = vst [vmem:[#allocation28_spill] sm:$0xff] %v9206_v44 }
  0x22   :  { %15085 = vst [vmem:[#allocation27_spill] sm:$0xff] %v9200_v33 }
  0x23   :  { %v9222_v5 = vpack.i.bf16 %v14786_v18, %v14785_v25  ;;  %v14790_v25 = vunpack.c.l.bf16 %v9194_v63  ;;  %v14796_v18 = vunpack.c.h.bf16 %v9211_v28 }
  0x25   :  { %15087 = vst [vmem:[#allocation29_spill] sm:$0xff] %v9222_v5  ;;  %579 = vadd.xlane.f32.xlu1 %v578_v29  ;;  %576 = vadd.xlane.f32.xlu0 %v575_v0  ;;  %v14794_v0 = vunpack.c.l.bf16 %v9216_v19  ;;  %v9245_v45 = vpack.i.bf16 %v14791_v62, %v14790_v25  ;;  %v9252_v29 = vld [vmem:[%s14751_s0 + $0x100] sm:$0xff]   ;;  %v9258_v48 = vpack.i.bf16 %v14796_v18, %v14793_v52  ;;  %v9269_v62 = vld [vmem:[%s14751_s0 + $0x108] sm:$0xff]  }
  0x26   :  { %v9280_v52 = vpack.i.bf16 %v14798_v38, %v14797_v46  ;;  %v14801_v38 = vunpack.c.l.bf16 %v9269_v62  ;;  %v9310_v46 = vld [vmem:[%s14751_s0 + $0x120] sm:$0xff]  }
  0x27   :  { %15088 = vst [vmem:[#allocation30_spill] sm:$0xff] %v9245_v45  ;;  %15089 = vst [vmem:[#allocation31_spill] sm:$0xff] %v9258_v48  ;;  %v9264_v25 = vpack.i.bf16 %v14795_v51, %v14794_v0  ;;  %v9285_v0 = vld [vmem:[%s14751_s0 + $0x118] sm:$0xff]   ;;  %v15092_v51 = vunpack.c.h.bf16 %v8932_v39  ;;  %v14799_v48 = vunpack.c.l.bf16 %v9252_v29  ;;  %v15194_v61 = vunpack.c.l.bf16 %v9310_v46 }
  0x28   :  { %15091 = vst [vmem:[#allocation33_spill] sm:$0xff] %v9280_v52  ;;  %v15095_v52 = vunpack.c.h.bf16 %v9269_v62 }
  0x29   :  { %15090 = vst [vmem:[#allocation32_spill] sm:$0xff] %v9264_v25  ;;  %585 = vadd.xlane.f32.xlu1 %v584_v26  ;;  %582 = vadd.xlane.f32.xlu0 %v581_v2  ;;  %v590_v18 = vsel %vm526_vm0, %v15092_v51, 0.0  ;;  %v15093_v25 = vunpack.c.l.bf16 %v8932_v39  ;;  %v14800_v2 = vunpack.c.h.bf16 %v9252_v29  ;;  %v743_v60 = vsel %vm526_vm0, %v15194_v61, 0.0 }
  0x2a   :  { %v9316_v45 = vpack.i.bf16 %v15095_v52, %v14801_v38  ;;  %v15102_v38 = vunpack.c.l.bf16 %v9285_v0 }
  0x2b   :  { %v587_v26 = vsel %vm526_vm0, %v15093_v25, 0.0  ;;  %v9303_v51 = vpack.i.bf16 %v14800_v2, %v14799_v48  ;;  %v15097_v48 = vunpack.c.l.bf16 %v9274_v47  ;;  %v15098_v2 = vunpack.c.h.bf16 %v9274_v47  ;;  %v9327_v25 = vld [vmem:[%s14751_s0 + $0x128] sm:$0xff]  }
  0x2c   :  { %15096 = vst [vmem:[#allocation35_spill] sm:$0xff] %v9316_v45  ;;  %v15103_v45 = vunpack.c.h.bf16 %v9285_v0  ;;  %v14803_v44 = vunpack.c.l.bf16 %v9327_v25  ;;  %v15197_v61 = vunpack.c.h.bf16 %v9327_v25 }
  0x2d   :  { %15094 = vst [vmem:[#allocation34_spill] sm:$0xff] %v9303_v51  ;;  %591 = vadd.xlane.f32.xlu1 %v590_v18  ;;  %588 = vadd.xlane.f32.xlu0 %v587_v26  ;;  %v9322_v39 = vpack.i.bf16 %v15098_v2, %v15097_v48  ;;  %v15100_v18 = vunpack.c.h.bf16 %v8943_v41  ;;  %v15101_v51 = vunpack.c.l.bf16 %v8943_v41  ;;  %v14805_v48 = vunpack.c.h.bf16 %v9310_v46 }
  0x2e   :  { %v9339_v5 = vpack.i.bf16 %v15103_v45, %v15102_v38  ;;  %v14802_v2 = vunpack.c.l.bf16 %v9310_v46  ;;  %v15107_v38 = vunpack.c.l.bf16 %v8964_v53 }
  0x2f   :  { %15099 = vst [vmem:[#allocation36_spill] sm:$0xff] %v9322_v39  ;;  %v596_v26 = vsel %vm526_vm0, %v15100_v18, 0.0  ;;  %v593_v52 = vsel %vm526_vm0, %v15101_v51, 0.0  ;;  %v14804_v39 = vunpack.c.h.bf16 %v9327_v25  ;;  %v15106_v51 = vunpack.c.h.bf16 %v8964_v53  ;;  %v9373_v53 = vld [vmem:[%s14751_s0 + $0x138] sm:$0xff]  }
  0x30   :  { %15104 = vst [vmem:[#allocation37_spill] sm:$0xff] %v9339_v5  ;;  %v9349_v41 = vpack.i.bf16 %v14805_v48, %v14802_v2  ;;  %v599_v18 = vsel %vm526_vm0, %v15107_v38, 0.0  ;;  %v15109_v38 = vunpack.c.h.bf16 %v8981_v56 }
  0x31   :  { %597 = vadd.xlane.f32.xlu1 %v596_v26  ;;  %594 = vadd.xlane.f32.xlu0 %v593_v52  ;;  %v602_v45 = vsel %vm526_vm0, %v15106_v51, 0.0  ;;  %v9361_v26 = vpack.i.bf16 %v14804_v39, %v14803_v44  ;;  %v9366_v52 = vld [vmem:[%s14751_s0 + $0x130] sm:$0xff]   ;;  %v15110_v39 = vunpack.c.l.bf16 %v8981_v56  ;;  %v15112_v56 = vunpack.c.h.bf16 %v8986_v57 }
  0x32   :  { %15105 = vst [vmem:[#allocation38_spill] sm:$0xff] %v9349_v41  ;;  %v14807_v2 = vunpack.c.h.bf16 %v9366_v52  ;;  %v14806_v51 = vunpack.c.l.bf16 %v9366_v52  ;;  %v608_v44 = vsel %vm526_vm0, %v15109_v38, 0.0  ;;  %v9392_v41 = vld [vmem:[%s14751_s0 + $0x140] sm:$0xff]   ;;  %v15113_v38 = vunpack.c.l.bf16 %v8986_v57 }
  0x33   :  { %15108 = vst [vmem:[#allocation39_spill] sm:$0xff] %v9361_v26  ;;  %v605_v48 = vsel %vm526_vm0, %v15110_v39, 0.0  ;;  %v14808_v26 = vunpack.c.l.bf16 %v9373_v53  ;;  %v614_v39 = vsel %vm526_vm0, %v15112_v56, 0.0  ;;  %v14810_v5 = vunpack.c.l.bf16 %v9392_v41 }
  0x34   :  { %v15205_v40 = vunpack.c.l.bf16 %v9366_v52  ;;  %v15212_v36 = vunpack.c.h.bf16 %v9392_v41 }
  0x35   :  { %603 = vadd.xlane.f32.xlu1 %v602_v45  ;;  %600 = vadd.xlane.f32.xlu0 %v599_v18  ;;  %v9385_v45 = vpack.i.bf16 %v14807_v2, %v14806_v51  ;;  %v14809_v18 = vunpack.c.h.bf16 %v9373_v53  ;;  %v611_v51 = vsel %vm526_vm0, %v15113_v38, 0.0  ;;  %v15117_v38 = vunpack.c.l.bf16 %v8997_v59 }
  0x37   :  { %15111 = vst [vmem:[#allocation40_spill] sm:$0xff] %v9385_v45  ;;  %v9404_v2 = vpack.i.bf16 %v14809_v18, %v14808_v26  ;;  %v14811_v45 = vunpack.c.h.bf16 %v9392_v41  ;;  %v617_v26 = vsel %vm526_vm0, %v15117_v38, 0.0 }
  0x39   :  { %609 = vadd.xlane.f32.xlu1 %v608_v44  ;;  %606 = vadd.xlane.f32.xlu0 %v605_v48  ;;  %15114 = vst [vmem:[#allocation41_spill] sm:$0xff] %v9404_v2  ;;  %v9411_v44 = vld [vmem:[%s14751_s0 + $0x148] sm:$0xff]   ;;  %v9417_v57 = vpack.i.bf16 %v14811_v45, %v14810_v5  ;;  %v15116_v48 = vunpack.c.h.bf16 %v8997_v59  ;;  %v9441_v59 = vld [vmem:[%s14751_s0 + $0x158] sm:$0xff]   ;;  %v9448_v5 = vld [vmem:[%s14751_s0 + $0x160] sm:$0xff]   ;;  %v15119_v45 = vunpack.c.h.bf16 %v9018_v7 }
  0x3a   :  { %v14813_v18 = vunpack.c.h.bf16 %v9411_v44  ;;  %v14812_v2 = vunpack.c.l.bf16 %v9411_v44  ;;  %v14816_v33 = vunpack.c.l.bf16 %v9441_v59 }
  0x3b   :  { %15115 = vst [vmem:[#allocation42_spill] sm:$0xff] %v9417_v57  ;;  %v620_v56 = vsel %vm526_vm0, %v15116_v48, 0.0  ;;  %v14817_v57 = vunpack.c.h.bf16 %v9441_v59 }
  0x3d   :  { %615 = vadd.xlane.f32.xlu1 %v614_v39  ;;  %612 = vadd.xlane.f32.xlu0 %v611_v51  ;;  %v9430_v51 = vld [vmem:[%s14751_s0 + $0x150] sm:$0xff]   ;;  %v9436_v39 = vpack.i.bf16 %v14813_v18, %v14812_v2  ;;  %v626_v2 = vsel %vm526_vm0, %v15119_v45, 0.0  ;;  %v15120_v18 = vunpack.c.l.bf16 %v9018_v7  ;;  %v9487_v45 = vld [vmem:[%s14751_s0 + $0x178] sm:$0xff]   ;;  %v15123_v7 = vunpack.c.h.bf16 %v9035_v10 }
  0x3e   :  { %v14815_v48 = vunpack.c.h.bf16 %v9430_v51  ;;  %v14814_v38 = vunpack.c.l.bf16 %v9430_v51 }
  0x3f   :  { %15118 = vst [vmem:[#allocation43_spill] sm:$0xff] %v9436_v39  ;;  %v623_v39 = vsel %vm526_vm0, %v15120_v18, 0.0  ;;  %v9474_v18 = vld [vmem:[%s14751_s0 + $0x170] sm:$0xff]  }
  0x41   :  { %621 = vadd.xlane.f32.xlu1 %v620_v56  ;;  %618 = vadd.xlane.f32.xlu0 %v617_v26  ;;  %v9459_v26 = vld [vmem:[%s14751_s0 + $0x168] sm:$0xff]   ;;  %v9465_v56 = vpack.i.bf16 %v14815_v48, %v14814_v38  ;;  %v9480_v38 = vpack.i.bf16 %v14817_v57, %v14816_v33  ;;  %v15125_v33 = vunpack.c.l.bf16 %v9448_v5  ;;  %v15126_v57 = vunpack.c.h.bf16 %v9448_v5 }
  0x42   :  { %v15129_v32 = vunpack.c.h.bf16 %v9459_v26 }
  0x43   :  { %15121 = vst [vmem:[#allocation44_spill] sm:$0xff] %v9465_v56  ;;  %15122 = vst [vmem:[#allocation45_spill] sm:$0xff] %v9480_v38  ;;  %v9499_v48 = vpack.i.bf16 %v15126_v57, %v15125_v33  ;;  %v9504_v56 = vld [vmem:[%s14751_s0 + $0x180] sm:$0xff]   ;;  %v15128_v38 = vunpack.c.l.bf16 %v9459_v26  ;;  %v9519_v57 = vld [vmem:[%s14751_s0 + $0x188] sm:$0xff]   ;;  %v15132_v33 = vunpack.c.h.bf16 %v9040_v11 }
  0x44   :  { %v14822_v27 = vunpack.c.h.bf16 %v9519_v57 }
  0x45   :  { %627 = vadd.xlane.f32.xlu1 %v626_v2  ;;  %624 = vadd.xlane.f32.xlu0 %v623_v39  ;;  %v632_v2 = vsel %vm526_vm0, %v15123_v7, 0.0  ;;  %v15124_v39 = vunpack.c.l.bf16 %v9035_v10  ;;  %15127 = vst [vmem:[#allocation46_spill] sm:$0xff] %v9499_v48  ;;  %v9510_v7 = vpack.i.bf16 %v15129_v32, %v15128_v38  ;;  %v14819_v10 = vunpack.c.h.bf16 %v9474_v18 }
  0x47   :  { %v629_v43 = vsel %vm526_vm0, %v15124_v39, 0.0  ;;  %15130 = vst [vmem:[#allocation47_spill] sm:$0xff] %v9510_v7  ;;  %v14818_v39 = vunpack.c.l.bf16 %v9474_v18  ;;  %v14820_v7 = vunpack.c.l.bf16 %v9504_v56 }
  0x49   :  { %633 = vadd.xlane.f32.xlu1 %v632_v2  ;;  %630 = vadd.xlane.f32.xlu0 %v629_v43  ;;  %v9525_v32 = vpack.i.bf16 %v14819_v10, %v14818_v39  ;;  %v638_v2 = vsel %vm526_vm0, %v15132_v33, 0.0  ;;  %v15133_v43 = vunpack.c.l.bf16 %v9040_v11  ;;  %v15134_v39 = vunpack.c.l.bf16 %v9487_v45 }
  0x4a   :  { %v15135_v10 = vunpack.c.h.bf16 %v9487_v45  ;;  %v14821_v33 = vunpack.c.l.bf16 %v9519_v57  ;;  %v15141_v11 = vunpack.c.l.bf16 %v9051_v14 }
  0x4b   :  { %15131 = vst [vmem:[#allocation48_spill] sm:$0xff] %v9525_v32  ;;  %v635_v48 = vsel %vm526_vm0, %v15133_v43, 0.0  ;;  %v15137_v32 = vunpack.c.h.bf16 %v9504_v56  ;;  %v14823_v43 = vunpack.c.l.bf16 %v9532_v24 }
  0x4c   :  { %v9544_v38 = vpack.i.bf16 %v15135_v10, %v15134_v39  ;;  %v9560_v10 = vpack.i.bf16 %v14822_v27, %v14821_v33  ;;  %v9565_v39 = vld [vmem:[%s14751_s0 + $0x198] sm:$0xff]  }
  0x4d   :  { %v9550_v20 = vpack.i.bf16 %v15137_v32, %v14820_v7  ;;  %639 = vadd.xlane.f32.xlu1 %v638_v2  ;;  %636 = vadd.xlane.f32.xlu0 %v635_v48  ;;  %v15140_v32 = vunpack.c.h.bf16 %v9051_v14  ;;  %v641_v2 = vsel %vm526_vm0, %v15141_v11, 0.0  ;;  %v15142_v48 = vunpack.c.h.bf16 %v9532_v24  ;;  %v9590_v14 = vld [vmem:[%s14751_s0 + $0x1a0] sm:$0xff]  }
  0x4e   :  { %15136 = vst [vmem:[#allocation49_spill] sm:$0xff] %v9544_v38  ;;  %15139 = vst [vmem:[#allocation51_spill] sm:$0xff] %v9560_v10  ;;  %v14825_v33 = vunpack.c.h.bf16 %v9565_v39  ;;  %v14824_v27 = vunpack.c.l.bf16 %v9565_v39  ;;  %v15145_v11 = vunpack.c.h.bf16 %v9072_v49  ;;  %v3599_v10 = vlaneseq }
  0x4f   :  { %15138 = vst [vmem:[#allocation50_spill] sm:$0xff] %v9550_v20  ;;  %v644_v7 = vsel %vm526_vm0, %v15140_v32, 0.0  ;;  %v9577_v20 = vpack.i.bf16 %v15142_v48, %v14823_v43  ;;  %v15146_v43 = vunpack.c.l.bf16 %v9072_v49  ;;  %v15148_v49 = vunpack.c.h.bf16 %v9089_v21 }
  0x50   :  { %v9585_v32 = vpack.i.bf16 %v14825_v33, %v14824_v27  ;;  %v650_v48 = vsel %vm526_vm0, %v15145_v11, 0.0  ;;  %v9609_v11 = vld [vmem:[%s14751_s0 + $0x1a8] sm:$0xff]   ;;  %v15149_v33 = vunpack.c.l.bf16 %v9089_v21  ;;  %v15151_v21 = vunpack.c.h.bf16 %v9094_v15 }
  0x51   :  { %15143 = vst [vmem:[#allocation52_spill] sm:$0xff] %v9577_v20  ;;  %645 = vadd.xlane.f32.xlu1 %v644_v7  ;;  %642 = vadd.xlane.f32.xlu0 %v641_v2  ;;  %v647_v7 = vsel %vm526_vm0, %v15146_v43, 0.0  ;;  %v14827_v2 = vunpack.c.h.bf16 %v9590_v14  ;;  %v14826_v20 = vunpack.c.l.bf16 %v9590_v14  ;;  %v656_v43 = vsel %vm526_vm0, %v15148_v49, 0.0  ;;  %v9628_v49 = vld [vmem:[%s14751_s0 + $0x1b0] sm:$0xff]  }
  0x52   :  { %15144 = vst [vmem:[#allocation53_spill] sm:$0xff] %v9585_v32  ;;  %v14828_v32 = vunpack.c.l.bf16 %v9609_v11  ;;  %v9866_v38 = vand.u32 127, %v3599_v10 }
  0x53   :  { %v9604_v27 = vpack.i.bf16 %v14827_v2, %v14826_v20  ;;  %v15152_v2 = vunpack.c.l.bf16 %v9094_v15  ;;  %v15154_v15 = vunpack.c.h.bf16 %v9111_v34 }
  0x54   :  { %v3619_v35 = vadd.s32 4294967272, %v9866_v38  ;;  %v3633_v42 = vadd.s32 4294967256, %v9866_v38  ;;  %v3647_v8 = vadd.s32 4294967240, %v9866_v38 }
  0x55   :  { %651 = vadd.xlane.f32.xlu1 %v650_v48  ;;  %648 = vadd.xlane.f32.xlu0 %v647_v7  ;;  %15147 = vst [vmem:[#allocation54_spill] sm:$0xff] %v9604_v27  ;;  %v653_v48 = vsel %vm526_vm0, %v15149_v33, 0.0  ;;  %v14829_v7 = vunpack.c.h.bf16 %v9609_v11  ;;  %v662_v33 = vsel %vm526_vm0, %v15151_v21, 0.0  ;;  %v14830_v27 = vunpack.c.l.bf16 %v9628_v49  ;;  %v9647_v21 = vld [vmem:[%s14751_s0 + $0x1b8] sm:$0xff]  }
  0x57   :  { %v9623_v20 = vpack.i.bf16 %v14829_v7, %v14828_v32  ;;  %v15155_v7 = vunpack.c.l.bf16 %v9111_v34  ;;  %v15157_v34 = vunpack.c.h.bf16 %v9130_v3 }
  0x59   :  { %657 = vadd.xlane.f32.xlu1 %v656_v43  ;;  %654 = vadd.xlane.f32.xlu0 %v653_v48  ;;  %15150 = vst [vmem:[#allocation55_spill] sm:$0xff] %v9623_v20  ;;  %v659_v43 = vsel %vm526_vm0, %v15152_v2, 0.0  ;;  %v14831_v48 = vunpack.c.h.bf16 %v9628_v49  ;;  %v668_v2 = vsel %vm526_vm0, %v15154_v15, 0.0  ;;  %v14832_v20 = vunpack.c.l.bf16 %v9647_v21  ;;  %v9666_v15 = vld [vmem:[%s14751_s0 + $0x1c0] sm:$0xff]  }
  0x5b   :  { %v9642_v32 = vpack.i.bf16 %v14831_v48, %v14830_v27  ;;  %v15158_v48 = vunpack.c.l.bf16 %v9130_v3  ;;  %v15160_v3 = vunpack.c.h.bf16 %v9153_v31 }
  0x5d   :  { %663 = vadd.xlane.f32.xlu1 %v662_v33  ;;  %660 = vadd.xlane.f32.xlu0 %v659_v43  ;;  %15153 = vst [vmem:[#allocation56_spill] sm:$0xff] %v9642_v32  ;;  %v665_v33 = vsel %vm526_vm0, %v15155_v7, 0.0  ;;  %v14833_v43 = vunpack.c.h.bf16 %v9647_v21  ;;  %v674_v7 = vsel %vm526_vm0, %v15157_v34, 0.0  ;;  %v14834_v32 = vunpack.c.l.bf16 %v9666_v15  ;;  %v9685_v34 = vld [vmem:[%s14751_s0 + $0x1c8] sm:$0xff]  }
  0x5f   :  { %v9661_v27 = vpack.i.bf16 %v14833_v43, %v14832_v20  ;;  %v15161_v43 = vunpack.c.l.bf16 %v9153_v31  ;;  %v15163_v31 = vunpack.c.h.bf16 %v9158_v23 }
  0x61   :  { %669 = vadd.xlane.f32.xlu1 %v668_v2  ;;  %666 = vadd.xlane.f32.xlu0 %v665_v33  ;;  %15156 = vst [vmem:[#allocation57_spill] sm:$0xff] %v9661_v27  ;;  %v671_v2 = vsel %vm526_vm0, %v15158_v48, 0.0  ;;  %v14835_v33 = vunpack.c.h.bf16 %v9666_v15  ;;  %v680_v48 = vsel %vm526_vm0, %v15160_v3, 0.0  ;;  %v14836_v27 = vunpack.c.l.bf16 %v9685_v34  ;;  %v9704_v3 = vld [vmem:[%s14751_s0 + $0x1d0] sm:$0xff]  }
  0x63   :  { %v9680_v20 = vpack.i.bf16 %v14835_v33, %v14834_v32  ;;  %v15164_v33 = vunpack.c.l.bf16 %v9158_v23  ;;  %v15166_v23 = vunpack.c.h.bf16 %v9169_v6 }
  0x65   :  { %675 = vadd.xlane.f32.xlu1 %v674_v7  ;;  %672 = vadd.xlane.f32.xlu0 %v671_v2  ;;  %15159 = vst [vmem:[#allocation58_spill] sm:$0xff] %v9680_v20  ;;  %v677_v7 = vsel %vm526_vm0, %v15161_v43, 0.0  ;;  %v14837_v2 = vunpack.c.h.bf16 %v9685_v34  ;;  %v686_v43 = vsel %vm526_vm0, %v15163_v31, 0.0  ;;  %v14838_v20 = vunpack.c.l.bf16 %v9704_v3  ;;  %v9723_v31 = vld [vmem:[%s14751_s0 + $0x1d8] sm:$0xff]  }
  0x67   :  { %v9699_v32 = vpack.i.bf16 %v14837_v2, %v14836_v27  ;;  %v15167_v2 = vunpack.c.l.bf16 %v9169_v6  ;;  %v15169_v6 = vunpack.c.h.bf16 %v9194_v63 }
  0x69   :  { %681 = vadd.xlane.f32.xlu1 %v680_v48  ;;  %678 = vadd.xlane.f32.xlu0 %v677_v7  ;;  %15162 = vst [vmem:[#allocation59_spill] sm:$0xff] %v9699_v32  ;;  %v683_v48 = vsel %vm526_vm0, %v15164_v33, 0.0  ;;  %v14839_v7 = vunpack.c.h.bf16 %v9704_v3  ;;  %v692_v33 = vsel %vm526_vm0, %v15166_v23, 0.0  ;;  %v14840_v32 = vunpack.c.l.bf16 %v9723_v31  ;;  %v9742_v23 = vld [vmem:[%s14751_s0 + $0x1e0] sm:$0xff]  }
  0x6b   :  { %v9718_v27 = vpack.i.bf16 %v14839_v7, %v14838_v20  ;;  %v15170_v7 = vunpack.c.l.bf16 %v9194_v63  ;;  %v15172_v63 = vunpack.c.h.bf16 %v9211_v28 }
  0x6d   :  { %687 = vadd.xlane.f32.xlu1 %v686_v43  ;;  %684 = vadd.xlane.f32.xlu0 %v683_v48  ;;  %15165 = vst [vmem:[#allocation60_spill] sm:$0xff] %v9718_v27  ;;  %v689_v43 = vsel %vm526_vm0, %v15167_v2, 0.0  ;;  %v14841_v48 = vunpack.c.h.bf16 %v9723_v31  ;;  %v698_v2 = vsel %vm526_vm0, %v15169_v6, 0.0  ;;  %v14842_v27 = vunpack.c.l.bf16 %v9742_v23  ;;  %v9761_v6 = vld [vmem:[%s14751_s0 + $0x1e8] sm:$0xff]  }
  0x6f   :  { %v9737_v20 = vpack.i.bf16 %v14841_v48, %v14840_v32  ;;  %v15173_v48 = vunpack.c.l.bf16 %v9211_v28  ;;  %v15175_v28 = vunpack.c.h.bf16 %v9216_v19 }
  0x71   :  { %693 = vadd.xlane.f32.xlu1 %v692_v33  ;;  %690 = vadd.xlane.f32.xlu0 %v689_v43  ;;  %15168 = vst [vmem:[#allocation61_spill] sm:$0xff] %v9737_v20  ;;  %v695_v33 = vsel %vm526_vm0, %v15170_v7, 0.0  ;;  %v14843_v43 = vunpack.c.h.bf16 %v9742_v23  ;;  %v704_v7 = vsel %vm526_vm0, %v15172_v63, 0.0  ;;  %v14844_v20 = vunpack.c.l.bf16 %v9761_v6  ;;  %v9780_v63 = vld [vmem:[%s14751_s0 + $0x1f0] sm:$0xff]  }
  0x73   :  { %v9756_v32 = vpack.i.bf16 %v14843_v43, %v14842_v27  ;;  %v15176_v43 = vunpack.c.l.bf16 %v9216_v19  ;;  %v15178_v19 = vunpack.c.h.bf16 %v9227_v1 }
  0x75   :  { %699 = vadd.xlane.f32.xlu1 %v698_v2  ;;  %696 = vadd.xlane.f32.xlu0 %v695_v33  ;;  %15171 = vst [vmem:[#allocation62_spill] sm:$0xff] %v9756_v32  ;;  %v701_v2 = vsel %vm526_vm0, %v15173_v48, 0.0  ;;  %v14845_v33 = vunpack.c.h.bf16 %v9761_v6  ;;  %v710_v48 = vsel %vm526_vm0, %v15175_v28, 0.0  ;;  %v14846_v32 = vunpack.c.l.bf16 %v9780_v63  ;;  %v9799_v28 = vld [vmem:[%s14751_s0 + $0x1f8] sm:$0xff]  }
  0x77   :  { %v9775_v27 = vpack.i.bf16 %v14845_v33, %v14844_v20  ;;  %v15179_v33 = vunpack.c.l.bf16 %v9227_v1  ;;  %v15181_v1 = vunpack.c.h.bf16 %v9252_v29 }
  0x79   :  { %705 = vadd.xlane.f32.xlu1 %v704_v7  ;;  %702 = vadd.xlane.f32.xlu0 %v701_v2  ;;  %15174 = vst [vmem:[#allocation63_spill] sm:$0xff] %v9775_v27  ;;  %v707_v7 = vsel %vm526_vm0, %v15176_v43, 0.0  ;;  %v14847_v2 = vunpack.c.h.bf16 %v9780_v63  ;;  %v716_v43 = vsel %vm526_vm0, %v15178_v19, 0.0  ;;  %v14848_v27 = vunpack.c.l.bf16 %v9799_v28  ;;  %v9818_v19 = vld [vmem:[%s14751_s0 + $0x200] sm:$0xff]  }
  0x7b   :  { %v9794_v20 = vpack.i.bf16 %v14847_v2, %v14846_v32  ;;  %v15182_v2 = vunpack.c.l.bf16 %v9252_v29  ;;  %v15184_v29 = vunpack.c.h.bf16 %v9269_v62 }
  0x7d   :  { %711 = vadd.xlane.f32.xlu1 %v710_v48  ;;  %708 = vadd.xlane.f32.xlu0 %v707_v7  ;;  %15177 = vst [vmem:[#allocation64_spill] sm:$0xff] %v9794_v20  ;;  %v713_v48 = vsel %vm526_vm0, %v15179_v33, 0.0  ;;  %v14849_v7 = vunpack.c.h.bf16 %v9799_v28  ;;  %v722_v33 = vsel %vm526_vm0, %v15181_v1, 0.0  ;;  %v14850_v20 = vunpack.c.l.bf16 %v9818_v19  ;;  %v9837_v1 = vld [vmem:[%s14751_s0 + $0x208] sm:$0xff]  }
  0x7f   :  { %v9813_v32 = vpack.i.bf16 %v14849_v7, %v14848_v27  ;;  %v15185_v7 = vunpack.c.l.bf16 %v9269_v62  ;;  %v15187_v62 = vunpack.c.h.bf16 %v9274_v47 }
  0x81   :  { %717 = vadd.xlane.f32.xlu1 %v716_v43  ;;  %714 = vadd.xlane.f32.xlu0 %v713_v48  ;;  %15180 = vst [vmem:[#allocation65_spill] sm:$0xff] %v9813_v32  ;;  %v719_v43 = vsel %vm526_vm0, %v15182_v2, 0.0  ;;  %v14851_v48 = vunpack.c.h.bf16 %v9818_v19  ;;  %v728_v2 = vsel %vm526_vm0, %v15184_v29, 0.0  ;;  %v14852_v32 = vunpack.c.l.bf16 %v9837_v1  ;;  %v9856_v29 = vld [vmem:[%s14751_s0 + $0x210] sm:$0xff]  }
  0x83   :  { %v9832_v27 = vpack.i.bf16 %v14851_v48, %v14850_v20  ;;  %v15188_v48 = vunpack.c.l.bf16 %v9274_v47  ;;  %v9877_v47 = vld [vmem:[%s14751_s0 + $0x218] sm:$0xff]  }
  0x85   :  { %723 = vadd.xlane.f32.xlu1 %v722_v33  ;;  %720 = vadd.xlane.f32.xlu0 %v719_v43  ;;  %15183 = vst [vmem:[#allocation66_spill] sm:$0xff] %v9832_v27  ;;  %v725_v33 = vsel %vm526_vm0, %v15185_v7, 0.0  ;;  %v14853_v43 = vunpack.c.h.bf16 %v9837_v1  ;;  %v734_v7 = vsel %vm526_vm0, %v15187_v62, 0.0  ;;  %v14854_v27 = vunpack.c.l.bf16 %v9856_v29 }
  0x87   :  { %v9851_v20 = vpack.i.bf16 %v14853_v43, %v14852_v32  ;;  %v15191_v43 = vunpack.c.l.bf16 %v9285_v0 }
  0x89   :  { %729 = vadd.xlane.f32.xlu1 %v728_v2  ;;  %726 = vadd.xlane.f32.xlu0 %v725_v33  ;;  %15186 = vst [vmem:[#allocation67_spill] sm:$0xff] %v9851_v20  ;;  %v731_v2 = vsel %vm526_vm0, %v15188_v48, 0.0  ;;  %v14855_v33 = vunpack.c.h.bf16 %v9856_v29  ;;  %v15190_v48 = vunpack.c.h.bf16 %v9285_v0  ;;  %v3605_v20 = vadd.s32 4294967288, %v9866_v38 }
  0x8b   :  { %v9872_v32 = vpack.i.bf16 %v14855_v33, %v14854_v27  ;;  %v740_v62 = vsel %vm526_vm0, %v15190_v48, 0.0  ;;  %v14857_v27 = vunpack.c.h.bf16 %v9877_v47  ;;  %v14856_v33 = vunpack.c.l.bf16 %v9877_v47 }
  0x8d   :  { %735 = vadd.xlane.f32.xlu1 %v734_v7  ;;  %732 = vadd.xlane.f32.xlu0 %v731_v2  ;;  %15189 = vst [vmem:[#allocation68_spill] sm:$0xff] %v9872_v32  ;;  %v737_v7 = vsel %vm526_vm0, %v15191_v43, 0.0  ;;  %v9885_v2 = vshrl.u32 %v3599_v10, 7  ;;  %v3612_v32 = vadd.s32 4294967280, %v9866_v38  ;;  %v9896_v0 = vpack.i.bf16 %v14857_v27, %v14856_v33  ;;  %v9901_v10 = vld [vmem:[%s14751_s0 + $0x220] sm:$0xff]  }
  0x8e   :  { %v3626_v33 = vadd.s32 4294967264, %v9866_v38  ;;  %v14858_v9 = vunpack.c.l.bf16 %v9901_v10 }
  0x8f   :  { %15192 = vst [vmem:[#allocation69_spill] sm:$0xff] %v9896_v0  ;;  %v9913_v27 = vsub.s32 %v9866_v38, %v9885_v2  ;;  %v9916_v0 = vsub.s32 %v3605_v20, %v9885_v2  ;;  %v9928_v4 = vsub.s32 %v3619_v35, %v9885_v2  ;;  %v15199_v20 = vunpack.c.l.bf16 %v9327_v25 }
  0x90   :  { %v9945_v35 = vsub.s32 %v3633_v42, %v9885_v2  ;;  %v9948_v25 = vsub.s32 %v3626_v33, %v9885_v2  ;;  %v755_v33 = vsel %vm526_vm0, %v15205_v40, 0.0  ;;  %v9963_v37 = vsub.s32 %v3647_v8, %v9885_v2  ;;  %v9977_v40 = vld [vmem:[%s14751_s0 + $0x230] sm:$0xff]  }
  0x91   :  { %741 = vadd.xlane.f32.xlu1 %v740_v62  ;;  %738 = vadd.xlane.f32.xlu0 %v737_v7  ;;  %v15193_v62 = vunpack.c.h.bf16 %v9310_v46  ;;  %15195 = vst [vmem:[#allocation70_spill] sm:$0xff] %v9913_v27  ;;  %v752_v46 = vsel %vm526_vm0, %v15197_v61, 0.0  ;;  %15198 = vst [vmem:[#allocation72_spill] sm:$0xff] %v9928_v4  ;;  %v749_v12 = vsel %vm526_vm0, %v15199_v20, 0.0  ;;  %v9942_v61 = vld [vmem:[%s14751_s0 + $0x228] sm:$0xff]   ;;  %v15204_v20 = vunpack.c.h.bf16 %v9366_v52 }
  0x92   :  { %v535_v43 = vpop.xlane.xlu1 %534  ;;  %v529_v48 = vpop.xlane.xlu0 %528  ;;  %15202 = vst [vmem:[#allocation74_spill] sm:$0xff] %v9945_v35  ;;  %15203 = vst [vmem:[#allocation75_spill] sm:$0xff] %v9948_v25  ;;  %v14860_v54 = vunpack.c.h.bf16 %v9942_v61  ;;  %v14859_v50 = vunpack.c.l.bf16 %v9942_v61 }
  0x93   :  { %v746_v7 = vsel %vm526_vm0, %v15193_v62, 0.0  ;;  %v9921_v62 = vsub.s32 %v3612_v32, %v9885_v2  ;;  %v15200_v32 = vunpack.c.h.bf16 %v9901_v10  ;;  %v758_v55 = vsel %vm526_vm0, %v15204_v20, 0.0 }
  0x95   :  { %15196 = vst [vmem:[#allocation71_spill] sm:$0xff] %v9921_v62  ;;  %747 = vadd.xlane.f32.xlu1 %v746_v7  ;;  %744 = vadd.xlane.f32.xlu0 %v743_v60  ;;  %v9937_v58 = vpack.i.bf16 %v15200_v32, %v14858_v9  ;;  %v3640_v32 = vadd.s32 4294967248, %v9866_v38  ;;  %v5451_v9 = vrot.slane %v529_v48, %v9913_v27 }
  0x96   :  { %v538_v60 = vpop.xlane.xlu1 %537  ;;  %v532_v7 = vpop.xlane.xlu0 %531  ;;  %v5460_v42 = vrot.slane %v535_v43, %v9921_v62  ;;  %v9972_v43 = vpack.i.bf16 %v14860_v54, %v14859_v50 }
  0x97   :  { %15201 = vst [vmem:[#allocation73_spill] sm:$0xff] %v9937_v58  ;;  %v5455_v58 = vrot.slane %v532_v7, %v9916_v0  ;;  %v5465_v20 = vrot.slane %v538_v60, %v9928_v4  ;;  %v3661_v7 = vadd.s32 4294967224, %v9866_v38 }
  0x98   :  { %15206 = vst [vmem:[#allocation76_spill] sm:$0xff] %v9972_v43  ;;  %v14861_v43 = vunpack.c.l.bf16 %v9977_v40 }
  0x99   :  { %v5456_v48 = vsel %vm3610_vm1, %v5455_v58, %v5451_v9  ;;  %753 = vadd.xlane.f32.xlu1 %v752_v46  ;;  %750 = vadd.xlane.f32.xlu0 %v749_v12  ;;  %v9981_v58 = vsub.s32 %v3640_v32, %v9885_v2  ;;  %v3654_v9 = vadd.s32 4294967232, %v9866_v38  ;;  %v15209_v12 = vunpack.c.l.bf16 %v9373_v53 }
  0x9a   :  { %v5461_v8 = vsel %vm3617_vm2, %v5460_v42, %v5456_v48  ;;  %v544_v52 = vpop.xlane.xlu1 %543  ;;  %v541_v60 = vpop.xlane.xlu0 %540  ;;  %v15208_v42 = vunpack.c.h.bf16 %v9373_v53 }
  0x9b   :  { %15207 = vst [vmem:[#allocation77_spill] sm:$0xff] %v9981_v58  ;;  %v5475_v46 = vrot.slane %v544_v52, %v9945_v35  ;;  %v5466_v50 = vsel %vm3624_vm3, %v5465_v20, %v5461_v8  ;;  %v5470_v54 = vrot.slane %v541_v60, %v9948_v25  ;;  %v761_v52 = vsel %vm526_vm0, %v15209_v12, 0.0 }
  0x9c   :  { %v764_v48 = vsel %vm526_vm0, %v15208_v42, 0.0  ;;  %v9997_v20 = vsub.s32 %v3661_v7, %v9885_v2  ;;  %v15210_v8 = vunpack.c.h.bf16 %v9977_v40  ;;  %v10008_v42 = vld [vmem:[%s14751_s0 + $0x238] sm:$0xff]   ;;  %v10012_v53 = vsub.s32 %v3654_v9, %v9885_v2 }
  0x9d   :  { %v5471_v32 = vsel %vm3631_vm4, %v5470_v54, %v5466_v50  ;;  %759 = vadd.xlane.f32.xlu1 %v758_v55  ;;  %756 = vadd.xlane.f32.xlu0 %v755_v33  ;;  %v3675_v33 = vadd.s32 4294967208, %v9866_v38  ;;  %v3668_v7 = vadd.s32 4294967216, %v9866_v38 }
  0x9e   :  { %v10003_v60 = vpack.i.bf16 %v15210_v8, %v14861_v43  ;;  %v550_v50 = vpop.xlane.xlu1 %549  ;;  %v5476_v54 = vsel %vm3638_vm5, %v5475_v46, %v5471_v32  ;;  %v547_v55 = vpop.xlane.xlu0 %546  ;;  %v14863_v43 = vunpack.c.h.bf16 %v10008_v42  ;;  %v770_v46 = vsel %vm526_vm0, %v15212_v36, 0.0  ;;  %v10037_v36 = vld [vmem:[%s14751_s0 + $0x240] sm:$0xff]  }
  0x9f   :  { %v5485_v12 = vrot.slane %v550_v50, %v9963_v37  ;;  %v5480_v8 = vrot.slane %v547_v55, %v9981_v58  ;;  %v15213_v32 = vunpack.c.l.bf16 %v9392_v41  ;;  %v3689_v55 = vadd.s32 4294967192, %v9866_v38 }
  0xa0   :  { %15211 = vst [vmem:[#allocation78_spill] sm:$0xff] %v10003_v60  ;;  %v14862_v60 = vunpack.c.l.bf16 %v10008_v42  ;;  %v10041_v41 = vsub.s32 %v3675_v33, %v9885_v2  ;;  %v14864_v22 = vunpack.c.l.bf16 %v10037_v36 }
  0xa1   :  { %v5481_v9 = vsel %vm3645_vm6, %v5480_v8, %v5476_v54  ;;  %765 = vadd.xlane.f32.xlu1 %v764_v48  ;;  %762 = vadd.xlane.f32.xlu0 %v761_v52  ;;  %v767_v50 = vsel %vm526_vm0, %v15213_v32, 0.0  ;;  %v10044_v8 = vsub.s32 %v3668_v7, %v9885_v2  ;;  %v3682_v32 = vadd.s32 4294967200, %v9866_v38 }
  0xa2   :  { %v10032_v30 = vpack.i.bf16 %v14863_v43, %v14862_v60  ;;  %v556_v54 = vpop.xlane.xlu1 %555  ;;  %v5486_v48 = vsel %vm15057_vm7, %v5485_v12, %v5481_v9  ;;  %v553_v52 = vpop.xlane.xlu0 %552  ;;  %v15215_v12 = vunpack.c.h.bf16 %v9411_v44  ;;  %v15216_v7 = vunpack.c.l.bf16 %v9411_v44 }
  0xa3   :  { %v5495_v60 = vrot.slane %v556_v54, %v9997_v20  ;;  %v5490_v43 = vrot.slane %v553_v52, %v10012_v53  ;;  %v10059_v52 = vsub.s32 %v3689_v55, %v9885_v2  ;;  %v3703_v55 = vadd.s32 4294967176, %v9866_v38 }
  0xa4   :  { %15214 = vst [vmem:[#allocation79_spill] sm:$0xff] %v10032_v30  ;;  %v14865_v30 = vunpack.c.h.bf16 %v10037_v36  ;;  %v776_v9 = vsel %vm526_vm0, %v15215_v12, 0.0  ;;  %v773_v54 = vsel %vm526_vm0, %v15216_v7, 0.0  ;;  %v10070_v12 = vld [vmem:[%s14751_s0 + $0x248] sm:$0xff]  }
  0xa5   :  { %v5491_v33 = vsel %vm14977_vm8, %v5490_v43, %v5486_v48  ;;  %771 = vadd.xlane.f32.xlu1 %v770_v46  ;;  %768 = vadd.xlane.f32.xlu0 %v767_v50  ;;  %v10074_v50 = vsub.s32 %v3682_v32, %v9885_v2  ;;  %v3696_v48 = vadd.s32 4294967184, %v9866_v38 }
  0xa6   :  { %v10065_v16 = vpack.i.bf16 %v14865_v30, %v14864_v22  ;;  %v562_v43 = vpop.xlane.xlu1 %561  ;;  %v5496_v46 = vsel %vm15058_vm9, %v5495_v60, %v5491_v33  ;;  %v559_v44 = vpop.xlane.xlu0 %558  ;;  %v14867_v30 = vunpack.c.h.bf16 %v10070_v12  ;;  %v15218_v60 = vunpack.c.h.bf16 %v9430_v51  ;;  %v10095_v33 = vld [vmem:[%s14751_s0 + $0x250] sm:$0xff]  }
  0xa7   :  { %v5505_v7 = vrot.slane %v562_v43, %v10041_v41  ;;  %v5500_v22 = vrot.slane %v559_v44, %v10044_v8  ;;  %v10102_v44 = vsub.s32 %v3703_v55, %v9885_v2  ;;  %v14868_v13 = vunpack.c.l.bf16 %v10095_v33 }
  0xa8   :  { %15217 = vst [vmem:[#allocation80_spill] sm:$0xff] %v10065_v16  ;;  %v14866_v16 = vunpack.c.l.bf16 %v10070_v12  ;;  %v782_v32 = vsel %vm526_vm0, %v15218_v60, 0.0  ;;  %v10105_v60 = vsub.s32 %v3696_v48, %v9885_v2  ;;  %v10121_v2 = vld [vmem:[%s14751_s0 + $0x258] sm:$0xff]  }
  0xa9   :  { %v5501_v17 = vsel %vm3673_vm10, %v5500_v22, %v5496_v46  ;;  %777 = vadd.xlane.f32.xlu1 %v776_v9  ;;  %774 = vadd.xlane.f32.xlu0 %v773_v54  ;;  %v15220_v54 = vunpack.c.l.bf16 %v9430_v51  ;;  %15221 = vst [vmem:[#allocation82_spill] sm:$0xff] %v10102_v44 }
  0xaa   :  { %v10090_v38 = vpack.i.bf16 %v14867_v30, %v14866_v16  ;;  %v568_v43 = vpop.xlane.xlu1 %567  ;;  %v5506_v22 = vsel %vm14976_vm11, %v5505_v7, %v5501_v17  ;;  %v565_v9 = vpop.xlane.xlu0 %564  ;;  %15222 = vst [vmem:[#allocation83_spill] sm:$0xff] %v10105_v60 }
  0xab   :  { %v779_v46 = vsel %vm526_vm0, %v15220_v54, 0.0  ;;  %v5515_v16 = vrot.slane %v568_v43, %v10059_v52  ;;  %v5510_v30 = vrot.slane %v565_v9, %v10074_v50  ;;  %v15225_v43 = vunpack.c.l.bf16 %v9441_v59 }
  0xac   :  { %15219 = vst [vmem:[#allocation81_spill] sm:$0xff] %v10090_v38  ;;  %v14871_v38 = vunpack.c.h.bf16 %v10095_v33 }
  0xad   :  { %v5511_v17 = vsel %vm3687_vm12, %v5510_v30, %v5506_v22  ;;  %783 = vadd.xlane.f32.xlu1 %v782_v32  ;;  %780 = vadd.xlane.f32.xlu0 %v779_v46  ;;  %v15224_v30 = vunpack.c.h.bf16 %v9441_v59  ;;  %v785_v22 = vsel %vm526_vm0, %v15225_v43, 0.0  ;;  %v14870_v46 = vunpack.c.h.bf16 %v10121_v2 }
  0xae   :  { %v10116_v51 = vpack.i.bf16 %v14871_v38, %v14868_v13  ;;  %v574_v55 = vpop.xlane.xlu1 %573  ;;  %v5516_v48 = vsel %vm3694_vm13, %v5515_v16, %v5511_v17  ;;  %v571_v7 = vpop.xlane.xlu0 %570  ;;  %v14869_v13 = vunpack.c.l.bf16 %v10121_v2  ;;  %v10144_v17 = vld [vmem:[%s14751_s0 + $0x260] sm:$0xff]  }
  0xaf   :  { %v788_v32 = vsel %vm526_vm0, %v15224_v30, 0.0  ;;  %v5525_v9 = vrot.slane %v574_v55, %v10102_v44  ;;  %v5520_v54 = vrot.slane %v571_v7, %v10105_v60  ;;  %v15227_v30 = vunpack.c.h.bf16 %v9448_v5 }
  0xb0   :  { %15223 = vst [vmem:[#allocation84_spill] sm:$0xff] %v10116_v51  ;;  %v10139_v59 = vpack.i.bf16 %v14870_v46, %v14869_v13  ;;  %v14873_v46 = vunpack.c.h.bf16 %v10144_v17  ;;  %v14872_v38 = vunpack.c.l.bf16 %v10144_v17 }
  0xb1   :  { %v5521_v16 = vsel %vm3701_vm14, %v5520_v54, %v5516_v48  ;;  %789 = vadd.xlane.f32.xlu1 %v788_v32  ;;  %786 = vadd.xlane.f32.xlu0 %v785_v22  ;;  %v794_v43 = vsel %vm526_vm0, %v15227_v30, 0.0  ;;  %v15228_v48 = vunpack.c.l.bf16 %v9448_v5 }
  0xb2   :  { %15226 = vst [vmem:[#allocation85_spill] sm:$0xff] %v10139_v59  ;;  %v580_v55 = vpop.xlane.xlu1 %579  ;;  %v577_v7 = vpop.xlane.xlu0 %576  ;;  %v10153_v22 = vsel %vm3708_vm15, %v5525_v9, %v5521_v16  ;;  %v10164_v5 = vpack.i.bf16 %v14873_v46, %v14872_v38  ;;  %v10169_v9 = vld [vmem:[%s14751_s0 + $0x268] sm:$0xff]  }
  0xb3   :  { %v791_v32 = vsel %vm526_vm0, %v15228_v48, 0.0  ;;  %v5534_v54 = vrot.slane %v580_v55, %v9916_v0  ;;  %v5530_v13 = vrot.slane %v577_v7, %v9913_v27  ;;  %v15230_v7 = vunpack.c.h.bf16 %v9459_v26 }
  0xb4   :  { %15229 = vst [vmem:[#allocation86_spill] sm:$0xff] %v10164_v5  ;;  %v14874_v38 = vunpack.c.l.bf16 %v10169_v9  ;;  %v15233_v5 = vunpack.c.h.bf16 %v9474_v18 }
  0xb5   :  { %v5535_v59 = vsel %vm3610_vm1, %v5534_v54, %v5530_v13  ;;  %795 = vadd.xlane.f32.xlu1 %v794_v43  ;;  %792 = vadd.xlane.f32.xlu0 %v791_v32  ;;  %v800_v30 = vsel %vm526_vm0, %v15230_v7, 0.0  ;;  %v15231_v13 = vunpack.c.l.bf16 %v9459_v26  ;;  %v14875_v54 = vunpack.c.h.bf16 %v10169_v9  ;;  %v10191_v26 = vld [vmem:[%s14751_s0 + $0x270] sm:$0xff]  }
  0xb6   :  { %v586_v16 = vpop.xlane.xlu1 %585  ;;  %v583_v55 = vpop.xlane.xlu0 %582 }
  0xb7   :  { %v797_v43 = vsel %vm526_vm0, %v15231_v13, 0.0  ;;  %v5544_v48 = vrot.slane %v586_v16, %v9928_v4  ;;  %v5539_v32 = vrot.slane %v583_v55, %v9921_v62  ;;  %v10186_v7 = vpack.i.bf16 %v14875_v54, %v14874_v38 }
  0xb8   :  { %v14877_v54 = vunpack.c.h.bf16 %v10191_v26 }
  0xb9   :  { %v5540_v46 = vsel %vm3617_vm2, %v5539_v32, %v5535_v59  ;;  %801 = vadd.xlane.f32.xlu1 %v800_v30  ;;  %798 = vadd.xlane.f32.xlu0 %v797_v43  ;;  %15232 = vst [vmem:[#allocation87_spill] sm:$0xff] %v10186_v7  ;;  %v806_v59 = vsel %vm526_vm0, %v15233_v5, 0.0  ;;  %v15234_v30 = vunpack.c.l.bf16 %v9474_v18  ;;  %v14876_v7 = vunpack.c.l.bf16 %v10191_v26  ;;  %v10214_v18 = vld [vmem:[%s14751_s0 + $0x278] sm:$0xff]  }
  0xba   :  { %v592_v16 = vpop.xlane.xlu1 %591  ;;  %v5545_v55 = vsel %vm3624_vm3, %v5544_v48, %v5540_v46  ;;  %v589_v13 = vpop.xlane.xlu0 %588 }
  0xbb   :  { %v803_v43 = vsel %vm526_vm0, %v15234_v30, 0.0  ;;  %v5554_v32 = vrot.slane %v592_v16, %v9945_v35  ;;  %v5549_v38 = vrot.slane %v589_v13, %v9948_v25  ;;  %v10209_v46 = vpack.i.bf16 %v14877_v54, %v14876_v7 }
  0xbc   :  { %v15236_v13 = vunpack.c.h.bf16 %v9487_v45  ;;  %v14879_v7 = vunpack.c.h.bf16 %v10214_v18  ;;  %v14878_v54 = vunpack.c.l.bf16 %v10214_v18 }
  0xbd   :  { %v5550_v51 = vsel %vm3631_vm4, %v5549_v38, %v5545_v55  ;;  %807 = vadd.xlane.f32.xlu1 %v806_v59  ;;  %804 = vadd.xlane.f32.xlu0 %v803_v43  ;;  %15235 = vst [vmem:[#allocation88_spill] sm:$0xff] %v10209_v46  ;;  %v15237_v55 = vunpack.c.l.bf16 %v9487_v45  ;;  %v10237_v45 = vld [vmem:[%s14751_s0 + $0x280] sm:$0xff]  }
  0xbe   :  { %v598_v5 = vpop.xlane.xlu1 %597  ;;  %v5555_v48 = vsel %vm3638_vm5, %v5554_v32, %v5550_v51  ;;  %v595_v16 = vpop.xlane.xlu0 %594  ;;  %v812_v38 = vsel %vm526_vm0, %v15236_v13, 0.0  ;;  %v10232_v51 = vpack.i.bf16 %v14879_v7, %v14878_v54  ;;  %v15239_v13 = vunpack.c.h.bf16 %v9504_v56 }
  0xbf   :  { %v809_v59 = vsel %vm526_vm0, %v15237_v55, 0.0  ;;  %v5564_v30 = vrot.slane %v598_v5, %v9963_v37  ;;  %v5559_v43 = vrot.slane %v595_v16, %v9981_v58  ;;  %v14881_v54 = vunpack.c.h.bf16 %v10237_v45 }
  0xc0   :  { %15238 = vst [vmem:[#allocation89_spill] sm:$0xff] %v10232_v51  ;;  %v14880_v7 = vunpack.c.l.bf16 %v10237_v45 }
  0xc1   :  { %v5560_v46 = vsel %vm3645_vm6, %v5559_v43, %v5555_v48  ;;  %813 = vadd.xlane.f32.xlu1 %v812_v38  ;;  %810 = vadd.xlane.f32.xlu0 %v809_v59  ;;  %v818_v48 = vsel %vm526_vm0, %v15239_v13, 0.0  ;;  %v15240_v38 = vunpack.c.l.bf16 %v9504_v56  ;;  %v10260_v56 = vld [vmem:[%s14751_s0 + $0x288] sm:$0xff]   ;;  %v15242_v13 = vunpack.c.h.bf16 %v9519_v57 }
  0xc2   :  { %v604_v32 = vpop.xlane.xlu1 %603  ;;  %v5565_v5 = vsel %vm15057_vm7, %v5564_v30, %v5560_v46  ;;  %v601_v16 = vpop.xlane.xlu0 %600  ;;  %v10255_v46 = vpack.i.bf16 %v14881_v54, %v14880_v7  ;;  %v14883_v7 = vunpack.c.h.bf16 %v10260_v56  ;;  %v14882_v54 = vunpack.c.l.bf16 %v10260_v56 }
  0xc3   :  { %v815_v55 = vsel %vm526_vm0, %v15240_v38, 0.0  ;;  %v5574_v59 = vrot.slane %v604_v32, %v9997_v20  ;;  %v5569_v43 = vrot.slane %v601_v16, %v10012_v53 }
  0xc4   :  { %15241 = vst [vmem:[#allocation90_spill] sm:$0xff] %v10255_v46 }
  0xc5   :  { %v5570_v51 = vsel %vm14977_vm8, %v5569_v43, %v5565_v5  ;;  %819 = vadd.xlane.f32.xlu1 %v818_v48  ;;  %816 = vadd.xlane.f32.xlu0 %v815_v55  ;;  %v824_v5 = vsel %vm526_vm0, %v15242_v13, 0.0  ;;  %v15243_v48 = vunpack.c.l.bf16 %v9519_v57  ;;  %v10283_v57 = vld [vmem:[%s14751_s0 + $0x290] sm:$0xff]   ;;  %v15245_v13 = vunpack.c.h.bf16 %v9532_v24 }
  0xc6   :  { %v610_v30 = vpop.xlane.xlu1 %609  ;;  %v5575_v32 = vsel %vm15058_vm9, %v5574_v59, %v5570_v51  ;;  %v607_v16 = vpop.xlane.xlu0 %606  ;;  %v10278_v51 = vpack.i.bf16 %v14883_v7, %v14882_v54  ;;  %v14885_v54 = vunpack.c.h.bf16 %v10283_v57  ;;  %v14884_v7 = vunpack.c.l.bf16 %v10283_v57 }
  0xc7   :  { %v821_v38 = vsel %vm526_vm0, %v15243_v48, 0.0  ;;  %v5584_v55 = vrot.slane %v610_v30, %v10041_v41  ;;  %v5579_v43 = vrot.slane %v607_v16, %v10044_v8 }
  0xc8   :  { %15244 = vst [vmem:[#allocation91_spill] sm:$0xff] %v10278_v51 }
  0xc9   :  { %v5580_v46 = vsel %vm3673_vm10, %v5579_v43, %v5575_v32  ;;  %825 = vadd.xlane.f32.xlu1 %v824_v5  ;;  %822 = vadd.xlane.f32.xlu0 %v821_v38  ;;  %v830_v32 = vsel %vm526_vm0, %v15245_v13, 0.0  ;;  %v15246_v5 = vunpack.c.l.bf16 %v9532_v24  ;;  %v10306_v24 = vld [vmem:[%s14751_s0 + $0x298] sm:$0xff]  }
  0xca   :  { %v616_v59 = vpop.xlane.xlu1 %615  ;;  %v5585_v30 = vsel %vm14976_vm11, %v5584_v55, %v5580_v46  ;;  %v613_v16 = vpop.xlane.xlu0 %612  ;;  %v10301_v46 = vpack.i.bf16 %v14885_v54, %v14884_v7  ;;  %v14887_v7 = vunpack.c.h.bf16 %v10306_v24  ;;  %v14886_v54 = vunpack.c.l.bf16 %v10306_v24 }
  0xcb   :  { %v827_v48 = vsel %vm526_vm0, %v15246_v5, 0.0  ;;  %v5594_v38 = vrot.slane %v616_v59, %v10059_v52  ;;  %v5589_v43 = vrot.slane %v613_v16, %v10074_v50  ;;  %v15248_v16 = vunpack.c.h.bf16 %v9565_v39 }
  0xcc   :  { %15247 = vst [vmem:[#allocation92_spill] sm:$0xff] %v10301_v46 }
  0xcd   :  { %v5590_v51 = vsel %vm3687_vm12, %v5589_v43, %v5585_v30  ;;  %831 = vadd.xlane.f32.xlu1 %v830_v32  ;;  %828 = vadd.xlane.f32.xlu0 %v827_v48  ;;  %v836_v13 = vsel %vm526_vm0, %v15248_v16, 0.0  ;;  %v15249_v30 = vunpack.c.l.bf16 %v9565_v39  ;;  %v10323_v16 = vpack.i.bf16 %v14887_v7, %v14886_v54  ;;  %v10328_v39 = vld [vmem:[%s14751_s0 + $0x2a0] sm:$0xff]  }
  0xce   :  { %v622_v55 = vpop.xlane.xlu1 %621  ;;  %v619_v59 = vpop.xlane.xlu0 %618  ;;  %v5595_v5 = vsel %vm3694_vm13, %v5594_v38, %v5590_v51  ;;  %v14889_v46 = vunpack.c.h.bf16 %v10328_v39 }
  0xcf   :  { %v833_v32 = vsel %vm526_vm0, %v15249_v30, 0.0  ;;  %v5604_v48 = vrot.slane %v622_v55, %v10102_v44  ;;  %v5599_v43 = vrot.slane %v619_v59, %v10105_v60  ;;  %15250 = vst [vmem:[#allocation93_spill] sm:$0xff] %v10323_v16  ;;  %v15251_v59 = vunpack.c.h.bf16 %v9590_v14 }
  0xd0   :  { %v15252_v30 = vunpack.c.l.bf16 %v9590_v14 }
  0xd1   :  { %837 = vadd.xlane.f32.xlu1 %v836_v13  ;;  %834 = vadd.xlane.f32.xlu0 %v833_v32  ;;  %v5600_v51 = vsel %vm3701_vm14, %v5599_v43, %v5595_v5  ;;  %v842_v13 = vsel %vm526_vm0, %v15251_v59, 0.0  ;;  %v14888_v5 = vunpack.c.l.bf16 %v10328_v39 }
  0xd2   :  { %v628_v38 = vpop.xlane.xlu1 %627  ;;  %v625_v55 = vpop.xlane.xlu0 %624  ;;  %v839_v32 = vsel %vm526_vm0, %v15252_v30, 0.0  ;;  %v10338_v54 = vsel %vm3708_vm15, %v5604_v48, %v5600_v51  ;;  %v10354_v48 = vld [vmem:[%s14751_s0 + $0x2a8] sm:$0xff]  }
  0xd3   :  { %15253 = vst [vmem:[#allocation94_spill] sm:$0xff] %v10338_v54  ;;  %v5613_v7 = vrot.slane %v628_v38, %v9916_v0  ;;  %v5609_v16 = vrot.slane %v625_v55, %v9913_v27  ;;  %v10349_v14 = vpack.i.bf16 %v14889_v46, %v14888_v5  ;;  %v15255_v55 = vunpack.c.h.bf16 %v9609_v11 }
  0xd4   :  { %v14890_v5 = vunpack.c.l.bf16 %v10354_v48 }
  0xd5   :  { %v5614_v43 = vsel %vm3610_vm1, %v5613_v7, %v5609_v16  ;;  %843 = vadd.xlane.f32.xlu1 %v842_v13  ;;  %840 = vadd.xlane.f32.xlu0 %v839_v32  ;;  %15254 = vst [vmem:[#allocation95_spill] sm:$0xff] %v10349_v14  ;;  %v848_v59 = vsel %vm526_vm0, %v15255_v55, 0.0  ;;  %v15256_v7 = vunpack.c.l.bf16 %v9609_v11  ;;  %v14891_v32 = vunpack.c.h.bf16 %v10354_v48  ;;  %v10376_v11 = vld [vmem:[%s14751_s0 + $0x2b0] sm:$0xff]  }
  0xd6   :  { %v634_v51 = vpop.xlane.xlu1 %633  ;;  %v631_v38 = vpop.xlane.xlu0 %630  ;;  %v15258_v14 = vunpack.c.h.bf16 %v9628_v49 }
  0xd7   :  { %v845_v16 = vsel %vm526_vm0, %v15256_v7, 0.0  ;;  %v5623_v13 = vrot.slane %v634_v51, %v9928_v4  ;;  %v5618_v30 = vrot.slane %v631_v38, %v9921_v62  ;;  %v10371_v55 = vpack.i.bf16 %v14891_v32, %v14890_v5 }
  0xd8   :  { %v14893_v32 = vunpack.c.h.bf16 %v10376_v11 }
  0xd9   :  { %v5619_v46 = vsel %vm3617_vm2, %v5618_v30, %v5614_v43  ;;  %849 = vadd.xlane.f32.xlu1 %v848_v59  ;;  %846 = vadd.xlane.f32.xlu0 %v845_v16  ;;  %15257 = vst [vmem:[#allocation96_spill] sm:$0xff] %v10371_v55  ;;  %v854_v43 = vsel %vm526_vm0, %v15258_v14, 0.0  ;;  %v15259_v59 = vunpack.c.l.bf16 %v9628_v49  ;;  %v14892_v55 = vunpack.c.l.bf16 %v10376_v11  ;;  %v10399_v49 = vld [vmem:[%s14751_s0 + $0x2b8] sm:$0xff]  }
  0xda   :  { %v640_v51 = vpop.xlane.xlu1 %639  ;;  %v5624_v38 = vsel %vm3624_vm3, %v5623_v13, %v5619_v46  ;;  %v637_v7 = vpop.xlane.xlu0 %636 }
  0xdb   :  { %v851_v16 = vsel %vm526_vm0, %v15259_v59, 0.0  ;;  %v5633_v30 = vrot.slane %v640_v51, %v9945_v35  ;;  %v5628_v5 = vrot.slane %v637_v7, %v9948_v25  ;;  %v10394_v46 = vpack.i.bf16 %v14893_v32, %v14892_v55 }
  0xdc   :  { %v15261_v7 = vunpack.c.h.bf16 %v9647_v21  ;;  %v14895_v55 = vunpack.c.h.bf16 %v10399_v49  ;;  %v14894_v32 = vunpack.c.l.bf16 %v10399_v49 }
  0xdd   :  { %v5629_v54 = vsel %vm3631_vm4, %v5628_v5, %v5624_v38  ;;  %855 = vadd.xlane.f32.xlu1 %v854_v43  ;;  %852 = vadd.xlane.f32.xlu0 %v851_v16  ;;  %15260 = vst [vmem:[#allocation97_spill] sm:$0xff] %v10394_v46  ;;  %v15262_v38 = vunpack.c.l.bf16 %v9647_v21  ;;  %v10422_v21 = vld [vmem:[%s14751_s0 + $0x2c0] sm:$0xff]  }
  0xde   :  { %v646_v14 = vpop.xlane.xlu1 %645  ;;  %v5634_v13 = vsel %vm3638_vm5, %v5633_v30, %v5629_v54  ;;  %v643_v51 = vpop.xlane.xlu0 %642  ;;  %v860_v5 = vsel %vm526_vm0, %v15261_v7, 0.0  ;;  %v10417_v54 = vpack.i.bf16 %v14895_v55, %v14894_v32  ;;  %v15264_v7 = vunpack.c.h.bf16 %v9666_v15 }
  0xdf   :  { %v857_v43 = vsel %vm526_vm0, %v15262_v38, 0.0  ;;  %v5643_v59 = vrot.slane %v646_v14, %v9963_v37  ;;  %v5638_v16 = vrot.slane %v643_v51, %v9981_v58  ;;  %v14897_v32 = vunpack.c.h.bf16 %v10422_v21 }
  0xe0   :  { %15263 = vst [vmem:[#allocation98_spill] sm:$0xff] %v10417_v54  ;;  %v14896_v55 = vunpack.c.l.bf16 %v10422_v21 }
  0xe1   :  { %v5639_v46 = vsel %vm3645_vm6, %v5638_v16, %v5634_v13  ;;  %861 = vadd.xlane.f32.xlu1 %v860_v5  ;;  %858 = vadd.xlane.f32.xlu0 %v857_v43  ;;  %v866_v13 = vsel %vm526_vm0, %v15264_v7, 0.0  ;;  %v15265_v5 = vunpack.c.l.bf16 %v9666_v15  ;;  %v10445_v15 = vld [vmem:[%s14751_s0 + $0x2c8] sm:$0xff]   ;;  %v15267_v7 = vunpack.c.h.bf16 %v9685_v34 }
  0xe2   :  { %v652_v30 = vpop.xlane.xlu1 %651  ;;  %v5644_v14 = vsel %vm15057_vm7, %v5643_v59, %v5639_v46  ;;  %v649_v51 = vpop.xlane.xlu0 %648  ;;  %v10440_v46 = vpack.i.bf16 %v14897_v32, %v14896_v55  ;;  %v14899_v55 = vunpack.c.h.bf16 %v10445_v15  ;;  %v14898_v32 = vunpack.c.l.bf16 %v10445_v15 }
  0xe3   :  { %v863_v38 = vsel %vm526_vm0, %v15265_v5, 0.0  ;;  %v5653_v43 = vrot.slane %v652_v30, %v9997_v20  ;;  %v5648_v16 = vrot.slane %v649_v51, %v10012_v53 }
  0xe4   :  { %15266 = vst [vmem:[#allocation99_spill] sm:$0xff] %v10440_v46 }
  0xe5   :  { %v5649_v54 = vsel %vm14977_vm8, %v5648_v16, %v5644_v14  ;;  %867 = vadd.xlane.f32.xlu1 %v866_v13  ;;  %864 = vadd.xlane.f32.xlu0 %v863_v38  ;;  %v872_v14 = vsel %vm526_vm0, %v15267_v7, 0.0  ;;  %v15268_v13 = vunpack.c.l.bf16 %v9685_v34  ;;  %v10468_v34 = vld [vmem:[%s14751_s0 + $0x2d0] sm:$0xff]   ;;  %v15270_v7 = vunpack.c.h.bf16 %v9704_v3 }
  0xe6   :  { %v658_v59 = vpop.xlane.xlu1 %657  ;;  %v5654_v30 = vsel %vm15058_vm9, %v5653_v43, %v5649_v54  ;;  %v655_v51 = vpop.xlane.xlu0 %654  ;;  %v10463_v54 = vpack.i.bf16 %v14899_v55, %v14898_v32  ;;  %v14901_v32 = vunpack.c.h.bf16 %v10468_v34  ;;  %v14900_v55 = vunpack.c.l.bf16 %v10468_v34 }
  0xe7   :  { %v869_v5 = vsel %vm526_vm0, %v15268_v13, 0.0  ;;  %v5663_v38 = vrot.slane %v658_v59, %v10041_v41  ;;  %v5658_v16 = vrot.slane %v655_v51, %v10044_v8 }
  0xe8   :  { %15269 = vst [vmem:[#allocation100_spill] sm:$0xff] %v10463_v54 }
  0xe9   :  { %v5659_v46 = vsel %vm3673_vm10, %v5658_v16, %v5654_v30  ;;  %873 = vadd.xlane.f32.xlu1 %v872_v14  ;;  %870 = vadd.xlane.f32.xlu0 %v869_v5  ;;  %v878_v30 = vsel %vm526_vm0, %v15270_v7, 0.0  ;;  %v15271_v14 = vunpack.c.l.bf16 %v9704_v3  ;;  %v10491_v3 = vld [vmem:[%s14751_s0 + $0x2d8] sm:$0xff]   ;;  %v15273_v7 = vunpack.c.h.bf16 %v9723_v31 }
  0xea   :  { %v664_v43 = vpop.xlane.xlu1 %663  ;;  %v5664_v59 = vsel %vm14976_vm11, %v5663_v38, %v5659_v46  ;;  %v661_v51 = vpop.xlane.xlu0 %660  ;;  %v10486_v46 = vpack.i.bf16 %v14901_v32, %v14900_v55  ;;  %v14903_v55 = vunpack.c.h.bf16 %v10491_v3  ;;  %v14902_v32 = vunpack.c.l.bf16 %v10491_v3 }
  0xeb   :  { %v875_v13 = vsel %vm526_vm0, %v15271_v14, 0.0  ;;  %v5673_v5 = vrot.slane %v664_v43, %v10059_v52  ;;  %v5668_v16 = vrot.slane %v661_v51, %v10074_v50 }
  0xec   :  { %15272 = vst [vmem:[#allocation101_spill] sm:$0xff] %v10486_v46 }
  0xed   :  { %v5669_v54 = vsel %vm3687_vm12, %v5668_v16, %v5664_v59  ;;  %879 = vadd.xlane.f32.xlu1 %v878_v30  ;;  %876 = vadd.xlane.f32.xlu0 %v875_v13  ;;  %v884_v59 = vsel %vm526_vm0, %v15273_v7, 0.0  ;;  %v15274_v30 = vunpack.c.l.bf16 %v9723_v31  ;;  %v10514_v31 = vld [vmem:[%s14751_s0 + $0x2e0] sm:$0xff]  }
  0xee   :  { %v670_v38 = vpop.xlane.xlu1 %669  ;;  %v5674_v43 = vsel %vm3694_vm13, %v5673_v5, %v5669_v54  ;;  %v667_v51 = vpop.xlane.xlu0 %666  ;;  %v10509_v54 = vpack.i.bf16 %v14903_v55, %v14902_v32  ;;  %v14905_v32 = vunpack.c.h.bf16 %v10514_v31  ;;  %v14904_v55 = vunpack.c.l.bf16 %v10514_v31 }
  0xef   :  { %v881_v14 = vsel %vm526_vm0, %v15274_v30, 0.0  ;;  %v5683_v13 = vrot.slane %v670_v38, %v10102_v44  ;;  %v5678_v16 = vrot.slane %v667_v51, %v10105_v60  ;;  %v15276_v51 = vunpack.c.h.bf16 %v9742_v23 }
  0xf0   :  { %15275 = vst [vmem:[#allocation102_spill] sm:$0xff] %v10509_v54 }
  0xf1   :  { %v5679_v46 = vsel %vm3701_vm14, %v5678_v16, %v5674_v43  ;;  %885 = vadd.xlane.f32.xlu1 %v884_v59  ;;  %882 = vadd.xlane.f32.xlu0 %v881_v14  ;;  %v890_v7 = vsel %vm526_vm0, %v15276_v51, 0.0  ;;  %v15277_v43 = vunpack.c.l.bf16 %v9742_v23  ;;  %v10534_v23 = vpack.i.bf16 %v14905_v32, %v14904_v55 }
  0xf2   :  { %v676_v5 = vpop.xlane.xlu1 %675  ;;  %v673_v38 = vpop.xlane.xlu0 %672  ;;  %v10523_v30 = vsel %vm3708_vm15, %v5683_v13, %v5679_v46  ;;  %v10539_v46 = vld [vmem:[%s14751_s0 + $0x2e8] sm:$0xff]  }
  0xf3   :  { %v887_v59 = vsel %vm526_vm0, %v15277_v43, 0.0  ;;  %15278 = vst [vmem:[#allocation103_spill] sm:$0xff] %v10523_v30  ;;  %v5692_v14 = vrot.slane %v676_v5, %v9916_v0  ;;  %v5688_v16 = vrot.slane %v673_v38, %v9913_v27  ;;  %15279 = vst [vmem:[#allocation104_spill] sm:$0xff] %v10534_v23  ;;  %v15280_v38 = vunpack.c.h.bf16 %v9761_v6 }
  0xf4   :  { %v14906_v55 = vunpack.c.l.bf16 %v10539_v46  ;;  %v15283_v30 = vunpack.c.h.bf16 %v9780_v63 }
  0xf5   :  { %v5693_v54 = vsel %vm3610_vm1, %v5692_v14, %v5688_v16  ;;  %891 = vadd.xlane.f32.xlu1 %v890_v7  ;;  %888 = vadd.xlane.f32.xlu0 %v887_v59  ;;  %v896_v51 = vsel %vm526_vm0, %v15280_v38, 0.0  ;;  %v15281_v7 = vunpack.c.l.bf16 %v9761_v6  ;;  %v14907_v16 = vunpack.c.h.bf16 %v10539_v46  ;;  %v10561_v6 = vld [vmem:[%s14751_s0 + $0x2f0] sm:$0xff]  }
  0xf6   :  { %v682_v13 = vpop.xlane.xlu1 %681  ;;  %v679_v5 = vpop.xlane.xlu0 %678 }
  0xf7   :  { %v893_v43 = vsel %vm526_vm0, %v15281_v7, 0.0  ;;  %v5702_v59 = vrot.slane %v682_v13, %v9928_v4  ;;  %v5697_v14 = vrot.slane %v679_v5, %v9921_v62  ;;  %v10556_v38 = vpack.i.bf16 %v14907_v16, %v14906_v55 }
  0xf8   :  { %v14909_v16 = vunpack.c.h.bf16 %v10561_v6 }
  0xf9   :  { %v5698_v32 = vsel %vm3617_vm2, %v5697_v14, %v5693_v54  ;;  %897 = vadd.xlane.f32.xlu1 %v896_v51  ;;  %894 = vadd.xlane.f32.xlu0 %v893_v43  ;;  %15282 = vst [vmem:[#allocation105_spill] sm:$0xff] %v10556_v38  ;;  %v902_v54 = vsel %vm526_vm0, %v15283_v30, 0.0  ;;  %v15284_v51 = vunpack.c.l.bf16 %v9780_v63  ;;  %v14908_v38 = vunpack.c.l.bf16 %v10561_v6  ;;  %v10584_v63 = vld [vmem:[%s14751_s0 + $0x2f8] sm:$0xff]  }
  0xfa   :  { %v688_v13 = vpop.xlane.xlu1 %687  ;;  %v5703_v5 = vsel %vm3624_vm3, %v5702_v59, %v5698_v32  ;;  %v685_v7 = vpop.xlane.xlu0 %684 }
  0xfb   :  { %v899_v43 = vsel %vm526_vm0, %v15284_v51, 0.0  ;;  %v5712_v14 = vrot.slane %v688_v13, %v9945_v35  ;;  %v5707_v55 = vrot.slane %v685_v7, %v9948_v25  ;;  %v10579_v32 = vpack.i.bf16 %v14909_v16, %v14908_v38 }
  0xfc   :  { %v15286_v7 = vunpack.c.h.bf16 %v9799_v28  ;;  %v14911_v38 = vunpack.c.h.bf16 %v10584_v63  ;;  %v14910_v16 = vunpack.c.l.bf16 %v10584_v63 }
  0xfd   :  { %v5708_v23 = vsel %vm3631_vm4, %v5707_v55, %v5703_v5  ;;  %903 = vadd.xlane.f32.xlu1 %v902_v54  ;;  %900 = vadd.xlane.f32.xlu0 %v899_v43  ;;  %15285 = vst [vmem:[#allocation106_spill] sm:$0xff] %v10579_v32  ;;  %v15287_v5 = vunpack.c.l.bf16 %v9799_v28  ;;  %v10607_v28 = vld [vmem:[%s14751_s0 + $0x300] sm:$0xff]  }
  0xfe   :  { %v694_v30 = vpop.xlane.xlu1 %693  ;;  %v5713_v59 = vsel %vm3638_vm5, %v5712_v14, %v5708_v23  ;;  %v691_v13 = vpop.xlane.xlu0 %690  ;;  %v908_v55 = vsel %vm526_vm0, %v15286_v7, 0.0  ;;  %v10602_v23 = vpack.i.bf16 %v14911_v38, %v14910_v16  ;;  %v15289_v7 = vunpack.c.h.bf16 %v9818_v19 }
  0xff   :  { %v905_v54 = vsel %vm526_vm0, %v15287_v5, 0.0  ;;  %v5722_v51 = vrot.slane %v694_v30, %v9963_v37  ;;  %v5717_v43 = vrot.slane %v691_v13, %v9981_v58  ;;  %v14913_v16 = vunpack.c.h.bf16 %v10607_v28 }
 0x100   :  { %15288 = vst [vmem:[#allocation107_spill] sm:$0xff] %v10602_v23  ;;  %v14912_v38 = vunpack.c.l.bf16 %v10607_v28 }
 0x101   :  { %v5718_v32 = vsel %vm3645_vm6, %v5717_v43, %v5713_v59  ;;  %909 = vadd.xlane.f32.xlu1 %v908_v55  ;;  %906 = vadd.xlane.f32.xlu0 %v905_v54  ;;  %v914_v59 = vsel %vm526_vm0, %v15289_v7, 0.0  ;;  %v15290_v55 = vunpack.c.l.bf16 %v9818_v19  ;;  %v10630_v19 = vld [vmem:[%s14751_s0 + $0x308] sm:$0xff]   ;;  %v15292_v7 = vunpack.c.h.bf16 %v9837_v1 }
 0x102   :  { %v700_v14 = vpop.xlane.xlu1 %699  ;;  %v5723_v30 = vsel %vm15057_vm7, %v5722_v51, %v5718_v32  ;;  %v697_v13 = vpop.xlane.xlu0 %696  ;;  %v10625_v32 = vpack.i.bf16 %v14913_v16, %v14912_v38  ;;  %v14915_v38 = vunpack.c.h.bf16 %v10630_v19  ;;  %v14914_v16 = vunpack.c.l.bf16 %v10630_v19 }
 0x103   :  { %v911_v5 = vsel %vm526_vm0, %v15290_v55, 0.0  ;;  %v5732_v54 = vrot.slane %v700_v14, %v9997_v20  ;;  %v5727_v43 = vrot.slane %v697_v13, %v10012_v53 }
 0x104   :  { %15291 = vst [vmem:[#allocation108_spill] sm:$0xff] %v10625_v32 }
 0x105   :  { %v5728_v23 = vsel %vm14977_vm8, %v5727_v43, %v5723_v30  ;;  %915 = vadd.xlane.f32.xlu1 %v914_v59  ;;  %912 = vadd.xlane.f32.xlu0 %v911_v5  ;;  %v920_v30 = vsel %vm526_vm0, %v15292_v7, 0.0  ;;  %v15293_v59 = vunpack.c.l.bf16 %v9837_v1  ;;  %v10653_v1 = vld [vmem:[%s14751_s0 + $0x310] sm:$0xff]   ;;  %v15295_v7 = vunpack.c.h.bf16 %v9856_v29 }
 0x106   :  { %v706_v51 = vpop.xlane.xlu1 %705  ;;  %v5733_v14 = vsel %vm15058_vm9, %v5732_v54, %v5728_v23  ;;  %v703_v13 = vpop.xlane.xlu0 %702  ;;  %v10648_v23 = vpack.i.bf16 %v14915_v38, %v14914_v16  ;;  %v14917_v16 = vunpack.c.h.bf16 %v10653_v1  ;;  %v14916_v38 = vunpack.c.l.bf16 %v10653_v1 }
 0x107   :  { %v917_v55 = vsel %vm526_vm0, %v15293_v59, 0.0  ;;  %v5742_v5 = vrot.slane %v706_v51, %v10041_v41  ;;  %v5737_v43 = vrot.slane %v703_v13, %v10044_v8 }
 0x108   :  { %15294 = vst [vmem:[#allocation109_spill] sm:$0xff] %v10648_v23 }
 0x109   :  { %v5738_v32 = vsel %vm3673_vm10, %v5737_v43, %v5733_v14  ;;  %921 = vadd.xlane.f32.xlu1 %v920_v30  ;;  %918 = vadd.xlane.f32.xlu0 %v917_v55  ;;  %v926_v14 = vsel %vm526_vm0, %v15295_v7, 0.0  ;;  %v15296_v30 = vunpack.c.l.bf16 %v9856_v29  ;;  %v10676_v29 = vld [vmem:[%s14751_s0 + $0x318] sm:$0xff]  }
 0x10a   :  { %v712_v54 = vpop.xlane.xlu1 %711  ;;  %v5743_v51 = vsel %vm14976_vm11, %v5742_v5, %v5738_v32  ;;  %v709_v13 = vpop.xlane.xlu0 %708  ;;  %v10671_v32 = vpack.i.bf16 %v14917_v16, %v14916_v38  ;;  %v14919_v38 = vunpack.c.h.bf16 %v10676_v29  ;;  %v14918_v16 = vunpack.c.l.bf16 %v10676_v29 }
 0x10b   :  { %v923_v59 = vsel %vm526_vm0, %v15296_v30, 0.0  ;;  %v5752_v55 = vrot.slane %v712_v54, %v10059_v52  ;;  %v5747_v43 = vrot.slane %v709_v13, %v10074_v50  ;;  %v15298_v13 = vunpack.c.h.bf16 %v9877_v47 }
 0x10c   :  { %15297 = vst [vmem:[#allocation110_spill] sm:$0xff] %v10671_v32 }
 0x10d   :  { %v5748_v23 = vsel %vm3687_vm12, %v5747_v43, %v5743_v51  ;;  %927 = vadd.xlane.f32.xlu1 %v926_v14  ;;  %924 = vadd.xlane.f32.xlu0 %v923_v59  ;;  %v932_v7 = vsel %vm526_vm0, %v15298_v13, 0.0  ;;  %v15299_v51 = vunpack.c.l.bf16 %v9877_v47  ;;  %v10693_v13 = vpack.i.bf16 %v14919_v38, %v14918_v16  ;;  %v10698_v47 = vld [vmem:[%s14751_s0 + $0x320] sm:$0xff]  }
 0x10e   :  { %v718_v5 = vpop.xlane.xlu1 %717  ;;  %v715_v54 = vpop.xlane.xlu0 %714  ;;  %v5753_v30 = vsel %vm3694_vm13, %v5752_v55, %v5748_v23  ;;  %v14921_v32 = vunpack.c.h.bf16 %v10698_v47 }
 0x10f   :  { %v929_v14 = vsel %vm526_vm0, %v15299_v51, 0.0  ;;  %v5762_v59 = vrot.slane %v718_v5, %v10102_v44  ;;  %v5757_v43 = vrot.slane %v715_v54, %v10105_v60  ;;  %15300 = vst [vmem:[#allocation111_spill] sm:$0xff] %v10693_v13  ;;  %v15301_v54 = vunpack.c.h.bf16 %v9901_v10 }
 0x110   :  { %v15302_v51 = vunpack.c.l.bf16 %v9901_v10 }
 0x111   :  { %933 = vadd.xlane.f32.xlu1 %v932_v7  ;;  %930 = vadd.xlane.f32.xlu0 %v929_v14  ;;  %v5758_v23 = vsel %vm3701_vm14, %v5757_v43, %v5753_v30  ;;  %v938_v7 = vsel %vm526_vm0, %v15301_v54, 0.0  ;;  %v14920_v30 = vunpack.c.l.bf16 %v10698_v47 }
 0x112   :  { %v724_v55 = vpop.xlane.xlu1 %723  ;;  %v721_v5 = vpop.xlane.xlu0 %720  ;;  %v935_v14 = vsel %vm526_vm0, %v15302_v51, 0.0  ;;  %v10708_v16 = vsel %vm3708_vm15, %v5762_v59, %v5758_v23  ;;  %v10724_v59 = vld [vmem:[%s14751_s0 + $0x328] sm:$0xff]  }
 0x113   :  { %15303 = vst [vmem:[#allocation112_spill] sm:$0xff] %v10708_v16  ;;  %v5771_v38 = vrot.slane %v724_v55, %v9916_v0  ;;  %v5767_v13 = vrot.slane %v721_v5, %v9913_v27  ;;  %v10719_v10 = vpack.i.bf16 %v14921_v32, %v14920_v30  ;;  %v15305_v5 = vunpack.c.h.bf16 %v9942_v61 }
 0x114   :  { %v14922_v30 = vunpack.c.l.bf16 %v10724_v59  ;;  %v15308_v16 = vunpack.c.h.bf16 %v9977_v40 }
 0x115   :  { %v5772_v43 = vsel %vm3610_vm1, %v5771_v38, %v5767_v13  ;;  %939 = vadd.xlane.f32.xlu1 %v938_v7  ;;  %936 = vadd.xlane.f32.xlu0 %v935_v14  ;;  %15304 = vst [vmem:[#allocation113_spill] sm:$0xff] %v10719_v10  ;;  %v944_v54 = vsel %vm526_vm0, %v15305_v5, 0.0  ;;  %v15306_v38 = vunpack.c.l.bf16 %v9942_v61  ;;  %v14923_v14 = vunpack.c.h.bf16 %v10724_v59  ;;  %v10746_v61 = vld [vmem:[%s14751_s0 + $0x330] sm:$0xff]  }
 0x116   :  { %v730_v23 = vpop.xlane.xlu1 %729  ;;  %v727_v55 = vpop.xlane.xlu0 %726 }
 0x117   :  { %v941_v13 = vsel %vm526_vm0, %v15306_v38, 0.0  ;;  %v5781_v7 = vrot.slane %v730_v23, %v9928_v4  ;;  %v5776_v51 = vrot.slane %v727_v55, %v9921_v62  ;;  %v10741_v5 = vpack.i.bf16 %v14923_v14, %v14922_v30 }
 0x118   :  { %v14925_v14 = vunpack.c.h.bf16 %v10746_v61 }
 0x119   :  { %v5777_v32 = vsel %vm3617_vm2, %v5776_v51, %v5772_v43  ;;  %945 = vadd.xlane.f32.xlu1 %v944_v54  ;;  %942 = vadd.xlane.f32.xlu0 %v941_v13  ;;  %15307 = vst [vmem:[#allocation114_spill] sm:$0xff] %v10741_v5  ;;  %v950_v43 = vsel %vm526_vm0, %v15308_v16, 0.0  ;;  %v15309_v54 = vunpack.c.l.bf16 %v9977_v40  ;;  %v14924_v5 = vunpack.c.l.bf16 %v10746_v61  ;;  %v10769_v40 = vld [vmem:[%s14751_s0 + $0x338] sm:$0xff]  }
 0x11a   :  { %v736_v23 = vpop.xlane.xlu1 %735  ;;  %v5782_v55 = vsel %vm3624_vm3, %v5781_v7, %v5777_v32  ;;  %v733_v38 = vpop.xlane.xlu0 %732 }
 0x11b   :  { %v947_v13 = vsel %vm526_vm0, %v15309_v54, 0.0  ;;  %v5791_v51 = vrot.slane %v736_v23, %v9945_v35  ;;  %v5786_v30 = vrot.slane %v733_v38, %v9948_v25  ;;  %v10764_v16 = vpack.i.bf16 %v14925_v14, %v14924_v5 }
 0x11c   :  { %v15311_v38 = vunpack.c.h.bf16 %v10008_v42  ;;  %v14927_v5 = vunpack.c.h.bf16 %v10769_v40  ;;  %v14926_v14 = vunpack.c.l.bf16 %v10769_v40 }
 0x11d   :  { %v5787_v10 = vsel %vm3631_vm4, %v5786_v30, %v5782_v55  ;;  %951 = vadd.xlane.f32.xlu1 %v950_v43  ;;  %948 = vadd.xlane.f32.xlu0 %v947_v13  ;;  %15310 = vst [vmem:[#allocation115_spill] sm:$0xff] %v10764_v16  ;;  %v15312_v55 = vunpack.c.l.bf16 %v10008_v42  ;;  %v10792_v42 = vld [vmem:[%s14751_s0 + $0x340] sm:$0xff]  }
 0x11e   :  { %v742_v32 = vpop.xlane.xlu1 %741  ;;  %v5792_v7 = vsel %vm3638_vm5, %v5791_v51, %v5787_v10  ;;  %v739_v23 = vpop.xlane.xlu0 %738  ;;  %v956_v30 = vsel %vm526_vm0, %v15311_v38, 0.0  ;;  %v10787_v10 = vpack.i.bf16 %v14927_v5, %v14926_v14  ;;  %v15314_v38 = vunpack.c.h.bf16 %v10037_v36 }
 0x11f   :  { %v953_v43 = vsel %vm526_vm0, %v15312_v55, 0.0  ;;  %v5801_v54 = vrot.slane %v742_v32, %v9963_v37  ;;  %v5796_v13 = vrot.slane %v739_v23, %v9981_v58  ;;  %v14929_v14 = vunpack.c.h.bf16 %v10792_v42 }
 0x120   :  { %15313 = vst [vmem:[#allocation116_spill] sm:$0xff] %v10787_v10  ;;  %v14928_v5 = vunpack.c.l.bf16 %v10792_v42 }
 0x121   :  { %v5797_v16 = vsel %vm3645_vm6, %v5796_v13, %v5792_v7  ;;  %957 = vadd.xlane.f32.xlu1 %v956_v30  ;;  %954 = vadd.xlane.f32.xlu0 %v953_v43  ;;  %v962_v7 = vsel %vm526_vm0, %v15314_v38, 0.0  ;;  %v15315_v30 = vunpack.c.l.bf16 %v10037_v36  ;;  %v10815_v36 = vld [vmem:[%s14751_s0 + $0x348] sm:$0xff]   ;;  %v15317_v38 = vunpack.c.h.bf16 %v10070_v12 }
 0x122   :  { %v748_v51 = vpop.xlane.xlu1 %747  ;;  %v5802_v32 = vsel %vm15057_vm7, %v5801_v54, %v5797_v16  ;;  %v745_v23 = vpop.xlane.xlu0 %744  ;;  %v10810_v16 = vpack.i.bf16 %v14929_v14, %v14928_v5  ;;  %v14931_v5 = vunpack.c.h.bf16 %v10815_v36  ;;  %v14930_v14 = vunpack.c.l.bf16 %v10815_v36 }
 0x123   :  { %v959_v55 = vsel %vm526_vm0, %v15315_v30, 0.0  ;;  %v5811_v43 = vrot.slane %v748_v51, %v9997_v20  ;;  %v5806_v13 = vrot.slane %v745_v23, %v10012_v53 }
 0x124   :  { %15316 = vst [vmem:[#allocation117_spill] sm:$0xff] %v10810_v16 }
 0x125   :  { %v5807_v10 = vsel %vm14977_vm8, %v5806_v13, %v5802_v32  ;;  %963 = vadd.xlane.f32.xlu1 %v962_v7  ;;  %960 = vadd.xlane.f32.xlu0 %v959_v55  ;;  %v968_v32 = vsel %vm526_vm0, %v15317_v38, 0.0  ;;  %v15318_v7 = vunpack.c.l.bf16 %v10070_v12  ;;  %v10838_v12 = vld [vmem:[%s14751_s0 + $0x350] sm:$0xff]   ;;  %v15320_v38 = vunpack.c.h.bf16 %v10095_v33 }
 0x126   :  { %v754_v54 = vpop.xlane.xlu1 %753  ;;  %v5812_v51 = vsel %vm15058_vm9, %v5811_v43, %v5807_v10  ;;  %v751_v23 = vpop.xlane.xlu0 %750  ;;  %v10833_v10 = vpack.i.bf16 %v14931_v5, %v14930_v14  ;;  %v14933_v14 = vunpack.c.h.bf16 %v10838_v12  ;;  %v14932_v5 = vunpack.c.l.bf16 %v10838_v12 }
 0x127   :  { %v965_v30 = vsel %vm526_vm0, %v15318_v7, 0.0  ;;  %v5821_v55 = vrot.slane %v754_v54, %v10041_v41  ;;  %v5816_v13 = vrot.slane %v751_v23, %v10044_v8 }
 0x128   :  { %15319 = vst [vmem:[#allocation118_spill] sm:$0xff] %v10833_v10 }
 0x129   :  { %v5817_v16 = vsel %vm3673_vm10, %v5816_v13, %v5812_v51  ;;  %969 = vadd.xlane.f32.xlu1 %v968_v32  ;;  %966 = vadd.xlane.f32.xlu0 %v965_v30  ;;  %v974_v51 = vsel %vm526_vm0, %v15320_v38, 0.0  ;;  %v15321_v32 = vunpack.c.l.bf16 %v10095_v33  ;;  %v10861_v33 = vld [vmem:[%s14751_s0 + $0x358] sm:$0xff]   ;;  %v15323_v38 = vunpack.c.h.bf16 %v10121_v2 }
 0x12a   :  { %v760_v43 = vpop.xlane.xlu1 %759  ;;  %v5822_v54 = vsel %vm14976_vm11, %v5821_v55, %v5817_v16  ;;  %v757_v23 = vpop.xlane.xlu0 %756  ;;  %v10856_v16 = vpack.i.bf16 %v14933_v14, %v14932_v5  ;;  %v14935_v5 = vunpack.c.h.bf16 %v10861_v33  ;;  %v14934_v14 = vunpack.c.l.bf16 %v10861_v33 }
 0x12b   :  { %v971_v7 = vsel %vm526_vm0, %v15321_v32, 0.0  ;;  %v5831_v30 = vrot.slane %v760_v43, %v10059_v52  ;;  %v5826_v13 = vrot.slane %v757_v23, %v10074_v50 }
 0x12c   :  { %15322 = vst [vmem:[#allocation119_spill] sm:$0xff] %v10856_v16 }
 0x12d   :  { %v5827_v10 = vsel %vm3687_vm12, %v5826_v13, %v5822_v54  ;;  %975 = vadd.xlane.f32.xlu1 %v974_v51  ;;  %972 = vadd.xlane.f32.xlu0 %v971_v7  ;;  %v980_v54 = vsel %vm526_vm0, %v15323_v38, 0.0  ;;  %v15324_v51 = vunpack.c.l.bf16 %v10121_v2  ;;  %v10884_v2 = vld [vmem:[%s14751_s0 + $0x360] sm:$0xff]  }
 0x12e   :  { %v766_v55 = vpop.xlane.xlu1 %765  ;;  %v5832_v43 = vsel %vm3694_vm13, %v5831_v30, %v5827_v10  ;;  %v763_v23 = vpop.xlane.xlu0 %762  ;;  %v10879_v10 = vpack.i.bf16 %v14935_v5, %v14934_v14  ;;  %v14937_v14 = vunpack.c.h.bf16 %v10884_v2  ;;  %v14936_v5 = vunpack.c.l.bf16 %v10884_v2 }
 0x12f   :  { %v977_v32 = vsel %vm526_vm0, %v15324_v51, 0.0  ;;  %v5841_v7 = vrot.slane %v766_v55, %v10102_v44  ;;  %v5836_v13 = vrot.slane %v763_v23, %v10105_v60  ;;  %v15326_v23 = vunpack.c.h.bf16 %v10144_v17 }
 0x130   :  { %15325 = vst [vmem:[#allocation120_spill] sm:$0xff] %v10879_v10 }
 0x131   :  { %v5837_v16 = vsel %vm3701_vm14, %v5836_v13, %v5832_v43  ;;  %981 = vadd.xlane.f32.xlu1 %v980_v54  ;;  %978 = vadd.xlane.f32.xlu0 %v977_v32  ;;  %v986_v38 = vsel %vm526_vm0, %v15326_v23, 0.0  ;;  %v15327_v43 = vunpack.c.l.bf16 %v10144_v17  ;;  %v10904_v17 = vpack.i.bf16 %v14937_v14, %v14936_v5 }
 0x132   :  { %v772_v30 = vpop.xlane.xlu1 %771  ;;  %v769_v55 = vpop.xlane.xlu0 %768  ;;  %v10893_v51 = vsel %vm3708_vm15, %v5841_v7, %v5837_v16  ;;  %v10909_v16 = vld [vmem:[%s14751_s0 + $0x368] sm:$0xff]  }
 0x133   :  { %v983_v54 = vsel %vm526_vm0, %v15327_v43, 0.0  ;;  %15328 = vst [vmem:[#allocation121_spill] sm:$0xff] %v10893_v51  ;;  %v5850_v32 = vrot.slane %v772_v30, %v9916_v0  ;;  %v5846_v13 = vrot.slane %v769_v55, %v9913_v27  ;;  %15329 = vst [vmem:[#allocation122_spill] sm:$0xff] %v10904_v17  ;;  %v15330_v55 = vunpack.c.h.bf16 %v10169_v9 }
 0x134   :  { %v14938_v5 = vunpack.c.l.bf16 %v10909_v16  ;;  %v15333_v51 = vunpack.c.h.bf16 %v10191_v26 }
 0x135   :  { %v5851_v10 = vsel %vm3610_vm1, %v5850_v32, %v5846_v13  ;;  %987 = vadd.xlane.f32.xlu1 %v986_v38  ;;  %984 = vadd.xlane.f32.xlu0 %v983_v54  ;;  %v992_v23 = vsel %vm526_vm0, %v15330_v55, 0.0  ;;  %v15331_v38 = vunpack.c.l.bf16 %v10169_v9  ;;  %v14939_v13 = vunpack.c.h.bf16 %v10909_v16  ;;  %v10931_v9 = vld [vmem:[%s14751_s0 + $0x370] sm:$0xff]  }
 0x136   :  { %v778_v7 = vpop.xlane.xlu1 %777  ;;  %v775_v30 = vpop.xlane.xlu0 %774 }
 0x137   :  { %v989_v43 = vsel %vm526_vm0, %v15331_v38, 0.0  ;;  %v5860_v54 = vrot.slane %v778_v7, %v9928_v4  ;;  %v5855_v32 = vrot.slane %v775_v30, %v9921_v62  ;;  %v10926_v55 = vpack.i.bf16 %v14939_v13, %v14938_v5 }
 0x138   :  { %v14941_v13 = vunpack.c.h.bf16 %v10931_v9 }
 0x139   :  { %v5856_v14 = vsel %vm3617_vm2, %v5855_v32, %v5851_v10  ;;  %993 = vadd.xlane.f32.xlu1 %v992_v23  ;;  %990 = vadd.xlane.f32.xlu0 %v989_v43  ;;  %15332 = vst [vmem:[#allocation123_spill] sm:$0xff] %v10926_v55  ;;  %v998_v10 = vsel %vm526_vm0, %v15333_v51, 0.0  ;;  %v15334_v23 = vunpack.c.l.bf16 %v10191_v26  ;;  %v14940_v55 = vunpack.c.l.bf16 %v10931_v9  ;;  %v10954_v26 = vld [vmem:[%s14751_s0 + $0x378] sm:$0xff]  }
 0x13a   :  { %v784_v7 = vpop.xlane.xlu1 %783  ;;  %v5861_v30 = vsel %vm3624_vm3, %v5860_v54, %v5856_v14  ;;  %v781_v38 = vpop.xlane.xlu0 %780 }
 0x13b   :  { %v995_v43 = vsel %vm526_vm0, %v15334_v23, 0.0  ;;  %v5870_v32 = vrot.slane %v784_v7, %v9945_v35  ;;  %v5865_v5 = vrot.slane %v781_v38, %v9948_v25  ;;  %v10949_v14 = vpack.i.bf16 %v14941_v13, %v14940_v55 }
 0x13c   :  { %v15336_v38 = vunpack.c.h.bf16 %v10214_v18  ;;  %v14943_v55 = vunpack.c.h.bf16 %v10954_v26  ;;  %v14942_v13 = vunpack.c.l.bf16 %v10954_v26 }
 0x13d   :  { %v5866_v17 = vsel %vm3631_vm4, %v5865_v5, %v5861_v30  ;;  %999 = vadd.xlane.f32.xlu1 %v998_v10  ;;  %996 = vadd.xlane.f32.xlu0 %v995_v43  ;;  %15335 = vst [vmem:[#allocation124_spill] sm:$0xff] %v10949_v14  ;;  %v15337_v30 = vunpack.c.l.bf16 %v10214_v18  ;;  %v10977_v18 = vld [vmem:[%s14751_s0 + $0x380] sm:$0xff]  }
 0x13e   :  { %v790_v51 = vpop.xlane.xlu1 %789  ;;  %v5871_v54 = vsel %vm3638_vm5, %v5870_v32, %v5866_v17  ;;  %v787_v7 = vpop.xlane.xlu0 %786  ;;  %v1004_v5 = vsel %vm526_vm0, %v15336_v38, 0.0  ;;  %v10972_v17 = vpack.i.bf16 %v14943_v55, %v14942_v13  ;;  %v15339_v38 = vunpack.c.h.bf16 %v10237_v45 }
 0x13f   :  { %v1001_v10 = vsel %vm526_vm0, %v15337_v30, 0.0  ;;  %v5880_v23 = vrot.slane %v790_v51, %v9963_v37  ;;  %v5875_v43 = vrot.slane %v787_v7, %v9981_v58  ;;  %v14945_v13 = vunpack.c.h.bf16 %v10977_v18 }
 0x140   :  { %15338 = vst [vmem:[#allocation125_spill] sm:$0xff] %v10972_v17  ;;  %v14944_v55 = vunpack.c.l.bf16 %v10977_v18 }
 0x141   :  { %v5876_v14 = vsel %vm3645_vm6, %v5875_v43, %v5871_v54  ;;  %1005 = vadd.xlane.f32.xlu1 %v1004_v5  ;;  %1002 = vadd.xlane.f32.xlu0 %v1001_v10  ;;  %v1010_v54 = vsel %vm526_vm0, %v15339_v38, 0.0  ;;  %v15340_v5 = vunpack.c.l.bf16 %v10237_v45  ;;  %v11000_v45 = vld [vmem:[%s14751_s0 + $0x388] sm:$0xff]   ;;  %v15342_v38 = vunpack.c.h.bf16 %v10260_v56 }
 0x142   :  { %v796_v32 = vpop.xlane.xlu1 %795  ;;  %v5881_v51 = vsel %vm15057_vm7, %v5880_v23, %v5876_v14  ;;  %v793_v7 = vpop.xlane.xlu0 %792  ;;  %v10995_v14 = vpack.i.bf16 %v14945_v13, %v14944_v55  ;;  %v14947_v55 = vunpack.c.h.bf16 %v11000_v45  ;;  %v14946_v13 = vunpack.c.l.bf16 %v11000_v45 }
 0x143   :  { %v1007_v30 = vsel %vm526_vm0, %v15340_v5, 0.0  ;;  %v5890_v10 = vrot.slane %v796_v32, %v9997_v20  ;;  %v5885_v43 = vrot.slane %v793_v7, %v10012_v53 }
 0x144   :  { %15341 = vst [vmem:[#allocation126_spill] sm:$0xff] %v10995_v14 }
 0x145   :  { %v5886_v17 = vsel %vm14977_vm8, %v5885_v43, %v5881_v51  ;;  %1011 = vadd.xlane.f32.xlu1 %v1010_v54  ;;  %1008 = vadd.xlane.f32.xlu0 %v1007_v30  ;;  %v1016_v51 = vsel %vm526_vm0, %v15342_v38, 0.0  ;;  %v15343_v54 = vunpack.c.l.bf16 %v10260_v56  ;;  %v11023_v56 = vld [vmem:[%s14751_s0 + $0x390] sm:$0xff]   ;;  %v15345_v38 = vunpack.c.h.bf16 %v10283_v57 }
 0x146   :  { %v802_v23 = vpop.xlane.xlu1 %801  ;;  %v5891_v32 = vsel %vm15058_vm9, %v5890_v10, %v5886_v17  ;;  %v799_v7 = vpop.xlane.xlu0 %798  ;;  %v11018_v17 = vpack.i.bf16 %v14947_v55, %v14946_v13  ;;  %v14949_v13 = vunpack.c.h.bf16 %v11023_v56  ;;  %v14948_v55 = vunpack.c.l.bf16 %v11023_v56 }
 0x147   :  { %v1013_v5 = vsel %vm526_vm0, %v15343_v54, 0.0  ;;  %v5900_v30 = vrot.slane %v802_v23, %v10041_v41  ;;  %v5895_v43 = vrot.slane %v799_v7, %v10044_v8 }
 0x148   :  { %15344 = vst [vmem:[#allocation127_spill] sm:$0xff] %v11018_v17 }
 0x149   :  { %v5896_v14 = vsel %vm3673_vm10, %v5895_v43, %v5891_v32  ;;  %1017 = vadd.xlane.f32.xlu1 %v1016_v51  ;;  %1014 = vadd.xlane.f32.xlu0 %v1013_v5  ;;  %v1022_v32 = vsel %vm526_vm0, %v15345_v38, 0.0  ;;  %v15346_v51 = vunpack.c.l.bf16 %v10283_v57  ;;  %v11046_v57 = vld [vmem:[%s14751_s0 + $0x398] sm:$0xff]  }
 0x14a   :  { %v808_v10 = vpop.xlane.xlu1 %807  ;;  %v5901_v23 = vsel %vm14976_vm11, %v5900_v30, %v5896_v14  ;;  %v805_v7 = vpop.xlane.xlu0 %804  ;;  %v11041_v14 = vpack.i.bf16 %v14949_v13, %v14948_v55  ;;  %v14951_v55 = vunpack.c.h.bf16 %v11046_v57  ;;  %v14950_v13 = vunpack.c.l.bf16 %v11046_v57 }
 0x14b   :  { %v1019_v54 = vsel %vm526_vm0, %v15346_v51, 0.0  ;;  %v5910_v5 = vrot.slane %v808_v10, %v10059_v52  ;;  %v5905_v43 = vrot.slane %v805_v7, %v10074_v50  ;;  %v15348_v7 = vunpack.c.h.bf16 %v10306_v24 }
 0x14c   :  { %15347 = vst [vmem:[#allocation128_spill] sm:$0xff] %v11041_v14 }
 0x14d   :  { %v5906_v17 = vsel %vm3687_vm12, %v5905_v43, %v5901_v23  ;;  %1023 = vadd.xlane.f32.xlu1 %v1022_v32  ;;  %1020 = vadd.xlane.f32.xlu0 %v1019_v54  ;;  %v1028_v38 = vsel %vm526_vm0, %v15348_v7, 0.0  ;;  %v15349_v23 = vunpack.c.l.bf16 %v10306_v24  ;;  %v11063_v7 = vpack.i.bf16 %v14951_v55, %v14950_v13  ;;  %v11068_v24 = vld [vmem:[%s14751_s0 + $0x3a0] sm:$0xff]  }
 0x14e   :  { %v814_v30 = vpop.xlane.xlu1 %813  ;;  %v811_v10 = vpop.xlane.xlu0 %810  ;;  %v5911_v51 = vsel %vm3694_vm13, %v5910_v5, %v5906_v17  ;;  %v14953_v14 = vunpack.c.h.bf16 %v11068_v24 }
 0x14f   :  { %v1025_v32 = vsel %vm526_vm0, %v15349_v23, 0.0  ;;  %v5920_v54 = vrot.slane %v814_v30, %v10102_v44  ;;  %v5915_v43 = vrot.slane %v811_v10, %v10105_v60  ;;  %15350 = vst [vmem:[#allocation129_spill] sm:$0xff] %v11063_v7  ;;  %v15351_v10 = vunpack.c.h.bf16 %v10328_v39 }
 0x150   :  { %v15352_v23 = vunpack.c.l.bf16 %v10328_v39 }
 0x151   :  { %1029 = vadd.xlane.f32.xlu1 %v1028_v38  ;;  %1026 = vadd.xlane.f32.xlu0 %v1025_v32  ;;  %v5916_v17 = vsel %vm3701_vm14, %v5915_v43, %v5911_v51  ;;  %v1034_v38 = vsel %vm526_vm0, %v15351_v10, 0.0  ;;  %v14952_v51 = vunpack.c.l.bf16 %v11068_v24 }
 0x152   :  { %v820_v5 = vpop.xlane.xlu1 %819  ;;  %v817_v30 = vpop.xlane.xlu0 %816  ;;  %v1031_v32 = vsel %vm526_vm0, %v15352_v23, 0.0  ;;  %v11078_v13 = vsel %vm3708_vm15, %v5920_v54, %v5916_v17  ;;  %v11094_v54 = vld [vmem:[%s14751_s0 + $0x3a8] sm:$0xff]  }
 0x153   :  { %15353 = vst [vmem:[#allocation130_spill] sm:$0xff] %v11078_v13  ;;  %v5929_v55 = vrot.slane %v820_v5, %v9916_v0  ;;  %v5925_v7 = vrot.slane %v817_v30, %v9913_v27  ;;  %v11089_v39 = vpack.i.bf16 %v14953_v14, %v14952_v51  ;;  %v15355_v30 = vunpack.c.h.bf16 %v10354_v48 }
 0x154   :  { %v14954_v51 = vunpack.c.l.bf16 %v11094_v54  ;;  %v15358_v13 = vunpack.c.h.bf16 %v10376_v11 }
 0x155   :  { %v5930_v43 = vsel %vm3610_vm1, %v5929_v55, %v5925_v7  ;;  %1035 = vadd.xlane.f32.xlu1 %v1034_v38  ;;  %1032 = vadd.xlane.f32.xlu0 %v1031_v32  ;;  %15354 = vst [vmem:[#allocation131_spill] sm:$0xff] %v11089_v39  ;;  %v1040_v10 = vsel %vm526_vm0, %v15355_v30, 0.0  ;;  %v15356_v55 = vunpack.c.l.bf16 %v10354_v48  ;;  %v14955_v32 = vunpack.c.h.bf16 %v11094_v54  ;;  %v11116_v48 = vld [vmem:[%s14751_s0 + $0x3b0] sm:$0xff]  }
 0x156   :  { %v826_v17 = vpop.xlane.xlu1 %825  ;;  %v823_v5 = vpop.xlane.xlu0 %822 }
 0x157   :  { %v1037_v7 = vsel %vm526_vm0, %v15356_v55, 0.0  ;;  %v5939_v38 = vrot.slane %v826_v17, %v9928_v4  ;;  %v5934_v23 = vrot.slane %v823_v5, %v9921_v62  ;;  %v11111_v30 = vpack.i.bf16 %v14955_v32, %v14954_v51 }
 0x158   :  { %v14957_v32 = vunpack.c.h.bf16 %v11116_v48 }
 0x159   :  { %v5935_v14 = vsel %vm3617_vm2, %v5934_v23, %v5930_v43  ;;  %1041 = vadd.xlane.f32.xlu1 %v1040_v10  ;;  %1038 = vadd.xlane.f32.xlu0 %v1037_v7  ;;  %15357 = vst [vmem:[#allocation132_spill] sm:$0xff] %v11111_v30  ;;  %v1046_v43 = vsel %vm526_vm0, %v15358_v13, 0.0  ;;  %v15359_v10 = vunpack.c.l.bf16 %v10376_v11  ;;  %v14956_v30 = vunpack.c.l.bf16 %v11116_v48  ;;  %v11139_v11 = vld [vmem:[%s14751_s0 + $0x3b8] sm:$0xff]  }
 0x15a   :  { %v832_v17 = vpop.xlane.xlu1 %831  ;;  %v5940_v5 = vsel %vm3624_vm3, %v5939_v38, %v5935_v14  ;;  %v829_v55 = vpop.xlane.xlu0 %828 }
 0x15b   :  { %v1043_v7 = vsel %vm526_vm0, %v15359_v10, 0.0  ;;  %v5949_v23 = vrot.slane %v832_v17, %v9945_v35  ;;  %v5944_v51 = vrot.slane %v829_v55, %v9948_v25  ;;  %v11134_v13 = vpack.i.bf16 %v14957_v32, %v14956_v30 }
 0x15c   :  { %v15361_v55 = vunpack.c.h.bf16 %v10399_v49  ;;  %v14959_v30 = vunpack.c.h.bf16 %v11139_v11  ;;  %v14958_v32 = vunpack.c.l.bf16 %v11139_v11 }
 0x15d   :  { %v5945_v39 = vsel %vm3631_vm4, %v5944_v51, %v5940_v5  ;;  %1047 = vadd.xlane.f32.xlu1 %v1046_v43  ;;  %1044 = vadd.xlane.f32.xlu0 %v1043_v7  ;;  %15360 = vst [vmem:[#allocation133_spill] sm:$0xff] %v11134_v13  ;;  %v15362_v5 = vunpack.c.l.bf16 %v10399_v49  ;;  %v11162_v49 = vld [vmem:[%s14751_s0 + $0x3c0] sm:$0xff]  }
 0x15e   :  { %v838_v14 = vpop.xlane.xlu1 %837  ;;  %v5950_v38 = vsel %vm3638_vm5, %v5949_v23, %v5945_v39  ;;  %v835_v17 = vpop.xlane.xlu0 %834  ;;  %v1052_v51 = vsel %vm526_vm0, %v15361_v55, 0.0  ;;  %v11157_v39 = vpack.i.bf16 %v14959_v30, %v14958_v32  ;;  %v15364_v55 = vunpack.c.h.bf16 %v10422_v21 }
 0x15f   :  { %v1049_v43 = vsel %vm526_vm0, %v15362_v5, 0.0  ;;  %v5959_v10 = vrot.slane %v838_v14, %v9963_v37  ;;  %v5954_v7 = vrot.slane %v835_v17, %v9981_v58  ;;  %v14961_v32 = vunpack.c.h.bf16 %v11162_v49 }
 0x160   :  { %15363 = vst [vmem:[#allocation134_spill] sm:$0xff] %v11157_v39  ;;  %v14960_v30 = vunpack.c.l.bf16 %v11162_v49 }
 0x161   :  { %v5955_v13 = vsel %vm3645_vm6, %v5954_v7, %v5950_v38  ;;  %1053 = vadd.xlane.f32.xlu1 %v1052_v51  ;;  %1050 = vadd.xlane.f32.xlu0 %v1049_v43  ;;  %v1058_v38 = vsel %vm526_vm0, %v15364_v55, 0.0  ;;  %v15365_v51 = vunpack.c.l.bf16 %v10422_v21  ;;  %v11185_v21 = vld [vmem:[%s14751_s0 + $0x3c8] sm:$0xff]   ;;  %v15367_v55 = vunpack.c.h.bf16 %v10445_v15 }
 0x162   :  { %v844_v23 = vpop.xlane.xlu1 %843  ;;  %v5960_v14 = vsel %vm15057_vm7, %v5959_v10, %v5955_v13  ;;  %v841_v17 = vpop.xlane.xlu0 %840  ;;  %v11180_v13 = vpack.i.bf16 %v14961_v32, %v14960_v30  ;;  %v14963_v30 = vunpack.c.h.bf16 %v11185_v21  ;;  %v14962_v32 = vunpack.c.l.bf16 %v11185_v21 }
 0x163   :  { %v1055_v5 = vsel %vm526_vm0, %v15365_v51, 0.0  ;;  %v5969_v43 = vrot.slane %v844_v23, %v9997_v20  ;;  %v5964_v7 = vrot.slane %v841_v17, %v10012_v53 }
 0x164   :  { %15366 = vst [vmem:[#allocation135_spill] sm:$0xff] %v11180_v13 }
 0x165   :  { %v5965_v39 = vsel %vm14977_vm8, %v5964_v7, %v5960_v14  ;;  %1059 = vadd.xlane.f32.xlu1 %v1058_v38  ;;  %1056 = vadd.xlane.f32.xlu0 %v1055_v5  ;;  %v1064_v14 = vsel %vm526_vm0, %v15367_v55, 0.0  ;;  %v15368_v38 = vunpack.c.l.bf16 %v10445_v15  ;;  %v11208_v15 = vld [vmem:[%s14751_s0 + $0x3d0] sm:$0xff]   ;;  %v15370_v55 = vunpack.c.h.bf16 %v10468_v34 }
 0x166   :  { %v850_v10 = vpop.xlane.xlu1 %849  ;;  %v5970_v23 = vsel %vm15058_vm9, %v5969_v43, %v5965_v39  ;;  %v847_v17 = vpop.xlane.xlu0 %846  ;;  %v11203_v39 = vpack.i.bf16 %v14963_v30, %v14962_v32  ;;  %v14965_v32 = vunpack.c.h.bf16 %v11208_v15  ;;  %v14964_v30 = vunpack.c.l.bf16 %v11208_v15 }
 0x167   :  { %v1061_v51 = vsel %vm526_vm0, %v15368_v38, 0.0  ;;  %v5979_v5 = vrot.slane %v850_v10, %v10041_v41  ;;  %v5974_v7 = vrot.slane %v847_v17, %v10044_v8 }
 0x168   :  { %15369 = vst [vmem:[#allocation136_spill] sm:$0xff] %v11203_v39 }
 0x169   :  { %v5975_v13 = vsel %vm3673_vm10, %v5974_v7, %v5970_v23  ;;  %1065 = vadd.xlane.f32.xlu1 %v1064_v14  ;;  %1062 = vadd.xlane.f32.xlu0 %v1061_v51  ;;  %v1070_v23 = vsel %vm526_vm0, %v15370_v55, 0.0  ;;  %v15371_v14 = vunpack.c.l.bf16 %v10468_v34  ;;  %v11231_v34 = vld [vmem:[%s14751_s0 + $0x3d8] sm:$0xff]   ;;  %v15373_v55 = vunpack.c.h.bf16 %v10491_v3 }
 0x16a   :  { %v856_v43 = vpop.xlane.xlu1 %855  ;;  %v5980_v10 = vsel %vm14976_vm11, %v5979_v5, %v5975_v13  ;;  %v853_v17 = vpop.xlane.xlu0 %852  ;;  %v11226_v13 = vpack.i.bf16 %v14965_v32, %v14964_v30  ;;  %v14967_v30 = vunpack.c.h.bf16 %v11231_v34  ;;  %v14966_v32 = vunpack.c.l.bf16 %v11231_v34 }
 0x16b   :  { %v1067_v38 = vsel %vm526_vm0, %v15371_v14, 0.0  ;;  %v5989_v51 = vrot.slane %v856_v43, %v10059_v52  ;;  %v5984_v7 = vrot.slane %v853_v17, %v10074_v50 }
 0x16c   :  { %15372 = vst [vmem:[#allocation137_spill] sm:$0xff] %v11226_v13 }
 0x16d   :  { %v5985_v39 = vsel %vm3687_vm12, %v5984_v7, %v5980_v10  ;;  %1071 = vadd.xlane.f32.xlu1 %v1070_v23  ;;  %1068 = vadd.xlane.f32.xlu0 %v1067_v38  ;;  %v1076_v10 = vsel %vm526_vm0, %v15373_v55, 0.0  ;;  %v15374_v23 = vunpack.c.l.bf16 %v10491_v3  ;;  %v11254_v3 = vld [vmem:[%s14751_s0 + $0x3e0] sm:$0xff]  }
 0x16e   :  { %v862_v5 = vpop.xlane.xlu1 %861  ;;  %v5990_v43 = vsel %vm3694_vm13, %v5989_v51, %v5985_v39  ;;  %v859_v17 = vpop.xlane.xlu0 %858  ;;  %v11249_v39 = vpack.i.bf16 %v14967_v30, %v14966_v32  ;;  %v14969_v32 = vunpack.c.h.bf16 %v11254_v3  ;;  %v14968_v30 = vunpack.c.l.bf16 %v11254_v3 }
 0x16f   :  { %v1073_v14 = vsel %vm526_vm0, %v15374_v23, 0.0  ;;  %v5999_v38 = vrot.slane %v862_v5, %v10102_v44  ;;  %v5994_v7 = vrot.slane %v859_v17, %v10105_v60  ;;  %v15376_v17 = vunpack.c.h.bf16 %v10514_v31 }
 0x170   :  { %15375 = vst [vmem:[#allocation138_spill] sm:$0xff] %v11249_v39 }
 0x171   :  { %v5995_v13 = vsel %vm3701_vm14, %v5994_v7, %v5990_v43  ;;  %1077 = vadd.xlane.f32.xlu1 %v1076_v10  ;;  %1074 = vadd.xlane.f32.xlu0 %v1073_v14  ;;  %v1082_v55 = vsel %vm526_vm0, %v15376_v17, 0.0  ;;  %v15377_v43 = vunpack.c.l.bf16 %v10514_v31  ;;  %v11274_v31 = vpack.i.bf16 %v14969_v32, %v14968_v30 }
 0x172   :  { %v868_v51 = vpop.xlane.xlu1 %867  ;;  %v865_v5 = vpop.xlane.xlu0 %864  ;;  %v11263_v23 = vsel %vm3708_vm15, %v5999_v38, %v5995_v13  ;;  %v11279_v13 = vld [vmem:[%s14751_s0 + $0x3e8] sm:$0xff]  }
 0x173   :  { %v1079_v10 = vsel %vm526_vm0, %v15377_v43, 0.0  ;;  %15378 = vst [vmem:[#allocation139_spill] sm:$0xff] %v11263_v23  ;;  %v6008_v14 = vrot.slane %v868_v51, %v9916_v0  ;;  %v6004_v7 = vrot.slane %v865_v5, %v9913_v27  ;;  %15379 = vst [vmem:[#allocation140_spill] sm:$0xff] %v11274_v31  ;;  %v15380_v5 = vunpack.c.h.bf16 %v10539_v46 }
 0x174   :  { %v14970_v30 = vunpack.c.l.bf16 %v11279_v13  ;;  %v15383_v23 = vunpack.c.h.bf16 %v10561_v6 }
 0x175   :  { %v6009_v39 = vsel %vm3610_vm1, %v6008_v14, %v6004_v7  ;;  %1083 = vadd.xlane.f32.xlu1 %v1082_v55  ;;  %1080 = vadd.xlane.f32.xlu0 %v1079_v10  ;;  %v1088_v17 = vsel %vm526_vm0, %v15380_v5, 0.0  ;;  %v15381_v55 = vunpack.c.l.bf16 %v10539_v46  ;;  %v14971_v7 = vunpack.c.h.bf16 %v11279_v13  ;;  %v11301_v46 = vld [vmem:[%s14751_s0 + $0x3f0] sm:$0xff]  }
 0x176   :  { %v874_v38 = vpop.xlane.xlu1 %873  ;;  %v871_v51 = vpop.xlane.xlu0 %870 }
 0x177   :  { %v1085_v43 = vsel %vm526_vm0, %v15381_v55, 0.0  ;;  %v6018_v10 = vrot.slane %v874_v38, %v9928_v4  ;;  %v6013_v14 = vrot.slane %v871_v51, %v9921_v62  ;;  %v11296_v5 = vpack.i.bf16 %v14971_v7, %v14970_v30 }
 0x178   :  { %v14973_v7 = vunpack.c.h.bf16 %v11301_v46 }
 0x179   :  { %v6014_v32 = vsel %vm3617_vm2, %v6013_v14, %v6009_v39  ;;  %1089 = vadd.xlane.f32.xlu1 %v1088_v17  ;;  %1086 = vadd.xlane.f32.xlu0 %v1085_v43  ;;  %15382 = vst [vmem:[#allocation141_spill] sm:$0xff] %v11296_v5  ;;  %v1094_v39 = vsel %vm526_vm0, %v15383_v23, 0.0  ;;  %v15384_v17 = vunpack.c.l.bf16 %v10561_v6  ;;  %v14972_v5 = vunpack.c.l.bf16 %v11301_v46  ;;  %v11324_v6 = vld [vmem:[%s14751_s0 + $0x3f8] sm:$0xff]   ;;  %s8838_s0 = smov 64  }
 0x17a   :  { %v880_v38 = vpop.xlane.xlu1 %879  ;;  %v6019_v51 = vsel %vm3624_vm3, %v6018_v10, %v6014_v32  ;;  %v877_v55 = vpop.xlane.xlu0 %876 }
 0x17b   :  { %v1091_v43 = vsel %vm526_vm0, %v15384_v17, 0.0  ;;  %v6028_v14 = vrot.slane %v880_v38, %v9945_v35  ;;  %v6023_v30 = vrot.slane %v877_v55, %v9948_v25  ;;  %v11319_v32 = vpack.i.bf16 %v14973_v7, %v14972_v5 }
 0x17c   :  { %v15386_v55 = vunpack.c.h.bf16 %v10584_v63  ;;  %v14975_v5 = vunpack.c.h.bf16 %v11324_v6  ;;  %v14974_v7 = vunpack.c.l.bf16 %v11324_v6 }
 0x17d   :  { %v6024_v31 = vsel %vm3631_vm4, %v6023_v30, %v6019_v51  ;;  %1095 = vadd.xlane.f32.xlu1 %v1094_v39  ;;  %1092 = vadd.xlane.f32.xlu0 %v1091_v43  ;;  %15385 = vst [vmem:[#allocation142_spill] sm:$0xff] %v11319_v32  ;;  %v15387_v51 = vunpack.c.l.bf16 %v10584_v63 }
 0x17e   :  { %v886_v23 = vpop.xlane.xlu1 %885  ;;  %v6029_v10 = vsel %vm3638_vm5, %v6028_v14, %v6024_v31  ;;  %v883_v38 = vpop.xlane.xlu0 %882  ;;  %v1100_v30 = vsel %vm526_vm0, %v15386_v55, 0.0  ;;  %v11342_v31 = vpack.i.bf16 %v14975_v5, %v14974_v7  ;;  %v15390_v5 = vunpack.c.h.bf16 %v10630_v19 }
 0x17f   :  { %v1097_v39 = vsel %vm526_vm0, %v15387_v51, 0.0  ;;  %v6038_v17 = vrot.slane %v886_v23, %v9963_v37  ;;  %v6033_v43 = vrot.slane %v883_v38, %v9981_v58  ;;  %v15388_v38 = vunpack.c.h.bf16 %v10607_v28 }
 0x180   :  { %v15389_v51 = vunpack.c.l.bf16 %v10607_v28  ;;  %v15391_v28 = vunpack.c.l.bf16 %v10630_v19  ;;  %v15393_v19 = vunpack.c.l.bf16 %v10653_v1 }
 0x181   :  { %v6034_v32 = vsel %vm3645_vm6, %v6033_v43, %v6029_v10  ;;  %1101 = vadd.xlane.f32.xlu1 %v1100_v30  ;;  %1098 = vadd.xlane.f32.xlu0 %v1097_v39  ;;  %v1106_v55 = vsel %vm526_vm0, %v15388_v38, 0.0  ;;  %v1112_v38 = vsel %vm526_vm0, %v15390_v5, 0.0 }
 0x182   :  { %v892_v63 = vpop.xlane.xlu1 %891  ;;  %v6039_v14 = vsel %vm15057_vm7, %v6038_v17, %v6034_v32  ;;  %v889_v23 = vpop.xlane.xlu0 %888  ;;  %v1103_v10 = vsel %vm526_vm0, %v15389_v51, 0.0  ;;  %v1109_v51 = vsel %vm526_vm0, %v15391_v28, 0.0 }
 0x183   :  { %v6048_v30 = vrot.slane %v892_v63, %v9997_v20  ;;  %v6043_v39 = vrot.slane %v889_v23, %v10012_v53 }
 0x185   :  { %v6044_v43 = vsel %vm14977_vm8, %v6043_v39, %v6039_v14  ;;  %1107 = vadd.xlane.f32.xlu1 %v1106_v55  ;;  %1104 = vadd.xlane.f32.xlu0 %v1103_v10  ;;  %v15392_v39 = vunpack.c.h.bf16 %v10653_v1 }
 0x186   :  { %v898_v7 = vpop.xlane.xlu1 %897  ;;  %v6049_v32 = vsel %vm15058_vm9, %v6048_v30, %v6044_v43  ;;  %v895_v17 = vpop.xlane.xlu0 %894  ;;  %v1115_v43 = vsel %vm526_vm0, %v15393_v19, 0.0  ;;  %v15396_v19 = vunpack.c.h.bf16 %v10698_v47 }
 0x187   :  { %v6058_v63 = vrot.slane %v898_v7, %v10041_v41  ;;  %v6053_v23 = vrot.slane %v895_v17, %v10044_v8  ;;  %v1118_v5 = vsel %vm526_vm0, %v15392_v39, 0.0 }
 0x189   :  { %v6054_v14 = vsel %vm3673_vm10, %v6053_v23, %v6049_v32  ;;  %1113 = vadd.xlane.f32.xlu1 %v1112_v38  ;;  %1110 = vadd.xlane.f32.xlu0 %v1109_v51  ;;  %v15394_v51 = vunpack.c.h.bf16 %v10676_v29  ;;  %v15395_v23 = vunpack.c.l.bf16 %v10676_v29  ;;  %v15397_v29 = vunpack.c.l.bf16 %v10698_v47 }
 0x18a   :  { %v904_v55 = vpop.xlane.xlu1 %903  ;;  %v6059_v10 = vsel %vm14976_vm11, %v6058_v63, %v6054_v14  ;;  %v901_v30 = vpop.xlane.xlu0 %900  ;;  %v15400_v47 = vunpack.c.l.bf16 %v10724_v59 }
 0x18b   :  { %v6068_v7 = vrot.slane %v904_v55, %v10059_v52  ;;  %v6063_v17 = vrot.slane %v901_v30, %v10074_v50  ;;  %v1124_v63 = vsel %vm526_vm0, %v15394_v51, 0.0  ;;  %v1121_v1 = vsel %vm526_vm0, %v15395_v23, 0.0 }
 0x18c   :  { %v15399_v23 = vunpack.c.h.bf16 %v10724_v59  ;;  %v15402_v59 = vunpack.c.l.bf16 %v10746_v61 }
 0x18d   :  { %v6064_v32 = vsel %vm3687_vm12, %v6063_v17, %v6059_v10  ;;  %1119 = vadd.xlane.f32.xlu1 %v1118_v5  ;;  %1116 = vadd.xlane.f32.xlu0 %v1115_v43  ;;  %v1130_v43 = vsel %vm526_vm0, %v15396_v19, 0.0  ;;  %v1127_v17 = vsel %vm526_vm0, %v15397_v29, 0.0 }
 0x18e   :  { %v910_v38 = vpop.xlane.xlu1 %909  ;;  %v907_v28 = vpop.xlane.xlu0 %906  ;;  %v6069_v14 = vsel %vm3694_vm13, %v6068_v7, %v6064_v32 }
 0x18f   :  { %v6078_v55 = vrot.slane %v910_v38, %v10102_v44  ;;  %v6073_v30 = vrot.slane %v907_v28, %v10105_v60 }
 0x191   :  { %1125 = vadd.xlane.f32.xlu1 %v1124_v63  ;;  %1122 = vadd.xlane.f32.xlu0 %v1121_v1  ;;  %v6074_v10 = vsel %vm3701_vm14, %v6073_v30, %v6069_v14  ;;  %v1136_v1 = vsel %vm526_vm0, %v15399_v23, 0.0  ;;  %v1133_v14 = vsel %vm526_vm0, %v15400_v47, 0.0 }
 0x192   :  { %v916_v39 = vpop.xlane.xlu1 %915  ;;  %v913_v5 = vpop.xlane.xlu0 %912  ;;  %v11391_v7 = vsel %vm3708_vm15, %v6078_v55, %v6074_v10 }
 0x193   :  { %15398 = vst [vmem:[#allocation143_spill] sm:$0xff] %v11391_v7  ;;  %v6087_v32 = vrot.slane %v916_v39, %v9916_v0  ;;  %v6083_v38 = vrot.slane %v913_v5, %v9913_v27  ;;  %v15503_v7 = vld [vmem:[#allocation8_spill] sm:$0xff] }
 0x195   :  { %v6088_v28 = vsel %vm3610_vm1, %v6087_v32, %v6083_v38  ;;  %1131 = vadd.xlane.f32.xlu1 %v1130_v43  ;;  %1128 = vadd.xlane.f32.xlu0 %v1127_v17  ;;  %v15401_v43 = vunpack.c.h.bf16 %v10746_v61  ;;  %v1139_v17 = vsel %vm526_vm0, %v15402_v59, 0.0  ;;  %v15404_v61 = vunpack.c.l.bf16 %v10769_v40 }
 0x196   :  { %v922_v51 = vpop.xlane.xlu1 %921  ;;  %v919_v63 = vpop.xlane.xlu0 %918 }
 0x197   :  { %v6097_v55 = vrot.slane %v922_v51, %v9928_v4  ;;  %v6092_v30 = vrot.slane %v919_v63, %v9921_v62  ;;  %v1142_v29 = vsel %vm526_vm0, %v15401_v43, 0.0  ;;  %v15405_v43 = vunpack.c.h.bf16 %v10792_v42 }
 0x199   :  { %v6093_v10 = vsel %vm3617_vm2, %v6092_v30, %v6088_v28  ;;  %1137 = vadd.xlane.f32.xlu1 %v1136_v1  ;;  %1134 = vadd.xlane.f32.xlu0 %v1133_v14  ;;  %v15403_v1 = vunpack.c.h.bf16 %v10769_v40  ;;  %v1145_v14 = vsel %vm526_vm0, %v15404_v61, 0.0  ;;  %v15406_v40 = vunpack.c.l.bf16 %v10792_v42 }
 0x19a   :  { %v928_v39 = vpop.xlane.xlu1 %927  ;;  %v6098_v5 = vsel %vm3624_vm3, %v6097_v55, %v6093_v10  ;;  %v925_v19 = vpop.xlane.xlu0 %924  ;;  %v15408_v42 = vunpack.c.l.bf16 %v10815_v36 }
 0x19b   :  { %v6107_v32 = vrot.slane %v928_v39, %v9945_v35  ;;  %v6102_v38 = vrot.slane %v925_v19, %v9948_v25  ;;  %v1148_v47 = vsel %vm526_vm0, %v15403_v1, 0.0  ;;  %v1151_v59 = vsel %vm526_vm0, %v15406_v40, 0.0 }
 0x19d   :  { %v6103_v28 = vsel %vm3631_vm4, %v6102_v38, %v6098_v5  ;;  %1143 = vadd.xlane.f32.xlu1 %v1142_v29  ;;  %1140 = vadd.xlane.f32.xlu0 %v1139_v17  ;;  %v1154_v29 = vsel %vm526_vm0, %v15405_v43, 0.0 }
 0x19e   :  { %v934_v51 = vpop.xlane.xlu1 %933  ;;  %v6108_v63 = vsel %vm3638_vm5, %v6107_v32, %v6103_v28  ;;  %v931_v23 = vpop.xlane.xlu0 %930 }
 0x19f   :  { %v6117_v55 = vrot.slane %v934_v51, %v9963_v37  ;;  %v6112_v30 = vrot.slane %v931_v23, %v9981_v58  ;;  %v15407_v23 = vunpack.c.h.bf16 %v10815_v36  ;;  %v15410_v36 = vunpack.c.l.bf16 %v10838_v12 }
 0x1a1   :  { %v6113_v10 = vsel %vm3645_vm6, %v6112_v30, %v6108_v63  ;;  %1149 = vadd.xlane.f32.xlu1 %v1148_v47  ;;  %1146 = vadd.xlane.f32.xlu0 %v1145_v14  ;;  %v1160_v1 = vsel %vm526_vm0, %v15407_v23, 0.0  ;;  %v1157_v47 = vsel %vm526_vm0, %v15408_v42, 0.0  ;;  %v1163_v43 = vsel %vm526_vm0, %v15410_v36, 0.0 }
 0x1a2   :  { %v940_v39 = vpop.xlane.xlu1 %939  ;;  %v6118_v5 = vsel %vm15057_vm7, %v6117_v55, %v6113_v10  ;;  %v937_v19 = vpop.xlane.xlu0 %936 }
 0x1a3   :  { %v6127_v17 = vrot.slane %v940_v39, %v9997_v20  ;;  %v6122_v32 = vrot.slane %v937_v19, %v10012_v53 }
 0x1a5   :  { %v6123_v38 = vsel %vm14977_vm8, %v6122_v32, %v6118_v5  ;;  %1155 = vadd.xlane.f32.xlu1 %v1154_v29  ;;  %1152 = vadd.xlane.f32.xlu0 %v1151_v59  ;;  %v15409_v5 = vunpack.c.h.bf16 %v10838_v12  ;;  %v15412_v12 = vunpack.c.l.bf16 %v10861_v33 }
 0x1a6   :  { %v946_v28 = vpop.xlane.xlu1 %945  ;;  %v6128_v51 = vsel %vm15058_vm9, %v6127_v17, %v6123_v38  ;;  %v943_v63 = vpop.xlane.xlu0 %942 }
 0x1a7   :  { %v6137_v61 = vrot.slane %v946_v28, %v10041_v41  ;;  %v6132_v14 = vrot.slane %v943_v63, %v10044_v8  ;;  %v1166_v19 = vsel %vm526_vm0, %v15409_v5, 0.0  ;;  %v15411_v28 = vunpack.c.h.bf16 %v10861_v33 }
 0x1a8   :  { %v1169_v63 = vsel %vm526_vm0, %v15412_v12, 0.0 }
 0x1a9   :  { %v6133_v55 = vsel %vm3673_vm10, %v6132_v14, %v6128_v51  ;;  %1161 = vadd.xlane.f32.xlu1 %v1160_v1  ;;  %1158 = vadd.xlane.f32.xlu0 %v1157_v47  ;;  %v1172_v51 = vsel %vm526_vm0, %v15411_v28, 0.0  ;;  %v15413_v14 = vunpack.c.h.bf16 %v10884_v2 }
 0x1aa   :  { %v952_v30 = vpop.xlane.xlu1 %951  ;;  %v6138_v10 = vsel %vm14976_vm11, %v6137_v61, %v6133_v55  ;;  %v949_v39 = vpop.xlane.xlu0 %948  ;;  %vm4895_vm11 = vcmask 1041409  }
 0x1ab   :  { %v6147_v29 = vrot.slane %v952_v30, %v10059_v52  ;;  %v6142_v40 = vrot.slane %v949_v39, %v10074_v50  ;;  %v1178_v55 = vsel %vm526_vm0, %v15413_v14, 0.0  ;;  %v15414_v30 = vunpack.c.l.bf16 %v10884_v2 }
 0x1ac   :  { %v15416_v2 = vunpack.c.h.bf16 %v10909_v16 }
 0x1ad   :  { %v6143_v59 = vsel %vm3687_vm12, %v6142_v40, %v6138_v10  ;;  %1167 = vadd.xlane.f32.xlu1 %v1166_v19  ;;  %1164 = vadd.xlane.f32.xlu0 %v1163_v43  ;;  %v1175_v33 = vsel %vm526_vm0, %v15414_v30, 0.0 }
 0x1ae   :  { %v958_v17 = vpop.xlane.xlu1 %957  ;;  %v6148_v32 = vsel %vm3694_vm13, %v6147_v29, %v6143_v59  ;;  %v955_v38 = vpop.xlane.xlu0 %954  ;;  %v1184_v40 = vsel %vm526_vm0, %v15416_v2, 0.0  ;;  %v15417_v59 = vunpack.c.l.bf16 %v10909_v16  ;;  %v15419_v16 = vunpack.c.l.bf16 %v10931_v9 }
 0x1af   :  { %v6157_v23 = vrot.slane %v958_v17, %v10102_v44  ;;  %v6152_v1 = vrot.slane %v955_v38, %v10105_v60 }
 0x1b0   :  { %v1181_v17 = vsel %vm526_vm0, %v15417_v59, 0.0  ;;  %v15422_v59 = vunpack.c.h.bf16 %v10977_v18 }
 0x1b1   :  { %v6153_v42 = vsel %vm3701_vm14, %v6152_v1, %v6148_v32  ;;  %1173 = vadd.xlane.f32.xlu1 %v1172_v51  ;;  %1170 = vadd.xlane.f32.xlu0 %v1169_v63  ;;  %v15418_v63 = vunpack.c.h.bf16 %v10931_v9  ;;  %v1187_v1 = vsel %vm526_vm0, %v15419_v16, 0.0  ;;  %v15421_v9 = vunpack.c.l.bf16 %v10954_v26 }
 0x1b2   :  { %v964_v47 = vpop.xlane.xlu1 %963  ;;  %v961_v61 = vpop.xlane.xlu0 %960  ;;  %v6158_v10 = vsel %vm3708_vm15, %v6157_v23, %v6153_v42 }
 0x1b3   :  { %v6166_v39 = vrot.slane %v964_v47, %v9916_v0  ;;  %v6162_v5 = vrot.slane %v961_v61, %v9913_v27  ;;  %v11476_v19 = vsel %vm4895_vm11, %v6158_v10, %v10153_v22  ;;  %v1190_v23 = vsel %vm526_vm0, %v15418_v63, 0.0 }
 0x1b4   :  { %15415 = vst [vmem:[#allocation144_spill] sm:$0xff] %v11476_v19  ;;  %v15507_v19 = vld [vmem:[#allocation10_spill] sm:$0xff] }
 0x1b5   :  { %v6167_v36 = vsel %vm3610_vm1, %v6166_v39, %v6162_v5  ;;  %1179 = vadd.xlane.f32.xlu1 %v1178_v55  ;;  %1176 = vadd.xlane.f32.xlu0 %v1175_v33  ;;  %v15420_v33 = vunpack.c.h.bf16 %v10954_v26  ;;  %v1193_v39 = vsel %vm526_vm0, %v15421_v9, 0.0  ;;  %v15423_v26 = vunpack.c.l.bf16 %v10977_v18 }
 0x1b6   :  { %v970_v43 = vpop.xlane.xlu1 %969  ;;  %v967_v29 = vpop.xlane.xlu0 %966  ;;  %v15425_v18 = vunpack.c.l.bf16 %v11000_v45 }
 0x1b7   :  { %v6176_v32 = vrot.slane %v970_v43, %v9928_v4  ;;  %v6171_v38 = vrot.slane %v967_v29, %v9921_v62  ;;  %v1196_v10 = vsel %vm526_vm0, %v15420_v33, 0.0  ;;  %v15427_v33 = vunpack.c.h.bf16 %v11023_v56 }
 0x1b9   :  { %v6172_v22 = vsel %vm3617_vm2, %v6171_v38, %v6167_v36  ;;  %1185 = vadd.xlane.f32.xlu1 %v1184_v40  ;;  %1182 = vadd.xlane.f32.xlu0 %v1181_v17  ;;  %v1202_v17 = vsel %vm526_vm0, %v15422_v59, 0.0  ;;  %v15430_v59 = vunpack.c.l.bf16 %v11046_v57 }
 0x1ba   :  { %v976_v28 = vpop.xlane.xlu1 %975  ;;  %v6177_v51 = vsel %vm3624_vm3, %v6176_v32, %v6172_v22  ;;  %v973_v12 = vpop.xlane.xlu0 %972  ;;  %v1199_v32 = vsel %vm526_vm0, %v15423_v26, 0.0 }
 0x1bb   :  { %v6186_v42 = vrot.slane %v976_v28, %v9945_v35  ;;  %v6181_v47 = vrot.slane %v973_v12, %v9948_v25 }
 0x1bd   :  { %v6182_v61 = vsel %vm3631_vm4, %v6181_v47, %v6177_v51  ;;  %1191 = vadd.xlane.f32.xlu1 %v1190_v23  ;;  %1188 = vadd.xlane.f32.xlu0 %v1187_v1  ;;  %v15424_v23 = vunpack.c.h.bf16 %v11000_v45  ;;  %v1205_v1 = vsel %vm526_vm0, %v15425_v18, 0.0  ;;  %v15428_v45 = vunpack.c.l.bf16 %v11023_v56 }
 0x1be   :  { %v982_v14 = vpop.xlane.xlu1 %981  ;;  %v6187_v55 = vsel %vm3638_vm5, %v6186_v42, %v6182_v61  ;;  %v979_v30 = vpop.xlane.xlu0 %978  ;;  %v1217_v56 = vsel %vm526_vm0, %v15430_v59, 0.0 }
 0x1bf   :  { %v6196_v5 = vrot.slane %v982_v14, %v9963_v37  ;;  %v6191_v36 = vrot.slane %v979_v30, %v9981_v58  ;;  %v1208_v16 = vsel %vm526_vm0, %v15424_v23, 0.0  ;;  %v1211_v9 = vsel %vm526_vm0, %v15428_v45, 0.0 }
 0x1c0   :  { %v15444_v45 = vunpack.c.l.bf16 %v11116_v48 }
 0x1c1   :  { %v6192_v43 = vsel %vm3645_vm6, %v6191_v36, %v6187_v55  ;;  %1197 = vadd.xlane.f32.xlu1 %v1196_v10  ;;  %1194 = vadd.xlane.f32.xlu0 %v1193_v39  ;;  %v1214_v10 = vsel %vm526_vm0, %v15427_v33, 0.0  ;;  %v15443_v33 = vunpack.c.h.bf16 %v11116_v48 }
 0x1c2   :  { %v988_v29 = vpop.xlane.xlu1 %987  ;;  %v6197_v2 = vsel %vm15057_vm7, %v6196_v5, %v6192_v43  ;;  %v985_v40 = vpop.xlane.xlu0 %984 }
 0x1c3   :  { %v6206_v38 = vrot.slane %v988_v29, %v9997_v20  ;;  %v6201_v22 = vrot.slane %v985_v40, %v10012_v53 }
 0x1c5   :  { %v6202_v28 = vsel %vm14977_vm8, %v6201_v22, %v6197_v2  ;;  %1203 = vadd.xlane.f32.xlu1 %v1202_v17  ;;  %1200 = vadd.xlane.f32.xlu0 %v1199_v32  ;;  %vm15426_vm8 = vcmask 786112   ;;  %v15429_v2 = vunpack.c.h.bf16 %v11046_v57 }
 0x1c6   :  { %v994_v51 = vpop.xlane.xlu1 %993  ;;  %v6207_v12 = vsel %vm15058_vm9, %v6206_v38, %v6202_v28  ;;  %v991_v63 = vpop.xlane.xlu0 %990 }
 0x1c7   :  { %v6216_v42 = vrot.slane %v994_v51, %v10041_v41  ;;  %v6211_v47 = vrot.slane %v991_v63, %v10044_v8  ;;  %v1220_v40 = vsel %vm526_vm0, %v15429_v2, 0.0  ;;  %v15433_v51 = vunpack.c.h.bf16 %v11068_v24 }
 0x1c9   :  { %v6212_v61 = vsel %vm3673_vm10, %v6211_v47, %v6207_v12  ;;  %1209 = vadd.xlane.f32.xlu1 %v1208_v16  ;;  %1206 = vadd.xlane.f32.xlu0 %v1205_v1  ;;  %v1226_v57 = vsel %vm526_vm0, %v15433_v51, 0.0  ;;  %v15434_v12 = vunpack.c.l.bf16 %v11068_v24  ;;  %v15435_v16 = vld [vmem:[#allocation94_spill] sm:$0xff]  ;;  %v15439_v47 = vunpack.c.h.bf16 %v11094_v54 }
 0x1ca   :  { %v1000_v14 = vpop.xlane.xlu1 %999  ;;  %v6217_v55 = vsel %vm15426_vm8, %v6216_v42, %v6212_v61  ;;  %v997_v30 = vpop.xlane.xlu0 %996  ;;  %v15440_v24 = vunpack.c.l.bf16 %v11094_v54  ;;  %v15456_v51 = vunpack.c.l.bf16 %v11185_v21  ;;  %vm15740_vm8 = vcmask 589312  }
 0x1cb   :  { %v6226_v39 = vrot.slane %v1000_v14, %v10059_v52  ;;  %v6221_v5 = vrot.slane %v997_v30, %v10074_v50  ;;  %v1223_v63 = vsel %vm526_vm0, %v15434_v12, 0.0  ;;  %v1232_v61 = vsel %vm526_vm0, %v15439_v47, 0.0 }
 0x1cc   :  { %v1229_v14 = vsel %vm526_vm0, %v15440_v24, 0.0  ;;  %v15463_v24 = vunpack.c.h.bf16 %v11231_v34 }
 0x1cd   :  { %v6222_v36 = vsel %vm3687_vm12, %v6221_v5, %v6217_v55  ;;  %1215 = vadd.xlane.f32.xlu1 %v1214_v10  ;;  %1212 = vadd.xlane.f32.xlu0 %v1211_v9  ;;  %v1238_v10 = vsel %vm526_vm0, %v15443_v33, 0.0  ;;  %v1235_v9 = vsel %vm526_vm0, %v15444_v45, 0.0  ;;  %v15447_v5 = vunpack.c.h.bf16 %v11139_v11 }
 0x1ce   :  { %v1006_v43 = vpop.xlane.xlu1 %1005  ;;  %v1003_v29 = vpop.xlane.xlu0 %1002  ;;  %v6227_v17 = vsel %vm3694_vm13, %v6226_v39, %v6222_v36  ;;  %v15464_v33 = vunpack.c.l.bf16 %v11231_v34 }
 0x1cf   :  { %v6236_v26 = vrot.slane %v1006_v43, %v10102_v44  ;;  %v6231_v32 = vrot.slane %v1003_v29, %v10105_v60  ;;  %v1244_v36 = vsel %vm526_vm0, %v15447_v5, 0.0  ;;  %v15448_v43 = vunpack.c.l.bf16 %v11139_v11 }
 0x1d1   :  { %1221 = vadd.xlane.f32.xlu1 %v1220_v40  ;;  %1218 = vadd.xlane.f32.xlu0 %v1217_v56  ;;  %v6232_v38 = vsel %vm3701_vm14, %v6231_v32, %v6227_v17  ;;  %v1241_v29 = vsel %vm526_vm0, %v15448_v43, 0.0  ;;  %v15451_v40 = vunpack.c.h.bf16 %v11162_v49  ;;  %v15452_v56 = vunpack.c.l.bf16 %v11162_v49 }
 0x1d2   :  { %v11548_v22 = vpop.xlane.xlu1 %1011  ;;  %v11550_v28 = vpop.xlane.xlu0 %1008  ;;  %v6237_v23 = vsel %vm3708_vm15, %v6236_v26, %v6232_v38  ;;  %v15455_v32 = vunpack.c.h.bf16 %v11185_v21 }
 0x1d3   :  { %15431 = vst [vmem:[#allocation145_spill] sm:$0xff] %v11548_v22  ;;  %15432 = vst [vmem:[#allocation146_spill] sm:$0xff] %v11550_v28  ;;  %v11561_v18 = vsel %vm4895_vm11, %v6237_v23, %v15435_v16  ;;  %v1250_v59 = vsel %vm526_vm0, %v15451_v40, 0.0  ;;  %v1247_v17 = vsel %vm526_vm0, %v15452_v56, 0.0  ;;  %v15460_v16 = vunpack.c.l.bf16 %v11208_v15  ;;  %v15659_v28 = vld [vmem:[#allocation110_spill] sm:$0xff] }
 0x1d4   :  { %15436 = vst [vmem:[#allocation94_spill] sm:$0xff] %v11561_v18  ;;  %v1256_v38 = vsel %vm526_vm0, %v15455_v32, 0.0  ;;  %v15471_v40 = vunpack.c.h.bf16 %v11279_v13  ;;  %v15472_v56 = vunpack.c.l.bf16 %v11279_v13  ;;  %v15547_v18 = vld [vmem:[#allocation30_spill] sm:$0xff] }
 0x1d5   :  { %1227 = vadd.xlane.f32.xlu1 %v1226_v57  ;;  %1224 = vadd.xlane.f32.xlu0 %v1223_v63  ;;  %v1253_v57 = vsel %vm526_vm0, %v15456_v51, 0.0  ;;  %v15459_v63 = vunpack.c.h.bf16 %v11208_v15  ;;  %v1259_v47 = vsel %vm526_vm0, %v15460_v16, 0.0  ;;  %v15479_v16 = vunpack.c.h.bf16 %v11324_v6 }
 0x1d6   :  { %v11563_v1 = vpop.xlane.xlu1 %1017  ;;  %v11565_v42 = vpop.xlane.xlu0 %1014 }
 0x1d7   :  { %15437 = vst [vmem:[#allocation147_spill] sm:$0xff] %v11563_v1  ;;  %15438 = vst [vmem:[#allocation148_spill] sm:$0xff] %v11565_v42  ;;  %v1262_v23 = vsel %vm526_vm0, %v15459_v63, 0.0  ;;  %v15651_v1 = vld [vmem:[#allocation106_spill] sm:$0xff] }
 0x1d9   :  { %1233 = vadd.xlane.f32.xlu1 %v1232_v61  ;;  %1230 = vadd.xlane.f32.xlu0 %v1229_v14  ;;  %v1268_v14 = vsel %vm526_vm0, %v15463_v24, 0.0  ;;  %v15480_v24 = vunpack.c.l.bf16 %v11324_v6  ;;  %v15489_v6 = vld [vmem:[#allocation2_spill] sm:$0xff] }
 0x1da   :  { %v11573_v55 = vpop.xlane.xlu1 %1023  ;;  %v11575_v30 = vpop.xlane.xlu0 %1020 }
 0x1db   :  { %15441 = vst [vmem:[#allocation149_spill] sm:$0xff] %v11573_v55  ;;  %15442 = vst [vmem:[#allocation150_spill] sm:$0xff] %v11575_v30  ;;  %v15644_v55 = vld [vmem:[#allocation101_spill] sm:$0xff] }
 0x1dd   :  { %1239 = vadd.xlane.f32.xlu1 %v1238_v10  ;;  %1236 = vadd.xlane.f32.xlu0 %v1235_v9  ;;  %v1265_v10 = vsel %vm526_vm0, %v15464_v33, 0.0  ;;  %v15467_v9 = vunpack.c.h.bf16 %v11254_v3 }
 0x1de   :  { %v11583_v39 = vpop.xlane.xlu1 %1029  ;;  %v11585_v54 = vpop.xlane.xlu0 %1026 }
 0x1df   :  { %15445 = vst [vmem:[#allocation151_spill] sm:$0xff] %v11583_v39  ;;  %15446 = vst [vmem:[#allocation152_spill] sm:$0xff] %v11585_v54  ;;  %v1274_v5 = vsel %vm526_vm0, %v15467_v9, 0.0  ;;  %v15637_v39 = vld [vmem:[#allocation95_spill] sm:$0xff] }
 0x1e1   :  { %1245 = vadd.xlane.f32.xlu1 %v1244_v36  ;;  %1242 = vadd.xlane.f32.xlu0 %v1241_v29  ;;  %v15468_v36 = vunpack.c.l.bf16 %v11254_v3 }
 0x1e2   :  { %v11593_v2 = vpop.xlane.xlu1 %1035  ;;  %v11595_v48 = vpop.xlane.xlu0 %1032 }
 0x1e3   :  { %15449 = vst [vmem:[#allocation153_spill] sm:$0xff] %v11593_v2  ;;  %15450 = vst [vmem:[#allocation154_spill] sm:$0xff] %v11595_v48  ;;  %v1271_v43 = vsel %vm526_vm0, %v15468_v36, 0.0  ;;  %v15627_v2 = vld [vmem:[#allocation84_spill] sm:$0xff] }
 0x1e5   :  { %1251 = vadd.xlane.f32.xlu1 %v1250_v59  ;;  %1248 = vadd.xlane.f32.xlu0 %v1247_v17  ;;  %v1280_v59 = vsel %vm526_vm0, %v15471_v40, 0.0  ;;  %v1277_v17 = vsel %vm526_vm0, %v15472_v56, 0.0 }
 0x1e6   :  { %v11603_v26 = vpop.xlane.xlu1 %1041  ;;  %v11605_v11 = vpop.xlane.xlu0 %1038 }
 0x1e7   :  { %15453 = vst [vmem:[#allocation155_spill] sm:$0xff] %v11603_v26  ;;  %15454 = vst [vmem:[#allocation156_spill] sm:$0xff] %v11605_v11 }
 0x1e9   :  { %1257 = vadd.xlane.f32.xlu1 %v1256_v38  ;;  %1254 = vadd.xlane.f32.xlu0 %v1253_v57  ;;  %v15475_v38 = vunpack.c.h.bf16 %v11301_v46  ;;  %v15476_v57 = vunpack.c.l.bf16 %v11301_v46 }
 0x1ea   :  { %v11613_v12 = vpop.xlane.xlu1 %1047  ;;  %v11615_v49 = vpop.xlane.xlu0 %1044 }
 0x1eb   :  { %15457 = vst [vmem:[#allocation157_spill] sm:$0xff] %v11613_v12  ;;  %15458 = vst [vmem:[#allocation158_spill] sm:$0xff] %v11615_v49  ;;  %v1286_v51 = vsel %vm526_vm0, %v15475_v38, 0.0  ;;  %v1283_v63 = vsel %vm526_vm0, %v15476_v57, 0.0  ;;  %v15495_v57 = vld [vmem:[#allocation3_spill] sm:$0xff] }
 0x1ed   :  { %1263 = vadd.xlane.f32.xlu1 %v1262_v23  ;;  %1260 = vadd.xlane.f32.xlu0 %v1259_v47  ;;  %v1292_v47 = vsel %vm526_vm0, %v15479_v16, 0.0 }
 0x1ee   :  { %v11623_v61 = vpop.xlane.xlu1 %1053  ;;  %v11625_v21 = vpop.xlane.xlu0 %1050 }
 0x1ef   :  { %15461 = vst [vmem:[#allocation159_spill] sm:$0xff] %v11623_v61  ;;  %15462 = vst [vmem:[#allocation160_spill] sm:$0xff] %v11625_v21  ;;  %v15531_v21 = vld [vmem:[#allocation22_spill] sm:$0xff] }
 0x1f1   :  { %1269 = vadd.xlane.f32.xlu1 %v1268_v14  ;;  %1266 = vadd.xlane.f32.xlu0 %v1265_v10  ;;  %v1289_v14 = vsel %vm526_vm0, %v15480_v24, 0.0  ;;  %v15499_v24 = vld [vmem:[#allocation6_spill] sm:$0xff] }
 0x1f2   :  { %v11633_v45 = vpop.xlane.xlu1 %1059  ;;  %v11635_v15 = vpop.xlane.xlu0 %1056 }
 0x1f3   :  { %15465 = vst [vmem:[#allocation161_spill] sm:$0xff] %v11633_v45  ;;  %15466 = vst [vmem:[#allocation162_spill] sm:$0xff] %v11635_v15  ;;  %v15671_v45 = vld [vmem:[#allocation117_spill] sm:$0xff] }
 0x1f5   :  { %1275 = vadd.xlane.f32.xlu1 %v1274_v5  ;;  %1272 = vadd.xlane.f32.xlu0 %v1271_v43 }
 0x1f6   :  { %v11643_v29 = vpop.xlane.xlu1 %1065  ;;  %v11645_v34 = vpop.xlane.xlu0 %1062 }
 0x1f7   :  { %15469 = vst [vmem:[#allocation163_spill] sm:$0xff] %v11643_v29  ;;  %15470 = vst [vmem:[#allocation164_spill] sm:$0xff] %v11645_v34  ;;  %v15667_v34 = vld [vmem:[#allocation115_spill] sm:$0xff] }
 0x1f9   :  { %1281 = vadd.xlane.f32.xlu1 %v1280_v59  ;;  %1278 = vadd.xlane.f32.xlu0 %v1277_v17  ;;  %v15492_v17 = vld [vmem:[#allocation4_spill] sm:$0xff] }
 0x1fa   :  { %v11653_v32 = vpop.xlane.xlu1 %1071  ;;  %v11655_v3 = vpop.xlane.xlu0 %1068 }
 0x1fb   :  { %15473 = vst [vmem:[#allocation165_spill] sm:$0xff] %v11653_v32  ;;  %15474 = vst [vmem:[#allocation166_spill] sm:$0xff] %v11655_v3  ;;  %v15655_v32 = vld [vmem:[#allocation108_spill] sm:$0xff]  ;;  %v15663_v3 = vld [vmem:[#allocation113_spill] sm:$0xff] }
 0x1fd   :  { %1287 = vadd.xlane.f32.xlu1 %v1286_v51  ;;  %1284 = vadd.xlane.f32.xlu0 %v1283_v63  ;;  %v15496_v63 = vld [vmem:[#allocation5_spill] sm:$0xff] }
 0x1fe   :  { %v11663_v23 = vpop.xlane.xlu1 %1077  ;;  %v11665_v13 = vpop.xlane.xlu0 %1074 }
 0x1ff   :  { %15477 = vst [vmem:[#allocation167_spill] sm:$0xff] %v11663_v23  ;;  %15478 = vst [vmem:[#allocation168_spill] sm:$0xff] %v11665_v13  ;;  %v15647_v23 = vld [vmem:[#allocation104_spill] sm:$0xff] }
 0x201   :  { %1293 = vadd.xlane.f32.xlu1 %v1292_v47  ;;  %1290 = vadd.xlane.f32.xlu0 %v1289_v14  ;;  %v15500_v14 = vld [vmem:[#allocation7_spill] sm:$0xff] }
 0x202   :  { %v11673_v33 = vpop.xlane.xlu1 %1083  ;;  %v11675_v46 = vpop.xlane.xlu0 %1080 }
 0x203   :  { %15481 = vst [vmem:[#allocation169_spill] sm:$0xff] %v11673_v33  ;;  %15482 = vst [vmem:[#allocation170_spill] sm:$0xff] %v11675_v46  ;;  %v15641_v33 = vld [vmem:[#allocation99_spill] sm:$0xff] }
 0x206   :  { %v11677_v10 = vpop.xlane.xlu1 %1089  ;;  %v11679_v9 = vpop.xlane.xlu0 %1086 }
 0x207   :  { %15483 = vst [vmem:[#allocation171_spill] sm:$0xff] %v11677_v10  ;;  %15484 = vst [vmem:[#allocation172_spill] sm:$0xff] %v11679_v9  ;;  %v15635_v10 = vld [vmem:[#allocation92_spill] sm:$0xff] }
 0x20a   :  { %v11681_v5 = vpop.xlane.xlu1 %1095  ;;  %v11683_v36 = vpop.xlane.xlu0 %1092 }
 0x20b   :  { %15485 = vst [vmem:[#allocation173_spill] sm:$0xff] %v11681_v5  ;;  %15486 = vst [vmem:[#allocation174_spill] sm:$0xff] %v11683_v36  ;;  %v15631_v5 = vld [vmem:[#allocation88_spill] sm:$0xff] }
 0x20e   :  { %v11685_v43 = vpop.xlane.xlu1 %1101  ;;  %v11687_v40 = vpop.xlane.xlu0 %1098 }
 0x20f   :  { %15487 = vst [vmem:[#allocation175_spill] sm:$0xff] %v11685_v43  ;;  %15488 = vst [vmem:[#allocation176_spill] sm:$0xff] %v11687_v40  ;;  %v15625_v43 = vld [vmem:[#allocation80_spill] sm:$0xff] }
 0x212   :  { %8204 = vrot.lane.b32.xlu1 %v15489_v6, %s8838_s0  ;;  %v11691_v59 = vpop.xlane.xlu1 %1107  ;;  %v11693_v56 = vpop.xlane.xlu0 %1104 }
 0x213   :  { %15490 = vst [vmem:[#allocation2_spill] sm:$0xff] %v11691_v59  ;;  %15491 = vst [vmem:[#allocation177_spill] sm:$0xff] %v11693_v56  ;;  %v15543_v59 = vld [vmem:[#allocation28_spill] sm:$0xff] }
 0x216   :  { %8209 = vrot.lane.b32.xlu1 %v15492_v17, %s8838_s0  ;;  %v11697_v38 = vpop.xlane.xlu1 %1113  ;;  %v11699_v51 = vpop.xlane.xlu0 %1110 }
 0x217   :  { %15493 = vst [vmem:[#allocation4_spill] sm:$0xff] %v11697_v38  ;;  %15494 = vst [vmem:[#allocation178_spill] sm:$0xff] %v11699_v51  ;;  %8199 = vrot.lane.b32.xlu0 %v15495_v57, %s8838_s0  ;;  %v15504_v57 = vld [vmem:[#allocation9_spill] sm:$0xff]  ;;  %v15535_v38 = vld [vmem:[#allocation24_spill] sm:$0xff] }
 0x218   :  { %v15539_v51 = vld [vmem:[#allocation26_spill] sm:$0xff] }
 0x21a   :  { %8214 = vrot.lane.b32.xlu1 %v15496_v63, %s8838_s0  ;;  %v11705_v16 = vpop.xlane.xlu1 %1119  ;;  %v11707_v47 = vpop.xlane.xlu0 %1116 }
 0x21b   :  { %15497 = vst [vmem:[#allocation3_spill] sm:$0xff] %v11705_v16  ;;  %15498 = vst [vmem:[#allocation5_spill] sm:$0xff] %v11707_v47  ;;  %8219 = vrot.lane.b32.xlu0 %v15499_v24, %s8838_s0  ;;  %v15508_v24 = vld [vmem:[#allocation11_spill] sm:$0xff] }
 0x21e   :  { %8224 = vrot.lane.b32.xlu1 %v15500_v14, %s8838_s0  ;;  %v11713_v6 = vpop.xlane.xlu1 %1125  ;;  %v11715_v17 = vpop.xlane.xlu0 %1122 }
 0x21f   :  { %15501 = vst [vmem:[#allocation6_spill] sm:$0xff] %v11713_v6  ;;  %15502 = vst [vmem:[#allocation7_spill] sm:$0xff] %v11715_v17  ;;  %8229 = vrot.lane.b32.xlu0 %v15503_v7, %s8838_s0  ;;  %v15511_v17 = vld [vmem:[#allocation12_spill] sm:$0xff]  ;;  %v15512_v7 = vld [vmem:[#allocation13_spill] sm:$0xff] }
 0x222   :  { %8234 = vrot.lane.b32.xlu1 %v15504_v57, %s8838_s0  ;;  %v11721_v63 = vpop.xlane.xlu1 %1131  ;;  %v11723_v61 = vpop.xlane.xlu0 %1128 }
 0x223   :  { %15505 = vst [vmem:[#allocation8_spill] sm:$0xff] %v11721_v63  ;;  %15506 = vst [vmem:[#allocation9_spill] sm:$0xff] %v11723_v61  ;;  %8239 = vrot.lane.b32.xlu0 %v15507_v19, %s8838_s0  ;;  %v15515_v61 = vld [vmem:[#allocation14_spill] sm:$0xff]  ;;  %v15516_v19 = vld [vmem:[#allocation15_spill] sm:$0xff] }
 0x226   :  { %8244 = vrot.lane.b32.xlu1 %v15508_v24, %s8838_s0  ;;  %v11729_v14 = vpop.xlane.xlu1 %1137  ;;  %v11731_v6 = vpop.xlane.xlu0 %1134 }
 0x227   :  { %15509 = vst [vmem:[#allocation10_spill] sm:$0xff] %v11729_v14  ;;  %15510 = vst [vmem:[#allocation11_spill] sm:$0xff] %v11731_v6  ;;  %8249 = vrot.lane.b32.xlu0 %v15511_v17, %s8838_s0  ;;  %v15519_v6 = vld [vmem:[#allocation16_spill] sm:$0xff]  ;;  %v15520_v17 = vld [vmem:[#allocation17_spill] sm:$0xff] }
 0x22a   :  { %8254 = vrot.lane.b32.xlu1 %v15512_v7, %s8838_s0  ;;  %v11737_v57 = vpop.xlane.xlu1 %1143  ;;  %v11739_v63 = vpop.xlane.xlu0 %1140 }
 0x22b   :  { %15513 = vst [vmem:[#allocation12_spill] sm:$0xff] %v11737_v57  ;;  %15514 = vst [vmem:[#allocation13_spill] sm:$0xff] %v11739_v63  ;;  %8259 = vrot.lane.b32.xlu0 %v15515_v61, %s8838_s0  ;;  %v15523_v63 = vld [vmem:[#allocation18_spill] sm:$0xff]  ;;  %v15524_v61 = vld [vmem:[#allocation19_spill] sm:$0xff] }
 0x22e   :  { %8264 = vrot.lane.b32.xlu1 %v15516_v19, %s8838_s0  ;;  %v11745_v24 = vpop.xlane.xlu1 %1149  ;;  %v11747_v14 = vpop.xlane.xlu0 %1146 }
 0x22f   :  { %15517 = vst [vmem:[#allocation14_spill] sm:$0xff] %v11745_v24  ;;  %15518 = vst [vmem:[#allocation15_spill] sm:$0xff] %v11747_v14  ;;  %8269 = vrot.lane.b32.xlu0 %v15519_v6, %s8838_s0  ;;  %v15527_v14 = vld [vmem:[#allocation20_spill] sm:$0xff]  ;;  %v15528_v6 = vld [vmem:[#allocation21_spill] sm:$0xff] }
 0x232   :  { %8274 = vrot.lane.b32.xlu1 %v15520_v17, %s8838_s0  ;;  %v11753_v7 = vpop.xlane.xlu1 %1155  ;;  %v11755_v57 = vpop.xlane.xlu0 %1152 }
 0x233   :  { %15521 = vst [vmem:[#allocation16_spill] sm:$0xff] %v11753_v7  ;;  %15522 = vst [vmem:[#allocation17_spill] sm:$0xff] %v11755_v57  ;;  %8279 = vrot.lane.b32.xlu0 %v15523_v63, %s8838_s0  ;;  %v15532_v63 = vld [vmem:[#allocation23_spill] sm:$0xff]  ;;  %v15639_v7 = vld [vmem:[#allocation97_spill] sm:$0xff] }
 0x236   :  { %8284 = vrot.lane.b32.xlu1 %v15524_v61, %s8838_s0  ;;  %v11761_v19 = vpop.xlane.xlu1 %1161  ;;  %v11763_v24 = vpop.xlane.xlu0 %1158 }
 0x237   :  { %15525 = vst [vmem:[#allocation18_spill] sm:$0xff] %v11761_v19  ;;  %15526 = vst [vmem:[#allocation19_spill] sm:$0xff] %v11763_v24  ;;  %8289 = vrot.lane.b32.xlu0 %v15527_v14, %s8838_s0  ;;  %v15536_v14 = vld [vmem:[#allocation25_spill] sm:$0xff]  ;;  %v15633_v19 = vld [vmem:[#allocation90_spill] sm:$0xff] }
 0x23a   :  { %8294 = vrot.lane.b32.xlu1 %v15528_v6, %s8838_s0  ;;  %v11769_v17 = vpop.xlane.xlu1 %1167  ;;  %v11771_v16 = vpop.xlane.xlu0 %1164 }
 0x23b   :  { %15529 = vst [vmem:[#allocation20_spill] sm:$0xff] %v11769_v17  ;;  %15530 = vst [vmem:[#allocation21_spill] sm:$0xff] %v11771_v16  ;;  %8299 = vrot.lane.b32.xlu0 %v15531_v21, %s8838_s0  ;;  %v15540_v21 = vld [vmem:[#allocation27_spill] sm:$0xff]  ;;  %v15629_v17 = vld [vmem:[#allocation86_spill] sm:$0xff] }
 0x23e   :  { %8304 = vrot.lane.b32.xlu1 %v15532_v63, %s8838_s0  ;;  %v11777_v61 = vpop.xlane.xlu1 %1173  ;;  %v11779_v47 = vpop.xlane.xlu0 %1170 }
 0x23f   :  { %15533 = vst [vmem:[#allocation22_spill] sm:$0xff] %v11777_v61  ;;  %15534 = vst [vmem:[#allocation23_spill] sm:$0xff] %v11779_v47  ;;  %8309 = vrot.lane.b32.xlu0 %v15535_v38, %s8838_s0  ;;  %v15544_v38 = vld [vmem:[#allocation29_spill] sm:$0xff] }
 0x242   :  { %8314 = vrot.lane.b32.xlu1 %v15536_v14, %s8838_s0  ;;  %v11785_v6 = vpop.xlane.xlu1 %1179  ;;  %v11787_v12 = vpop.xlane.xlu0 %1176 }
 0x243   :  { %15537 = vst [vmem:[#allocation24_spill] sm:$0xff] %v11785_v6  ;;  %15538 = vst [vmem:[#allocation25_spill] sm:$0xff] %v11787_v12  ;;  %8319 = vrot.lane.b32.xlu0 %v15539_v51, %s8838_s0  ;;  %v15548_v51 = vld [vmem:[#allocation31_spill] sm:$0xff]  ;;  %v15621_v6 = vld [vmem:[#allocation73_spill] sm:$0xff] }
 0x244   :  { %v15623_v12 = vld [vmem:[#allocation78_spill] sm:$0xff] }
 0x246   :  { %8324 = vrot.lane.b32.xlu1 %v15540_v21, %s8838_s0  ;;  %v11793_v63 = vpop.xlane.xlu1 %1185  ;;  %v11795_v56 = vpop.xlane.xlu0 %1182 }
 0x247   :  { %15541 = vst [vmem:[#allocation26_spill] sm:$0xff] %v11793_v63  ;;  %15542 = vst [vmem:[#allocation27_spill] sm:$0xff] %v11795_v56  ;;  %8329 = vrot.lane.b32.xlu0 %v15543_v59, %s8838_s0  ;;  %v15551_v56 = vld [vmem:[#allocation32_spill] sm:$0xff]  ;;  %v15552_v59 = vld [vmem:[#allocation33_spill] sm:$0xff] }
 0x24a   :  { %8334 = vrot.lane.b32.xlu1 %v15544_v38, %s8838_s0  ;;  %v11801_v14 = vpop.xlane.xlu1 %1191  ;;  %v11803_v49 = vpop.xlane.xlu0 %1188 }
 0x24b   :  { %15545 = vst [vmem:[#allocation28_spill] sm:$0xff] %v11801_v14  ;;  %15546 = vst [vmem:[#allocation29_spill] sm:$0xff] %v11803_v49  ;;  %8339 = vrot.lane.b32.xlu0 %v15547_v18, %s8838_s0  ;;  %v15555_v49 = vld [vmem:[#allocation34_spill] sm:$0xff]  ;;  %v15556_v18 = vld [vmem:[#allocation35_spill] sm:$0xff] }
 0x24e   :  { %8344 = vrot.lane.b32.xlu1 %v15548_v51, %s8838_s0  ;;  %v11809_v21 = vpop.xlane.xlu1 %1197  ;;  %v11811_v63 = vpop.xlane.xlu0 %1194 }
 0x24f   :  { %15549 = vst [vmem:[#allocation30_spill] sm:$0xff] %v11809_v21  ;;  %15550 = vst [vmem:[#allocation31_spill] sm:$0xff] %v11811_v63  ;;  %8349 = vrot.lane.b32.xlu0 %v15551_v56, %s8838_s0  ;;  %v15559_v63 = vld [vmem:[#allocation36_spill] sm:$0xff]  ;;  %v15560_v56 = vld [vmem:[#allocation37_spill] sm:$0xff] }
 0x252   :  { %8354 = vrot.lane.b32.xlu1 %v15552_v59, %s8838_s0  ;;  %v11817_v38 = vpop.xlane.xlu1 %1203  ;;  %v11819_v14 = vpop.xlane.xlu0 %1200 }
 0x253   :  { %15553 = vst [vmem:[#allocation32_spill] sm:$0xff] %v11817_v38  ;;  %15554 = vst [vmem:[#allocation33_spill] sm:$0xff] %v11819_v14  ;;  %8359 = vrot.lane.b32.xlu0 %v15555_v49, %s8838_s0  ;;  %v15563_v14 = vld [vmem:[#allocation38_spill] sm:$0xff]  ;;  %v15564_v49 = vld [vmem:[#allocation39_spill] sm:$0xff] }
 0x256   :  { %8364 = vrot.lane.b32.xlu1 %v15556_v18, %s8838_s0  ;;  %v11825_v51 = vpop.xlane.xlu1 %1209  ;;  %v11827_v21 = vpop.xlane.xlu0 %1206 }
 0x257   :  { %15557 = vst [vmem:[#allocation34_spill] sm:$0xff] %v11825_v51  ;;  %15558 = vst [vmem:[#allocation35_spill] sm:$0xff] %v11827_v21  ;;  %8369 = vrot.lane.b32.xlu0 %v15559_v63, %s8838_s0  ;;  %v15567_v21 = vld [vmem:[#allocation40_spill] sm:$0xff]  ;;  %v15568_v63 = vld [vmem:[#allocation41_spill] sm:$0xff] }
 0x25a   :  { %8374 = vrot.lane.b32.xlu1 %v15560_v56, %s8838_s0  ;;  %v11833_v59 = vpop.xlane.xlu1 %1215  ;;  %v11835_v38 = vpop.xlane.xlu0 %1212 }
 0x25b   :  { %15561 = vst [vmem:[#allocation36_spill] sm:$0xff] %v11833_v59  ;;  %15562 = vst [vmem:[#allocation37_spill] sm:$0xff] %v11835_v38  ;;  %8379 = vrot.lane.b32.xlu0 %v15563_v14, %s8838_s0  ;;  %v15571_v38 = vld [vmem:[#allocation42_spill] sm:$0xff]  ;;  %v15572_v14 = vld [vmem:[#allocation43_spill] sm:$0xff] }
 0x25e   :  { %8384 = vrot.lane.b32.xlu1 %v15564_v49, %s8838_s0  ;;  %v11841_v18 = vpop.xlane.xlu1 %1221  ;;  %v11843_v51 = vpop.xlane.xlu0 %1218 }
 0x25f   :  { %15565 = vst [vmem:[#allocation38_spill] sm:$0xff] %v11841_v18  ;;  %15566 = vst [vmem:[#allocation39_spill] sm:$0xff] %v11843_v51  ;;  %8389 = vrot.lane.b32.xlu0 %v15567_v21, %s8838_s0  ;;  %v15575_v51 = vld [vmem:[#allocation44_spill] sm:$0xff]  ;;  %v15576_v21 = vld [vmem:[#allocation45_spill] sm:$0xff] }
 0x262   :  { %8394 = vrot.lane.b32.xlu1 %v15568_v63, %s8838_s0  ;;  %v11849_v56 = vpop.xlane.xlu1 %1227  ;;  %v11851_v59 = vpop.xlane.xlu0 %1224 }
 0x263   :  { %15569 = vst [vmem:[#allocation40_spill] sm:$0xff] %v11849_v56  ;;  %15570 = vst [vmem:[#allocation41_spill] sm:$0xff] %v11851_v59  ;;  %8399 = vrot.lane.b32.xlu0 %v15571_v38, %s8838_s0  ;;  %v15579_v59 = vld [vmem:[#allocation46_spill] sm:$0xff]  ;;  %v15580_v38 = vld [vmem:[#allocation47_spill] sm:$0xff] }
 0x266   :  { %8404 = vrot.lane.b32.xlu1 %v15572_v14, %s8838_s0  ;;  %v11857_v49 = vpop.xlane.xlu1 %1233  ;;  %v11859_v18 = vpop.xlane.xlu0 %1230 }
 0x267   :  { %15573 = vst [vmem:[#allocation42_spill] sm:$0xff] %v11857_v49  ;;  %15574 = vst [vmem:[#allocation43_spill] sm:$0xff] %v11859_v18  ;;  %8409 = vrot.lane.b32.xlu0 %v15575_v51, %s8838_s0  ;;  %v15583_v18 = vld [vmem:[#allocation48_spill] sm:$0xff]  ;;  %v15584_v51 = vld [vmem:[#allocation49_spill] sm:$0xff] }
 0x26a   :  { %8414 = vrot.lane.b32.xlu1 %v15576_v21, %s8838_s0  ;;  %v11865_v63 = vpop.xlane.xlu1 %1239  ;;  %v11867_v56 = vpop.xlane.xlu0 %1236 }
 0x26b   :  { %15577 = vst [vmem:[#allocation44_spill] sm:$0xff] %v11865_v63  ;;  %15578 = vst [vmem:[#allocation45_spill] sm:$0xff] %v11867_v56  ;;  %8419 = vrot.lane.b32.xlu0 %v15579_v59, %s8838_s0  ;;  %v15587_v56 = vld [vmem:[#allocation50_spill] sm:$0xff]  ;;  %v15588_v59 = vld [vmem:[#allocation51_spill] sm:$0xff] }
 0x26e   :  { %8424 = vrot.lane.b32.xlu1 %v15580_v38, %s8838_s0  ;;  %v11873_v14 = vpop.xlane.xlu1 %1245  ;;  %v11875_v49 = vpop.xlane.xlu0 %1242 }
 0x26f   :  { %15581 = vst [vmem:[#allocation46_spill] sm:$0xff] %v11873_v14  ;;  %15582 = vst [vmem:[#allocation47_spill] sm:$0xff] %v11875_v49  ;;  %8429 = vrot.lane.b32.xlu0 %v15583_v18, %s8838_s0  ;;  %v15591_v49 = vld [vmem:[#allocation52_spill] sm:$0xff]  ;;  %v15592_v18 = vld [vmem:[#allocation53_spill] sm:$0xff] }
 0x272   :  { %8434 = vrot.lane.b32.xlu1 %v15584_v51, %s8838_s0  ;;  %v11881_v21 = vpop.xlane.xlu1 %1251  ;;  %v11883_v63 = vpop.xlane.xlu0 %1248 }
 0x273   :  { %15585 = vst [vmem:[#allocation48_spill] sm:$0xff] %v11881_v21  ;;  %15586 = vst [vmem:[#allocation49_spill] sm:$0xff] %v11883_v63  ;;  %8439 = vrot.lane.b32.xlu0 %v15587_v56, %s8838_s0  ;;  %v15595_v63 = vld [vmem:[#allocation54_spill] sm:$0xff]  ;;  %v15596_v56 = vld [vmem:[#allocation55_spill] sm:$0xff] }
 0x276   :  { %8444 = vrot.lane.b32.xlu1 %v15588_v59, %s8838_s0  ;;  %v11889_v38 = vpop.xlane.xlu1 %1257  ;;  %v11891_v14 = vpop.xlane.xlu0 %1254 }
 0x277   :  { %15589 = vst [vmem:[#allocation50_spill] sm:$0xff] %v11889_v38  ;;  %15590 = vst [vmem:[#allocation51_spill] sm:$0xff] %v11891_v14  ;;  %8449 = vrot.lane.b32.xlu0 %v15591_v49, %s8838_s0  ;;  %v15599_v14 = vld [vmem:[#allocation56_spill] sm:$0xff]  ;;  %v15600_v49 = vld [vmem:[#allocation57_spill] sm:$0xff] }
 0x27a   :  { %8454 = vrot.lane.b32.xlu1 %v15592_v18, %s8838_s0  ;;  %v11897_v51 = vpop.xlane.xlu1 %1263  ;;  %v11899_v21 = vpop.xlane.xlu0 %1260 }
 0x27b   :  { %15593 = vst [vmem:[#allocation52_spill] sm:$0xff] %v11897_v51  ;;  %15594 = vst [vmem:[#allocation53_spill] sm:$0xff] %v11899_v21  ;;  %8459 = vrot.lane.b32.xlu0 %v15595_v63, %s8838_s0  ;;  %v15603_v21 = vld [vmem:[#allocation58_spill] sm:$0xff]  ;;  %v15604_v63 = vld [vmem:[#allocation59_spill] sm:$0xff] }
 0x27e   :  { %8464 = vrot.lane.b32.xlu1 %v15596_v56, %s8838_s0  ;;  %v11905_v59 = vpop.xlane.xlu1 %1269  ;;  %v11907_v38 = vpop.xlane.xlu0 %1266 }
 0x27f   :  { %15597 = vst [vmem:[#allocation54_spill] sm:$0xff] %v11905_v59  ;;  %15598 = vst [vmem:[#allocation55_spill] sm:$0xff] %v11907_v38  ;;  %8469 = vrot.lane.b32.xlu0 %v15599_v14, %s8838_s0  ;;  %v15607_v38 = vld [vmem:[#allocation60_spill] sm:$0xff]  ;;  %v15608_v14 = vld [vmem:[#allocation61_spill] sm:$0xff] }
 0x282   :  { %8474 = vrot.lane.b32.xlu1 %v15600_v49, %s8838_s0  ;;  %v11913_v18 = vpop.xlane.xlu1 %1275  ;;  %v11915_v51 = vpop.xlane.xlu0 %1272 }
 0x283   :  { %15601 = vst [vmem:[#allocation56_spill] sm:$0xff] %v11913_v18  ;;  %15602 = vst [vmem:[#allocation57_spill] sm:$0xff] %v11915_v51  ;;  %8479 = vrot.lane.b32.xlu0 %v15603_v21, %s8838_s0  ;;  %v15611_v51 = vld [vmem:[#allocation62_spill] sm:$0xff]  ;;  %v15612_v21 = vld [vmem:[#allocation63_spill] sm:$0xff] }
 0x286   :  { %8484 = vrot.lane.b32.xlu1 %v15604_v63, %s8838_s0  ;;  %v11921_v56 = vpop.xlane.xlu1 %1281  ;;  %v11923_v59 = vpop.xlane.xlu0 %1278 }
 0x287   :  { %15605 = vst [vmem:[#allocation58_spill] sm:$0xff] %v11921_v56  ;;  %15606 = vst [vmem:[#allocation59_spill] sm:$0xff] %v11923_v59  ;;  %8489 = vrot.lane.b32.xlu0 %v15607_v38, %s8838_s0  ;;  %v15615_v59 = vld [vmem:[#allocation64_spill] sm:$0xff]  ;;  %v15616_v38 = vld [vmem:[#allocation65_spill] sm:$0xff] }
 0x28a   :  { %8494 = vrot.lane.b32.xlu1 %v15608_v14, %s8838_s0  ;;  %v11929_v49 = vpop.xlane.xlu1 %1287  ;;  %v11931_v18 = vpop.xlane.xlu0 %1284 }
 0x28b   :  { %15609 = vst [vmem:[#allocation60_spill] sm:$0xff] %v11929_v49  ;;  %15610 = vst [vmem:[#allocation61_spill] sm:$0xff] %v11931_v18  ;;  %8499 = vrot.lane.b32.xlu0 %v15611_v51, %s8838_s0  ;;  %v15617_v18 = vld [vmem:[#allocation66_spill] sm:$0xff]  ;;  %v15618_v51 = vld [vmem:[#allocation67_spill] sm:$0xff] }
 0x28e   :  { %8504 = vrot.lane.b32.xlu1 %v15612_v21, %s8838_s0  ;;  %v11937_v63 = vpop.xlane.xlu1 %1293  ;;  %v11939_v56 = vpop.xlane.xlu0 %1290 }
 0x28f   :  { %15613 = vst [vmem:[#allocation62_spill] sm:$0xff] %v11937_v63  ;;  %15614 = vst [vmem:[#allocation63_spill] sm:$0xff] %v11939_v56  ;;  %8509 = vrot.lane.b32.xlu0 %v15615_v59, %s8838_s0  ;;  %v15619_v56 = vld [vmem:[#allocation68_spill] sm:$0xff]  ;;  %v15620_v59 = vld [vmem:[#allocation69_spill] sm:$0xff] }
 0x292   :  { %8514 = vrot.lane.b32.xlu1 %v15616_v38, %s8838_s0  ;;  %v11945_v14 = vpop.permute.xlu1 %8204  ;;  %v11947_v49 = vpop.permute.xlu0 %8199 }
 0x293   :  { %8519 = vrot.lane.b32.xlu0 %v15617_v18, %s8838_s0  ;;  %v15622_v18 = vld [vmem:[#allocation76_spill] sm:$0xff] }
 0x296   :  { %8524 = vrot.lane.b32.xlu1 %v15618_v51, %s8838_s0  ;;  %v11953_v21 = vpop.permute.xlu1 %8209  ;;  %v11955_v63 = vpop.permute.xlu0 %8219 }
 0x297   :  { %8529 = vrot.lane.b32.xlu0 %v15619_v56, %s8838_s0  ;;  %v15624_v56 = vld [vmem:[#allocation79_spill] sm:$0xff] }
 0x29a   :  { %8534 = vrot.lane.b32.xlu1 %v15620_v59, %s8838_s0  ;;  %v11961_v38 = vpop.permute.xlu1 %8214  ;;  %v11963_v26 = vpop.permute.xlu0 %8229 }
 0x29b   :  { %8539 = vrot.lane.b32.xlu0 %v15621_v6, %s8838_s0  ;;  %v15626_v6 = vld [vmem:[#allocation81_spill] sm:$0xff] }
 0x29e   :  { %8544 = vrot.lane.b32.xlu1 %v15622_v18, %s8838_s0  ;;  %v11969_v51 = vpop.permute.xlu1 %8224  ;;  %v11971_v11 = vpop.permute.xlu0 %8239 }
 0x29f   :  { %8549 = vrot.lane.b32.xlu0 %v15623_v12, %s8838_s0  ;;  %v15628_v12 = vld [vmem:[#allocation85_spill] sm:$0xff] }
 0x2a2   :  { %8554 = vrot.lane.b32.xlu1 %v15624_v56, %s8838_s0  ;;  %v11977_v59 = vpop.permute.xlu1 %8234  ;;  %v11979_v61 = vpop.permute.xlu0 %8249 }
 0x2a3   :  { %8559 = vrot.lane.b32.xlu0 %v15625_v43, %s8838_s0  ;;  %v15630_v43 = vld [vmem:[#allocation87_spill] sm:$0xff] }
 0x2a6   :  { %8564 = vrot.lane.b32.xlu1 %v15626_v6, %s8838_s0  ;;  %v11985_v18 = vpop.permute.xlu1 %8244  ;;  %v11987_v48 = vpop.permute.xlu0 %8259 }
 0x2a7   :  { %8569 = vrot.lane.b32.xlu0 %v15627_v2, %s8838_s0  ;;  %v15632_v2 = vld [vmem:[#allocation89_spill] sm:$0xff] }
 0x2aa   :  { %8574 = vrot.lane.b32.xlu1 %v15628_v12, %s8838_s0  ;;  %v11993_v56 = vpop.permute.xlu1 %8254  ;;  %v11995_v47 = vpop.permute.xlu0 %8269 }
 0x2ab   :  { %8579 = vrot.lane.b32.xlu0 %v15629_v17, %s8838_s0  ;;  %v15634_v17 = vld [vmem:[#allocation91_spill] sm:$0xff] }
 0x2ae   :  { %8584 = vrot.lane.b32.xlu1 %v15630_v43, %s8838_s0  ;;  %v12001_v6 = vpop.permute.xlu1 %8264  ;;  %v12003_v40 = vpop.permute.xlu0 %8279 }
 0x2af   :  { %8589 = vrot.lane.b32.xlu0 %v15631_v5, %s8838_s0  ;;  %v15636_v5 = vld [vmem:[#allocation93_spill] sm:$0xff] }
 0x2b2   :  { %8594 = vrot.lane.b32.xlu1 %v15632_v2, %s8838_s0  ;;  %v12009_v12 = vpop.permute.xlu1 %8274  ;;  %v12011_v16 = vpop.permute.xlu0 %8289 }
 0x2b3   :  { %8599 = vrot.lane.b32.xlu0 %v15633_v19, %s8838_s0  ;;  %v15638_v19 = vld [vmem:[#allocation96_spill] sm:$0xff] }
 0x2b6   :  { %8604 = vrot.lane.b32.xlu1 %v15634_v17, %s8838_s0  ;;  %v12017_v43 = vpop.permute.xlu1 %8284  ;;  %v12019_v36 = vpop.permute.xlu0 %8299 }
 0x2b7   :  { %8609 = vrot.lane.b32.xlu0 %v15635_v10, %s8838_s0  ;;  %v15640_v10 = vld [vmem:[#allocation98_spill] sm:$0xff] }
 0x2ba   :  { %8614 = vrot.lane.b32.xlu1 %v15636_v5, %s8838_s0  ;;  %v12025_v2 = vpop.permute.xlu1 %8294  ;;  %v12027_v24 = vpop.permute.xlu0 %8309 }
 0x2bb   :  { %8619 = vrot.lane.b32.xlu0 %v15637_v39, %s8838_s0  ;;  %v15642_v39 = vld [vmem:[#allocation100_spill] sm:$0xff] }
 0x2be   :  { %8624 = vrot.lane.b32.xlu1 %v15638_v19, %s8838_s0  ;;  %v12033_v17 = vpop.permute.xlu1 %8304  ;;  %v12035_v57 = vpop.permute.xlu0 %8319 }
 0x2bf   :  { %8629 = vrot.lane.b32.xlu0 %v15639_v7, %s8838_s0  ;;  %v15645_v7 = vld [vmem:[#allocation102_spill] sm:$0xff] }
 0x2c2   :  { %8634 = vrot.lane.b32.xlu1 %v15640_v10, %s8838_s0  ;;  %v12041_v5 = vpop.permute.xlu1 %8314  ;;  %v12043_v9 = vpop.permute.xlu0 %8329 }
 0x2c3   :  { %8639 = vrot.lane.b32.xlu0 %v15641_v33, %s8838_s0  ;;  %v15648_v33 = vld [vmem:[#allocation105_spill] sm:$0xff] }
 0x2c6   :  { %8644 = vrot.lane.b32.xlu1 %v15642_v39, %s8838_s0  ;;  %v12049_v19 = vpop.permute.xlu1 %8324  ;;  %v12051_v54 = vpop.permute.xlu0 %8339 }
 0x2c7   :  { %15643 = vst [vmem:[#allocation64_spill] sm:$0xff] %v12051_v54  ;;  %8649 = vrot.lane.b32.xlu0 %v15644_v55, %s8838_s0  ;;  %v15652_v55 = vld [vmem:[#allocation107_spill] sm:$0xff] }
 0x2ca   :  { %8654 = vrot.lane.b32.xlu1 %v15645_v7, %s8838_s0  ;;  %v12057_v10 = vpop.permute.xlu1 %8334  ;;  %v12059_v46 = vpop.permute.xlu0 %8349 }
 0x2cb   :  { %15646 = vst [vmem:[#allocation65_spill] sm:$0xff] %v12059_v46  ;;  %8659 = vrot.lane.b32.xlu0 %v15647_v23, %s8838_s0  ;;  %v15656_v23 = vld [vmem:[#allocation109_spill] sm:$0xff] }
 0x2ce   :  { %8664 = vrot.lane.b32.xlu1 %v15648_v33, %s8838_s0  ;;  %v12065_v39 = vpop.permute.xlu1 %8344  ;;  %v12067_v30 = vpop.permute.xlu0 %8359 }
 0x2cf   :  { %15649 = vst [vmem:[#allocation66_spill] sm:$0xff] %v12065_v39  ;;  %15650 = vst [vmem:[#allocation67_spill] sm:$0xff] %v12067_v30  ;;  %8669 = vrot.lane.b32.xlu0 %v15651_v1, %s8838_s0  ;;  %v15660_v1 = vld [vmem:[#allocation111_spill] sm:$0xff]  ;;  %v8202_v39 = vunpack.i.h.bf16 %v11947_v49 }
 0x2d2   :  { %8674 = vrot.lane.b32.xlu1 %v15652_v55, %s8838_s0  ;;  %v12073_v7 = vpop.permute.xlu1 %8354  ;;  %v12075_v13 = vpop.permute.xlu0 %8369 }
 0x2d3   :  { %15653 = vst [vmem:[#allocation68_spill] sm:$0xff] %v12073_v7  ;;  %15654 = vst [vmem:[#allocation69_spill] sm:$0xff] %v12075_v13  ;;  %8679 = vrot.lane.b32.xlu0 %v15655_v32, %s8838_s0  ;;  %v15664_v32 = vld [vmem:[#allocation114_spill] sm:$0xff]  ;;  %v15691_v13 = vld [vmem:[#allocation128_spill] sm:$0xff] }
 0x2d6   :  { %8684 = vrot.lane.b32.xlu1 %v15656_v23, %s8838_s0  ;;  %v12081_v33 = vpop.permute.xlu1 %8364  ;;  %v12083_v42 = vpop.permute.xlu0 %8379 }
 0x2d7   :  { %15657 = vst [vmem:[#allocation73_spill] sm:$0xff] %v12081_v33  ;;  %15658 = vst [vmem:[#allocation76_spill] sm:$0xff] %v12083_v42  ;;  %8689 = vrot.lane.b32.xlu0 %v15659_v28, %s8838_s0  ;;  %v15668_v28 = vld [vmem:[#allocation116_spill] sm:$0xff]  ;;  %v15679_v42 = vld [vmem:[#allocation122_spill] sm:$0xff]  ;;  %v8201_v33 = vunpack.i.l.bf16 %v11947_v49  ;;  %v8217_v49 = vunpack.i.h.bf16 %v11961_v38 }
 0x2d9   :  { %v2319_v7 = vsel %vm526_vm0, %v8201_v33, 0.0  ;;  %v8211_v33 = vunpack.i.l.bf16 %v11953_v21 }
 0x2da   :  { %8694 = vrot.lane.b32.xlu1 %v15660_v1, %s8838_s0  ;;  %v12089_v55 = vpop.permute.xlu1 %8374  ;;  %v12091_v22 = vpop.permute.xlu0 %8389 }
 0x2db   :  { %15661 = vst [vmem:[#allocation78_spill] sm:$0xff] %v12089_v55  ;;  %15662 = vst [vmem:[#allocation79_spill] sm:$0xff] %v12091_v22  ;;  %8699 = vrot.lane.b32.xlu0 %v15663_v3, %s8838_s0  ;;  %v15672_v3 = vld [vmem:[#allocation118_spill] sm:$0xff] }
 0x2de   :  { %8704 = vrot.lane.b32.xlu1 %v15664_v32, %s8838_s0  ;;  %v12097_v23 = vpop.permute.xlu1 %8384  ;;  %v12099_v29 = vpop.permute.xlu0 %8399 }
 0x2df   :  { %15665 = vst [vmem:[#allocation80_spill] sm:$0xff] %v12097_v23  ;;  %15666 = vst [vmem:[#allocation81_spill] sm:$0xff] %v12099_v29  ;;  %8709 = vrot.lane.b32.xlu0 %v15667_v34, %s8838_s0  ;;  %v15675_v23 = vld [vmem:[#allocation119_spill] sm:$0xff]  ;;  %v15676_v34 = vld [vmem:[#allocation120_spill] sm:$0xff]  ;;  %v8206_v29 = vunpack.i.l.bf16 %v11945_v14 }
 0x2e2   :  { %8714 = vrot.lane.b32.xlu1 %v15668_v28, %s8838_s0  ;;  %v12105_v1 = vpop.permute.xlu1 %8394  ;;  %v12107_v15 = vpop.permute.xlu0 %8409 }
 0x2e3   :  { %15669 = vst [vmem:[#allocation84_spill] sm:$0xff] %v12105_v1  ;;  %15670 = vst [vmem:[#allocation85_spill] sm:$0xff] %v12107_v15  ;;  %8719 = vrot.lane.b32.xlu0 %v15671_v45, %s8838_s0  ;;  %v15680_v45 = vld [vmem:[#allocation123_spill] sm:$0xff] }
 0x2e6   :  { %8724 = vrot.lane.b32.xlu1 %v15672_v3, %s8838_s0  ;;  %v12113_v32 = vpop.permute.xlu1 %8404  ;;  %v12115_v22 = vpop.permute.xlu0 %8419 }
 0x2e7   :  { %15673 = vst [vmem:[#allocation86_spill] sm:$0xff] %v12113_v32  ;;  %15674 = vst [vmem:[#allocation87_spill] sm:$0xff] %v12115_v22  ;;  %8729 = vrot.lane.b32.xlu0 %v15675_v23, %s8838_s0  ;;  %v15683_v22 = vld [vmem:[#allocation124_spill] sm:$0xff]  ;;  %v15684_v23 = vld [vmem:[#allocation125_spill] sm:$0xff] }
 0x2ea   :  { %8734 = vrot.lane.b32.xlu1 %v15676_v34, %s8838_s0  ;;  %v12121_v28 = vpop.permute.xlu1 %8414  ;;  %v12123_v1 = vpop.permute.xlu0 %8429 }
 0x2eb   :  { %15677 = vst [vmem:[#allocation88_spill] sm:$0xff] %v12121_v28  ;;  %15678 = vst [vmem:[#allocation89_spill] sm:$0xff] %v12123_v1  ;;  %8739 = vrot.lane.b32.xlu0 %v15679_v42, %s8838_s0  ;;  %v15687_v1 = vld [vmem:[#allocation126_spill] sm:$0xff]  ;;  %v15688_v42 = vld [vmem:[#allocation127_spill] sm:$0xff] }
 0x2ee   :  { %8744 = vrot.lane.b32.xlu1 %v15680_v45, %s8838_s0  ;;  %v12129_v3 = vpop.permute.xlu1 %8424  ;;  %v12131_v55 = vpop.permute.xlu0 %8439 }
 0x2ef   :  { %15681 = vst [vmem:[#allocation90_spill] sm:$0xff] %v12129_v3  ;;  %15682 = vst [vmem:[#allocation91_spill] sm:$0xff] %v12131_v55  ;;  %8749 = vrot.lane.b32.xlu0 %v15683_v22, %s8838_s0  ;;  %v15692_v22 = vld [vmem:[#allocation129_spill] sm:$0xff] }
 0x2f0   :  { %v15707_v55 = vld [vmem:[#allocation137_spill] sm:$0xff] }
 0x2f2   :  { %8754 = vrot.lane.b32.xlu1 %v15684_v23, %s8838_s0  ;;  %v12137_v34 = vpop.permute.xlu1 %8434  ;;  %v12139_v28 = vpop.permute.xlu0 %8449 }
 0x2f3   :  { %15685 = vst [vmem:[#allocation92_spill] sm:$0xff] %v12137_v34  ;;  %15686 = vst [vmem:[#allocation93_spill] sm:$0xff] %v12139_v28  ;;  %8759 = vrot.lane.b32.xlu0 %v15687_v1, %s8838_s0  ;;  %v15695_v28 = vld [vmem:[#allocation131_spill] sm:$0xff]  ;;  %v15696_v1 = vld [vmem:[#allocation132_spill] sm:$0xff] }
 0x2f6   :  { %8764 = vrot.lane.b32.xlu1 %v15688_v42, %s8838_s0  ;;  %v12145_v45 = vpop.permute.xlu1 %8444  ;;  %v12147_v3 = vpop.permute.xlu0 %8459 }
 0x2f7   :  { %15689 = vst [vmem:[#allocation95_spill] sm:$0xff] %v12145_v45  ;;  %15690 = vst [vmem:[#allocation96_spill] sm:$0xff] %v12147_v3  ;;  %8769 = vrot.lane.b32.xlu0 %v15691_v13, %s8838_s0  ;;  %v15699_v3 = vld [vmem:[#allocation133_spill] sm:$0xff]  ;;  %v15700_v13 = vld [vmem:[#allocation134_spill] sm:$0xff] }
 0x2fa   :  { %8774 = vrot.lane.b32.xlu1 %v15692_v22, %s8838_s0  ;;  %v12153_v23 = vpop.permute.xlu1 %8454  ;;  %v12155_v34 = vpop.permute.xlu0 %8469 }
 0x2fb   :  { %15693 = vst [vmem:[#allocation97_spill] sm:$0xff] %v12153_v23  ;;  %15694 = vst [vmem:[#allocation98_spill] sm:$0xff] %v12155_v34  ;;  %8779 = vrot.lane.b32.xlu0 %v15695_v28, %s8838_s0  ;;  %v15703_v34 = vld [vmem:[#allocation135_spill] sm:$0xff]  ;;  %v15704_v28 = vld [vmem:[#allocation136_spill] sm:$0xff] }
 0x2fe   :  { %8784 = vrot.lane.b32.xlu1 %v15696_v1, %s8838_s0  ;;  %v12161_v42 = vpop.permute.xlu1 %8464  ;;  %v12163_v45 = vpop.permute.xlu0 %8479 }
 0x2ff   :  { %15697 = vst [vmem:[#allocation99_spill] sm:$0xff] %v12161_v42  ;;  %15698 = vst [vmem:[#allocation100_spill] sm:$0xff] %v12163_v45  ;;  %8789 = vrot.lane.b32.xlu0 %v15699_v3, %s8838_s0  ;;  %v15708_v3 = vld [vmem:[#allocation138_spill] sm:$0xff] }
 0x302   :  { %8794 = vrot.lane.b32.xlu1 %v15700_v13, %s8838_s0  ;;  %v12169_v22 = vpop.permute.xlu1 %8474  ;;  %v12171_v23 = vpop.permute.xlu0 %8489 }
 0x303   :  { %15701 = vst [vmem:[#allocation101_spill] sm:$0xff] %v12169_v22  ;;  %15702 = vst [vmem:[#allocation102_spill] sm:$0xff] %v12171_v23  ;;  %8799 = vrot.lane.b32.xlu0 %v15703_v34, %s8838_s0  ;;  %v15711_v23 = vld [vmem:[#allocation140_spill] sm:$0xff]  ;;  %v15712_v34 = vld [vmem:[#allocation141_spill] sm:$0xff] }
 0x306   :  { %8804 = vrot.lane.b32.xlu1 %v15704_v28, %s8838_s0  ;;  %v12177_v1 = vpop.permute.xlu1 %8484  ;;  %v12179_v42 = vpop.permute.xlu0 %8499 }
 0x307   :  { %15705 = vst [vmem:[#allocation104_spill] sm:$0xff] %v12177_v1  ;;  %15706 = vst [vmem:[#allocation105_spill] sm:$0xff] %v12179_v42  ;;  %8809 = vrot.lane.b32.xlu0 %v15707_v55, %s8838_s0  ;;  %v15714_v42 = vld [vmem:[#allocation142_spill] sm:$0xff] }
 0x30a   :  { %8814 = vrot.lane.b32.xlu1 %v15708_v3, %s8838_s0  ;;  %v12185_v13 = vpop.permute.xlu1 %8494  ;;  %v12187_v22 = vpop.permute.xlu0 %8509 }
 0x30b   :  { %15709 = vst [vmem:[#allocation106_spill] sm:$0xff] %v12185_v13  ;;  %15710 = vst [vmem:[#allocation107_spill] sm:$0xff] %v12187_v22  ;;  %8819 = vrot.lane.b32.xlu0 %v15711_v23, %s8838_s0 }
 0x30e   :  { %8824 = vrot.lane.b32.xlu1 %v15712_v34, %s8838_s0  ;;  %v12193_v28 = vpop.permute.xlu1 %8504  ;;  %v12195_v1 = vpop.permute.xlu0 %8519 }
 0x30f   :  { %15713 = vst [vmem:[#allocation108_spill] sm:$0xff] %v12193_v28  ;;  %8829 = vrot.lane.b32.xlu0 %v15714_v42, %s8838_s0 }
 0x312   :  { %8834 = vrot.lane.b32.xlu1 %v11342_v31, %s8838_s0  ;;  %v12201_v55 = vpop.permute.xlu1 %8514  ;;  %v12203_v3 = vpop.permute.xlu0 %8529 }
 0x313   :  { %15715 = vst [vmem:[#allocation109_spill] sm:$0xff] %v12201_v55 }
 0x316   :  { %v12205_v22 = vpop.permute.xlu1 %8524  ;;  %v12207_v23 = vpop.permute.xlu0 %8539 }
 0x31a   :  { %v12209_v13 = vpop.permute.xlu1 %8534  ;;  %v12211_v34 = vpop.permute.xlu0 %8549 }
 0x31b   :  { %15716 = vst [vmem:[#allocation110_spill] sm:$0xff] %v12211_v34 }
 0x31e   :  { %v12213_v28 = vpop.permute.xlu1 %8544  ;;  %v12215_v15 = vpop.permute.xlu0 %8559 }
 0x31f   :  { %15717 = vst [vmem:[#allocation111_spill] sm:$0xff] %v12213_v28  ;;  %v2325_v28 = vsel %vm526_vm0, %v8206_v29, 0.0  ;;  %v8216_v29 = vunpack.i.l.bf16 %v11961_v38 }
 0x322   :  { %v12217_v42 = vpop.permute.xlu1 %8554  ;;  %v12219_v45 = vpop.permute.xlu0 %8569 }
 0x323   :  { %15718 = vst [vmem:[#allocation113_spill] sm:$0xff] %v12217_v42  ;;  %v8207_v42 = vunpack.i.h.bf16 %v11945_v14 }
 0x325   :  { %v2328_v44 = vsel %vm526_vm0, %v8207_v42, 0.0  ;;  %v8221_v42 = vunpack.i.l.bf16 %v11955_v63 }
 0x326   :  { %v12221_v31 = vpop.permute.xlu1 %8564  ;;  %v12223_v55 = vpop.permute.xlu0 %8579 }
 0x32a   :  { %v12226_v32 = vpop.permute.xlu1 %8574  ;;  %v12228_v30 = vpop.permute.xlu0 %8589 }
 0x32b   :  { %15719 = vst [vmem:[#allocation114_spill] sm:$0xff] %v12228_v30  ;;  %v8212_v30 = vunpack.i.h.bf16 %v11953_v21 }
 0x32e   :  { %v12232_v46 = vpop.permute.xlu1 %8584  ;;  %v12234_v34 = vpop.permute.xlu0 %8599  ;;  %2320 = vadd.xlane.f32.xlu0 %v2319_v7 }
 0x32f   :  { %15720 = vst [vmem:[#allocation115_spill] sm:$0xff] %v12232_v46  ;;  %v2322_v46 = vsel %vm526_vm0, %v8202_v39, 0.0  ;;  %v8222_v39 = vunpack.i.h.bf16 %v11955_v63  ;;  %v8232_v63 = vunpack.i.h.bf16 %v11963_v26 }
 0x332   :  { %v12239_v54 = vpop.permute.xlu1 %8594  ;;  %2326 = vadd.xlane.f32.xlu0 %v2325_v28  ;;  %v12241_v60 = vpop.permute.xlu0 %8609  ;;  %v2334_v28 = vsel %vm526_vm0, %v8212_v30, 0.0  ;;  %v8227_v30 = vunpack.i.h.bf16 %v11969_v51 }
 0x333   :  { %15721 = vst [vmem:[#allocation116_spill] sm:$0xff] %v12239_v54  ;;  %v2331_v54 = vsel %vm526_vm0, %v8211_v33, 0.0  ;;  %v8226_v33 = vunpack.i.l.bf16 %v11969_v51 }
 0x336   :  { %v12247_v7 = vpop.permute.xlu1 %8604  ;;  %2323 = vadd.xlane.f32.xlu1 %v2322_v46  ;;  %2329 = vadd.xlane.f32.xlu0 %v2328_v44  ;;  %v12251_v14 = vpop.permute.xlu0 %8619  ;;  %v2340_v44 = vsel %vm526_vm0, %v8217_v49, 0.0  ;;  %v2337_v46 = vsel %vm526_vm0, %v8216_v29, 0.0  ;;  %v8231_v49 = vunpack.i.l.bf16 %v11963_v26 }
 0x337   :  { %15722 = vst [vmem:[#allocation117_spill] sm:$0xff] %v12251_v14  ;;  %v2343_v14 = vsel %vm526_vm0, %v8221_v42, 0.0  ;;  %v8236_v42 = vunpack.i.l.bf16 %v11977_v59 }
 0x33a   :  { %2335 = vadd.xlane.f32.xlu1 %v2334_v28  ;;  %2332 = vadd.xlane.f32.xlu0 %v2331_v54  ;;  %v12255_v21 = vpop.permute.xlu1 %8614  ;;  %v12261_v38 = vpop.permute.xlu0 %8629  ;;  %v2346_v54 = vsel %vm526_vm0, %v8222_v39, 0.0  ;;  %v8237_v39 = vunpack.i.h.bf16 %v11977_v59  ;;  %v8247_v59 = vunpack.i.h.bf16 %v11985_v18 }
 0x33b   :  { %15723 = vst [vmem:[#allocation118_spill] sm:$0xff] %v12261_v38 }
 0x33e   :  { %2341 = vadd.xlane.f32.xlu1 %v2340_v44  ;;  %2338 = vadd.xlane.f32.xlu0 %v2337_v46  ;;  %v12265_v28 = vpop.permute.xlu1 %8624  ;;  %v12271_v29 = vpop.permute.xlu0 %8639  ;;  %v2352_v44 = vsel %vm526_vm0, %v8227_v30, 0.0  ;;  %v2349_v46 = vsel %vm526_vm0, %v8226_v33, 0.0  ;;  %v8242_v30 = vunpack.i.h.bf16 %v11971_v11  ;;  %v8241_v33 = vunpack.i.l.bf16 %v11971_v11 }
 0x342   :  { %2347 = vadd.xlane.f32.xlu1 %v2346_v54  ;;  %2344 = vadd.xlane.f32.xlu0 %v2343_v14  ;;  %v12275_v51 = vpop.permute.xlu1 %8634  ;;  %v2358_v14 = vsel %vm526_vm0, %v8232_v63, 0.0  ;;  %v2355_v54 = vsel %vm526_vm0, %v8231_v49, 0.0  ;;  %v12281_v26 = vpop.permute.xlu0 %8649  ;;  %v8246_v63 = vunpack.i.l.bf16 %v11985_v18 }
 0x343   :  { %15724 = vst [vmem:[#allocation119_spill] sm:$0xff] %v12275_v51  ;;  %v2361_v51 = vsel %vm526_vm0, %v8236_v42, 0.0  ;;  %v8251_v42 = vunpack.i.l.bf16 %v11979_v61 }
 0x345   :  { %v2379_v38 = vsel %vm526_vm0, %v8251_v42, 0.0  ;;  %v8266_v42 = vunpack.i.l.bf16 %v12001_v6 }
 0x346   :  { %2353 = vadd.xlane.f32.xlu1 %v2352_v44  ;;  %2350 = vadd.xlane.f32.xlu0 %v2349_v46  ;;  %v12285_v44 = vpop.permute.xlu1 %8644  ;;  %v2364_v46 = vsel %vm526_vm0, %v8237_v39, 0.0  ;;  %v12291_v49 = vpop.permute.xlu0 %8659  ;;  %v8252_v39 = vunpack.i.h.bf16 %v11979_v61  ;;  %v8262_v61 = vunpack.i.h.bf16 %v11987_v48 }
 0x34a   :  { %2359 = vadd.xlane.f32.xlu1 %v2358_v14  ;;  %2356 = vadd.xlane.f32.xlu0 %v2355_v54  ;;  %v2370_v14 = vsel %vm526_vm0, %v8242_v30, 0.0  ;;  %v2367_v54 = vsel %vm526_vm0, %v8241_v33, 0.0  ;;  %v12295_v11 = vpop.permute.xlu1 %8654  ;;  %v12301_v18 = vpop.permute.xlu0 %8669  ;;  %v8257_v30 = vunpack.i.h.bf16 %v11993_v56  ;;  %v8256_v33 = vunpack.i.l.bf16 %v11993_v56 }
 0x34e   :  { %2365 = vadd.xlane.f32.xlu1 %v2364_v46  ;;  %2362 = vadd.xlane.f32.xlu0 %v2361_v51  ;;  %v2376_v51 = vsel %vm526_vm0, %v8247_v59, 0.0  ;;  %v2373_v46 = vsel %vm526_vm0, %v8246_v63, 0.0  ;;  %v8261_v59 = vunpack.i.l.bf16 %v11987_v48  ;;  %v12311_v63 = vpop.permute.xlu0 %8679 }
 0x34f   :  { %15725 = vst [vmem:[#allocation120_spill] sm:$0xff] %v12311_v63  ;;  %v2397_v63 = vsel %vm526_vm0, %v8266_v42, 0.0  ;;  %v8281_v42 = vunpack.i.l.bf16 %v12003_v40 }
 0x352   :  { %2371 = vadd.xlane.f32.xlu1 %v2370_v14  ;;  %2368 = vadd.xlane.f32.xlu0 %v2367_v54  ;;  %v12305_v14 = vpop.permute.xlu1 %8664  ;;  %v2382_v54 = vsel %vm526_vm0, %v8252_v39, 0.0  ;;  %v8267_v39 = vunpack.i.h.bf16 %v12001_v6  ;;  %v12321_v48 = vpop.permute.xlu0 %8689  ;;  %v8277_v6 = vunpack.i.h.bf16 %v12009_v12 }
 0x356   :  { %2377 = vadd.xlane.f32.xlu1 %v2376_v51  ;;  %2374 = vadd.xlane.f32.xlu0 %v2373_v46  ;;  %v2388_v51 = vsel %vm526_vm0, %v8257_v30, 0.0  ;;  %v2385_v46 = vsel %vm526_vm0, %v8256_v33, 0.0  ;;  %v12315_v56 = vpop.permute.xlu1 %8674  ;;  %v8272_v30 = vunpack.i.h.bf16 %v11995_v47  ;;  %v8271_v33 = vunpack.i.l.bf16 %v11995_v47 }
 0x35a   :  { %2383 = vadd.xlane.f32.xlu1 %v2382_v54  ;;  %2380 = vadd.xlane.f32.xlu0 %v2379_v38  ;;  %v2394_v38 = vsel %vm526_vm0, %v8262_v61, 0.0  ;;  %v2391_v54 = vsel %vm526_vm0, %v8261_v59, 0.0  ;;  %v8276_v61 = vunpack.i.l.bf16 %v12009_v12  ;;  %v12331_v59 = vpop.permute.xlu0 %8699 }
 0x35b   :  { %15726 = vst [vmem:[#allocation122_spill] sm:$0xff] %v12331_v59  ;;  %v2415_v59 = vsel %vm526_vm0, %v8281_v42, 0.0  ;;  %v8296_v42 = vunpack.i.l.bf16 %v12025_v2 }
 0x35e   :  { %2389 = vadd.xlane.f32.xlu1 %v2388_v51  ;;  %2386 = vadd.xlane.f32.xlu0 %v2385_v46  ;;  %v12325_v51 = vpop.permute.xlu1 %8684  ;;  %v2400_v46 = vsel %vm526_vm0, %v8267_v39, 0.0  ;;  %v8282_v39 = vunpack.i.h.bf16 %v12003_v40  ;;  %v12341_v12 = vpop.permute.xlu0 %8709  ;;  %v8292_v40 = vunpack.i.h.bf16 %v12011_v16 }
 0x35f   :  { %15727 = vst [vmem:[#allocation123_spill] sm:$0xff] %v12341_v12 }
 0x362   :  { %2395 = vadd.xlane.f32.xlu1 %v2394_v38  ;;  %2392 = vadd.xlane.f32.xlu0 %v2391_v54  ;;  %v2406_v38 = vsel %vm526_vm0, %v8272_v30, 0.0  ;;  %v2403_v54 = vsel %vm526_vm0, %v8271_v33, 0.0  ;;  %v12335_v47 = vpop.permute.xlu1 %8694  ;;  %v8287_v30 = vunpack.i.h.bf16 %v12017_v43  ;;  %v8286_v33 = vunpack.i.l.bf16 %v12017_v43 }
 0x366   :  { %2401 = vadd.xlane.f32.xlu1 %v2400_v46  ;;  %2398 = vadd.xlane.f32.xlu0 %v2397_v63  ;;  %v2412_v63 = vsel %vm526_vm0, %v8277_v6, 0.0  ;;  %v2409_v46 = vsel %vm526_vm0, %v8276_v61, 0.0  ;;  %v8291_v6 = vunpack.i.l.bf16 %v12011_v16  ;;  %v12351_v61 = vpop.permute.xlu0 %8719 }
 0x36a   :  { %2407 = vadd.xlane.f32.xlu1 %v2406_v38  ;;  %2404 = vadd.xlane.f32.xlu0 %v2403_v54  ;;  %v12345_v38 = vpop.permute.xlu1 %8704  ;;  %v2418_v54 = vsel %vm526_vm0, %v8282_v39, 0.0  ;;  %v8297_v39 = vunpack.i.h.bf16 %v12025_v2  ;;  %v12361_v16 = vpop.permute.xlu0 %8729  ;;  %v8307_v2 = vunpack.i.h.bf16 %v12033_v17 }
 0x36b   :  { %15728 = vst [vmem:[#allocation124_spill] sm:$0xff] %v12345_v38 }
 0x36e   :  { %2413 = vadd.xlane.f32.xlu1 %v2412_v63  ;;  %2410 = vadd.xlane.f32.xlu0 %v2409_v46  ;;  %v2424_v63 = vsel %vm526_vm0, %v8287_v30, 0.0  ;;  %v2421_v46 = vsel %vm526_vm0, %v8286_v33, 0.0  ;;  %v12355_v43 = vpop.permute.xlu1 %8714  ;;  %v8302_v30 = vunpack.i.h.bf16 %v12019_v36  ;;  %v8301_v33 = vunpack.i.l.bf16 %v12019_v36 }
 0x36f   :  { %15729 = vst [vmem:[#allocation125_spill] sm:$0xff] %v12355_v43  ;;  %v2433_v43 = vsel %vm526_vm0, %v8296_v42, 0.0  ;;  %v8311_v42 = vunpack.i.l.bf16 %v12027_v24 }
 0x371   :  { %v2451_v12 = vsel %vm526_vm0, %v8311_v42, 0.0  ;;  %v8326_v42 = vunpack.i.l.bf16 %v12049_v19 }
 0x372   :  { %2419 = vadd.xlane.f32.xlu1 %v2418_v54  ;;  %2416 = vadd.xlane.f32.xlu0 %v2415_v59  ;;  %v2430_v59 = vsel %vm526_vm0, %v8292_v40, 0.0  ;;  %v2427_v54 = vsel %vm526_vm0, %v8291_v6, 0.0  ;;  %v8306_v40 = vunpack.i.l.bf16 %v12033_v17  ;;  %v12371_v6 = vpop.permute.xlu0 %8739 }
 0x376   :  { %2425 = vadd.xlane.f32.xlu1 %v2424_v63  ;;  %2422 = vadd.xlane.f32.xlu0 %v2421_v46  ;;  %v12365_v63 = vpop.permute.xlu1 %8724  ;;  %v2436_v46 = vsel %vm526_vm0, %v8297_v39, 0.0  ;;  %v8312_v39 = vunpack.i.h.bf16 %v12027_v24  ;;  %v12381_v17 = vpop.permute.xlu0 %8749  ;;  %v8322_v24 = vunpack.i.h.bf16 %v12035_v57 }
 0x377   :  { %15730 = vst [vmem:[#allocation126_spill] sm:$0xff] %v12381_v17 }
 0x37a   :  { %2431 = vadd.xlane.f32.xlu1 %v2430_v59  ;;  %2428 = vadd.xlane.f32.xlu0 %v2427_v54  ;;  %v2442_v59 = vsel %vm526_vm0, %v8302_v30, 0.0  ;;  %v2439_v54 = vsel %vm526_vm0, %v8301_v33, 0.0  ;;  %v12375_v36 = vpop.permute.xlu1 %8734  ;;  %v8317_v30 = vunpack.i.h.bf16 %v12041_v5  ;;  %v8316_v33 = vunpack.i.l.bf16 %v12041_v5 }
 0x37e   :  { %2437 = vadd.xlane.f32.xlu1 %v2436_v46  ;;  %2434 = vadd.xlane.f32.xlu0 %v2433_v43  ;;  %v2448_v43 = vsel %vm526_vm0, %v8307_v2, 0.0  ;;  %v2445_v46 = vsel %vm526_vm0, %v8306_v40, 0.0  ;;  %v8321_v2 = vunpack.i.l.bf16 %v12035_v57  ;;  %v12391_v40 = vpop.permute.xlu0 %8759 }
 0x382   :  { %2443 = vadd.xlane.f32.xlu1 %v2442_v59  ;;  %2440 = vadd.xlane.f32.xlu0 %v2439_v54  ;;  %v12385_v59 = vpop.permute.xlu1 %8744  ;;  %v2454_v54 = vsel %vm526_vm0, %v8312_v39, 0.0  ;;  %v8327_v39 = vunpack.i.h.bf16 %v12049_v19  ;;  %v12401_v57 = vpop.permute.xlu0 %8769  ;;  %v8521_v19 = vunpack.i.l.bf16 %v12195_v1 }
 0x386   :  { %2449 = vadd.xlane.f32.xlu1 %v2448_v43  ;;  %2446 = vadd.xlane.f32.xlu0 %v2445_v46  ;;  %v2460_v43 = vsel %vm526_vm0, %v8317_v30, 0.0  ;;  %v2457_v46 = vsel %vm526_vm0, %v8316_v33, 0.0  ;;  %v12395_v5 = vpop.permute.xlu1 %8754  ;;  %v8331_v30 = vunpack.i.l.bf16 %v12043_v9  ;;  %v8561_v33 = vunpack.i.l.bf16 %v12215_v15 }
 0x387   :  { %15731 = vst [vmem:[#allocation127_spill] sm:$0xff] %v12395_v5  ;;  %v2469_v5 = vsel %vm526_vm0, %v8326_v42, 0.0  ;;  %v8566_v42 = vunpack.i.l.bf16 %v12221_v31 }
 0x38a   :  { %2455 = vadd.xlane.f32.xlu1 %v2454_v54  ;;  %2452 = vadd.xlane.f32.xlu0 %v2451_v12  ;;  %v2466_v12 = vsel %vm526_vm0, %v8322_v24, 0.0  ;;  %v2463_v54 = vsel %vm526_vm0, %v8321_v2, 0.0  ;;  %v8562_v24 = vunpack.i.h.bf16 %v12215_v15  ;;  %v12411_v2 = vpop.permute.xlu0 %8779 }
 0x38b   :  { %15732 = vst [vmem:[#allocation128_spill] sm:$0xff] %v12411_v2 }
 0x38e   :  { %2461 = vadd.xlane.f32.xlu1 %v2460_v43  ;;  %2458 = vadd.xlane.f32.xlu0 %v2457_v46  ;;  %v12405_v43 = vpop.permute.xlu1 %8764  ;;  %v2472_v46 = vsel %vm526_vm0, %v8327_v39, 0.0  ;;  %v8522_v39 = vunpack.i.h.bf16 %v12195_v1  ;;  %v12421_v15 = vpop.permute.xlu0 %8789 }
 0x38f   :  { %15733 = vst [vmem:[#allocation129_spill] sm:$0xff] %v12421_v15 }
 0x390   :  { %v2706_v1 = vsel %vm526_vm0, %v8522_v39, 0.0  ;;  %v8571_v39 = vunpack.i.l.bf16 %v12219_v45 }
 0x392   :  { %2467 = vadd.xlane.f32.xlu1 %v2466_v12  ;;  %2464 = vadd.xlane.f32.xlu0 %v2463_v54  ;;  %v2751_v12 = vsel %vm526_vm0, %v8561_v33, 0.0  ;;  %v2475_v54 = vsel %vm526_vm0, %v8331_v30, 0.0  ;;  %v12415_v17 = vpop.permute.xlu1 %8774  ;;  %v8526_v33 = vunpack.i.l.bf16 %v12205_v22  ;;  %v8567_v30 = vunpack.i.h.bf16 %v12221_v31 }
 0x394   :  { %v2709_v15 = vsel %vm526_vm0, %v8526_v33, 0.0  ;;  %v8601_v33 = vunpack.i.l.bf16 %v12234_v34 }
 0x396   :  { %2473 = vadd.xlane.f32.xlu1 %v2472_v46  ;;  %2470 = vadd.xlane.f32.xlu0 %v2469_v5  ;;  %v2703_v5 = vsel %vm526_vm0, %v8521_v19, 0.0  ;;  %v2754_v46 = vsel %vm526_vm0, %v8562_v24, 0.0  ;;  %v8642_v19 = vunpack.i.h.bf16 %v12271_v29  ;;  %v8641_v24 = vunpack.i.l.bf16 %v12271_v29 }
 0x39a   :  { %2752 = vadd.xlane.f32.xlu1 %v2751_v12  ;;  %2476 = vadd.xlane.f32.xlu0 %v2475_v54  ;;  %v12425_v12 = vpop.permute.xlu1 %8784  ;;  %v2757_v54 = vsel %vm526_vm0, %v8566_v42, 0.0  ;;  %v8527_v42 = vunpack.i.h.bf16 %v12205_v22 }
 0x39b   :  { %15734 = vst [vmem:[#allocation131_spill] sm:$0xff] %v12425_v12 }
 0x39c   :  { %v2712_v22 = vsel %vm526_vm0, %v8527_v42, 0.0  ;;  %v8606_v42 = vunpack.i.l.bf16 %v12247_v7 }
 0x39e   :  { %2704 = vadd.xlane.f32.xlu1 %v2703_v5  ;;  %2755 = vadd.xlane.f32.xlu0 %v2754_v46  ;;  %v12431_v5 = vpop.permute.xlu0 %8799  ;;  %v2760_v46 = vsel %vm526_vm0, %v8567_v30, 0.0  ;;  %v12435_v31 = vpop.permute.xlu1 %8794  ;;  %v8602_v30 = vunpack.i.h.bf16 %v12234_v34 }
 0x39f   :  { %15735 = vst [vmem:[#allocation132_spill] sm:$0xff] %v12435_v31  ;;  %v2799_v31 = vsel %vm526_vm0, %v8601_v33, 0.0  ;;  %v8647_v33 = vunpack.i.h.bf16 %v12285_v44 }
 0x3a2   :  { %2758 = vadd.xlane.f32.xlu1 %v2757_v54  ;;  %2707 = vadd.xlane.f32.xlu0 %v2706_v1  ;;  %v2850_v54 = vsel %vm526_vm0, %v8642_v19, 0.0  ;;  %v2847_v1 = vsel %vm526_vm0, %v8641_v24, 0.0  ;;  %v12441_v29 = vpop.permute.xlu0 %8809  ;;  %v8531_v19 = vunpack.i.l.bf16 %v12203_v3  ;;  %v8646_v24 = vunpack.i.l.bf16 %v12285_v44 }
 0x3a6   :  { %2761 = vadd.xlane.f32.xlu1 %v2760_v46  ;;  %2710 = vadd.xlane.f32.xlu0 %v2709_v15  ;;  %v12445_v46 = vpop.permute.xlu1 %8804  ;;  %v2763_v15 = vsel %vm526_vm0, %v8571_v39, 0.0  ;;  %v8572_v39 = vunpack.i.h.bf16 %v12219_v45 }
 0x3a8   :  { %v2766_v45 = vsel %vm526_vm0, %v8572_v39, 0.0  ;;  %v8651_v39 = vunpack.i.l.bf16 %v12281_v26 }
 0x3aa   :  { %2851 = vadd.xlane.f32.xlu1 %v2850_v54  ;;  %2848 = vadd.xlane.f32.xlu0 %v2847_v1  ;;  %v12451_v54 = vpop.permute.xlu0 %8819  ;;  %v2802_v1 = vsel %vm526_vm0, %v8602_v30, 0.0  ;;  %v12455_v34 = vpop.permute.xlu1 %8814  ;;  %v8532_v30 = vunpack.i.h.bf16 %v12203_v3 }
 0x3ab   :  { %15736 = vst [vmem:[#allocation133_spill] sm:$0xff] %v12451_v54 }
 0x3ae   :  { %2764 = vadd.xlane.f32.xlu1 %v2763_v15  ;;  %2713 = vadd.xlane.f32.xlu0 %v2712_v22  ;;  %v2715_v15 = vsel %vm526_vm0, %v8531_v19, 0.0  ;;  %v2853_v22 = vsel %vm526_vm0, %v8646_v24, 0.0  ;;  %v12461_v12 = vpop.permute.xlu0 %8829  ;;  %v8576_v19 = vunpack.i.l.bf16 %v12226_v32  ;;  %v8607_v24 = vunpack.i.h.bf16 %v12247_v7 }
 0x3af   :  { %15737 = vst [vmem:[#allocation134_spill] sm:$0xff] %v12461_v12 }
 0x3b2   :  { %2803 = vadd.xlane.f32.xlu1 %v2802_v1  ;;  %2800 = vadd.xlane.f32.xlu0 %v2799_v31  ;;  %v12465_v1 = vpop.permute.xlu1 %8824  ;;  %v2805_v31 = vsel %vm526_vm0, %v8606_v42, 0.0  ;;  %v8332_v42 = vunpack.i.h.bf16 %v12043_v9  ;;  %v8577_v9 = vunpack.i.h.bf16 %v12226_v32 }
 0x3b3   :  { %15738 = vst [vmem:[#allocation135_spill] sm:$0xff] %v12465_v1 }
 0x3b6   :  { %2716 = vadd.xlane.f32.xlu1 %v2715_v15  ;;  %2854 = vadd.xlane.f32.xlu0 %v2853_v22  ;;  %v2718_v15 = vsel %vm526_vm0, %v8532_v30, 0.0  ;;  %v2856_v22 = vsel %vm526_vm0, %v8647_v33, 0.0  ;;  %v12473_v3 = vpop.permute.xlu1 %8834 }
 0x3b7   :  { %15739 = vst [vmem:[#allocation136_spill] sm:$0xff] %v12473_v3 }
 0x3ba   :  { %2806 = vadd.xlane.f32.xlu1 %v2805_v31  ;;  %2767 = vadd.xlane.f32.xlu0 %v2766_v45  ;;  %v2808_v31 = vsel %vm526_vm0, %v8607_v24, 0.0  ;;  %v2769_v45 = vsel %vm526_vm0, %v8576_v19, 0.0  ;;  %v2859_v24 = vsel %vm526_vm0, %v8651_v39, 0.0  ;;  %v8652_v39 = vunpack.i.h.bf16 %v12281_v26 }
 0x3bb   :  { %v2321_v2 = vpop.xlane.xlu0 %2320  ;;  %v8537_v26 = vunpack.i.h.bf16 %v12209_v13 }
 0x3bc   :  { %v3604_v30 = vrot.slane %v2321_v2, %v9913_v27 }
 0x3be   :  { %2719 = vadd.xlane.f32.xlu1 %v2718_v15  ;;  %2857 = vadd.xlane.f32.xlu0 %v2856_v22  ;;  %v2478_v15 = vsel %vm526_vm0, %v8332_v42, 0.0  ;;  %v8536_v22 = vunpack.i.l.bf16 %v12209_v13  ;;  %v8612_v13 = vunpack.i.h.bf16 %v12241_v60 }
 0x3bf   :  { %v2327_v44 = vpop.xlane.xlu0 %2326 }
 0x3c0   :  { %v3616_v3 = vrot.slane %v2327_v44, %v9921_v62  ;;  %v8611_v44 = vunpack.i.l.bf16 %v12241_v60  ;;  %v8656_v60 = vunpack.i.l.bf16 %v12295_v11 }
 0x3c2   :  { %2809 = vadd.xlane.f32.xlu1 %v2808_v31  ;;  %2770 = vadd.xlane.f32.xlu0 %v2769_v45 }
 0x3c3   :  { %v2324_v7 = vpop.xlane.xlu1 %2323  ;;  %v2330_v12 = vpop.xlane.xlu0 %2329 }
 0x3c4   :  { %v3609_v33 = vrot.slane %v2324_v7, %v9916_v0  ;;  %v3623_v31 = vrot.slane %v2330_v12, %v9928_v4  ;;  %v2721_v12 = vsel %vm526_vm0, %v8536_v22, 0.0  ;;  %v2811_v22 = vsel %vm526_vm0, %v8611_v44, 0.0 }
 0x3c6   :  { %v3611_v19 = vsel %vm3610_vm1, %v3609_v33, %v3604_v30  ;;  %2479 = vadd.xlane.f32.xlu1 %v2478_v15  ;;  %2860 = vadd.xlane.f32.xlu0 %v2859_v24  ;;  %v2772_v30 = vsel %vm526_vm0, %v8577_v9, 0.0  ;;  %v2862_v9 = vsel %vm526_vm0, %v8652_v39, 0.0  ;;  %v2724_v39 = vsel %vm526_vm0, %v8537_v26, 0.0 }
 0x3c7   :  { %v3618_v2 = vsel %vm3617_vm2, %v3616_v3, %v3611_v19  ;;  %v2336_v45 = vpop.xlane.xlu1 %2335  ;;  %v2333_v7 = vpop.xlane.xlu0 %2332  ;;  %v2814_v26 = vsel %vm526_vm0, %v8612_v13, 0.0 }
 0x3c8   :  { %v3625_v42 = vsel %vm3624_vm3, %v3623_v31, %v3618_v2  ;;  %v3637_v1 = vrot.slane %v2336_v45, %v9945_v35  ;;  %v3630_v32 = vrot.slane %v2333_v7, %v9948_v25  ;;  %v8336_v2 = vunpack.i.l.bf16 %v12057_v10 }
 0x3ca   :  { %v3632_v33 = vsel %vm3631_vm4, %v3630_v32, %v3625_v42  ;;  %2773 = vadd.xlane.f32.xlu1 %v2772_v30  ;;  %2722 = vadd.xlane.f32.xlu0 %v2721_v12  ;;  %v8581_v12 = vunpack.i.l.bf16 %v12223_v55  ;;  %v2481_v44 = vsel %vm526_vm0, %v8336_v2, 0.0 }
 0x3cb   :  { %v2342_v3 = vpop.xlane.xlu1 %2341  ;;  %v3639_v15 = vsel %vm3638_vm5, %v3637_v1, %v3632_v33  ;;  %v2339_v24 = vpop.xlane.xlu0 %2338 }
 0x3cc   :  { %v3651_v19 = vrot.slane %v2342_v3, %v9963_v37  ;;  %v3644_v31 = vrot.slane %v2339_v24, %v9981_v58  ;;  %v2775_v2 = vsel %vm526_vm0, %v8581_v12, 0.0  ;;  %v2865_v12 = vsel %vm526_vm0, %v8656_v60, 0.0 }
 0x3ce   :  { %v3646_v45 = vsel %vm3645_vm6, %v3644_v31, %v3639_v15  ;;  %2863 = vadd.xlane.f32.xlu1 %v2862_v9  ;;  %2812 = vadd.xlane.f32.xlu0 %v2811_v22  ;;  %v8337_v9 = vunpack.i.h.bf16 %v12057_v10  ;;  %v8541_v10 = vunpack.i.l.bf16 %v12207_v23 }
 0x3cf   :  { %v2348_v7 = vpop.xlane.xlu1 %2347  ;;  %v3653_v1 = vsel %vm15057_vm7, %v3651_v19, %v3646_v45  ;;  %v2345_v42 = vpop.xlane.xlu0 %2344 }
 0x3d0   :  { %v3665_v32 = vrot.slane %v2348_v7, %v9997_v20  ;;  %v3658_v30 = vrot.slane %v2345_v42, %v10012_v53  ;;  %v2484_v13 = vsel %vm526_vm0, %v8337_v9, 0.0  ;;  %v2727_v60 = vsel %vm526_vm0, %v8541_v10, 0.0 }
 0x3d2   :  { %v3660_v33 = vsel %vm15740_vm8, %v3658_v30, %v3653_v1  ;;  %2725 = vadd.xlane.f32.xlu1 %v2724_v39  ;;  %2482 = vadd.xlane.f32.xlu0 %v2481_v44  ;;  %vm15741_vm8 = vcmask 786112   ;;  %v8582_v30 = vunpack.i.h.bf16 %v12223_v55  ;;  %v8657_v55 = vunpack.i.h.bf16 %v12295_v11 }
 0x3d3   :  { %v2354_v3 = vpop.xlane.xlu1 %2353  ;;  %v3667_v15 = vsel %vm15058_vm9, %v3665_v32, %v3660_v33  ;;  %v2351_v24 = vpop.xlane.xlu0 %2350  ;;  %v8542_v11 = vunpack.i.h.bf16 %v12207_v23 }
 0x3d4   :  { %v3679_v19 = vrot.slane %v2354_v3, %v10041_v41  ;;  %v3672_v31 = vrot.slane %v2351_v24, %v10044_v8  ;;  %v2778_v9 = vsel %vm526_vm0, %v8582_v30, 0.0  ;;  %v2868_v30 = vsel %vm526_vm0, %v8657_v55, 0.0 }
 0x3d5   :  { %v2730_v23 = vsel %vm526_vm0, %v8542_v11, 0.0 }
 0x3d6   :  { %v3674_v22 = vsel %vm3673_vm10, %v3672_v31, %v3667_v15  ;;  %2815 = vadd.xlane.f32.xlu1 %v2814_v26  ;;  %2776 = vadd.xlane.f32.xlu0 %v2775_v2  ;;  %v15742_v15 = vld [vmem:[#allocation82_spill] sm:$0xff]  ;;  %v8616_v26 = vunpack.i.l.bf16 %v12255_v21 }
 0x3d7   :  { %v2360_v45 = vpop.xlane.xlu1 %2359  ;;  %v3681_v7 = vsel %vm15741_vm8, %v3679_v19, %v3674_v22  ;;  %v2357_v1 = vpop.xlane.xlu0 %2356  ;;  %v15743_v19 = vld [vmem:[#allocation83_spill] sm:$0xff]  ;;  %vm15748_vm8 = vcmask 589312  }
 0x3d8   :  { %v3693_v42 = vrot.slane %v2360_v45, %v10059_v52  ;;  %v3686_v32 = vrot.slane %v2357_v1, %v10074_v50  ;;  %v2817_v10 = vsel %vm526_vm0, %v8616_v26, 0.0 }
 0x3da   :  { %v3688_v39 = vsel %vm3687_vm12, %v3686_v32, %v3681_v7  ;;  %2485 = vadd.xlane.f32.xlu1 %v2484_v13  ;;  %2866 = vadd.xlane.f32.xlu0 %v2865_v12  ;;  %v15744_v32 = vld [vmem:[#allocation64_spill] sm:$0xff] }
 0x3db   :  { %v2366_v44 = vpop.xlane.xlu1 %2365  ;;  %v2363_v33 = vpop.xlane.xlu0 %2362  ;;  %v3695_v3 = vsel %vm3694_vm13, %v3693_v42, %v3688_v39  ;;  %v8341_v13 = vunpack.i.l.bf16 %v15744_v32 }
 0x3dc   :  { %v3707_v24 = vrot.slane %v2366_v44, %v15742_v15  ;;  %v3700_v31 = vrot.slane %v2363_v33, %v15743_v19 }
 0x3dd   :  { %v2487_v55 = vsel %vm526_vm0, %v8341_v13, 0.0 }
 0x3de   :  { %2779 = vadd.xlane.f32.xlu1 %v2778_v9  ;;  %2728 = vadd.xlane.f32.xlu0 %v2727_v60  ;;  %v3702_v2 = vsel %vm3701_vm14, %v3700_v31, %v3695_v3  ;;  %v8617_v9 = vunpack.i.h.bf16 %v12255_v21  ;;  %v8661_v21 = vunpack.i.l.bf16 %v12291_v49 }
 0x3df   :  { %v2372_v22 = vpop.xlane.xlu1 %2371  ;;  %v2369_v45 = vpop.xlane.xlu0 %2368  ;;  %v12538_v7 = vsel %vm3708_vm15, %v3707_v24, %v3702_v2  ;;  %v15745_v24 = vld [vmem:[#allocation115_spill] sm:$0xff] }
 0x3e0   :  { %v3717_v1 = vrot.slane %v2372_v22, %v9916_v0  ;;  %v3713_v42 = vrot.slane %v2369_v45, %v9913_v27  ;;  %v8586_v31 = vunpack.i.l.bf16 %v15745_v24  ;;  %v2820_v11 = vsel %vm526_vm0, %v8617_v9, 0.0 }
 0x3e2   :  { %v3718_v12 = vsel %vm3610_vm1, %v3717_v1, %v3713_v42  ;;  %2869 = vadd.xlane.f32.xlu1 %v2868_v30  ;;  %2818 = vadd.xlane.f32.xlu0 %v2817_v10  ;;  %v8342_v42 = vunpack.i.h.bf16 %v15744_v32  ;;  %v2781_v13 = vsel %vm526_vm0, %v8586_v31, 0.0  ;;  %v2871_v31 = vsel %vm526_vm0, %v8661_v21, 0.0 }
 0x3e3   :  { %v2378_v39 = vpop.xlane.xlu1 %2377  ;;  %v2375_v44 = vpop.xlane.xlu0 %2374 }
 0x3e4   :  { %v3727_v33 = vrot.slane %v2378_v39, %v9928_v4  ;;  %v3722_v3 = vrot.slane %v2375_v44, %v9921_v62  ;;  %v2490_v9 = vsel %vm526_vm0, %v8342_v42, 0.0 }
 0x3e6   :  { %v3723_v26 = vsel %vm3617_vm2, %v3722_v3, %v3718_v12  ;;  %2731 = vadd.xlane.f32.xlu1 %v2730_v23  ;;  %2488 = vadd.xlane.f32.xlu0 %v2487_v55  ;;  %v15746_v3 = vld [vmem:[#allocation111_spill] sm:$0xff]  ;;  %v8587_v23 = vunpack.i.h.bf16 %v15745_v24  ;;  %v8662_v24 = vunpack.i.h.bf16 %v12291_v49 }
 0x3e7   :  { %v2384_v60 = vpop.xlane.xlu1 %2383  ;;  %v3728_v2 = vsel %vm3624_vm3, %v3727_v33, %v3723_v26  ;;  %v2381_v22 = vpop.xlane.xlu0 %2380  ;;  %v8546_v32 = vunpack.i.l.bf16 %v15746_v3  ;;  %v8547_v49 = vunpack.i.h.bf16 %v15746_v3 }
 0x3e8   :  { %v3737_v45 = vrot.slane %v2384_v60, %v9945_v35  ;;  %v3732_v1 = vrot.slane %v2381_v22, %v9948_v25  ;;  %v2784_v42 = vsel %vm526_vm0, %v8587_v23, 0.0  ;;  %v2874_v23 = vsel %vm526_vm0, %v8662_v24, 0.0 }
 0x3e9   :  { %v2733_v21 = vsel %vm526_vm0, %v8546_v32, 0.0  ;;  %v2736_v24 = vsel %vm526_vm0, %v8547_v49, 0.0 }
 0x3ea   :  { %v3733_v30 = vsel %vm3631_vm4, %v3732_v1, %v3728_v2  ;;  %2821 = vadd.xlane.f32.xlu1 %v2820_v11  ;;  %2782 = vadd.xlane.f32.xlu0 %v2781_v13  ;;  %v15747_v1 = vld [vmem:[#allocation117_spill] sm:$0xff] }
 0x3eb   :  { %v2390_v10 = vpop.xlane.xlu1 %2389  ;;  %v3738_v12 = vsel %vm3638_vm5, %v3737_v45, %v3733_v30  ;;  %v2387_v39 = vpop.xlane.xlu0 %2386  ;;  %v8621_v11 = vunpack.i.l.bf16 %v15747_v1  ;;  %v8622_v3 = vunpack.i.h.bf16 %v15747_v1  ;;  %v8666_v1 = vunpack.i.l.bf16 %v12305_v14 }
 0x3ec   :  { %v3747_v44 = vrot.slane %v2390_v10, %v9963_v37  ;;  %v3742_v33 = vrot.slane %v2387_v39, %v9981_v58 }
 0x3ed   :  { %v2823_v32 = vsel %vm526_vm0, %v8621_v11, 0.0  ;;  %v2826_v49 = vsel %vm526_vm0, %v8622_v3, 0.0 }
 0x3ee   :  { %v3743_v55 = vsel %vm3645_vm6, %v3742_v33, %v3738_v12  ;;  %2491 = vadd.xlane.f32.xlu1 %v2490_v9  ;;  %2872 = vadd.xlane.f32.xlu0 %v2871_v31  ;;  %v15749_v33 = vld [vmem:[#allocation66_spill] sm:$0xff] }
 0x3ef   :  { %v2396_v26 = vpop.xlane.xlu1 %2395  ;;  %v3748_v60 = vsel %vm15057_vm7, %v3747_v44, %v3743_v55  ;;  %v2393_v2 = vpop.xlane.xlu0 %2392  ;;  %v8346_v9 = vunpack.i.l.bf16 %v15749_v33 }
 0x3f0   :  { %v3757_v22 = vrot.slane %v2396_v26, %v9997_v20  ;;  %v3752_v45 = vrot.slane %v2393_v2, %v10012_v53 }
 0x3f1   :  { %v2493_v11 = vsel %vm526_vm0, %v8346_v9, 0.0 }
 0x3f2   :  { %v3753_v13 = vsel %vm15748_vm8, %v3752_v45, %v3748_v60  ;;  %2785 = vadd.xlane.f32.xlu1 %v2784_v42  ;;  %2734 = vadd.xlane.f32.xlu0 %v2733_v21  ;;  %vm15750_vm8 = vcmask 786112   ;;  %v15751_v45 = vld [vmem:[#allocation114_spill] sm:$0xff] }
 0x3f3   :  { %v2402_v30 = vpop.xlane.xlu1 %2401  ;;  %v3758_v10 = vsel %vm15058_vm9, %v3757_v22, %v3753_v13  ;;  %v2399_v12 = vpop.xlane.xlu0 %2398  ;;  %v8591_v42 = vunpack.i.l.bf16 %v15751_v45 }
 0x3f4   :  { %v3767_v39 = vrot.slane %v2402_v30, %v10041_v41  ;;  %v3762_v44 = vrot.slane %v2399_v12, %v10044_v8 }
 0x3f5   :  { %v2787_v9 = vsel %vm526_vm0, %v8591_v42, 0.0  ;;  %v2877_v42 = vsel %vm526_vm0, %v8666_v1, 0.0 }
 0x3f6   :  { %v3763_v31 = vsel %vm3673_vm10, %v3762_v44, %v3758_v10  ;;  %2875 = vadd.xlane.f32.xlu1 %v2874_v23  ;;  %2824 = vadd.xlane.f32.xlu0 %v2823_v32  ;;  %v8347_v44 = vunpack.i.h.bf16 %v15749_v33  ;;  %v15752_v33 = vld [vmem:[#allocation110_spill] sm:$0xff] }
 0x3f7   :  { %v2408_v55 = vpop.xlane.xlu1 %2407  ;;  %v3768_v26 = vsel %vm15750_vm8, %v3767_v39, %v3763_v31  ;;  %v2405_v60 = vpop.xlane.xlu0 %2404  ;;  %vm15755_vm8 = vcmask 589312  }
 0x3f8   :  { %v3777_v2 = vrot.slane %v2408_v55, %v10059_v52  ;;  %v3772_v22 = vrot.slane %v2405_v60, %v10074_v50  ;;  %v2496_v3 = vsel %vm526_vm0, %v8347_v44, 0.0 }
 0x3fa   :  { %v3773_v21 = vsel %vm3687_vm12, %v3772_v22, %v3768_v26  ;;  %2737 = vadd.xlane.f32.xlu1 %v2736_v24  ;;  %2494 = vadd.xlane.f32.xlu0 %v2493_v11  ;;  %v8592_v22 = vunpack.i.h.bf16 %v15751_v45 }
 0x3fb   :  { %v2414_v13 = vpop.xlane.xlu1 %2413  ;;  %v2411_v30 = vpop.xlane.xlu0 %2410  ;;  %v3778_v10 = vsel %vm3694_vm13, %v3777_v2, %v3773_v21  ;;  %v8551_v2 = vunpack.i.l.bf16 %v15752_v33 }
 0x3fc   :  { %v3787_v12 = vrot.slane %v2414_v13, %v15742_v15  ;;  %v3782_v39 = vrot.slane %v2411_v30, %v15743_v19  ;;  %v2790_v45 = vsel %vm526_vm0, %v8592_v22, 0.0 }
 0x3fe   :  { %2827 = vadd.xlane.f32.xlu1 %v2826_v49  ;;  %2788 = vadd.xlane.f32.xlu0 %v2787_v9  ;;  %v3783_v23 = vsel %vm3701_vm14, %v3782_v39, %v3778_v10  ;;  %v8626_v10 = vunpack.i.l.bf16 %v12265_v28  ;;  %v2739_v39 = vsel %vm526_vm0, %v8551_v2, 0.0 }
 0x3ff   :  { %v2420_v32 = vpop.xlane.xlu1 %2419  ;;  %v2417_v31 = vpop.xlane.xlu0 %2416  ;;  %v12603_v55 = vsel %vm3708_vm15, %v3787_v12, %v3783_v23  ;;  %v8667_v12 = vunpack.i.h.bf16 %v12305_v14  ;;  %v8552_v14 = vunpack.i.h.bf16 %v15752_v33  ;;  %v8627_v33 = vunpack.i.h.bf16 %v12265_v28 }
 0x400   :  { %v3796_v26 = vrot.slane %v2420_v32, %v9916_v0  ;;  %v3792_v60 = vrot.slane %v2417_v31, %v9913_v27  ;;  %v15753_v31 = vld [vmem:[#allocation65_spill] sm:$0xff]  ;;  %v2829_v2 = vsel %vm526_vm0, %v8626_v10, 0.0  ;;  %v8671_v28 = vunpack.i.l.bf16 %v12301_v18 }
 0x402   :  { %v3797_v24 = vsel %vm3610_vm1, %v3796_v26, %v3792_v60  ;;  %2497 = vadd.xlane.f32.xlu1 %v2496_v3  ;;  %2878 = vadd.xlane.f32.xlu0 %v2877_v42  ;;  %v8351_v26 = vunpack.i.l.bf16 %v15753_v31  ;;  %v2880_v60 = vsel %vm526_vm0, %v8667_v12, 0.0  ;;  %v2742_v12 = vsel %vm526_vm0, %v8552_v14, 0.0  ;;  %v3231_v14 = vld [vmem:[%s14752_s1 + $0x480] sm:$0xff] }
 0x403   :  { %v2426_v11 = vpop.xlane.xlu1 %2425  ;;  %v2423_v21 = vpop.xlane.xlu0 %2422 }
 0x404   :  { %v3806_v13 = vrot.slane %v2426_v11, %v9928_v4  ;;  %v3801_v30 = vrot.slane %v2423_v21, %v9921_v62  ;;  %v2499_v10 = vsel %vm526_vm0, %v8351_v26, 0.0 }
 0x406   :  { %v3802_v44 = vsel %vm3617_vm2, %v3801_v30, %v3797_v24  ;;  %2791 = vadd.xlane.f32.xlu1 %v2790_v45  ;;  %2740 = vadd.xlane.f32.xlu0 %v2739_v39 }
 0x407   :  { %v2432_v1 = vpop.xlane.xlu1 %2431  ;;  %v3807_v49 = vsel %vm3624_vm3, %v3806_v13, %v3802_v44  ;;  %v2429_v9 = vpop.xlane.xlu0 %2428  ;;  %v15754_v13 = vld [vmem:[#allocation116_spill] sm:$0xff] }
 0x408   :  { %v3816_v23 = vrot.slane %v2432_v1, %v9945_v35  ;;  %v3811_v32 = vrot.slane %v2429_v9, %v9948_v25  ;;  %v8596_v30 = vunpack.i.l.bf16 %v15754_v13 }
 0x40a   :  { %v3812_v22 = vsel %vm3631_vm4, %v3811_v32, %v3807_v49  ;;  %2881 = vadd.xlane.f32.xlu1 %v2880_v60  ;;  %2830 = vadd.xlane.f32.xlu0 %v2829_v2  ;;  %v2832_v32 = vsel %vm526_vm0, %v8627_v33, 0.0  ;;  %v2793_v26 = vsel %vm526_vm0, %v8596_v30, 0.0  ;;  %v3232_v60 = vld [vmem:[%s14752_s1 + $0x488] sm:$0xff] }
 0x40b   :  { %v2438_v3 = vpop.xlane.xlu1 %2437  ;;  %v3817_v42 = vsel %vm3638_vm5, %v3816_v23, %v3812_v22  ;;  %v2435_v24 = vpop.xlane.xlu0 %2434  ;;  %v8352_v23 = vunpack.i.h.bf16 %v15753_v31  ;;  %v7941_v22 = vpack.c.bf16 %v3232_v60, %v3231_v14  ;;  %v3215_v31 = vld [vmem:[%s14752_s1 + $0x400] sm:$0xff] }
 0x40c   :  { %v3826_v11 = vrot.slane %v2438_v3, %v9963_v37  ;;  %v3821_v21 = vrot.slane %v2435_v24, %v9981_v58  ;;  %v3216_v3 = vld [vmem:[%s14752_s1 + $0x408] sm:$0xff] }
 0x40d   :  { %7942 = vmatprep.subr.bf16.mxu0 %v7941_v22 }
 0x40e   :  { %v3822_v45 = vsel %vm3645_vm6, %v3821_v21, %v3817_v42  ;;  %2743 = vadd.xlane.f32.xlu1 %v2742_v12  ;;  %2500 = vadd.xlane.f32.xlu0 %v2499_v10  ;;  %v7943_v21 = vpack.c.bf16 %v3216_v3, %v3215_v31  ;;  %v15756_v12 = vld [vmem:[#allocation113_spill] sm:$0xff]  ;;  %v15758_v31 = vld [vmem:[#allocation118_spill] sm:$0xff] }
 0x40f   :  { %v2444_v39 = vpop.xlane.xlu1 %2443  ;;  %v3827_v44 = vsel %vm15057_vm7, %v3826_v11, %v3822_v45  ;;  %v2441_v1 = vpop.xlane.xlu0 %2440  ;;  %v8556_v10 = vunpack.i.l.bf16 %v15756_v12  ;;  %v8597_v45 = vunpack.i.h.bf16 %v15754_v13  ;;  %v3217_v13 = vld [vmem:[%s14752_s1 + $0x410] sm:$0xff]  ;;  %v8631_v3 = vunpack.i.l.bf16 %v15758_v31 }
 0x410   :  { %v3836_v49 = vrot.slane %v2444_v39, %v9997_v20  ;;  %v3831_v9 = vrot.slane %v2441_v1, %v10012_v53  ;;  %v2502_v39 = vsel %vm526_vm0, %v8352_v23, 0.0  ;;  %7944 = vmatpush3.bf16.msra.mxu0 %v7943_v21  ;;  %v3233_v1 = vld [vmem:[%s14752_s1 + $0x490] sm:$0xff]  ;;  %v3218_v23 = vld [vmem:[%s14752_s1 + $0x418] sm:$0xff]  ;;  %v3235_v21 = vld [vmem:[%s14752_s1 + $0x4a0] sm:$0xff] }
 0x411   :  { %v7947_v60 = vpack.c.bf16 %v3218_v23, %v3217_v13  ;;  %v15759_v13 = vld [vmem:[#allocation68_spill] sm:$0xff] }
 0x412   :  { %v3832_v2 = vsel %vm15755_vm8, %v3831_v9, %v3827_v44  ;;  %2833 = vadd.xlane.f32.xlu1 %v2832_v32  ;;  %2794 = vadd.xlane.f32.xlu0 %v2793_v26  ;;  %v2883_v44 = vsel %vm526_vm0, %v8671_v28, 0.0  ;;  %vm15757_vm8 = vcmask 786112   ;;  %v8356_v23 = vunpack.i.l.bf16 %v15759_v13 }
 0x413   :  { %v2450_v42 = vpop.xlane.xlu1 %2449  ;;  %v3837_v24 = vsel %vm15058_vm9, %v3836_v49, %v3832_v2  ;;  %v2447_v11 = vpop.xlane.xlu0 %2446  ;;  %v3234_v49 = vld [vmem:[%s14752_s1 + $0x498] sm:$0xff] }
 0x414   :  { %v3846_v30 = vrot.slane %v2450_v42, %v10041_v41  ;;  %v3841_v33 = vrot.slane %v2447_v11, %v10044_v8  ;;  %v7945_v32 = vpack.c.bf16 %v3234_v49, %v3233_v1  ;;  %v8672_v42 = vunpack.i.h.bf16 %v12301_v18  ;;  %v3219_v18 = vld [vmem:[%s14752_s1 + $0x420] sm:$0xff] }
 0x415   :  { %v2745_v11 = vsel %vm526_vm0, %v8556_v10, 0.0  ;;  %v3220_v10 = vld [vmem:[%s14752_s1 + $0x428] sm:$0xff] }
 0x416   :  { %v3842_v9 = vsel %vm3673_vm10, %v3841_v33, %v3837_v24  ;;  %2503 = vadd.xlane.f32.xlu1 %v2502_v39  ;;  %2884 = vadd.xlane.f32.xlu0 %v2883_v44  ;;  %v2796_v24 = vsel %vm526_vm0, %v8597_v45, 0.0  ;;  %v7951_v1 = vpack.c.bf16 %v3220_v10, %v3219_v18  ;;  %v3248_v18 = vld [vmem:[%s14752_s1 + $0x508] sm:$0xff] }
 0x417   :  { %v2456_v28 = vpop.xlane.xlu1 %2455  ;;  %v3847_v26 = vsel %vm15757_vm8, %v3846_v30, %v3842_v9  ;;  %v2453_v14 = vpop.xlane.xlu0 %2452  ;;  %7946 = vmatprep.subr.bf16.mxu0 %v7945_v32  ;;  %v3236_v30 = vld [vmem:[%s14752_s1 + $0x4a8] sm:$0xff]  ;;  %vm15773_vm8 = vcmask 589312  }
 0x418   :  { %v3856_v2 = vrot.slane %v2456_v28, %v10059_v52  ;;  %v3851_v22 = vrot.slane %v2453_v14, %v10074_v50  ;;  %7948 = vmatpush3.bf16.msra.mxu0 %v7947_v60  ;;  %v7949_v39 = vpack.c.bf16 %v3236_v30, %v3235_v21  ;;  %v8557_v28 = vunpack.i.h.bf16 %v15756_v12  ;;  %v3237_v60 = vld [vmem:[%s14752_s1 + $0x4b0] sm:$0xff] }
 0x419   :  { %v2835_v14 = vsel %vm526_vm0, %v8631_v3, 0.0  ;;  %v3221_v12 = vld [vmem:[%s14752_s1 + $0x430] sm:$0xff]  ;;  %v3222_v3 = vld [vmem:[%s14752_s1 + $0x438] sm:$0xff] }
 0x41a   :  { %v3852_v33 = vsel %vm3687_vm12, %v3851_v22, %v3847_v26  ;;  %2797 = vadd.xlane.f32.xlu1 %v2796_v24  ;;  %2746 = vadd.xlane.f32.xlu0 %v2745_v11  ;;  %v2886_v26 = vsel %vm526_vm0, %v8672_v42, 0.0  ;;  %v3263_v42 = vld [vmem:[%s14752_s1 + $0x580] sm:$0xff]  ;;  %v7955_v30 = vpack.c.bf16 %v3222_v3, %v3221_v12  ;;  %v3265_v12 = vld [vmem:[%s14752_s1 + $0x590] sm:$0xff] }
 0x41b   :  { %v2462_v45 = vpop.xlane.xlu1 %2461  ;;  %v2459_v44 = vpop.xlane.xlu0 %2458  ;;  %v3857_v49 = vsel %vm3694_vm13, %v3856_v2, %v3852_v33  ;;  %7950 = vmatprep.subr.bf16.mxu0 %v7949_v39  ;;  %v3238_v2 = vld [vmem:[%s14752_s1 + $0x4b8] sm:$0xff]  ;;  %v3264_v33 = vld [vmem:[%s14752_s1 + $0x588] sm:$0xff]  ;;  %v3247_v39 = vld [vmem:[%s14752_s1 + $0x500] sm:$0xff] }
 0x41c   :  { %v3866_v9 = vrot.slane %v2462_v45, %v15742_v15  ;;  %v3861_v32 = vrot.slane %v2459_v44, %v15743_v19  ;;  %7952 = vmatpush3.bf16.msra.mxu0 %v7951_v1  ;;  %v7953_v22 = vpack.c.bf16 %v3238_v2, %v3237_v60  ;;  %v7973_v1 = vpack.c.bf16 %v3264_v33, %v3263_v42  ;;  %v3240_v2 = vld [vmem:[%s14752_s1 + $0x4c8] sm:$0xff] }
 0x41d   :  { %v2505_v60 = vsel %vm526_vm0, %v8356_v23, 0.0  ;;  %v3224_v23 = vld [vmem:[%s14752_s1 + $0x448] sm:$0xff]  ;;  %v8357_v33 = vunpack.i.h.bf16 %v15759_v13  ;;  %v3242_v13 = vld [vmem:[%s14752_s1 + $0x4d8] sm:$0xff] }
 0x41e   :  { %2887 = vadd.xlane.f32.xlu1 %v2886_v26  ;;  %2836 = vadd.xlane.f32.xlu0 %v2835_v14  ;;  %v3862_v24 = vsel %vm3701_vm14, %v3861_v32, %v3857_v49  ;;  %v7975_v49 = vpack.c.bf16 %v3248_v18, %v3247_v39  ;;  %v8632_v32 = vunpack.i.h.bf16 %v15758_v31  ;;  %v8676_v26 = vunpack.i.l.bf16 %v12315_v56 }
 0x41f   :  { %v2468_v11 = vpop.xlane.xlu1 %2467  ;;  %v2465_v21 = vpop.xlane.xlu0 %2464  ;;  %v12728_v10 = vsel %vm3708_vm15, %v3866_v9, %v3862_v24  ;;  %7954 = vmatprep.subr.bf16.mxu0 %v7953_v22  ;;  %v2748_v14 = vsel %vm526_vm0, %v8557_v28, 0.0  ;;  %v3239_v9 = vld [vmem:[%s14752_s1 + $0x4c0] sm:$0xff]  ;;  %7974 = vmatprep.subr.bf16.mxu1 %v7973_v1 }
 0x420   :  { %v3875_v45 = vrot.slane %v2468_v11, %v9916_v0  ;;  %v3871_v44 = vrot.slane %v2465_v21, %v9913_v27  ;;  %7956 = vmatpush3.bf16.msra.mxu0 %v7955_v30  ;;  %v7957_v31 = vpack.c.bf16 %v3240_v2, %v3239_v9  ;;  %v3223_v28 = vld [vmem:[%s14752_s1 + $0x440] sm:$0xff]  ;;  %v3266_v11 = vld [vmem:[%s14752_s1 + $0x598] sm:$0xff]  ;;  %v3249_v21 = vld [vmem:[%s14752_s1 + $0x510] sm:$0xff]  ;;  %7976 = vmatpush3.bf16.msra.mxu1 %v7975_v49 }
 0x421   :  { %v7959_v24 = vpack.c.bf16 %v3224_v23, %v3223_v28  ;;  %v3250_v30 = vld [vmem:[%s14752_s1 + $0x518] sm:$0xff]  ;;  %v3241_v2 = vld [vmem:[%s14752_s1 + $0x4d0] sm:$0xff]  ;;  %v3267_v28 = vld [vmem:[%s14752_s1 + $0x5a0] sm:$0xff] }
 0x422   :  { %v3876_v22 = vsel %vm3610_vm1, %v3875_v45, %v3871_v44  ;;  %2749 = vadd.xlane.f32.xlu1 %v2748_v14  ;;  %2506 = vadd.xlane.f32.xlu0 %v2505_v60  ;;  %v7977_v45 = vpack.c.bf16 %v3266_v11, %v3265_v12  ;;  %v15760_v44 = vld [vmem:[#allocation119_spill] sm:$0xff]  ;;  %v2889_v14 = vsel %vm526_vm0, %v8676_v26, 0.0  ;;  %v2838_v60 = vsel %vm526_vm0, %v8632_v32, 0.0  ;;  %v3225_v26 = vld [vmem:[%s14752_s1 + $0x450] sm:$0xff]  ;;  %v3226_v32 = vld [vmem:[%s14752_s1 + $0x458] sm:$0xff] }
 0x423   :  { %v2474_v3 = vpop.xlane.xlu1 %2473  ;;  %v2471_v42 = vpop.xlane.xlu0 %2470  ;;  %7958 = vmatprep.subr.bf16.mxu0 %v7957_v31  ;;  %v8636_v1 = vunpack.i.l.bf16 %v15760_v44  ;;  %v7979_v9 = vpack.c.bf16 %v3250_v30, %v3249_v21  ;;  %v7961_v31 = vpack.c.bf16 %v3242_v13, %v3241_v2  ;;  %v3252_v11 = vld [vmem:[%s14752_s1 + $0x528] sm:$0xff]  ;;  %v2508_v30 = vsel %vm526_vm0, %v8357_v33, 0.0  ;;  %v3243_v2 = vld [vmem:[%s14752_s1 + $0x4e0] sm:$0xff] }
 0x424   :  { %v3885_v39 = vrot.slane %v2474_v3, %v9928_v4  ;;  %v3880_v18 = vrot.slane %v2471_v42, %v9921_v62  ;;  %7960 = vmatpush3.bf16.msra.mxu0 %v7959_v24  ;;  %7978 = vmatprep.subr.bf16.mxu1 %v7977_v45  ;;  %v3268_v42 = vld [vmem:[%s14752_s1 + $0x5a8] sm:$0xff]  ;;  %v3251_v24 = vld [vmem:[%s14752_s1 + $0x520] sm:$0xff]  ;;  %v8677_v45 = vunpack.i.h.bf16 %v12315_v56 }
 0x425   :  { %7980 = vmatpush3.bf16.msra.mxu1 %v7979_v9  ;;  %7962 = vmatprep.subr.bf16.mxu0 %v7961_v31  ;;  %v3244_v13 = vld [vmem:[%s14752_s1 + $0x4e8] sm:$0xff]  ;;  %v3227_v56 = vld [vmem:[%s14752_s1 + $0x460] sm:$0xff]  ;;  %v3269_v9 = vld [vmem:[%s14752_s1 + $0x5b0] sm:$0xff] }
 0x426   :  { %v3881_v49 = vsel %vm3617_vm2, %v3880_v18, %v3876_v22  ;;  %2890 = vadd.xlane.f32.xlu1 %v2889_v14  ;;  %2839 = vadd.xlane.f32.xlu0 %v2838_v60  ;;  %v7963_v22 = vpack.c.bf16 %v3226_v32, %v3225_v26  ;;  %v8637_v18 = vunpack.i.h.bf16 %v15760_v44  ;;  %v2841_v14 = vsel %vm526_vm0, %v8636_v1, 0.0  ;;  %v3228_v1 = vld [vmem:[%s14752_s1 + $0x468] sm:$0xff]  ;;  %v3270_v32 = vld [vmem:[%s14752_s1 + $0x5b8] sm:$0xff] }
 0x427   :  { %v2753_v23 = vpop.xlane.xlu1 %2752  ;;  %v3886_v12 = vsel %vm3624_vm3, %v3885_v39, %v3881_v49  ;;  %v2477_v3 = vpop.xlane.xlu0 %2476  ;;  %v7981_v39 = vpack.c.bf16 %v3268_v42, %v3267_v28  ;;  %v7983_v60 = vpack.c.bf16 %v3252_v11, %v3251_v24  ;;  %v7965_v44 = vpack.c.bf16 %v3244_v13, %v3243_v2  ;;  %v3253_v28 = vld [vmem:[%s14752_s1 + $0x530] sm:$0xff] }
 0x428   :  { %v3890_v21 = vrot.slane %v2477_v3, %v9948_v25  ;;  %7964 = vmatpush3.bf16.msra.mxu0 %v7963_v22  ;;  %v7967_v26 = vpack.c.bf16 %v3228_v1, %v3227_v56  ;;  %v15761_v3 = vld [vmem:[#allocation81_spill] sm:$0xff]  ;;  %v4345_v42 = vrot.slane %v2753_v23, %v9913_v27  ;;  %v7985_v11 = vpack.c.bf16 %v3270_v32, %v3269_v9  ;;  %v3245_v2 = vld [vmem:[%s14752_s1 + $0x4f0] sm:$0xff]  ;;  %v3255_v32 = vld [vmem:[%s14752_s1 + $0x540] sm:$0xff] }
 0x429   :  { %7982 = vmatprep.subr.bf16.mxu1 %v7981_v39  ;;  %v8402_v22 = vunpack.i.h.bf16 %v15761_v3  ;;  %7966 = vmatprep.subr.bf16.mxu0 %v7965_v44  ;;  %v2892_v39 = vsel %vm526_vm0, %v8677_v45, 0.0  ;;  %v3246_v23 = vld [vmem:[%s14752_s1 + $0x4f8] sm:$0xff]  ;;  %v3271_v44 = vld [vmem:[%s14752_s1 + $0x5c0] sm:$0xff] }
 0x42a   :  { %v12805_v33 = vsel %vm3631_vm4, %v3890_v21, %v3886_v12  ;;  %2842 = vadd.xlane.f32.xlu1 %v2841_v14  ;;  %2509 = vadd.xlane.f32.xlu0 %v2508_v30  ;;  %v3254_v12 = vld [vmem:[%s14752_s1 + $0x538] sm:$0xff]  ;;  %v8401_v21 = vunpack.i.l.bf16 %v15761_v3  ;;  %v2844_v30 = vsel %vm526_vm0, %v8637_v18, 0.0  ;;  %v7969_v13 = vpack.c.bf16 %v3246_v23, %v3245_v2  ;;  %v3229_v18 = vld [vmem:[%s14752_s1 + $0x470] sm:$0xff] }
 0x42b   :  { %v2705_v49 = vpop.xlane.xlu1 %2704  ;;  %v2756_v31 = vpop.xlane.xlu0 %2755  ;;  %7984 = vmatpush3.bf16.msra.mxu1 %v7983_v60  ;;  %v7987_v14 = vpack.c.bf16 %v3254_v12, %v3253_v28  ;;  %v3230_v45 = vld [vmem:[%s14752_s1 + $0x478] sm:$0xff]  ;;  %v3256_v28 = vld [vmem:[%s14752_s1 + $0x548] sm:$0xff]  ;;  %v2562_v3 = vsel %vm526_vm0, %v8402_v22, 0.0  ;;  %v3273_v22 = vld [vmem:[%s14752_s1 + $0x5d0] sm:$0xff] }
 0x42c   :  { %v4349_v24 = vrot.slane %v2756_v31, %v9916_v0  ;;  %7968 = vmatpush3.bf16.msra.mxu0 %v7967_v26  ;;  %v4266_v56 = vrot.slane %v2705_v49, %v9913_v27  ;;  %7986 = vmatprep.subr.bf16.mxu1 %v7985_v11  ;;  %v7971_v31 = vpack.c.bf16 %v3230_v45, %v3229_v18  ;;  %v3272_v26 = vld [vmem:[%s14752_s1 + $0x5c8] sm:$0xff]  ;;  %v8721_v11 = vunpack.i.l.bf16 %v12351_v61  ;;  %v3258_v18 = vld [vmem:[%s14752_s1 + $0x558] sm:$0xff] }
 0x42d   :  { %7970 = vmatprep.subr.bf16.mxu0 %v7969_v13 }
 0x42e   :  { %v4350_v60 = vsel %vm3610_vm1, %v4349_v24, %v4345_v42  ;;  %2845 = vadd.xlane.f32.xlu1 %v2844_v30  ;;  %2893 = vadd.xlane.f32.xlu0 %v2892_v39  ;;  %v7989_v42 = vpack.c.bf16 %v3272_v26, %v3271_v44  ;;  %v8722_v24 = vunpack.i.h.bf16 %v12351_v61  ;;  %v2559_v30 = vsel %vm526_vm0, %v8401_v21, 0.0 }
 0x42f   :  { %v2759_v1 = vpop.xlane.xlu1 %2758  ;;  %v2708_v9 = vpop.xlane.xlu0 %2707  ;;  %7988 = vmatpush3.bf16.msra.mxu1 %v7987_v14  ;;  %v7991_v39 = vpack.c.bf16 %v3256_v28, %v3255_v32  ;;  %v3274_v14 = vld [vmem:[%s14752_s1 + $0x5d8] sm:$0xff]  ;;  %v2943_v32 = vsel %vm526_vm0, %v8721_v11, 0.0  ;;  %v3259_v11 = vld [vmem:[%s14752_s1 + $0x560] sm:$0xff] }
 0x430   :  { %v4354_v12 = vrot.slane %v2759_v1, %v9921_v62  ;;  %v4270_v49 = vrot.slane %v2708_v9, %v9916_v0  ;;  %7972 = vmatpush3.bf16.msra.mxu0 %v7971_v31  ;;  %7990 = vmatprep.subr.bf16.mxu1 %v7989_v42  ;;  %v7993_v21 = vpack.c.bf16 %v3274_v14, %v3273_v22  ;;  %v15762_v1 = vld [vmem:[#allocation67_spill] sm:$0xff]  ;;  %v2946_v26 = vsel %vm526_vm0, %v8722_v24, 0.0  ;;  %v15763_v14 = vld [vmem:[#allocation86_spill] sm:$0xff] }
 0x431   :  { %v8362_v9 = vunpack.i.h.bf16 %v15762_v1  ;;  %v8361_v31 = vunpack.i.l.bf16 %v15762_v1 }
 0x432   :  { %v4355_v2 = vsel %vm3617_vm2, %v4354_v12, %v4350_v60  ;;  %v4271_v23 = vsel %vm3610_vm1, %v4270_v49, %v4266_v56  ;;  %2563 = vadd.xlane.f32.xlu1 %v2562_v3  ;;  %2560 = vadd.xlane.f32.xlu0 %v2559_v30  ;;  %v3257_v60 = vld [vmem:[%s14752_s1 + $0x550] sm:$0xff]  ;;  %v3275_v49 = vld [vmem:[%s14752_s1 + $0x5e0] sm:$0xff]  ;;  %v3276_v3 = vld [vmem:[%s14752_s1 + $0x5e8] sm:$0xff] }
 0x433   :  { %v2762_v13 = vpop.xlane.xlu1 %2761  ;;  %v2711_v61 = vpop.xlane.xlu0 %2710  ;;  %7992 = vmatpush3.bf16.msra.mxu1 %v7991_v39  ;;  %v7995_v56 = vpack.c.bf16 %v3258_v18, %v3257_v60  ;;  %v7997_v24 = vpack.c.bf16 %v3276_v3, %v3275_v49  ;;  %v3260_v39 = vld [vmem:[%s14752_s1 + $0x568] sm:$0xff]  ;;  %v2514_v60 = vsel %vm526_vm0, %v8362_v9, 0.0  ;;  %v2511_v18 = vsel %vm526_vm0, %v8361_v31, 0.0  ;;  %v3261_v9 = vld [vmem:[%s14752_s1 + $0x570] sm:$0xff]  ;;  %v3262_v31 = vld [vmem:[%s14752_s1 + $0x578] sm:$0xff] }
 0x434   :  { %v4359_v45 = vrot.slane %v2762_v13, %v9928_v4  ;;  %v4275_v44 = vrot.slane %v2711_v61, %v9921_v62  ;;  %7994 = vmatprep.subr.bf16.mxu1 %v7993_v21  ;;  %v7999_v22 = vpack.c.bf16 %v3260_v39, %v3259_v11  ;;  %v8406_v13 = vunpack.i.l.bf16 %v15763_v14  ;;  %v15764_v61 = vld [vmem:[#allocation120_spill] sm:$0xff] }
 0x435   :  { %v8681_v21 = vunpack.i.l.bf16 %v15764_v61 }
 0x436   :  { %v4360_v28 = vsel %vm3624_vm3, %v4359_v45, %v4355_v2  ;;  %v4276_v12 = vsel %vm3617_vm2, %v4275_v44, %v4271_v23  ;;  %2947 = vadd.xlane.f32.xlu1 %v2946_v26  ;;  %2944 = vadd.xlane.f32.xlu0 %v2943_v32  ;;  %v3277_v44 = vld [vmem:[%s14752_s1 + $0x5f0] sm:$0xff]  ;;  %v2565_v39 = vsel %vm526_vm0, %v8406_v13, 0.0 }
 0x437   :  { %v2852_v42 = vpop.xlane.xlu1 %2851  ;;  %v2849_v30 = vpop.xlane.xlu0 %2848  ;;  %7996 = vmatpush3.bf16.msra.mxu1 %v7995_v56  ;;  %v3278_v56 = vld [vmem:[%s14752_s1 + $0x5f8] sm:$0xff]  ;;  %v2895_v11 = vsel %vm526_vm0, %v8681_v21, 0.0  ;;  %v8407_v21 = vunpack.i.h.bf16 %v15763_v14 }
 0x438   :  { %v4507_v2 = vrot.slane %v2852_v42, %v9916_v0  ;;  %v4503_v23 = vrot.slane %v2849_v30, %v9913_v27  ;;  %7998 = vmatprep.subr.bf16.mxu1 %v7997_v24  ;;  %v8001_v32 = vpack.c.bf16 %v3278_v56, %v3277_v44  ;;  %v8003_v42 = vpack.c.bf16 %v3262_v31, %v3261_v9  ;;  %v15766_v31 = vld [vmem:[#allocation100_spill] sm:$0xff] }
 0x439   :  { %v8682_v30 = vunpack.i.h.bf16 %v15764_v61  ;;  %v8726_v24 = vunpack.i.l.bf16 %v12365_v63  ;;  %v15765_v61 = vld [vmem:[#allocation73_spill] sm:$0xff]  ;;  %v2568_v14 = vsel %vm526_vm0, %v8407_v21, 0.0 }
 0x43a   :  { %v4508_v45 = vsel %vm3610_vm1, %v4507_v2, %v4503_v23  ;;  %2515 = vadd.xlane.f32.xlu1 %v2514_v60  ;;  %2512 = vadd.xlane.f32.xlu0 %v2511_v18  ;;  %v8366_v56 = vunpack.i.l.bf16 %v15765_v61 }
 0x43b   :  { %v2765_v1 = vpop.xlane.xlu1 %2764  ;;  %v2714_v26 = vpop.xlane.xlu0 %2713  ;;  %8000 = vmatpush3.bf16.msra.mxu1 %v7999_v22  ;;  %v2949_v13 = vsel %vm526_vm0, %v8726_v24, 0.0 }
 0x43c   :  { %v4364_v49 = vrot.slane %v2765_v1, %v9948_v25  ;;  %v4280_v3 = vrot.slane %v2714_v26, %v9928_v4  ;;  %8002 = vmatprep.subr.bf16.mxu1 %v8001_v32  ;;  %v2898_v1 = vsel %vm526_vm0, %v8682_v30, 0.0 }
 0x43e   :  { %v4365_v2 = vsel %vm3631_vm4, %v4364_v49, %v4360_v28  ;;  %v4281_v23 = vsel %vm3624_vm3, %v4280_v3, %v4276_v12  ;;  %2896 = vadd.xlane.f32.xlu1 %v2895_v11  ;;  %2566 = vadd.xlane.f32.xlu0 %v2565_v39  ;;  %v8482_v49 = vunpack.i.h.bf16 %v15766_v31  ;;  %v8481_v3 = vunpack.i.l.bf16 %v15766_v31 }
 0x43f   :  { %v2804_v60 = vpop.xlane.xlu1 %2803  ;;  %v2801_v18 = vpop.xlane.xlu0 %2800  ;;  %8004 = vmatpush3.bf16.msra.mxu1 %v8003_v42  ;;  %v2517_v42 = vsel %vm526_vm0, %v8366_v56, 0.0 }
 0x440   :  { %v4428_v22 = vrot.slane %v2804_v60, %v9916_v0  ;;  %v4424_v44 = vrot.slane %v2801_v18, %v9913_v27  ;;  %v2658_v21 = vsel %vm526_vm0, %v8482_v49, 0.0  ;;  %v2655_v56 = vsel %vm526_vm0, %v8481_v3, 0.0 }
 0x442   :  { %v4429_v28 = vsel %vm3610_vm1, %v4428_v22, %v4424_v44  ;;  %2950 = vadd.xlane.f32.xlu1 %v2949_v13  ;;  %2899 = vadd.xlane.f32.xlu0 %v2898_v1  ;;  %v8686_v22 = vunpack.i.l.bf16 %v12325_v51  ;;  %v8727_v44 = vunpack.i.h.bf16 %v12365_v63  ;;  %v8801_v63 = vunpack.i.l.bf16 %v12431_v5 }
 0x443   :  { %v2717_v12 = vpop.xlane.xlu1 %2716  ;;  %v2855_v26 = vpop.xlane.xlu0 %2854 }
 0x444   :  { %v4285_v32 = vrot.slane %v2717_v12, %v9948_v25  ;;  %v4512_v9 = vrot.slane %v2855_v26, %v9921_v62  ;;  %v2901_v31 = vsel %vm526_vm0, %v8686_v22, 0.0 }
 0x446   :  { %v4286_v30 = vsel %vm3631_vm4, %v4285_v32, %v4281_v23  ;;  %v4513_v24 = vsel %vm3617_vm2, %v4512_v9, %v4508_v45  ;;  %2569 = vadd.xlane.f32.xlu1 %v2568_v14  ;;  %2518 = vadd.xlane.f32.xlu0 %v2517_v42  ;;  %v8802_v32 = vunpack.i.h.bf16 %v12431_v5  ;;  %v2952_v9 = vsel %vm526_vm0, %v8727_v44, 0.0 }
 0x447   :  { %v2807_v11 = vpop.xlane.xlu1 %2806  ;;  %v2768_v39 = vpop.xlane.xlu0 %2767 }
 0x448   :  { %v4433_v60 = vrot.slane %v2807_v11, %v9921_v62  ;;  %v4369_v18 = vrot.slane %v2768_v39, %v9945_v35  ;;  %v8367_v11 = vunpack.i.h.bf16 %v15765_v61  ;;  %v15767_v39 = vld [vmem:[#allocation85_spill] sm:$0xff]  ;;  %v8816_v62 = vunpack.i.l.bf16 %v12455_v34 }
 0x449   :  { %v8411_v5 = vunpack.i.l.bf16 %v15767_v39 }
 0x44a   :  { %v4434_v23 = vsel %vm3617_vm2, %v4433_v60, %v4429_v28  ;;  %v4370_v45 = vsel %vm3638_vm5, %v4369_v18, %v4365_v2  ;;  %2659 = vadd.xlane.f32.xlu1 %v2658_v21  ;;  %2656 = vadd.xlane.f32.xlu0 %v2655_v56  ;;  %v3042_v60 = vsel %vm526_vm0, %v8802_v32, 0.0  ;;  %v3039_v18 = vsel %vm526_vm0, %v8801_v63, 0.0 }
 0x44b   :  { %v2720_v13 = vpop.xlane.xlu1 %2719  ;;  %v2858_v1 = vpop.xlane.xlu0 %2857 }
 0x44c   :  { %v4290_v12 = vrot.slane %v2720_v13, %v9945_v35  ;;  %v4517_v26 = vrot.slane %v2858_v1, %v9928_v4  ;;  %v15768_v13 = vld [vmem:[#allocation91_spill] sm:$0xff] }
 0x44d   :  { %v8442_v61 = vunpack.i.h.bf16 %v15768_v13  ;;  %v8441_v1 = vunpack.i.l.bf16 %v15768_v13 }
 0x44e   :  { %v4291_v28 = vsel %vm3638_vm5, %v4290_v12, %v4286_v30  ;;  %v4518_v2 = vsel %vm3624_vm3, %v4517_v26, %v4513_v24  ;;  %2953 = vadd.xlane.f32.xlu1 %v2952_v9  ;;  %2902 = vadd.xlane.f32.xlu0 %v2901_v31  ;;  %v2571_v12 = vsel %vm526_vm0, %v8411_v5, 0.0  ;;  %v2520_v26 = vsel %vm526_vm0, %v8367_v11, 0.0 }
 0x44f   :  { %v2810_v49 = vpop.xlane.xlu1 %2809  ;;  %v2771_v3 = vpop.xlane.xlu0 %2770  ;;  %v2607_v11 = vsel %vm526_vm0, %v8441_v1, 0.0 }
 0x450   :  { %v4438_v14 = vrot.slane %v2810_v49, %v9928_v4  ;;  %v4374_v42 = vrot.slane %v2771_v3, %v9981_v58  ;;  %v15769_v49 = vld [vmem:[#allocation104_spill] sm:$0xff] }
 0x451   :  { %v8486_v3 = vunpack.i.l.bf16 %v15769_v49 }
 0x452   :  { %v4439_v30 = vsel %vm3624_vm3, %v4438_v14, %v4434_v23  ;;  %v4375_v24 = vsel %vm3645_vm6, %v4374_v42, %v4370_v45  ;;  %3043 = vadd.xlane.f32.xlu1 %v3042_v60  ;;  %3040 = vadd.xlane.f32.xlu0 %v3039_v18  ;;  %v8687_v14 = vunpack.i.h.bf16 %v12325_v51  ;;  %v2610_v42 = vsel %vm526_vm0, %v8442_v61, 0.0 }
 0x453   :  { %v2480_v22 = vpop.xlane.xlu1 %2479  ;;  %v2861_v44 = vpop.xlane.xlu0 %2860  ;;  %v8761_v51 = vunpack.i.l.bf16 %v12391_v40 }
 0x454   :  { %v3895_v21 = vrot.slane %v2480_v22, %v9945_v35  ;;  %v4522_v56 = vrot.slane %v2861_v44, %v9948_v25  ;;  %v8731_v44 = vunpack.i.l.bf16 %v12361_v16 }
 0x456   :  { %v3896_v23 = vsel %vm3638_vm5, %v3895_v21, %v12805_v33  ;;  %v4523_v45 = vsel %vm3631_vm4, %v4522_v56, %v4518_v2  ;;  %2572 = vadd.xlane.f32.xlu1 %v2571_v12  ;;  %2521 = vadd.xlane.f32.xlu0 %v2520_v26  ;;  %v2904_v21 = vsel %vm526_vm0, %v8687_v14, 0.0  ;;  %v2661_v56 = vsel %vm526_vm0, %v8486_v3, 0.0 }
 0x457   :  { %v2774_v32 = vpop.xlane.xlu1 %2773  ;;  %v2723_v63 = vpop.xlane.xlu0 %2722  ;;  %v8762_v26 = vunpack.i.h.bf16 %v12391_v40 }
 0x458   :  { %v4379_v9 = vrot.slane %v2774_v32, %v9963_v37  ;;  %v4295_v31 = vrot.slane %v2723_v63, %v9981_v58  ;;  %v8806_v32 = vunpack.i.l.bf16 %v12445_v46  ;;  %v2991_v63 = vsel %vm526_vm0, %v8761_v51, 0.0  ;;  %v15771_v51 = vld [vmem:[#allocation95_spill] sm:$0xff] }
 0x45a   :  { %v12979_v33 = vsel %vm15057_vm7, %v4379_v9, %v4375_v24  ;;  %v4296_v2 = vsel %vm3645_vm6, %v4295_v31, %v4291_v28  ;;  %2611 = vadd.xlane.f32.xlu1 %v2610_v42  ;;  %2608 = vadd.xlane.f32.xlu0 %v2607_v11  ;;  %v2955_v9 = vsel %vm526_vm0, %v8731_v44, 0.0  ;;  %v15770_v42 = vld [vmem:[#allocation69_spill] sm:$0xff]  ;;  %v8412_v11 = vunpack.i.h.bf16 %v15767_v39 }
 0x45b   :  { %v2864_v5 = vpop.xlane.xlu1 %2863  ;;  %v2813_v60 = vpop.xlane.xlu0 %2812  ;;  %v8371_v40 = vunpack.i.l.bf16 %v15770_v42 }
 0x45c   :  { %v4527_v18 = vrot.slane %v2864_v5, %v9945_v35  ;;  %v4443_v22 = vrot.slane %v2813_v60, %v9948_v25  ;;  %v3045_v5 = vsel %vm526_vm0, %v8806_v32, 0.0  ;;  %v2994_v60 = vsel %vm526_vm0, %v8762_v26, 0.0 }
 0x45d   :  { %v2574_v39 = vsel %vm526_vm0, %v8412_v11, 0.0  ;;  %v8691_v26 = vunpack.i.l.bf16 %v12321_v48  ;;  %v8732_v32 = vunpack.i.h.bf16 %v12361_v16 }
 0x45e   :  { %v4528_v24 = vsel %vm3638_vm5, %v4527_v18, %v4523_v45  ;;  %v4444_v28 = vsel %vm3631_vm4, %v4443_v22, %v4439_v30  ;;  %2905 = vadd.xlane.f32.xlu1 %v2904_v21  ;;  %2662 = vadd.xlane.f32.xlu0 %v2661_v56  ;;  %v8446_v21 = vunpack.i.l.bf16 %v15771_v51  ;;  %v8487_v56 = vunpack.i.h.bf16 %v15769_v49 }
 0x45f   :  { %v2726_v13 = vpop.xlane.xlu1 %2725  ;;  %v2483_v61 = vpop.xlane.xlu0 %2482  ;;  %v2958_v11 = vsel %vm526_vm0, %v8732_v32, 0.0  ;;  %v2907_v16 = vsel %vm526_vm0, %v8691_v26, 0.0  ;;  %v8447_v26 = vunpack.i.h.bf16 %v15771_v51  ;;  %v15774_v32 = vld [vmem:[#allocation102_spill] sm:$0xff] }
 0x460   :  { %v4300_v1 = vrot.slane %v2726_v13, %v9963_v37  ;;  %v3900_v12 = vrot.slane %v2483_v61, %v9981_v58  ;;  %v2523_v13 = vsel %vm526_vm0, %v8371_v40, 0.0  ;;  %v2664_v49 = vsel %vm526_vm0, %v8487_v56, 0.0 }
 0x461   :  { %v8807_v40 = vunpack.i.h.bf16 %v12445_v46  ;;  %v15772_v46 = vld [vmem:[#allocation88_spill] sm:$0xff]  ;;  %v2616_v51 = vsel %vm526_vm0, %v8447_v26, 0.0 }
 0x462   :  { %v12997_v45 = vsel %vm15057_vm7, %v4300_v1, %v4296_v2  ;;  %v3901_v30 = vsel %vm3645_vm6, %v3900_v12, %v3896_v23  ;;  %2992 = vadd.xlane.f32.xlu1 %v2991_v63  ;;  %2956 = vadd.xlane.f32.xlu0 %v2955_v9  ;;  %v2613_v63 = vsel %vm526_vm0, %v8446_v21, 0.0  ;;  %v8416_v21 = vunpack.i.l.bf16 %v15772_v46 }
 0x463   :  { %v2816_v31 = vpop.xlane.xlu1 %2815  ;;  %v13000_v3 = vpop.xlane.xlu0 %2776  ;;  %v3048_v56 = vsel %vm526_vm0, %v8807_v40, 0.0 }
 0x464   :  { %v4448_v14 = vrot.slane %v2816_v31, %v9945_v35 }
 0x466   :  { %v4449_v2 = vsel %vm3638_vm5, %v4448_v14, %v4444_v28  ;;  %3046 = vadd.xlane.f32.xlu1 %v3045_v5  ;;  %2995 = vadd.xlane.f32.xlu0 %v2994_v60  ;;  %v8766_v14 = vunpack.i.l.bf16 %v12405_v43 }
 0x467   :  { %v2486_v23 = vpop.xlane.xlu1 %2485  ;;  %v2867_v18 = vpop.xlane.xlu0 %2866 }
 0x468   :  { %v3905_v22 = vrot.slane %v2486_v23, %v9963_v37  ;;  %v4532_v44 = vrot.slane %v2867_v18, %v9981_v58 }
 0x46a   :  { %v3906_v61 = vsel %vm15057_vm7, %v3905_v22, %v3901_v30  ;;  %v4533_v28 = vsel %vm3645_vm6, %v4532_v44, %v4528_v24  ;;  %2575 = vadd.xlane.f32.xlu1 %v2574_v39  ;;  %2524 = vadd.xlane.f32.xlu0 %v2523_v13  ;;  %v8372_v44 = vunpack.i.h.bf16 %v15770_v42  ;;  %v2997_v39 = vsel %vm526_vm0, %v8766_v14, 0.0 }
 0x46b   :  { %v13016_v1 = vpop.xlane.xlu1 %2779  ;;  %v13018_v12 = vpop.xlane.xlu0 %2728  ;;  %v2577_v42 = vsel %vm526_vm0, %v8416_v21, 0.0  ;;  %v15775_v21 = vld [vmem:[#allocation78_spill] sm:$0xff] }
 0x46e   :  { %2665 = vadd.xlane.f32.xlu1 %v2664_v49  ;;  %2614 = vadd.xlane.f32.xlu0 %v2613_v63  ;;  %v8491_v49 = vunpack.i.l.bf16 %v15774_v32  ;;  %v2526_v63 = vsel %vm526_vm0, %v8372_v44, 0.0 }
 0x46f   :  { %v2870_v9 = vpop.xlane.xlu1 %2869  ;;  %v2819_v30 = vpop.xlane.xlu0 %2818 }
 0x470   :  { %v4537_v24 = vrot.slane %v2870_v9, %v9963_v37  ;;  %v4453_v31 = vrot.slane %v2819_v30, %v9981_v58  ;;  %v8692_v30 = vunpack.i.h.bf16 %v12321_v48 }
 0x472   :  { %v13031_v5 = vsel %vm15057_vm7, %v4537_v24, %v4533_v28  ;;  %v13034_v60 = vsel %vm3645_vm6, %v4453_v31, %v4449_v2  ;;  %2959 = vadd.xlane.f32.xlu1 %v2958_v11  ;;  %2908 = vadd.xlane.f32.xlu0 %v2907_v16  ;;  %v8736_v24 = vunpack.i.l.bf16 %v12375_v36  ;;  %v2667_v31 = vsel %vm526_vm0, %v8491_v49, 0.0 }
 0x473   :  { %v13036_v23 = vpop.xlane.xlu1 %2731  ;;  %v2489_v18 = vpop.xlane.xlu0 %2488  ;;  %v8767_v11 = vunpack.i.h.bf16 %v12405_v43  ;;  %v8811_v16 = vunpack.i.l.bf16 %v12441_v29  ;;  %v2910_v48 = vsel %vm526_vm0, %v8692_v30, 0.0 }
 0x474   :  { %v3910_v22 = vrot.slane %v2489_v18, %v10012_v53  ;;  %v2961_v18 = vsel %vm526_vm0, %v8736_v24, 0.0  ;;  %v8492_v24 = vunpack.i.h.bf16 %v15774_v32 }
 0x475   :  { %v3051_v26 = vsel %vm526_vm0, %v8811_v16, 0.0  ;;  %v3000_v43 = vsel %vm526_vm0, %v8767_v11, 0.0  ;;  %v8696_v11 = vunpack.i.l.bf16 %v12335_v47 }
 0x476   :  { %v13044_v13 = vsel %vm15773_vm8, %v3910_v22, %v3906_v61  ;;  %3049 = vadd.xlane.f32.xlu1 %v3048_v56  ;;  %2998 = vadd.xlane.f32.xlu0 %v2997_v39  ;;  %v8376_v56 = vunpack.i.l.bf16 %v15775_v21  ;;  %v8417_v39 = vunpack.i.h.bf16 %v15772_v46 }
 0x477   :  { %v13046_v2 = vpop.xlane.xlu1 %2821  ;;  %v13048_v28 = vpop.xlane.xlu0 %2782 }
 0x47a   :  { %2578 = vadd.xlane.f32.xlu1 %v2577_v42  ;;  %2527 = vadd.xlane.f32.xlu0 %v2526_v63  ;;  %v15776_v63 = vld [vmem:[#allocation93_spill] sm:$0xff] }
 0x47b   :  { %v13054_v9 = vpop.xlane.xlu1 %2491  ;;  %v13056_v61 = vpop.xlane.xlu0 %2872  ;;  %v8451_v30 = vunpack.i.l.bf16 %v15776_v63 }
 0x47e   :  { %2668 = vadd.xlane.f32.xlu1 %v2667_v31  ;;  %2617 = vadd.xlane.f32.xlu0 %v2616_v51  ;;  %v2580_v31 = vsel %vm526_vm0, %v8417_v39, 0.0  ;;  %v2529_v51 = vsel %vm526_vm0, %v8376_v56, 0.0  ;;  %v8771_v56 = vunpack.i.l.bf16 %v12401_v57 }
 0x47f   :  { %v13062_v14 = vpop.xlane.xlu1 %2785  ;;  %v13064_v40 = vpop.xlane.xlu0 %2734 }
 0x480   :  { %v3003_v35 = vsel %vm526_vm0, %v8771_v56, 0.0 }
 0x482   :  { %2962 = vadd.xlane.f32.xlu1 %v2961_v18  ;;  %2911 = vadd.xlane.f32.xlu0 %v2910_v48  ;;  %v8737_v18 = vunpack.i.h.bf16 %v12375_v36  ;;  %v2670_v48 = vsel %vm526_vm0, %v8492_v24, 0.0 }
 0x483   :  { %v13070_v22 = vpop.xlane.xlu1 %2875  ;;  %v13072_v44 = vpop.xlane.xlu0 %2824 }
 0x486   :  { %3052 = vadd.xlane.f32.xlu1 %v3051_v26  ;;  %3001 = vadd.xlane.f32.xlu0 %v3000_v43  ;;  %v2619_v26 = vsel %vm526_vm0, %v8451_v30, 0.0  ;;  %v8812_v43 = vunpack.i.h.bf16 %v12441_v29  ;;  %v8377_v30 = vunpack.i.h.bf16 %v15775_v21 }
 0x487   :  { %v13078_v49 = vpop.xlane.xlu1 %2737  ;;  %v13080_v42 = vpop.xlane.xlu0 %2494 }
 0x488   :  { %v3054_v58 = vsel %vm526_vm0, %v8812_v43, 0.0  ;;  %v2532_v21 = vsel %vm526_vm0, %v8377_v30, 0.0 }
 0x48a   :  { %2581 = vadd.xlane.f32.xlu1 %v2580_v31  ;;  %2530 = vadd.xlane.f32.xlu0 %v2529_v51  ;;  %v2964_v31 = vsel %vm526_vm0, %v8737_v18, 0.0  ;;  %v2913_v51 = vsel %vm526_vm0, %v8696_v11, 0.0  ;;  %v8452_v11 = vunpack.i.h.bf16 %v15776_v63 }
 0x48b   :  { %v13086_v46 = vpop.xlane.xlu1 %2827  ;;  %v13088_v16 = vpop.xlane.xlu0 %2788 }
 0x48c   :  { %v2622_v63 = vsel %vm526_vm0, %v8452_v11, 0.0  ;;  %v4394_v11 = vrot.slane %v13048_v28, %v10044_v8 }
 0x48e   :  { %2671 = vadd.xlane.f32.xlu1 %v2670_v48  ;;  %2620 = vadd.xlane.f32.xlu0 %v2619_v26  ;;  %v15777_v48 = vld [vmem:[#allocation87_spill] sm:$0xff] }
 0x48f   :  { %v13094_v32 = vpop.xlane.xlu1 %2497  ;;  %v13096_v39 = vpop.xlane.xlu0 %2878  ;;  %v8421_v26 = vunpack.i.l.bf16 %v15777_v48 }
 0x491   :  { %v2583_v25 = vsel %vm526_vm0, %v8421_v26, 0.0  ;;  %v4384_v26 = vrot.slane %v13000_v3, %v10012_v53  ;;  %v4399_v3 = vrot.slane %v13062_v14, %v10041_v41 }
 0x492   :  { %2965 = vadd.xlane.f32.xlu1 %v2964_v31  ;;  %2914 = vadd.xlane.f32.xlu0 %v2913_v51  ;;  %v15778_v31 = vld [vmem:[#allocation106_spill] sm:$0xff] }
 0x493   :  { %v2792_v36 = vpop.xlane.xlu1 %2791  ;;  %v13102_v24 = vpop.xlane.xlu0 %2740  ;;  %v8496_v51 = vunpack.i.l.bf16 %v15778_v31 }
 0x494   :  { %v4409_v14 = vrot.slane %v2792_v36, %v10059_v52 }
 0x495   :  { %v2673_v56 = vsel %vm526_vm0, %v8496_v51, 0.0 }
 0x496   :  { %3055 = vadd.xlane.f32.xlu1 %v3054_v58  ;;  %3004 = vadd.xlane.f32.xlu0 %v3003_v35  ;;  %v8697_v35 = vunpack.i.h.bf16 %v12335_v47  ;;  %v8741_v58 = vunpack.i.l.bf16 %v12371_v6  ;;  %v8772_v47 = vunpack.i.h.bf16 %v12401_v57  ;;  %v4404_v57 = vrot.slane %v13088_v16, %v10074_v50 }
 0x497   :  { %v13108_v29 = vpop.xlane.xlu1 %2881  ;;  %v13110_v18 = vpop.xlane.xlu0 %2830 }
 0x498   :  { %v2916_v38 = vsel %vm526_vm0, %v8697_v35, 0.0  ;;  %v2967_v51 = vsel %vm526_vm0, %v8741_v58, 0.0  ;;  %v4385_v35 = vsel %vm15773_vm8, %v4384_v26, %v12979_v33  ;;  %v3006_v27 = vsel %vm526_vm0, %v8772_v47, 0.0 }
 0x499   :  { %vm15780_vm8 = vcmask 786112   ;;  %v4305_v26 = vrot.slane %v13018_v12, %v10012_v53  ;;  %v4310_v47 = vrot.slane %v13036_v23, %v9997_v20  ;;  %v8497_v12 = vunpack.i.h.bf16 %v15778_v31 }
 0x49a   :  { %2584 = vadd.xlane.f32.xlu1 %v2583_v25  ;;  %2533 = vadd.xlane.f32.xlu0 %v2532_v21  ;;  %v4389_v21 = vrot.slane %v13016_v1, %v9997_v20  ;;  %v8422_v1 = vunpack.i.h.bf16 %v15777_v48  ;;  %v3057_v48 = vsel %vm526_vm0, %v8816_v62, 0.0  ;;  %v15781_v62 = vld [vmem:[#allocation90_spill] sm:$0xff]  ;;  %v4325_v31 = vrot.slane %v13102_v24, %v10074_v50 }
 0x49b   :  { %v13116_v4 = vpop.xlane.xlu1 %2743  ;;  %v13118_v43 = vpop.xlane.xlu0 %2500 }
 0x49c   :  { %v4390_v58 = vsel %vm15058_vm9, %v4389_v21, %v4385_v35 }
 0x49e   :  { %2674 = vadd.xlane.f32.xlu1 %v2673_v56  ;;  %2623 = vadd.xlane.f32.xlu0 %v2622_v63  ;;  %v15779_v56 = vld [vmem:[#allocation76_spill] sm:$0xff] }
 0x49f   :  { %v13126_v30 = vpop.xlane.xlu1 %2833  ;;  %v2795_v25 = vpop.xlane.xlu0 %2794  ;;  %v8381_v63 = vunpack.i.l.bf16 %v15779_v56  ;;  %v8382_v33 = vunpack.i.h.bf16 %v15779_v56  ;;  %v15782_v56 = vld [vmem:[#allocation97_spill] sm:$0xff] }
 0x4a2   :  { %2968 = vadd.xlane.f32.xlu1 %v2967_v51  ;;  %2917 = vadd.xlane.f32.xlu0 %v2916_v38  ;;  %v4395_v38 = vsel %vm3673_vm10, %v4394_v11, %v4390_v58  ;;  %v4414_v51 = vrot.slane %v2795_v25, %v15743_v19  ;;  %v2586_v11 = vsel %vm526_vm0, %v8422_v1, 0.0  ;;  %v2535_v25 = vsel %vm526_vm0, %v8381_v63, 0.0 }
 0x4a3   :  { %v13144_v54 = vpop.xlane.xlu1 %2503  ;;  %v13146_v28 = vpop.xlane.xlu0 %2884  ;;  %v4400_v16 = vsel %vm15780_vm8, %v4399_v3, %v4395_v38  ;;  %v8426_v58 = vunpack.i.l.bf16 %v15781_v62  ;;  %v8456_v38 = vunpack.i.l.bf16 %v15782_v56  ;;  %vm15784_vm8 = vcmask 589312  }
 0x4a4   :  { %v4405_v21 = vsel %vm3687_vm12, %v4404_v57, %v4400_v16  ;;  %v4315_v57 = vrot.slane %v13064_v40, %v10044_v8  ;;  %v4320_v16 = vrot.slane %v13078_v49, %v10041_v41 }
 0x4a5   :  { %v4410_v3 = vsel %vm3694_vm13, %v4409_v14, %v4405_v21  ;;  %v8742_v14 = vunpack.i.h.bf16 %v12371_v6  ;;  %v4306_v21 = vsel %vm15784_vm8, %v4305_v26, %v12997_v45  ;;  %v13190_v6 = vsel %vm526_vm0, %v8426_v58, 0.0 }
 0x4a6   :  { %3058 = vadd.xlane.f32.xlu1 %v3057_v48  ;;  %3007 = vadd.xlane.f32.xlu0 %v3006_v27  ;;  %v4415_v1 = vsel %vm3701_vm14, %v4414_v51, %v4410_v3  ;;  %v15783_v48 = vld [vmem:[#allocation122_spill] sm:$0xff]  ;;  %v4311_v49 = vsel %vm15058_vm9, %v4310_v47, %v4306_v21  ;;  %v13193_v45 = vsel %vm526_vm0, %v8382_v33, 0.0  ;;  %v8457_v47 = vunpack.i.h.bf16 %v15782_v56 }
 0x4a7   :  { %v2798_v36 = vpop.xlane.xlu1 %2797  ;;  %v2747_v35 = vpop.xlane.xlu0 %2746  ;;  %v8701_v63 = vunpack.i.l.bf16 %v15783_v48  ;;  %v4316_v24 = vsel %vm3673_vm10, %v4315_v57, %v4311_v49  ;;  %v8776_v3 = vunpack.i.l.bf16 %v12415_v17  ;;  %vm15785_vm8 = vcmask 786112  }
 0x4a8   :  { %v4419_v27 = vrot.slane %v2798_v36, %v15742_v15  ;;  %v4335_v26 = vrot.slane %v2747_v35, %v15743_v19  ;;  %v8817_v33 = vunpack.i.h.bf16 %v12455_v34  ;;  %v2970_v56 = vsel %vm526_vm0, %v8742_v14, 0.0 }
 0x4a9   :  { %v2919_v58 = vsel %vm526_vm0, %v8701_v63, 0.0  ;;  %v3009_v21 = vsel %vm526_vm0, %v8776_v3, 0.0 }
 0x4aa   :  { %2587 = vadd.xlane.f32.xlu1 %v2586_v11  ;;  %2536 = vadd.xlane.f32.xlu0 %v2535_v25  ;;  %v4420_v23 = vsel %vm3708_vm15, %v4419_v27, %v4415_v1  ;;  %v4330_v11 = vrot.slane %v13116_v4, %v10059_v52  ;;  %v2676_v25 = vsel %vm526_vm0, %v8497_v12, 0.0  ;;  %v4321_v4 = vsel %vm15785_vm8, %v4320_v16, %v4316_v24 }
 0x4ab   :  { %v13180_v40 = vpop.xlane.xlu1 %2887  ;;  %v13182_v51 = vpop.xlane.xlu0 %2836  ;;  %v4897_v36 = vsel %vm4895_vm11, %v4420_v23, %v12603_v55  ;;  %v2625_v55 = vsel %vm526_vm0, %v8456_v38, 0.0  ;;  %v4458_v27 = vrot.slane %v13046_v2, %v9963_v37  ;;  %v4326_v35 = vsel %vm3687_vm12, %v4325_v31, %v4321_v4 }
 0x4ac   :  { %4976 = vmatprep.mubr.f32.mxu0 %v4897_v36  ;;  %v3915_v38 = vrot.slane %v13054_v9, %v9997_v20  ;;  %v4542_v1 = vrot.slane %v13056_v61, %v10012_v53  ;;  %v4331_v63 = vsel %vm3694_vm13, %v4330_v11, %v4326_v35  ;;  %v4547_v2 = vrot.slane %v13070_v22, %v9997_v20 }
 0x4ad   :  { %v4463_v16 = vrot.slane %v13072_v44, %v10012_v53  ;;  %v3920_v23 = vrot.slane %v13080_v42, %v10044_v8  ;;  %v4336_v14 = vsel %vm3701_vm14, %v4335_v26, %v4331_v63  ;;  %v4468_v9 = vrot.slane %v13086_v46, %v9997_v20 }
 0x4ae   :  { %2677 = vadd.xlane.f32.xlu1 %v2676_v25  ;;  %2626 = vadd.xlane.f32.xlu0 %v2625_v55  ;;  %v2628_v31 = vsel %vm526_vm0, %v8457_v47, 0.0  ;;  %v4459_v22 = vsel %vm15057_vm7, %v4458_v27, %v13034_v60  ;;  %v4552_v44 = vrot.slane %v13096_v39, %v10044_v8  ;;  %v3060_v46 = vsel %vm526_vm0, %v8817_v33, 0.0 }
 0x4af   :  { %v2750_v12 = vpop.xlane.xlu1 %2749  ;;  %v13207_v57 = vpop.xlane.xlu0 %2506  ;;  %v3916_v11 = vsel %vm15058_vm9, %v3915_v38, %v13044_v13  ;;  %vm15786_vm8 = vcmask 589312   ;;  %v3925_v26 = vrot.slane %v13094_v32, %v10041_v41  ;;  %v4557_v60 = vrot.slane %v13108_v29, %v10041_v41  ;;  %v15788_v13 = vld [vmem:[#allocation105_spill] sm:$0xff] }
 0x4b0   :  { %v4340_v34 = vrot.slane %v2750_v12, %v15742_v15  ;;  %v4543_v24 = vsel %vm15786_vm8, %v4542_v1, %v13031_v5  ;;  %vm15787_vm7 = vmmov %vm15786_vm8  ;;  %v4473_v55 = vrot.slane %v13110_v18, %v10044_v8  ;;  %v8501_v47 = vunpack.i.l.bf16 %v15788_v13 }
 0x4b1   :  { %v4548_v39 = vsel %vm15058_vm9, %v4547_v2, %v4543_v24  ;;  %v4464_v25 = vsel %vm15787_vm7, %v4463_v16, %v4459_v22  ;;  %v3930_v32 = vrot.slane %v13118_v43, %v10074_v50  ;;  %v4478_v29 = vrot.slane %v13126_v30, %v10041_v41 }
 0x4b2   :  { %2971 = vadd.xlane.f32.xlu1 %v2970_v56  ;;  %2920 = vadd.xlane.f32.xlu0 %v2919_v58  ;;  %v4341_v61 = vsel %vm3708_vm15, %v4340_v34, %v4336_v14  ;;  %v4469_v5 = vsel %vm15058_vm9, %v4468_v9, %v4464_v25  ;;  %v4553_v3 = vsel %vm3673_vm10, %v4552_v44, %v4548_v39  ;;  %vm15789_vm7 = vcmask 786112   ;;  %v15792_v39 = vld [vmem:[#allocation70_spill] sm:$0xff] }
 0x4b3   :  { %v2891_v42 = vpop.xlane.xlu1 %2890  ;;  %v2840_v36 = vpop.xlane.xlu0 %2839  ;;  %v4896_v49 = vsel %vm4895_vm11, %v4341_v61, %v12538_v7  ;;  %v3921_v7 = vsel %vm3673_vm10, %v3920_v23, %v3916_v11  ;;  %v3935_v4 = vrot.slane %v13144_v54, %v10059_v52  ;;  %v4562_v18 = vrot.slane %v13146_v28, %v10074_v50  ;;  %vm15790_vm8 = vmmov %vm15789_vm7 }
 0x4b4   :  { %4977 = vmatmul.mubr.f32.vlgmr.msra.gmra.mrb[0].mxu0 %v4896_v49  ;;  %v4483_v58 = vrot.slane %v13182_v51, %v10074_v50  ;;  %v3926_v43 = vsel %vm15789_vm7, %v3925_v26, %v3921_v7  ;;  %v4558_v35 = vsel %vm15790_vm8, %v4557_v60, %v4553_v3  ;;  %v4567_v30 = vrot.slane %v13180_v40, %v10059_v52  ;;  %vm15791_vm9 = vmmov %vm15789_vm7  ;;  %v15793_v7 = vld [vmem:[#allocation133_spill] sm:$0xff] }
 0x4b5   :  { %v4488_v12 = vrot.slane %v2840_v36, %v10059_v52  ;;  %v4474_v56 = vsel %vm3673_vm10, %v4473_v55, %v4469_v5  ;;  %v3940_v54 = vrot.slane %v13207_v57, %v15743_v19  ;;  %v4572_v28 = vrot.slane %v2891_v42, %v15743_v19 }
 0x4b6   :  { %3061 = vadd.xlane.f32.xlu1 %v3060_v46  ;;  %3010 = vadd.xlane.f32.xlu0 %v3009_v21  ;;  %v3931_v38 = vsel %vm3687_vm12, %v3930_v32, %v3926_v43  ;;  %v4479_v1 = vsel %vm15791_vm9, %v4478_v29, %v4474_v56  ;;  %v2679_v40 = vsel %vm526_vm0, %v8501_v47, 0.0  ;;  %v8702_v34 = vunpack.i.h.bf16 %v15783_v48 }
 0x4b7   :  { %v2843_v33 = vpop.xlane.xlu1 %2842  ;;  %v2510_v27 = vpop.xlane.xlu0 %2509  ;;  %v3936_v57 = vsel %vm3694_vm13, %v3935_v4, %v3931_v38  ;;  %v4563_v2 = vsel %vm3687_vm12, %v4562_v18, %v4558_v35  ;;  %v4484_v16 = vsel %vm3687_vm12, %v4483_v58, %v4479_v1  ;;  %v8746_v21 = vunpack.i.l.bf16 %v12385_v59  ;;  %v15794_v18 = vld [vmem:[#allocation80_spill] sm:$0xff] }
 0x4b8   :  { %v4493_v51 = vrot.slane %v2843_v33, %v15743_v19  ;;  %v3945_v63 = vrot.slane %v2510_v27, %v15742_v15  ;;  %v4568_v9 = vsel %vm3694_vm13, %v4567_v30, %v4563_v2  ;;  %v4489_v61 = vsel %vm3694_vm13, %v4488_v12, %v4484_v16  ;;  %v15797_v2 = vld [vmem:[#allocation124_spill] sm:$0xff] }
 0x4b9   :  { %v3941_v48 = vsel %vm3701_vm14, %v3940_v54, %v3936_v57  ;;  %v4573_v22 = vsel %vm3701_vm14, %v4572_v28, %v4568_v9  ;;  %v8821_v55 = vunpack.i.l.bf16 %v15793_v7  ;;  %v2973_v47 = vsel %vm526_vm0, %v8746_v21, 0.0  ;;  %v15795_v54 = vld [vmem:[#allocation96_spill] sm:$0xff] }
 0x4ba   :  { %2590 = vadd.xlane.f32.xlu1 %v13190_v6  ;;  %2539 = vadd.xlane.f32.xlu0 %v13193_v45  ;;  %v4494_v44 = vsel %vm3701_vm14, %v4493_v51, %v4489_v61  ;;  %v3946_v42 = vsel %vm3708_vm15, %v3945_v63, %v3941_v48  ;;  %v2922_v5 = vsel %vm526_vm0, %v8702_v34, 0.0  ;;  %v8386_v58 = vunpack.i.l.bf16 %v15794_v18  ;;  %v15796_v34 = vld [vmem:[#allocation71_spill] sm:$0xff] }
 0x4bb   :  { %v2846_v23 = vpop.xlane.xlu1 %2845  ;;  %v2894_v14 = vpop.xlane.xlu0 %2893  ;;  %v3063_v33 = vsel %vm526_vm0, %v8821_v55, 0.0  ;;  %v8461_v28 = vunpack.i.l.bf16 %v15795_v54  ;;  %v8502_v51 = vunpack.i.h.bf16 %v15788_v13  ;;  %v8706_v16 = vunpack.i.l.bf16 %v15797_v2  ;;  %v15800_v55 = vld [vmem:[#allocation89_spill] sm:$0xff] }
 0x4bc   :  { %v4498_v6 = vrot.slane %v2846_v23, %v15742_v15  ;;  %v4577_v45 = vrot.slane %v2894_v14, %v15742_v15  ;;  %v2541_v38 = vsel %vm526_vm0, %v8386_v58, 0.0  ;;  %v8747_v23 = vunpack.i.h.bf16 %v12385_v59 }
 0x4bd   :  { %v2682_v14 = vsel %vm526_vm0, %v8502_v51, 0.0  ;;  %v2631_v13 = vsel %vm526_vm0, %v8461_v28, 0.0  ;;  %v8822_v59 = vunpack.i.h.bf16 %v15793_v7  ;;  %v8431_v7 = vunpack.i.l.bf16 %v15800_v55 }
 0x4be   :  { %2680 = vadd.xlane.f32.xlu1 %v2679_v40  ;;  %2629 = vadd.xlane.f32.xlu0 %v2628_v31  ;;  %v4578_v36 = vsel %vm3708_vm15, %v4577_v45, %v4573_v22  ;;  %v4499_v49 = vsel %vm3708_vm15, %v4498_v6, %v4494_v44  ;;  %v8777_v31 = vunpack.i.h.bf16 %v12415_v17  ;;  %v8427_v17 = vunpack.i.h.bf16 %v15781_v62  ;;  %v15798_v22 = vld [vmem:[#allocation128_spill] sm:$0xff] }
 0x4bf   :  { %v2564_v46 = vpop.xlane.xlu1 %2563  ;;  %v2561_v11 = vpop.xlane.xlu0 %2560  ;;  %v4899_v24 = vsel %vm4895_vm11, %v4578_v36, %v3946_v42  ;;  %v4898_v26 = vsel %vm4895_vm11, %v4499_v49, %v12728_v10  ;;  %v8781_v44 = vunpack.i.l.bf16 %v15798_v22  ;;  %v2976_v42 = vsel %vm526_vm0, %v8747_v23, 0.0 }
 0x4c0   :  { %v4033_v60 = vrot.slane %v2564_v46, %v9916_v0  ;;  %v4029_v25 = vrot.slane %v2561_v11, %v15792_v39  ;;  %5046 = vmatprep.mubr.f32.mxu1 %v4899_v24  ;;  %v3012_v27 = vsel %vm526_vm0, %v8777_v31, 0.0  ;;  %v2592_v62 = vsel %vm526_vm0, %v8427_v17, 0.0  ;;  %v15801_v17 = vld [vmem:[#allocation108_spill] sm:$0xff] }
 0x4c1   :  { %5047 = vmatmul.mubr.f32.vlgmr.msra.gmra.mrb[0].mxu1 %v4898_v26  ;;  %v2925_v36 = vsel %vm526_vm0, %v8706_v16, 0.0  ;;  %v15799_v26 = vld [vmem:[#allocation72_spill] sm:$0xff]  ;;  %v8387_v31 = vunpack.i.h.bf16 %v15794_v18  ;;  %v8462_v18 = vunpack.i.h.bf16 %v15795_v54  ;;  %v8707_v51 = vunpack.i.h.bf16 %v15797_v2 }
 0x4c2   :  { %v4034_v32 = vsel %vm3610_vm1, %v4033_v60, %v4029_v25  ;;  %2974 = vadd.xlane.f32.xlu1 %v2973_v47  ;;  %2923 = vadd.xlane.f32.xlu0 %v2922_v5  ;;  %v3066_v47 = vsel %vm526_vm0, %v8822_v59, 0.0  ;;  %v3015_v5 = vsel %vm526_vm0, %v8781_v44, 0.0  ;;  %v8782_v2 = vunpack.i.h.bf16 %v15798_v22  ;;  %v15804_v44 = vld [vmem:[#allocation75_spill] sm:$0xff] }
 0x4c3   :  { %v2948_v29 = vpop.xlane.xlu1 %2947  ;;  %v2945_v10 = vpop.xlane.xlu0 %2944  ;;  %v8432_v22 = vunpack.i.h.bf16 %v15800_v55  ;;  %v8507_v55 = vunpack.i.h.bf16 %v15801_v17  ;;  %vm15820_vm9 = vcmask 523712   ;;  %vm15825_vm8 = vcmask 589312  }
 0x4c4   :  { %v4665_v3 = vrot.slane %v2948_v29, %v9916_v0  ;;  %v4661_v4 = vrot.slane %v2945_v10, %v15792_v39  ;;  %vm15823_vm7 = vmmov %vm15820_vm9 }
 0x4c6   :  { %v4666_v43 = vsel %vm3610_vm1, %v4665_v3, %v4661_v4  ;;  %3064 = vadd.xlane.f32.xlu1 %v3063_v33  ;;  %3013 = vadd.xlane.f32.xlu0 %v3012_v27  ;;  %v8506_v33 = vunpack.i.l.bf16 %v15801_v17  ;;  %v2595_v27 = vsel %vm526_vm0, %v8431_v7, 0.0  ;;  %v2688_v17 = vsel %vm526_vm0, %v8507_v55, 0.0 }
 0x4c7   :  { %v2516_v35 = vpop.xlane.xlu1 %2515  ;;  %v2513_v30 = vpop.xlane.xlu0 %2512 }
 0x4c8   :  { %v3954_v12 = vrot.slane %v2516_v35, %v9916_v0  ;;  %v3950_v56 = vrot.slane %v2513_v30, %v15792_v39 }
 0x4ca   :  { %v3955_v1 = vsel %vm3610_vm1, %v3954_v12, %v3950_v56  ;;  %2593 = vadd.xlane.f32.xlu1 %v2592_v62  ;;  %2542 = vadd.xlane.f32.xlu0 %v2541_v38  ;;  %v15802_v62 = vld [vmem:[#allocation126_spill] sm:$0xff]  ;;  %v2685_v38 = vsel %vm526_vm0, %v8506_v33, 0.0 }
 0x4cb   :  { %v2897_v63 = vpop.xlane.xlu1 %2896  ;;  %v2567_v40 = vpop.xlane.xlu0 %2566  ;;  %v8751_v54 = vunpack.i.l.bf16 %v15802_v62 }
 0x4cc   :  { %v4038_v57 = vrot.slane %v2567_v40, %v15796_v34  ;;  %v4582_v45 = vrot.slane %v2897_v63, %v15792_v39 }
 0x4ce   :  { %v4039_v9 = vsel %vm3617_vm2, %v4038_v57, %v4034_v32  ;;  %2683 = vadd.xlane.f32.xlu1 %v2682_v14  ;;  %2632 = vadd.xlane.f32.xlu0 %v2631_v13  ;;  %v15803_v13 = vld [vmem:[#allocation135_spill] sm:$0xff] }
 0x4cf   :  { %v2951_v61 = vpop.xlane.xlu1 %2950  ;;  %v2900_v6 = vpop.xlane.xlu0 %2899 }
 0x4d0   :  { %v4670_v21 = vrot.slane %v2951_v61, %v15796_v34  ;;  %v4586_v48 = vrot.slane %v2900_v6, %v9916_v0  ;;  %v2979_v61 = vsel %vm526_vm0, %v8751_v54, 0.0  ;;  %v2928_v6 = vsel %vm526_vm0, %v8707_v51, 0.0 }
 0x4d2   :  { %v4671_v49 = vsel %vm3617_vm2, %v4670_v21, %v4666_v43  ;;  %v4587_v46 = vsel %vm3610_vm1, %v4586_v48, %v4582_v45  ;;  %2977 = vadd.xlane.f32.xlu1 %v2976_v42  ;;  %2926 = vadd.xlane.f32.xlu0 %v2925_v36  ;;  %v2544_v43 = vsel %vm526_vm0, %v8387_v31, 0.0  ;;  %v15805_v36 = vld [vmem:[#allocation79_spill] sm:$0xff] }
 0x4d3   :  { %v2570_v11 = vpop.xlane.xlu1 %2569  ;;  %v2519_v24 = vpop.xlane.xlu0 %2518 }
 0x4d4   :  { %v4043_v60 = vrot.slane %v2570_v11, %v15799_v26  ;;  %v3959_v25 = vrot.slane %v2519_v24, %v15796_v34  ;;  %v3018_v11 = vsel %vm526_vm0, %v8782_v2, 0.0 }
 0x4d6   :  { %v4044_v32 = vsel %vm3624_vm3, %v4043_v60, %v4039_v9  ;;  %v3960_v29 = vsel %vm3617_vm2, %v3959_v25, %v3955_v1  ;;  %3067 = vadd.xlane.f32.xlu1 %v3066_v47  ;;  %3016 = vadd.xlane.f32.xlu0 %v3015_v5  ;;  %v2634_v1 = vsel %vm526_vm0, %v8462_v18, 0.0  ;;  %v8826_v9 = vunpack.i.l.bf16 %v15803_v13  ;;  %v15806_v5 = vld [vmem:[#allocation99_spill] sm:$0xff] }
 0x4d7   :  { %v2660_v10 = vpop.xlane.xlu1 %2659  ;;  %v2657_v3 = vpop.xlane.xlu0 %2656 }
 0x4d8   :  { %v4191_v4 = vrot.slane %v2660_v10, %v9916_v0  ;;  %v4187_v58 = vrot.slane %v2657_v3, %v15792_v39  ;;  %v8466_v10 = vunpack.i.l.bf16 %v15806_v5  ;;  %v2598_v3 = vsel %vm526_vm0, %v8432_v22, 0.0 }
 0x4da   :  { %v4192_v35 = vsel %vm3610_vm1, %v4191_v4, %v4187_v58  ;;  %2596 = vadd.xlane.f32.xlu1 %v2595_v27  ;;  %2545 = vadd.xlane.f32.xlu0 %v2544_v43  ;;  %v15807_v27 = vld [vmem:[#allocation123_spill] sm:$0xff] }
 0x4db   :  { %v2954_v30 = vpop.xlane.xlu1 %2953  ;;  %v2903_v12 = vpop.xlane.xlu0 %2902  ;;  %v8711_v43 = vunpack.i.l.bf16 %v15807_v27 }
 0x4dc   :  { %v4675_v56 = vrot.slane %v2954_v30, %v15799_v26  ;;  %v4591_v28 = vrot.slane %v2903_v12, %v15796_v34  ;;  %v8752_v30 = vunpack.i.h.bf16 %v15802_v62  ;;  %v2637_v12 = vsel %vm526_vm0, %v8466_v10, 0.0 }
 0x4de   :  { %v4676_v63 = vsel %vm3624_vm3, %v4675_v56, %v4671_v49  ;;  %v4592_v40 = vsel %vm3617_vm2, %v4591_v28, %v4587_v46  ;;  %2686 = vadd.xlane.f32.xlu1 %v2685_v38  ;;  %2635 = vadd.xlane.f32.xlu0 %v2634_v1  ;;  %v8391_v49 = vunpack.i.l.bf16 %v15805_v36  ;;  %v3069_v46 = vsel %vm526_vm0, %v8826_v9, 0.0  ;;  %v15808_v1 = vld [vmem:[#allocation131_spill] sm:$0xff] }
 0x4df   :  { %v3044_v57 = vpop.xlane.xlu1 %3043  ;;  %v3041_v16 = vpop.xlane.xlu0 %3040  ;;  %v2982_v62 = vsel %vm526_vm0, %v8752_v30, 0.0 }
 0x4e0   :  { %v4823_v23 = vrot.slane %v3044_v57, %v9916_v0  ;;  %v4819_v14 = vrot.slane %v3041_v16, %v15792_v39  ;;  %v2547_v4 = vsel %vm526_vm0, %v8391_v49, 0.0  ;;  %v8786_v57 = vunpack.i.l.bf16 %v15808_v1 }
 0x4e1   :  { %v8827_v16 = vunpack.i.h.bf16 %v15803_v13 }
 0x4e2   :  { %v4824_v45 = vsel %vm3610_vm1, %v4823_v23, %v4819_v14  ;;  %2980 = vadd.xlane.f32.xlu1 %v2979_v61  ;;  %2929 = vadd.xlane.f32.xlu0 %v2928_v6  ;;  %v2931_v23 = vsel %vm526_vm0, %v8711_v43, 0.0  ;;  %v8392_v6 = vunpack.i.h.bf16 %v15805_v36  ;;  %v8467_v36 = vunpack.i.h.bf16 %v15806_v5 }
 0x4e3   :  { %v2573_v21 = vpop.xlane.xlu1 %2572  ;;  %v2522_v48 = vpop.xlane.xlu0 %2521  ;;  %v8712_v5 = vunpack.i.h.bf16 %v15807_v27  ;;  %v8787_v27 = vunpack.i.h.bf16 %v15808_v1 }
 0x4e4   :  { %v4048_v59 = vrot.slane %v2573_v21, %v15804_v44  ;;  %v3964_v42 = vrot.slane %v2522_v48, %v15799_v26  ;;  %v15809_v21 = vld [vmem:[#allocation92_spill] sm:$0xff]  ;;  %v3072_v48 = vsel %vm526_vm0, %v8827_v16, 0.0  ;;  %v2550_v10 = vsel %vm526_vm0, %v8392_v6, 0.0 }
 0x4e5   :  { %v8436_v13 = vunpack.i.l.bf16 %v15809_v21  ;;  %v2640_v30 = vsel %vm526_vm0, %v8467_v36, 0.0 }
 0x4e6   :  { %v4049_v24 = vsel %vm3631_vm4, %v4048_v59, %v4044_v32  ;;  %v3965_v60 = vsel %vm3624_vm3, %v3964_v42, %v3960_v29  ;;  %3070 = vadd.xlane.f32.xlu1 %v3069_v46  ;;  %3019 = vadd.xlane.f32.xlu0 %v3018_v11  ;;  %v3021_v59 = vsel %vm526_vm0, %v8786_v57, 0.0  ;;  %v15810_v46 = vld [vmem:[#allocation74_spill] sm:$0xff] }
 0x4e7   :  { %v2612_v25 = vpop.xlane.xlu1 %2611  ;;  %v2609_v31 = vpop.xlane.xlu0 %2608 }
 0x4e8   :  { %v4112_v7 = vrot.slane %v2612_v25, %v9916_v0  ;;  %v4108_v47 = vrot.slane %v2609_v31, %v15792_v39  ;;  %v15811_v31 = vld [vmem:[#allocation107_spill] sm:$0xff] }
 0x4e9   :  { %v8512_v36 = vunpack.i.h.bf16 %v15811_v31 }
 0x4ea   :  { %v4113_v32 = vsel %vm3610_vm1, %v4112_v7, %v4108_v47  ;;  %2599 = vadd.xlane.f32.xlu1 %v2598_v3  ;;  %2548 = vadd.xlane.f32.xlu0 %v2547_v4  ;;  %v8511_v7 = vunpack.i.l.bf16 %v15811_v31  ;;  %v2601_v47 = vsel %vm526_vm0, %v8436_v13, 0.0  ;;  %v3024_v13 = vsel %vm526_vm0, %v8787_v27, 0.0 }
 0x4eb   :  { %v2906_v29 = vpop.xlane.xlu1 %2905  ;;  %v2663_v58 = vpop.xlane.xlu0 %2662 }
 0x4ec   :  { %v4596_v18 = vrot.slane %v2906_v29, %v15799_v26  ;;  %v4196_v33 = vrot.slane %v2663_v58, %v15796_v34  ;;  %v2691_v43 = vsel %vm526_vm0, %v8511_v7, 0.0 }
 0x4ee   :  { %v4597_v56 = vsel %vm3624_vm3, %v4596_v18, %v4592_v40  ;;  %v4197_v28 = vsel %vm3617_vm2, %v4196_v33, %v4192_v35  ;;  %2689 = vadd.xlane.f32.xlu1 %v2688_v17  ;;  %2638 = vadd.xlane.f32.xlu0 %v2637_v12  ;;  %v15812_v18 = vld [vmem:[#allocation127_spill] sm:$0xff] }
 0x4ef   :  { %v2993_v51 = vpop.xlane.xlu1 %2992  ;;  %v2957_v54 = vpop.xlane.xlu0 %2956  ;;  %v8756_v33 = vunpack.i.l.bf16 %v15812_v18 }
 0x4f0   :  { %v4680_v38 = vrot.slane %v2957_v54, %v15804_v44  ;;  %v4740_v2 = vrot.slane %v2993_v51, %v15792_v39 }
 0x4f1   :  { %v2985_v16 = vsel %vm526_vm0, %v8756_v33, 0.0  ;;  %v2694_v33 = vsel %vm526_vm0, %v8512_v36, 0.0 }
 0x4f2   :  { %v4681_v14 = vsel %vm3631_vm4, %v4680_v38, %v4676_v63  ;;  %2983 = vadd.xlane.f32.xlu1 %v2982_v62  ;;  %2932 = vadd.xlane.f32.xlu0 %v2931_v23  ;;  %v15813_v38 = vld [vmem:[#allocation134_spill] sm:$0xff]  ;;  %v2934_v62 = vsel %vm526_vm0, %v8712_v5, 0.0  ;;  %v8757_v5 = vunpack.i.h.bf16 %v15812_v18 }
 0x4f3   :  { %v3047_v40 = vpop.xlane.xlu1 %3046  ;;  %v2996_v35 = vpop.xlane.xlu0 %2995  ;;  %v8831_v57 = vunpack.i.l.bf16 %v15813_v38 }
 0x4f4   :  { %v4828_v9 = vrot.slane %v3047_v40, %v15796_v34  ;;  %v4744_v61 = vrot.slane %v2996_v35, %v9916_v0 }
 0x4f5   :  { %v3075_v6 = vsel %vm526_vm0, %v8831_v57, 0.0 }
 0x4f6   :  { %v4829_v63 = vsel %vm3617_vm2, %v4828_v9, %v4824_v45  ;;  %v4745_v42 = vsel %vm3610_vm1, %v4744_v61, %v4740_v2  ;;  %3073 = vadd.xlane.f32.xlu1 %v3072_v48  ;;  %3022 = vadd.xlane.f32.xlu0 %v3021_v59  ;;  %v15814_v9 = vld [vmem:[#allocation84_spill] sm:$0xff]  ;;  %v8437_v61 = vunpack.i.h.bf16 %v15809_v21 }
 0x4f7   :  { %v2576_v49 = vpop.xlane.xlu1 %2575  ;;  %v2525_v22 = vpop.xlane.xlu0 %2524  ;;  %v8396_v1 = vunpack.i.l.bf16 %v15814_v9 }
 0x4f8   :  { %v4053_v11 = vrot.slane %v2576_v49, %v15810_v46  ;;  %v3969_v25 = vrot.slane %v2525_v22, %v15804_v44  ;;  %v15815_v49 = vld [vmem:[#allocation77_spill] sm:$0xff]  ;;  %v2604_v7 = vsel %vm526_vm0, %v8437_v61, 0.0 }
 0x4fa   :  { %v4054_v45 = vsel %vm3638_vm5, %v4053_v11, %v4049_v24  ;;  %v3970_v55 = vsel %vm3631_vm4, %v3969_v25, %v3965_v60  ;;  %2602 = vadd.xlane.f32.xlu1 %v2601_v47  ;;  %2551 = vadd.xlane.f32.xlu0 %v2550_v10  ;;  %v15816_v25 = vld [vmem:[#allocation98_spill] sm:$0xff] }
 0x4fb   :  { %v2666_v3 = vpop.xlane.xlu1 %2665  ;;  %v2615_v4 = vpop.xlane.xlu0 %2614  ;;  %v8471_v21 = vunpack.i.l.bf16 %v15816_v25  ;;  %v8472_v36 = vunpack.i.h.bf16 %v15816_v25 }
 0x4fc   :  { %v4201_v29 = vrot.slane %v2666_v3, %v15799_v26  ;;  %v4117_v58 = vrot.slane %v2615_v4, %v15796_v34 }
 0x4fe   :  { %v4202_v24 = vsel %vm3624_vm3, %v4201_v29, %v4197_v28  ;;  %v4118_v60 = vsel %vm3617_vm2, %v4117_v58, %v4113_v32  ;;  %2692 = vadd.xlane.f32.xlu1 %v2691_v43  ;;  %2641 = vadd.xlane.f32.xlu0 %v2640_v30  ;;  %v15817_v58 = vld [vmem:[#allocation125_spill] sm:$0xff]  ;;  %v3296_v43 = vld [vmem:[%s14752_s1 + $0x688] sm:$0xff] }
 0x4ff   :  { %v2960_v17 = vpop.xlane.xlu1 %2959  ;;  %v2909_v12 = vpop.xlane.xlu0 %2908  ;;  %v8716_v31 = vunpack.i.l.bf16 %v15817_v58 }
 0x500   :  { %v4685_v51 = vrot.slane %v2960_v17, %v15810_v46  ;;  %v4601_v54 = vrot.slane %v2909_v12, %v15804_v44  ;;  %v3279_v12 = vld [vmem:[%s14752_s1 + $0x600] sm:$0xff] }
 0x502   :  { %v4686_v28 = vsel %vm3638_vm5, %v4685_v51, %v4681_v14  ;;  %v4602_v32 = vsel %vm3631_vm4, %v4601_v54, %v4597_v56  ;;  %2986 = vadd.xlane.f32.xlu1 %v2985_v16  ;;  %2935 = vadd.xlane.f32.xlu0 %v2934_v62  ;;  %v3280_v51 = vld [vmem:[%s14752_s1 + $0x608] sm:$0xff] }
 0x503   :  { %v3050_v23 = vpop.xlane.xlu1 %3049  ;;  %v2999_v40 = vpop.xlane.xlu0 %2998  ;;  %v8007_v57 = vpack.c.bf16 %v3280_v51, %v3279_v12  ;;  %v2646_v12 = vsel %vm526_vm0, %v8472_v36, 0.0  ;;  %v3287_v36 = vld [vmem:[%s14752_s1 + $0x640] sm:$0xff] }
 0x504   :  { %v4833_v35 = vrot.slane %v3050_v23, %v15799_v26  ;;  %v4749_v2 = vrot.slane %v2999_v40, %v15796_v34  ;;  %v8832_v23 = vunpack.i.h.bf16 %v15813_v38  ;;  %v2988_v40 = vsel %vm526_vm0, %v8757_v5, 0.0 }
 0x506   :  { %v13430_v14 = vsel %vm3624_vm3, %v4833_v35, %v4829_v63  ;;  %v13433_v56 = vsel %vm3617_vm2, %v4749_v2, %v4745_v42  ;;  %3076 = vadd.xlane.f32.xlu1 %v3075_v6  ;;  %3025 = vadd.xlane.f32.xlu0 %v3024_v13  ;;  %v2553_v63 = vsel %vm526_vm0, %v8396_v1, 0.0  ;;  %v2937_v35 = vsel %vm526_vm0, %v8716_v31, 0.0  ;;  %v3297_v2 = vld [vmem:[%s14752_s1 + $0x690] sm:$0xff]  ;;  %v3298_v1 = vld [vmem:[%s14752_s1 + $0x698] sm:$0xff]  ;;  %v3284_v31 = vld [vmem:[%s14752_s1 + $0x628] sm:$0xff] }
 0x507   :  { %v2579_v48 = vpop.xlane.xlu1 %2578  ;;  %v2528_v59 = vpop.xlane.xlu0 %2527  ;;  %v8009_v38 = vpack.c.bf16 %v3298_v1, %v3297_v2  ;;  %v3281_v13 = vld [vmem:[%s14752_s1 + $0x610] sm:$0xff] }
 0x508   :  { %v4058_v22 = vrot.slane %v2579_v48, %v15815_v49  ;;  %v3974_v11 = vrot.slane %v2528_v59, %v15810_v46  ;;  %v3282_v48 = vld [vmem:[%s14752_s1 + $0x618] sm:$0xff]  ;;  %v15821_v1 = vld [vmem:[#allocation136_spill] sm:$0xff] }
 0x50a   :  { %v13442_v47 = vsel %vm3645_vm6, %v4058_v22, %v4054_v45  ;;  %v13445_v42 = vsel %vm3638_vm5, %v3974_v11, %v3970_v55  ;;  %2605 = vadd.xlane.f32.xlu1 %v2604_v7  ;;  %2554 = vadd.xlane.f32.xlu0 %v2553_v63  ;;  %v2643_v45 = vsel %vm526_vm0, %v8471_v21, 0.0  ;;  %v3295_v55 = vld [vmem:[%s14752_s1 + $0x680] sm:$0xff]  ;;  %v8011_v11 = vpack.c.bf16 %v3282_v48, %v3281_v13 }
 0x50b   :  { %v2669_v10 = vpop.xlane.xlu1 %2668  ;;  %v2618_v3 = vpop.xlane.xlu0 %2617  ;;  %v8005_v18 = vpack.c.bf16 %v3296_v43, %v3295_v55  ;;  %v3078_v7 = vsel %vm526_vm0, %v8832_v23, 0.0 }
 0x50c   :  { %v4206_v4 = vrot.slane %v2669_v10, %v15804_v44  ;;  %v4122_v29 = vrot.slane %v2618_v3, %v15799_v26  ;;  %v3299_v10 = vld [vmem:[%s14752_s1 + $0x6a0] sm:$0xff]  ;;  %v3300_v3 = vld [vmem:[%s14752_s1 + $0x6a8] sm:$0xff] }
 0x50d   :  { %8006 = vmatprep.subr.bf16.mxu0 %v8005_v18  ;;  %v8013_v25 = vpack.c.bf16 %v3300_v3, %v3299_v10  ;;  %v8717_v18 = vunpack.i.h.bf16 %v15817_v58  ;;  %v3311_v3 = vld [vmem:[%s14752_s1 + $0x700] sm:$0xff] }
 0x50e   :  { %v13460_v30 = vsel %vm3631_vm4, %v4206_v4, %v4202_v24  ;;  %v13463_v17 = vsel %vm3624_vm3, %v4122_v29, %v4118_v60  ;;  %2695 = vadd.xlane.f32.xlu1 %v2694_v33  ;;  %2644 = vadd.xlane.f32.xlu0 %v2643_v45  ;;  %v15818_v60 = vld [vmem:[#allocation129_spill] sm:$0xff]  ;;  %v3283_v29 = vld [vmem:[%s14752_s1 + $0x620] sm:$0xff] }
 0x50f   :  { %v2963_v54 = vpop.xlane.xlu1 %2962  ;;  %v2912_v27 = vpop.xlane.xlu0 %2911  ;;  %v8791_v62 = vunpack.i.l.bf16 %v15818_v60  ;;  %8008 = vmatpush3.bf16.msra.mxu0 %v8007_v57  ;;  %v8015_v45 = vpack.c.bf16 %v3284_v31, %v3283_v29  ;;  %v2940_v13 = vsel %vm526_vm0, %v8717_v18, 0.0  ;;  %v3305_v18 = vld [vmem:[%s14752_s1 + $0x6d0] sm:$0xff] }
 0x510   :  { %v4690_v24 = vrot.slane %v2963_v54, %v15815_v49  ;;  %v4606_v16 = vrot.slane %v2912_v27, %v15810_v46  ;;  %8010 = vmatprep.subr.bf16.mxu0 %v8009_v38  ;;  %v3301_v54 = vld [vmem:[%s14752_s1 + $0x6b0] sm:$0xff]  ;;  %v3302_v27 = vld [vmem:[%s14752_s1 + $0x6b8] sm:$0xff]  ;;  %v8836_v38 = vunpack.i.l.bf16 %v15821_v1 }
 0x511   :  { %v3027_v63 = vsel %vm526_vm0, %v8791_v62, 0.0  ;;  %v3286_v62 = vld [vmem:[%s14752_s1 + $0x638] sm:$0xff] }
 0x512   :  { %v13484_v61 = vsel %vm3645_vm6, %v4690_v24, %v4686_v28  ;;  %v13487_v6 = vsel %vm3638_vm5, %v4606_v16, %v4602_v32  ;;  %2989 = vadd.xlane.f32.xlu1 %v2988_v40  ;;  %2938 = vadd.xlane.f32.xlu0 %v2937_v35  ;;  %v8397_v32 = vunpack.i.h.bf16 %v15814_v9  ;;  %v8017_v24 = vpack.c.bf16 %v3302_v27, %v3301_v54  ;;  %v3285_v16 = vld [vmem:[%s14752_s1 + $0x630] sm:$0xff] }
 0x513   :  { %v3053_v59 = vpop.xlane.xlu1 %3052  ;;  %v3002_v22 = vpop.xlane.xlu0 %3001  ;;  %8012 = vmatpush3.bf16.msra.mxu0 %v8011_v11  ;;  %v8019_v35 = vpack.c.bf16 %v3286_v62, %v3285_v16  ;;  %v3303_v11 = vld [vmem:[%s14752_s1 + $0x6c0] sm:$0xff]  ;;  %v3289_v16 = vld [vmem:[%s14752_s1 + $0x650] sm:$0xff] }
 0x514   :  { %v4838_v28 = vrot.slane %v3053_v59, %v15804_v44  ;;  %v4754_v21 = vrot.slane %v3002_v22, %v15799_v26  ;;  %8014 = vmatprep.subr.bf16.mxu0 %v8013_v25  ;;  %v2556_v51 = vsel %vm526_vm0, %v8397_v32, 0.0  ;;  %v3327_v59 = vld [vmem:[%s14752_s1 + $0x780] sm:$0xff]  ;;  %v3328_v22 = vld [vmem:[%s14752_s1 + $0x788] sm:$0xff] }
 0x515   :  { %v3304_v32 = vld [vmem:[%s14752_s1 + $0x6c8] sm:$0xff] }
 0x516   :  { %v13509_v4 = vsel %vm3631_vm4, %v4838_v28, %v13430_v14  ;;  %v13513_v9 = vsel %vm3624_vm3, %v4754_v21, %v13433_v56  ;;  %3079 = vadd.xlane.f32.xlu1 %v3078_v7  ;;  %3028 = vadd.xlane.f32.xlu0 %v3027_v63  ;;  %v15819_v56 = vld [vmem:[#allocation109_spill] sm:$0xff]  ;;  %v8037_v21 = vpack.c.bf16 %v3328_v22, %v3327_v59  ;;  %v3312_v25 = vld [vmem:[%s14752_s1 + $0x708] sm:$0xff]  ;;  %v8837_v59 = vunpack.i.h.bf16 %v15821_v1 }
 0x517   :  { %v2582_v5 = vpop.xlane.xlu1 %2581  ;;  %v2531_v33 = vpop.xlane.xlu0 %2530  ;;  %v8516_v43 = vunpack.i.l.bf16 %v15819_v56  ;;  %8016 = vmatpush3.bf16.msra.mxu0 %v8015_v45  ;;  %v8021_v10 = vpack.c.bf16 %v3304_v32, %v3303_v11  ;;  %v3308_v32 = vld [vmem:[%s14752_s1 + $0x6e8] sm:$0xff] }
 0x518   :  { %v4063_v14 = vrot.slane %v2582_v5, %v9963_v37  ;;  %v3979_v55 = vrot.slane %v2531_v33, %v15815_v49  ;;  %8018 = vmatprep.subr.bf16.mxu0 %v8017_v24  ;;  %8038 = vmatprep.subr.bf16.mxu1 %v8037_v21  ;;  %v8039_v5 = vpack.c.bf16 %v3312_v25, %v3311_v3  ;;  %v15822_v33 = vld [vmem:[#allocation101_spill] sm:$0xff]  ;;  %v3307_v21 = vld [vmem:[%s14752_s1 + $0x6e0] sm:$0xff] }
 0x519   :  { %v2697_v48 = vsel %vm526_vm0, %v8516_v43, 0.0  ;;  %v8476_v45 = vunpack.i.l.bf16 %v15822_v33  ;;  %v3330_v24 = vld [vmem:[%s14752_s1 + $0x798] sm:$0xff] }
 0x51a   :  { %v13535_v57 = vsel %vm15820_vm9, %v4063_v14, %v13442_v47  ;;  %v13539_v58 = vsel %vm3645_vm6, %v3979_v55, %v13445_v42  ;;  %2647 = vadd.xlane.f32.xlu1 %v2646_v12  ;;  %2557 = vadd.xlane.f32.xlu0 %v2556_v51  ;;  %v8792_v42 = vunpack.i.h.bf16 %v15818_v60  ;;  %v8517_v14 = vunpack.i.h.bf16 %v15819_v56  ;;  %v3306_v12 = vld [vmem:[%s14752_s1 + $0x6d8] sm:$0xff]  ;;  %v3329_v51 = vld [vmem:[%s14752_s1 + $0x790] sm:$0xff]  ;;  %vm15826_vm9 = vmmov %vm15823_vm7 }
 0x51b   :  { %v2672_v23 = vpop.xlane.xlu1 %2671  ;;  %v2621_v40 = vpop.xlane.xlu0 %2620  ;;  %8020 = vmatpush3.bf16.msra.mxu0 %v8019_v35  ;;  %v3081_v55 = vsel %vm526_vm0, %v8836_v38, 0.0  ;;  %v8025_v27 = vpack.c.bf16 %v3306_v12, %v3305_v18  ;;  %8040 = vmatpush3.bf16.msra.mxu1 %v8039_v5  ;;  %v3313_v35 = vld [vmem:[%s14752_s1 + $0x710] sm:$0xff]  ;;  %v2649_v11 = vsel %vm526_vm0, %v8476_v45, 0.0  ;;  %v3084_v18 = vsel %vm526_vm0, %v8837_v59, 0.0 }
 0x51c   :  { %v4211_v47 = vrot.slane %v2672_v23, %v15810_v46  ;;  %v4127_v2 = vrot.slane %v2621_v40, %v15804_v44  ;;  %v3030_v43 = vsel %vm526_vm0, %v8792_v42, 0.0  ;;  %8022 = vmatprep.subr.bf16.mxu0 %v8021_v10  ;;  %v2700_v22 = vsel %vm526_vm0, %v8517_v14, 0.0  ;;  %v3291_v10 = vld [vmem:[%s14752_s1 + $0x660] sm:$0xff] }
 0x51e   :  { %v13564_v60 = vsel %vm3638_vm5, %v4211_v47, %v13460_v30  ;;  %v13568_v28 = vsel %vm3631_vm4, %v4127_v2, %v13463_v17  ;;  %2941 = vadd.xlane.f32.xlu1 %v2940_v13  ;;  %2698 = vadd.xlane.f32.xlu0 %v2697_v48  ;;  %v3288_v30 = vld [vmem:[%s14752_s1 + $0x648] sm:$0xff]  ;;  %v3314_v47 = vld [vmem:[%s14752_s1 + $0x718] sm:$0xff]  ;;  %v15824_v13 = vld [vmem:[#allocation132_spill] sm:$0xff] }
 0x51f   :  { %v2966_v7 = vpop.xlane.xlu1 %2965  ;;  %v2915_v63 = vpop.xlane.xlu0 %2914  ;;  %v8023_v17 = vpack.c.bf16 %v3288_v30, %v3287_v36  ;;  %v8043_v38 = vpack.c.bf16 %v3314_v47, %v3313_v35  ;;  %v8796_v48 = vunpack.i.l.bf16 %v15824_v13  ;;  %v3331_v36 = vld [vmem:[%s14752_s1 + $0x7a0] sm:$0xff]  ;;  %v3317_v47 = vld [vmem:[%s14752_s1 + $0x730] sm:$0xff] }
 0x520   :  { %v4695_v29 = vrot.slane %v2966_v7, %v9963_v37  ;;  %v4611_v31 = vrot.slane %v2915_v63, %v15815_v49  ;;  %v8029_v7 = vpack.c.bf16 %v3308_v32, %v3307_v21  ;;  %v3332_v63 = vld [vmem:[%s14752_s1 + $0x7a8] sm:$0xff]  ;;  %v3103_v21 = vld [vmem:[%s14752_s1 + $0x80] sm:$0xff] }
 0x521   :  { %8024 = vmatpush3.bf16.msra.mxu0 %v8023_v17  ;;  %v3033_v12 = vsel %vm526_vm0, %v8796_v48, 0.0 }
 0x522   :  { %v13602_v56 = vsel %vm15823_vm7, %v4695_v29, %v13484_v61  ;;  %v13606_v54 = vsel %vm3645_vm6, %v4611_v31, %v13487_v6  ;;  %3082 = vadd.xlane.f32.xlu1 %v3081_v55  ;;  %3031 = vadd.xlane.f32.xlu0 %v3030_v43  ;;  %v3290_v61 = vld [vmem:[%s14752_s1 + $0x658] sm:$0xff]  ;;  %v8041_v6 = vpack.c.bf16 %v3330_v24, %v3329_v51  ;;  %v3315_v29 = vld [vmem:[%s14752_s1 + $0x720] sm:$0xff]  ;;  %v3316_v31 = vld [vmem:[%s14752_s1 + $0x728] sm:$0xff]  ;;  %v8477_v55 = vunpack.i.h.bf16 %v15822_v33 }
 0x523   :  { %v3056_v62 = vpop.xlane.xlu1 %3055  ;;  %v3005_v23 = vpop.xlane.xlu0 %3004  ;;  %v8027_v40 = vpack.c.bf16 %v3290_v61, %v3289_v16  ;;  %8026 = vmatprep.subr.bf16.mxu0 %v8025_v27  ;;  %v8047_v14 = vpack.c.bf16 %v3316_v31, %v3315_v29  ;;  %v8797_v43 = vunpack.i.h.bf16 %v15824_v13  ;;  %v3309_v51 = vld [vmem:[%s14752_s1 + $0x6f0] sm:$0xff]  ;;  %v3310_v27 = vld [vmem:[%s14752_s1 + $0x6f8] sm:$0xff] }
 0x524   :  { %v4843_v2 = vrot.slane %v3056_v62, %v15810_v46  ;;  %v4759_v42 = vrot.slane %v3005_v23, %v15804_v44  ;;  %8042 = vmatprep.subr.bf16.mxu1 %v8041_v6  ;;  %v3333_v24 = vld [vmem:[%s14752_s1 + $0x7b0] sm:$0xff]  ;;  %v8033_v61 = vpack.c.bf16 %v3310_v27, %v3309_v51  ;;  %v3334_v62 = vld [vmem:[%s14752_s1 + $0x7b8] sm:$0xff]  ;;  %v2652_v59 = vsel %vm526_vm0, %v8477_v55, 0.0 }
 0x525   :  { %8028 = vmatpush3.bf16.msra.mxu0 %v8027_v40  ;;  %8044 = vmatpush3.bf16.msra.mxu1 %v8043_v38  ;;  %v3293_v23 = vld [vmem:[%s14752_s1 + $0x670] sm:$0xff]  ;;  %v3036_v48 = vsel %vm526_vm0, %v8797_v43, 0.0  ;;  %v3338_v31 = vld [vmem:[%s14752_s1 + $0x7d8] sm:$0xff]  ;;  %vm15827_vm0 = vmmov %vm15825_vm8 }
 0x526   :  { %v13640_v1 = vsel %vm3638_vm5, %v4843_v2, %v13509_v4  ;;  %v13644_v30 = vsel %vm3631_vm4, %v4759_v42, %v13513_v9  ;;  %2701 = vadd.xlane.f32.xlu1 %v2700_v22  ;;  %2650 = vadd.xlane.f32.xlu0 %v2649_v11  ;;  %v3292_v4 = vld [vmem:[%s14752_s1 + $0x668] sm:$0xff]  ;;  %v8045_v9 = vpack.c.bf16 %v3332_v63, %v3331_v36  ;;  %v3318_v2 = vld [vmem:[%s14752_s1 + $0x738] sm:$0xff]  ;;  %v3335_v22 = vld [vmem:[%s14752_s1 + $0x7c0] sm:$0xff] }
 0x527   :  { %v2585_v17 = vpop.xlane.xlu1 %2584  ;;  %v2534_v3 = vpop.xlane.xlu0 %2533  ;;  %v8031_v25 = vpack.c.bf16 %v3292_v4, %v3291_v10  ;;  %8030 = vmatprep.subr.bf16.mxu0 %v8029_v7  ;;  %v8051_v13 = vpack.c.bf16 %v3318_v2, %v3317_v47  ;;  %v3336_v11 = vld [vmem:[%s14752_s1 + $0x7c8] sm:$0xff]  ;;  %v3319_v10 = vld [vmem:[%s14752_s1 + $0x740] sm:$0xff]  ;;  %v3337_v29 = vld [vmem:[%s14752_s1 + $0x7d0] sm:$0xff] }
 0x528   :  { %v4068_v5 = vrot.slane %v2585_v17, %v10012_v53  ;;  %v3984_v45 = vrot.slane %v2534_v3, %v9963_v37  ;;  %8046 = vmatprep.subr.bf16.mxu1 %v8045_v9  ;;  %v8053_v7 = vpack.c.bf16 %v3336_v11, %v3335_v22  ;;  %v3104_v63 = vld [vmem:[%s14752_s1 + $0x88] sm:$0xff]  ;;  %v3321_v55 = vld [vmem:[%s14752_s1 + $0x750] sm:$0xff]  ;;  %v3322_v43 = vld [vmem:[%s14752_s1 + $0x758] sm:$0xff] }
 0x529   :  { %8032 = vmatpush3.bf16.msra.mxu0 %v8031_v25  ;;  %8048 = vmatpush3.bf16.msra.mxu1 %v8047_v14  ;;  %v3320_v4 = vld [vmem:[%s14752_s1 + $0x748] sm:$0xff]  ;;  %v8057_v14 = vpack.c.bf16 %v3338_v31, %v3337_v29  ;;  %v8059_v51 = vpack.c.bf16 %v3322_v43, %v3321_v55  ;;  %v3342_v2 = vld [vmem:[%s14752_s1 + $0x7f8] sm:$0xff] }
 0x52a   :  { %v13678_v33 = vsel %vm15825_vm8, %v4068_v5, %v13535_v57  ;;  %v13682_v16 = vsel %vm15826_vm9, %v3984_v45, %v13539_v58  ;;  %3085 = vadd.xlane.f32.xlu1 %v3084_v18  ;;  %3034 = vadd.xlane.f32.xlu0 %v3033_v12  ;;  %v3294_v57 = vld [vmem:[%s14752_s1 + $0x678] sm:$0xff]  ;;  %v8049_v58 = vpack.c.bf16 %v3334_v62, %v3333_v24  ;;  %v3340_v24 = vld [vmem:[%s14752_s1 + $0x7e8] sm:$0xff]  ;;  %vm15828_vm8 = vcmask 654912   ;;  %vm15829_vm9 = vmmov %vm15827_vm0 }
 0x52b   :  { %v2675_v6 = vpop.xlane.xlu1 %2674  ;;  %v2624_v40 = vpop.xlane.xlu0 %2623  ;;  %v8035_v35 = vpack.c.bf16 %v3294_v57, %v3293_v23  ;;  %8034 = vmatprep.subr.bf16.mxu0 %v8033_v61  ;;  %v8055_v3 = vpack.c.bf16 %v3320_v4, %v3319_v10  ;;  %v3323_v57 = vld [vmem:[%s14752_s1 + $0x760] sm:$0xff]  ;;  %v3136_v4 = vld [vmem:[%s14752_s1 + $0x188] sm:$0xff] }
 0x52c   :  { %v4216_v42 = vrot.slane %v2675_v6, %v15815_v49  ;;  %v4132_v38 = vrot.slane %v2624_v40, %v15810_v46  ;;  %8050 = vmatprep.subr.bf16.mxu1 %v8049_v58  ;;  %v3324_v6 = vld [vmem:[%s14752_s1 + $0x768] sm:$0xff] }
 0x52d   :  { %8036 = vmatpush3.bf16.msra.mxu0 %v8035_v35  ;;  %8052 = vmatpush3.bf16.msra.mxu1 %v8051_v13  ;;  %v8063_v35 = vpack.c.bf16 %v3324_v6, %v3323_v57 }
 0x52e   :  { %v4217_v32 = vsel %vm3645_vm6, %v4216_v42, %v13564_v60  ;;  %v4133_v36 = vsel %vm3638_vm5, %v4132_v38, %v13568_v28  ;;  %3037 = vadd.xlane.f32.xlu1 %v3036_v48  ;;  %2653 = vadd.xlane.f32.xlu0 %v2652_v59  ;;  %v8069_v28 = vpack.c.bf16 %v3104_v63, %v3103_v21  ;;  %v3325_v48 = vld [vmem:[%s14752_s1 + $0x770] sm:$0xff]  ;;  %v3326_v59 = vld [vmem:[%s14752_s1 + $0x778] sm:$0xff] }
 0x52f   :  { %v2969_v17 = vpop.xlane.xlu1 %2968  ;;  %v2918_v60 = vpop.xlane.xlu0 %2917  ;;  %8054 = vmatprep.subr.bf16.mxu1 %v8053_v7  ;;  %v8067_v21 = vpack.c.bf16 %v3326_v59, %v3325_v48 }
 0x530   :  { %v4700_v9 = vrot.slane %v2969_v17, %v10012_v53  ;;  %v4616_v25 = vrot.slane %v2918_v60, %v9963_v37  ;;  %8070 = vmatprep.subr.bf16.mxu0 %v8069_v28 }
 0x531   :  { %8056 = vmatpush3.bf16.msra.mxu1 %v8055_v3 }
 0x532   :  { %v4701_v5 = vsel %vm15827_vm0, %v4700_v9, %v13602_v56  ;;  %v4617_v45 = vsel %vm15823_vm7, %v4616_v25, %v13606_v54  ;;  %8058 = vmatprep.subr.bf16.mxu1 %v8057_v14  ;;  %v3339_v54 = vld [vmem:[%s14752_s1 + $0x7e0] sm:$0xff]  ;;  %vm15830_vm0 = vmmov %vm15823_vm7 }
 0x533   :  { %v3059_v18 = vpop.xlane.xlu1 %3058  ;;  %v3008_v12 = vpop.xlane.xlu0 %3007  ;;  %v8061_v23 = vpack.c.bf16 %v3340_v24, %v3339_v54  ;;  %vm15831_vm7 = vmmov %vm15828_vm8 }
 0x534   :  { %v4848_v27 = vrot.slane %v3059_v18, %v15815_v49  ;;  %v4764_v56 = vrot.slane %v3008_v12, %v15810_v46 }
 0x535   :  { %8060 = vmatpush3.bf16.msra.mxu1 %v8059_v51 }
 0x536   :  { %v4849_v61 = vsel %vm3645_vm6, %v4848_v27, %v13640_v1  ;;  %v4765_v62 = vsel %vm3638_vm5, %v4764_v56, %v13644_v30  ;;  %8062 = vmatprep.subr.bf16.mxu1 %v8061_v23  ;;  %v3341_v30 = vld [vmem:[%s14752_s1 + $0x7f0] sm:$0xff] }
 0x537   :  { %v2588_v40 = vpop.xlane.xlu1 %2587  ;;  %v2537_v58 = vpop.xlane.xlu0 %2536  ;;  %v8065_v13 = vpack.c.bf16 %v3342_v2, %v3341_v30 }
 0x538   :  { %v4073_v47 = vrot.slane %v2588_v40, %v9997_v20  ;;  %v3989_v1 = vrot.slane %v2537_v58, %v10012_v53 }
 0x539   :  { %8064 = vmatpush3.bf16.msra.mxu1 %v8063_v35 }
 0x53a   :  { %v4074_v42 = vsel %vm15828_vm8, %v4073_v47, %v13678_v33  ;;  %v3990_v38 = vsel %vm15829_vm9, %v3989_v1, %v13682_v16  ;;  %8066 = vmatprep.subr.bf16.mxu1 %v8065_v13  ;;  %v3135_v16 = vld [vmem:[%s14752_s1 + $0x180] sm:$0xff]  ;;  %vm15832_vm8 = vmmov %vm15829_vm9 }
 0x53b   :  { %v2678_v22 = vpop.xlane.xlu1 %2677  ;;  %v2627_v11 = vpop.xlane.xlu0 %2626  ;;  %v8101_v28 = vpack.c.bf16 %v3136_v4, %v3135_v16  ;;  %vm15833_vm9 = vmmov %vm15830_vm0 }
 0x53c   :  { %v4221_v7 = vrot.slane %v2678_v22, %v9963_v37  ;;  %v4137_v33 = vrot.slane %v2627_v11, %v15815_v49 }
 0x53d   :  { %8068 = vmatpush3.bf16.msra.mxu1 %v8067_v21 }
 0x53e   :  { %v4222_v63 = vsel %vm15830_vm0, %v4221_v7, %v4217_v32  ;;  %v4138_v10 = vsel %vm3645_vm6, %v4137_v33, %v4133_v36  ;;  %8102 = vmatprep.subr.bf16.mxu1 %v8101_v28  ;;  %vm15834_vm0 = vmmov %vm15831_vm7 }
 0x53f   :  { %v2972_v17 = vpop.xlane.xlu1 %2971  ;;  %v2921_v60 = vpop.xlane.xlu0 %2920 }
 0x540   :  { %v4705_v3 = vrot.slane %v2972_v17, %v9997_v20  ;;  %v4621_v9 = vrot.slane %v2921_v60, %v10012_v53 }
 0x542   :  { %v4706_v25 = vsel %vm15831_vm7, %v4705_v3, %v4701_v5  ;;  %v4622_v29 = vsel %vm15832_vm8, %v4621_v9, %v4617_v45  ;;  %vm15835_vm7 = vmmov %vm15832_vm8 }
 0x543   :  { %v3062_v32 = vpop.xlane.xlu1 %3061  ;;  %v3011_v31 = vpop.xlane.xlu0 %3010  ;;  %vm15836_vm8 = vmmov %vm15833_vm9 }
 0x544   :  { %v4853_v36 = vrot.slane %v3062_v32, %v9963_v37  ;;  %v4769_v14 = vrot.slane %v3011_v31, %v15815_v49 }
 0x546   :  { %v4854_v55 = vsel %vm15833_vm9, %v4853_v36, %v4849_v61  ;;  %v4770_v43 = vsel %vm3645_vm6, %v4769_v14, %v4765_v62  ;;  %vm15837_vm9 = vmmov %vm15834_vm0 }
 0x547   :  { %v2591_v18 = vpop.xlane.xlu1 %2590  ;;  %v2540_v12 = vpop.xlane.xlu0 %2539 }
 0x548   :  { %v4078_v51 = vrot.slane %v2591_v18, %v10044_v8  ;;  %v3994_v27 = vrot.slane %v2540_v12, %v9997_v20 }
 0x54a   :  { %v4079_v5 = vsel %vm3673_vm10, %v4078_v51, %v4074_v42  ;;  %v3995_v45 = vsel %vm15834_vm0, %v3994_v27, %v3990_v38  ;;  %vm15838_vm0 = vmmov %vm15835_vm7 }
 0x54b   :  { %v2681_v56 = vpop.xlane.xlu1 %2680  ;;  %v2630_v54 = vpop.xlane.xlu0 %2629 }
 0x54c   :  { %v4226_v24 = vrot.slane %v2681_v56, %v10012_v53  ;;  %v4142_v23 = vrot.slane %v2630_v54, %v9963_v37 }
 0x54e   :  { %v4227_v61 = vsel %vm15835_vm7, %v4226_v24, %v4222_v63  ;;  %v4143_v62 = vsel %vm15836_vm8, %v4142_v23, %v4138_v10  ;;  %vm15839_vm7 = vmmov %vm15836_vm8  ;;  %vm15840_vm8 = vcmask 786112  }
 0x54f   :  { %v2975_v57 = vpop.xlane.xlu1 %2974  ;;  %v2924_v6 = vpop.xlane.xlu0 %2923 }
 0x550   :  { %v4710_v40 = vrot.slane %v2975_v57, %v10044_v8  ;;  %v4626_v58 = vrot.slane %v2924_v6, %v9997_v20 }
 0x552   :  { %v13808_v35 = vsel %vm3673_vm10, %v4710_v40, %v4706_v25  ;;  %v4627_v47 = vsel %vm15837_vm9, %v4626_v58, %v4622_v29 }
 0x553   :  { %v3065_v1 = vpop.xlane.xlu1 %3064  ;;  %v3014_v30 = vpop.xlane.xlu0 %3013 }
 0x554   :  { %v4858_v2 = vrot.slane %v3065_v1, %v10012_v53  ;;  %v4774_v42 = vrot.slane %v3014_v30, %v9963_v37 }
 0x556   :  { %v4859_v38 = vsel %vm15838_vm0, %v4858_v2, %v4854_v55  ;;  %v4775_v13 = vsel %vm15839_vm7, %v4774_v42, %v4770_v43  ;;  %vm15841_vm7 = vmmov %vm15837_vm9 }
 0x557   :  { %v2594_v48 = vpop.xlane.xlu1 %2593  ;;  %v2543_v59 = vpop.xlane.xlu0 %2542 }
 0x558   :  { %v4083_v22 = vrot.slane %v2594_v48, %v10041_v41  ;;  %v3999_v11 = vrot.slane %v2543_v59, %v10044_v8  ;;  %v15848_v59 = vld [vmem:[#allocation162_spill] sm:$0xff] }
 0x55a   :  { %v13818_v21 = vsel %vm15840_vm8, %v4083_v22, %v4079_v5  ;;  %v13821_v7 = vsel %vm3673_vm10, %v3999_v11, %v3995_v45  ;;  %vm15842_vm8 = vmmov %vm15838_vm0  ;;  %v6320_v22 = vrot.slane %v15848_v59, %v15792_v39 }
 0x55b   :  { %v2684_v33 = vpop.xlane.xlu1 %2683  ;;  %v2633_v16 = vpop.xlane.xlu0 %2632 }
 0x55c   :  { %v4231_v63 = vrot.slane %v2684_v33, %v9997_v20  ;;  %v4147_v10 = vrot.slane %v2633_v16, %v10012_v53  ;;  %v15849_v16 = vld [vmem:[#allocation164_spill] sm:$0xff] }
 0x55e   :  { %v4232_v4 = vsel %vm15837_vm9, %v4231_v63, %v4227_v61  ;;  %v4148_v17 = vsel %vm15838_vm0, %v4147_v10, %v4143_v62  ;;  %vm15843_vm9 = vmmov %vm15841_vm7  ;;  %v6329_v63 = vrot.slane %v15849_v16, %v15796_v34 }
 0x55f   :  { %v13827_v60 = vpop.xlane.xlu1 %2977  ;;  %v2927_v28 = vpop.xlane.xlu0 %2926  ;;  %vm15845_vm0 = vmmov %vm15841_vm7 }
 0x560   :  { %v4631_v3 = vrot.slane %v2927_v28, %v10044_v8  ;;  %v15850_v28 = vld [vmem:[#allocation163_spill] sm:$0xff] }
 0x562   :  { %v13831_v9 = vsel %vm3673_vm10, %v4631_v3, %v4627_v47  ;;  %v6334_v3 = vrot.slane %v15850_v28, %v15799_v26 }
 0x563   :  { %v3068_v25 = vpop.xlane.xlu1 %3067  ;;  %v3017_v29 = vpop.xlane.xlu0 %3016 }
 0x564   :  { %v4863_v32 = vrot.slane %v3068_v25, %v9997_v20  ;;  %v4779_v31 = vrot.slane %v3017_v29, %v10012_v53 }
 0x566   :  { %v13836_v36 = vsel %vm15841_vm7, %v4863_v32, %v4859_v38  ;;  %v4780_v14 = vsel %vm15842_vm8, %v4779_v31, %v4775_v13  ;;  %v15847_v13 = vld [vmem:[#allocation161_spill] sm:$0xff]  ;;  %v15852_v32 = vld [vmem:[#allocation166_spill] sm:$0xff]  ;;  %vm15866_vm7 = vcmask 523712  }
 0x567   :  { %v13839_v55 = vpop.xlane.xlu1 %2596  ;;  %v13841_v43 = vpop.xlane.xlu0 %2545  ;;  %v6324_v48 = vrot.slane %v15847_v13, %v9916_v0  ;;  %v6339_v31 = vrot.slane %v15852_v32, %v15804_v44 }
 0x56b   :  { %v2687_v18 = vpop.xlane.xlu1 %2686  ;;  %v2636_v12 = vpop.xlane.xlu0 %2635 }
 0x56c   :  { %v4236_v51 = vrot.slane %v2687_v18, %v10044_v8  ;;  %v4152_v27 = vrot.slane %v2636_v12, %v9997_v20  ;;  %v15854_v12 = vld [vmem:[#allocation146_spill] sm:$0xff] }
 0x56e   :  { %v13846_v5 = vsel %vm3673_vm10, %v4236_v51, %v4232_v4  ;;  %v13849_v45 = vsel %vm15843_vm9, %v4152_v27, %v4148_v17  ;;  %v6325_v17 = vsel %vm3610_vm1, %v6324_v48, %v6320_v22  ;;  %v6241_v51 = vrot.slane %v15854_v12, %v15792_v39  ;;  %v15855_v27 = vld [vmem:[#allocation148_spill] sm:$0xff]  ;;  %vm15873_vm9 = vmmov %vm15845_vm0 }
 0x56f   :  { %15844 = vst [vmem:[#allocation137_spill] sm:$0xff] %v13849_v45  ;;  %v13851_v56 = vpop.xlane.xlu1 %2980  ;;  %v13853_v54 = vpop.xlane.xlu0 %2929  ;;  %v6330_v29 = vsel %vm3617_vm2, %v6329_v63, %v6325_v17  ;;  %v15858_v17 = vld [vmem:[#allocation147_spill] sm:$0xff] }
 0x570   :  { %v6335_v48 = vsel %vm3624_vm3, %v6334_v3, %v6330_v29  ;;  %v6255_v28 = vrot.slane %v15858_v17, %v15799_v26  ;;  %v15860_v3 = vld [vmem:[#allocation167_spill] sm:$0xff] }
 0x571   :  { %v6340_v22 = vsel %vm3631_vm4, %v6339_v31, %v6335_v48  ;;  %v6354_v29 = vrot.slane %v15860_v3, %v9963_v37 }
 0x573   :  { %v13855_v24 = vpop.xlane.xlu1 %3070  ;;  %v3020_v23 = vpop.xlane.xlu0 %3019 }
 0x574   :  { %v4784_v61 = vrot.slane %v3020_v23, %v9997_v20  ;;  %v6250_v23 = vrot.slane %v15855_v27, %v15796_v34 }
 0x576   :  { %v13859_v62 = vsel %vm15845_vm0, %v4784_v61, %v4780_v14  ;;  %v15853_v14 = vld [vmem:[#allocation145_spill] sm:$0xff]  ;;  %vm15876_vm0 = vcmask 786112  }
 0x577   :  { %15846 = vst [vmem:[#allocation138_spill] sm:$0xff] %v13859_v62  ;;  %v13861_v57 = vpop.xlane.xlu1 %2599  ;;  %v13863_v6 = vpop.xlane.xlu0 %2548  ;;  %v6245_v18 = vrot.slane %v15853_v14, %v9916_v0  ;;  %v15859_v14 = vld [vmem:[#allocation150_spill] sm:$0xff] }
 0x578   :  { %v6260_v12 = vrot.slane %v15859_v14, %v15804_v44 }
 0x579   :  { %v6246_v63 = vsel %vm3610_vm1, %v6245_v18, %v6241_v51  ;;  %v15862_v51 = vld [vmem:[#allocation170_spill] sm:$0xff] }
 0x57a   :  { %v6251_v32 = vsel %vm3617_vm2, %v6250_v23, %v6246_v63  ;;  %v15863_v23 = vld [vmem:[#allocation149_spill] sm:$0xff] }
 0x57b   :  { %v13865_v40 = vpop.xlane.xlu1 %2689  ;;  %v13867_v58 = vpop.xlane.xlu0 %2638  ;;  %v6265_v63 = vrot.slane %v15863_v23, %v15810_v46  ;;  %v6256_v14 = vsel %vm3624_vm3, %v6255_v28, %v6251_v32  ;;  %v15868_v28 = vld [vmem:[#allocation172_spill] sm:$0xff] }
 0x57c   :  { %v6261_v62 = vsel %vm3631_vm4, %v6260_v12, %v6256_v14  ;;  %v6369_v32 = vrot.slane %v15868_v28, %v10044_v8  ;;  %v15870_v14 = vld [vmem:[#allocation17_spill] sm:$0xff] }
 0x57d   :  { %v6266_v12 = vsel %vm3638_vm5, %v6265_v63, %v6261_v62  ;;  %v4720_v62 = vrot.slane %v13851_v56, %v10074_v50 }
 0x57f   :  { %v13869_v47 = vpop.xlane.xlu1 %2983  ;;  %v13871_v1 = vpop.xlane.xlu0 %2932 }
 0x583   :  { %v13873_v30 = vpop.xlane.xlu1 %3073  ;;  %v13875_v2 = vpop.xlane.xlu0 %3022 }
 0x587   :  { %v13877_v42 = vpop.xlane.xlu1 %2602  ;;  %v7693_v38 = vpop.f32.mrb[0].mxu0 }
 0x588   :  { %v13883_v11 = vpop.xlane.xlu0 %2551  ;;  %v7694_v33 = vpop.f32.mrb[1].mxu0  ;;  %v4098_v56 = vrot.slane %v13877_v42, %v15743_v19 }
 0x589   :  { %v7695_v10 = vadd.f32 %v7694_v33, %v7693_v38  ;;  %v15856_v38 = vld [vmem:[#allocation165_spill] sm:$0xff]  ;;  %v15857_v33 = vld [vmem:[#allocation168_spill] sm:$0xff] }
 0x58a   :  { %v6344_v13 = vrot.slane %v15856_v38, %v15810_v46  ;;  %v6349_v16 = vrot.slane %v15857_v33, %v15815_v49  ;;  %v6359_v33 = vrot.slane %v15862_v51, %v10012_v53 }
 0x58b   :  { %v13887_v4 = vpop.xlane.xlu1 %2692 }
 0x58c   :  { %v13892_v25 = vpop.xlane.xlu0 %2641  ;;  %v6345_v31 = vsel %vm3638_vm5, %v6344_v13, %v6340_v22  ;;  %v15864_v13 = vld [vmem:[#allocation152_spill] sm:$0xff] }
 0x58d   :  { %15851 = vst [vmem:[#allocation140_spill] sm:$0xff] %v13892_v25  ;;  %v6350_v18 = vsel %vm3645_vm6, %v6349_v16, %v6345_v31  ;;  %v6270_v22 = vrot.slane %v15864_v13, %v15815_v49  ;;  %v6478_v13 = vrot.slane %v15870_v14, %v15792_v39 }
 0x58e   :  { %v6355_v16 = vsel %vm15866_vm7, %v6354_v29, %v6350_v18  ;;  %v4715_v29 = vrot.slane %v13827_v60, %v10041_v41  ;;  %v4093_v60 = vrot.slane %v13861_v57, %v10059_v52  ;;  %vm15880_vm7 = vmmov %vm15876_vm0 }
 0x58f   :  { %v13903_v61 = vpop.xlane.xlu1 %2986  ;;  %v6360_v23 = vsel %vm15842_vm8, %v6359_v33, %v6355_v16  ;;  %v4088_v33 = vrot.slane %v13839_v55, %v10074_v50  ;;  %v6271_v16 = vsel %vm3645_vm6, %v6270_v22, %v6266_v12  ;;  %vm15885_vm8 = vcmask 523712  }
 0x590   :  { %v13908_v59 = vpop.xlane.xlu0 %2935  ;;  %v4730_v22 = vrot.slane %v13903_v61, %v15743_v19 }
 0x591   :  { %v4089_v42 = vsel %vm3687_vm12, %v4088_v33, %v13818_v21 }
 0x593   :  { %v13919_v27 = vpop.xlane.xlu1 %3076 }
 0x594   :  { %v13924_v38 = vpop.xlane.xlu0 %3025  ;;  %v7728_v48 = vpop.f32.mrb[0].mxu1 }
 0x595   :  { %15861 = vst [vmem:[#allocation141_spill] sm:$0xff] %v13924_v38  ;;  %v7729_v17 = vpop.f32.mrb[1].mxu1  ;;  %v15865_v38 = vld [vmem:[#allocation169_spill] sm:$0xff] }
 0x596   :  { %v7730_v25 = vadd.f32 %v7729_v17, %v7728_v48  ;;  %v6364_v45 = vrot.slane %v15865_v38, %v9997_v20  ;;  %v15869_v48 = vld [vmem:[#allocation16_spill] sm:$0xff]  ;;  %v15872_v38 = vld [vmem:[#allocation19_spill] sm:$0xff] }
 0x597   :  { %v2606_v3 = vpop.xlane.xlu1 %2605  ;;  %v6482_v17 = vrot.slane %v15869_v48, %v9916_v0  ;;  %v6487_v18 = vrot.slane %v15872_v38, %v15796_v34  ;;  %v4725_v48 = vrot.slane %v13869_v47, %v10059_v52  ;;  %v4716_v47 = vsel %vm15876_vm0, %v4715_v29, %v13808_v35  ;;  %v15879_v29 = vld [vmem:[#allocation173_spill] sm:$0xff] }
 0x598   :  { %v13938_v31 = vadd.f32 %v7730_v25, %v7695_v10  ;;  %v13940_v51 = vpop.xlane.xlu0 %2554  ;;  %v15871_v10 = vld [vmem:[#allocation151_spill] sm:$0xff]  ;;  %v6365_v28 = vsel %vm15873_vm9, %v6364_v45, %v6360_v23  ;;  %v15875_v45 = vld [vmem:[#allocation174_spill] sm:$0xff]  ;;  %v4103_v12 = vrot.slane %v2606_v3, %v15742_v15  ;;  %v4721_v61 = vsel %vm3687_vm12, %v4720_v62, %v4716_v47 }
 0x599   :  { %v6275_v25 = vrot.slane %v15871_v10, %v9963_v37  ;;  %v15874_v10 = vld [vmem:[#allocation171_spill] sm:$0xff]  ;;  %v6370_v38 = vsel %vm3673_vm10, %v6369_v32, %v6365_v28  ;;  %v6379_v23 = vrot.slane %v15875_v45, %v10074_v50  ;;  %v6483_v57 = vsel %vm3610_vm1, %v6482_v17, %v6478_v13  ;;  %v15878_v45 = vld [vmem:[#allocation21_spill] sm:$0xff] }
 0x59a   :  { %15867 = vst [vmem:[#allocation142_spill] sm:$0xff] %v13938_v31  ;;  %v6374_v55 = vrot.slane %v15874_v10, %v10041_v41  ;;  %v15877_v10 = vld [vmem:[#allocation18_spill] sm:$0xff]  ;;  %v6488_v32 = vsel %vm3617_vm2, %v6487_v18, %v6483_v57  ;;  %v6497_v34 = vrot.slane %v15878_v45, %v15804_v44  ;;  %v4094_v17 = vsel %vm3694_vm13, %v4093_v60, %v4089_v42  ;;  %v15881_v57 = vld [vmem:[#allocation176_spill] sm:$0xff] }
 0x59b   :  { %v13960_v63 = vpop.xlane.xlu1 %2695  ;;  %v6492_v31 = vrot.slane %v15877_v10, %v15799_v26  ;;  %v4726_v35 = vsel %vm3694_vm13, %v4725_v48, %v4721_v61  ;;  %v6384_v10 = vrot.slane %v15879_v29, %v10059_v52  ;;  %v4099_v21 = vsel %vm3701_vm14, %v4098_v56, %v4094_v17  ;;  %v15882_v42 = vld [vmem:[#allocation20_spill] sm:$0xff]  ;;  %v15883_v56 = vld [vmem:[#allocation23_spill] sm:$0xff] }
 0x59c   :  { %v13968_v14 = vpop.xlane.xlu0 %2644  ;;  %v6375_v18 = vsel %vm15880_vm7, %v6374_v55, %v6370_v38  ;;  %v4731_v33 = vsel %vm3701_vm14, %v4730_v22, %v4726_v35  ;;  %v6389_v47 = vrot.slane %v15881_v57, %v15743_v19  ;;  %v4104_v60 = vsel %vm3708_vm15, %v4103_v12, %v4099_v21  ;;  %v15884_v12 = vld [vmem:[#allocation153_spill] sm:$0xff]  ;;  %v15887_v29 = vld [vmem:[#allocation175_spill] sm:$0xff]  ;;  %v15888_v57 = vld [vmem:[#allocation22_spill] sm:$0xff] }
 0x59d   :  { %v6380_v62 = vsel %vm3687_vm12, %v6379_v23, %v6375_v18  ;;  %v6502_v61 = vrot.slane %v15882_v42, %v15810_v46  ;;  %v6507_v22 = vrot.slane %v15883_v56, %v15815_v49  ;;  %v6285_v17 = vrot.slane %v15884_v12, %v9997_v20  ;;  %vm15892_vm7 = vmmov %vm15876_vm0  ;;  %v3088_v12 = vld [vmem:[%s14752_s1 + $0x8] sm:$0xff] }
 0x59e   :  { %v6276_v35 = vsel %vm15885_vm8, %v6275_v25, %v6271_v16  ;;  %v6394_v18 = vrot.slane %v15887_v29, %v15742_v15  ;;  %v4636_v21 = vrot.slane %v13853_v54, %v10041_v41  ;;  %v4009_v16 = vrot.slane %v13863_v6, %v10074_v50  ;;  %v15891_v6 = vld [vmem:[#allocation156_spill] sm:$0xff]  ;;  %v3106_v29 = vld [vmem:[%s14752_s1 + $0x98] sm:$0xff] }
 0x59f   :  { %v2990_v28 = vpop.xlane.xlu1 %2989  ;;  %v4646_v42 = vrot.slane %v13908_v59, %v10059_v52  ;;  %vm15890_vm9 = vcmask 589312   ;;  %v3087_v59 = vld [vmem:[%s14752_s1] sm:$0xff] }
 0x5a0   :  { %v4735_v3 = vrot.slane %v2990_v28, %v15742_v15  ;;  %v2939_v13 = vpop.xlane.xlu0 %2938  ;;  %v6493_v28 = vsel %vm3624_vm3, %v6492_v31, %v6488_v32  ;;  %v6385_v32 = vsel %vm3694_vm13, %v6384_v10, %v6380_v62  ;;  %v4641_v10 = vrot.slane %v13871_v1, %v10074_v50 }
 0x5a1   :  { %v6498_v38 = vsel %vm3631_vm4, %v6497_v34, %v6493_v28  ;;  %v4004_v34 = vrot.slane %v13841_v43, %v10041_v41  ;;  %v4019_v1 = vrot.slane %v13940_v51, %v15743_v19 }
 0x5a2   :  { %v4736_v48 = vsel %vm3708_vm15, %v4735_v3, %v4731_v33  ;;  %v15886_v3 = vld [vmem:[#allocation154_spill] sm:$0xff]  ;;  %v6390_v33 = vsel %vm3701_vm14, %v6389_v47, %v6385_v32  ;;  %v6503_v25 = vsel %vm3638_vm5, %v6502_v61, %v6498_v38  ;;  %v4014_v47 = vrot.slane %v13883_v11, %v10059_v52  ;;  %v3105_v32 = vld [vmem:[%s14752_s1 + $0x90] sm:$0xff] }
 0x5a3   :  { %v14007_v45 = vpop.xlane.xlu1 %3079  ;;  %v4901_v55 = vsel %vm4895_vm11, %v4736_v48, %v4104_v60  ;;  %v6280_v31 = vrot.slane %v15886_v3, %v10012_v53  ;;  %v6512_v60 = vrot.slane %v15888_v57, %v9963_v37  ;;  %v6508_v43 = vsel %vm3645_vm6, %v6507_v22, %v6503_v25  ;;  %v15889_v48 = vld [vmem:[#allocation25_spill] sm:$0xff] }
 0x5a4   :  { %v14013_v23 = vpop.xlane.xlu0 %3028  ;;  %5116 = vmatprep.mubr.f32.mxu0 %v4901_v55  ;;  %v6517_v54 = vrot.slane %v15889_v48, %v10012_v53  ;;  %v6290_v55 = vrot.slane %v15891_v6, %v10044_v8  ;;  %v4651_v38 = vrot.slane %v2939_v13, %v15743_v19  ;;  %v4005_v56 = vsel %vm15876_vm0, %v4004_v34, %v13821_v7  ;;  %v15893_v13 = vld [vmem:[#allocation24_spill] sm:$0xff]  ;;  %v3090_v48 = vld [vmem:[%s14752_s1 + $0x18] sm:$0xff]  ;;  %v3108_v6 = vld [vmem:[%s14752_s1 + $0xa8] sm:$0xff] }
 0x5a5   :  { %v6281_v28 = vsel %vm15890_vm9, %v6280_v31, %v6276_v35  ;;  %v4637_v11 = vsel %vm15892_vm7, %v4636_v21, %v13831_v9  ;;  %v6395_v51 = vsel %vm3708_vm15, %v6394_v18, %v6390_v33  ;;  %v6522_v35 = vrot.slane %v15893_v13, %v9997_v20  ;;  %v3110_v13 = vld [vmem:[%s14752_s1 + $0xb8] sm:$0xff] }
 0x5a6   :  { %v6513_v7 = vsel %vm15885_vm8, %v6512_v60, %v6508_v43  ;;  %v4010_v3 = vsel %vm3687_vm12, %v4009_v16, %v4005_v56  ;;  %v4642_v9 = vsel %vm3687_vm12, %v4641_v10, %v4637_v11  ;;  %vm15894_vm0 = vcmask 654912   ;;  %v3089_v43 = vld [vmem:[%s14752_s1 + $0x10] sm:$0xff] }
 0x5a7   :  { %v14035_v62 = vpop.xlane.xlu1 %2647  ;;  %v6518_v18 = vsel %vm15890_vm9, %v6517_v54, %v6513_v7  ;;  %v4015_v34 = vsel %vm3694_vm13, %v4014_v47, %v4010_v3  ;;  %v4647_v21 = vsel %vm3694_vm13, %v4646_v42, %v4642_v9  ;;  %v6286_v60 = vsel %vm15894_vm0, %v6285_v17, %v6281_v28  ;;  %v3107_v54 = vld [vmem:[%s14752_s1 + $0xa0] sm:$0xff]  ;;  %v15895_v47 = vld [vmem:[#allocation155_spill] sm:$0xff]  ;;  %vm15896_vm7 = vmmov %vm15894_vm0 }
 0x5a8   :  { %v2558_v61 = vpop.xlane.xlu0 %2557  ;;  %v4020_v25 = vsel %vm3701_vm14, %v4019_v1, %v4015_v34  ;;  %v4652_v16 = vsel %vm3701_vm14, %v4651_v38, %v4647_v21  ;;  %v8071_v10 = vpack.c.bf16 %v3088_v12, %v3087_v59  ;;  %v8073_v28 = vpack.c.bf16 %v3106_v29, %v3105_v32  ;;  %v14101_v1 = vld [vmem:[%s14752_s1 + $0x20] sm:$0xff]  ;;  %v3092_v38 = vld [vmem:[%s14752_s1 + $0x28] sm:$0xff]  ;;  %v3109_v12 = vld [vmem:[%s14752_s1 + $0xb0] sm:$0xff] }
 0x5a9   :  { %v4024_v22 = vrot.slane %v2558_v61, %v15742_v15  ;;  %v14107_v56 = vsel %vm3673_vm10, %v6290_v55, %v6286_v60  ;;  %v14110_v11 = vsel %vm15896_vm7, %v6522_v35, %v6518_v18  ;;  %v14122_v7 = vld [vmem:[%s14752_s1 + $0x30] sm:$0xff]  ;;  %v15898_v3 = vld [vmem:[#allocation27_spill] sm:$0xff]  ;;  %v4868_v29 = vrot.slane %v13855_v24, %v10044_v8  ;;  %v14146_v21 = vld [vmem:[%s14752_s1 + $0xc0] sm:$0xff] }
 0x5aa   :  { %v15897_v55 = vld [vmem:[#allocation112_spill] sm:$0xff]  ;;  %v6527_v9 = vrot.slane %v15898_v3, %v10044_v8  ;;  %v4241_v18 = vrot.slane %v13865_v40, %v10041_v41  ;;  %v14151_v24 = vld [vmem:[%s14752_s1 + $0xc8] sm:$0xff]  ;;  %v4157_v40 = vrot.slane %v13867_v58, %v10044_v8  ;;  %v15900_v60 = vld [vmem:[#allocation94_spill] sm:$0xff]  ;;  %v4878_v58 = vrot.slane %v13919_v27, %v10074_v50 }
 0x5ab   :  { %v2942_v31 = vpop.xlane.xlu1 %2941  ;;  %v4025_v42 = vsel %vm3708_vm15, %v4024_v22, %v4020_v25  ;;  %v14126_v35 = vsel %vm4895_vm11, %v6395_v51, %v15897_v55  ;;  %v14141_v51 = vld [vmem:[%s14752_s1 + $0x38] sm:$0xff]  ;;  %v8075_v25 = vpack.c.bf16 %v3090_v48, %v3089_v43  ;;  %v4246_v55 = vrot.slane %v13887_v4, %v10074_v50 }
 0x5ac   :  { %v4656_v33 = vrot.slane %v2942_v31, %v15742_v15  ;;  %v14077_v57 = vpop.xlane.xlu0 %2698  ;;  %v15899_v31 = vld [vmem:[#allocation48_spill] sm:$0xff]  ;;  %vm15901_vm8 = vcmask 786112   ;;  %v4251_v48 = vrot.slane %v13960_v63, %v10059_v52  ;;  %v4883_v4 = vrot.slane %v14007_v45, %v10059_v52  ;;  %v15906_v45 = vld [vmem:[#allocation141_spill] sm:$0xff] }
 0x5ad   :  { %v6640_v32 = vrot.slane %v15899_v31, %v9916_v0  ;;  %v4242_v43 = vsel %vm15901_vm8, %v4241_v18, %v13846_v5  ;;  %vm15903_vm9 = vmmov %vm15901_vm8  ;;  %v15905_v63 = vld [vmem:[#allocation140_spill] sm:$0xff]  ;;  %v15913_v3 = vld [vmem:[#allocation29_spill] sm:$0xff] }
 0x5ae   :  { %v4657_v61 = vsel %vm3708_vm15, %v4656_v33, %v4652_v16  ;;  %v4873_v33 = vrot.slane %v13873_v30, %v10041_v41  ;;  %v4789_v16 = vrot.slane %v13875_v2, %v10044_v8  ;;  %v8083_v30 = vpack.c.bf16 %v14141_v51, %v14122_v7  ;;  %vm15907_vm0 = vmmov %vm15901_vm8 }
 0x5af   :  { %v3083_v22 = vpop.xlane.xlu1 %3082  ;;  %v4900_v59 = vsel %vm4895_vm11, %v4657_v61, %v4025_v42  ;;  %v8077_v42 = vpack.c.bf16 %v3108_v6, %v3107_v54  ;;  %v8079_v61 = vpack.c.bf16 %v3092_v38, %v14101_v1  ;;  %v4869_v2 = vsel %vm3673_vm10, %v4868_v29, %v13836_v36  ;;  %v15902_v54 = vld [vmem:[#allocation137_spill] sm:$0xff]  ;;  %v15904_v38 = vld [vmem:[#allocation138_spill] sm:$0xff]  ;;  %vm15909_vm7 = vmmov %vm15907_vm0 }
 0x5b0   :  { %v14136_v34 = vpop.xlane.xlu0 %3031  ;;  %5117 = vmatmul.mubr.f32.vlgmr.msra.gmra.mrb[2].mxu0 %v4900_v59  ;;  %v8081_v59 = vpack.c.bf16 %v3110_v13, %v3109_v12  ;;  %v4874_v6 = vsel %vm15903_vm9, %v4873_v33, %v4869_v2  ;;  %v4256_v1 = vrot.slane %v14077_v57, %v15743_v19  ;;  %v4888_v36 = vrot.slane %v3083_v22, %v15743_v19  ;;  %vm15917_vm8 = vmmov %vm15907_vm0 }
 0x5b1   :  { %8072 = vmatpush3.bf16.msra.mxu0 %v8071_v10  ;;  %6792 = vmatprep.mubr.f32.mxu0 %v15900_v60  ;;  %v8085_v10 = vpack.c.bf16 %v14151_v24, %v14146_v21  ;;  %v4790_v5 = vsel %vm3673_vm10, %v4789_v16, %v15904_v38  ;;  %v4162_v12 = vrot.slane %v15905_v63, %v10041_v41  ;;  %v15910_v38 = vld [vmem:[#allocation71_spill] sm:$0xff]  ;;  %vm15919_vm9 = vmmov %vm15907_vm0 }
 0x5b2   :  { %8074 = vmatprep.subr.bf16.mxu0 %v8073_v28  ;;  %v4158_v28 = vsel %vm3673_vm10, %v4157_v40, %v15902_v54  ;;  %v4794_v13 = vrot.slane %v15906_v45, %v10041_v41  ;;  %v4247_v29 = vsel %vm3687_vm12, %v4246_v55, %v4242_v43  ;;  %v4879_v18 = vsel %vm3687_vm12, %v4878_v58, %v4874_v6  ;;  %v3096_v43 = vld [vmem:[%s14752_s1 + $0x48] sm:$0xff]  ;;  %v3119_v6 = vld [vmem:[%s14752_s1 + $0x100] sm:$0xff] }
 0x5b3   :  { %v2702_v17 = vpop.xlane.xlu1 %2701  ;;  %v4167_v57 = vrot.slane %v13968_v14, %v10074_v50  ;;  %v4799_v22 = vrot.slane %v14013_v23, %v10074_v50  ;;  %v4252_v40 = vsel %vm3694_vm13, %v4251_v48, %v4247_v29  ;;  %v4884_v33 = vsel %vm3694_vm13, %v4883_v4, %v4879_v18  ;;  %v15908_v48 = vld [vmem:[#allocation49_spill] sm:$0xff]  ;;  %v3137_v29 = vld [vmem:[%s14752_s1 + $0x190] sm:$0xff] }
 0x5b4   :  { %v2651_v27 = vpop.xlane.xlu0 %2650  ;;  %v4261_v7 = vrot.slane %v2702_v17, %v15742_v15  ;;  %v4804_v60 = vrot.slane %v14136_v34, %v10059_v52  ;;  %v4172_v16 = vrot.slane %v14035_v62, %v10059_v52  ;;  %v4889_v14 = vsel %vm3701_vm14, %v4888_v36, %v4884_v33  ;;  %v3095_v62 = vld [vmem:[%s14752_s1 + $0x40] sm:$0xff]  ;;  %v3113_v36 = vld [vmem:[%s14752_s1 + $0xd0] sm:$0xff]  ;;  %v3138_v18 = vld [vmem:[%s14752_s1 + $0x198] sm:$0xff] }
 0x5b5   :  { %8076 = vmatpush3.bf16.msra.mxu0 %v8075_v25  ;;  %v4795_v55 = vsel %vm15907_vm0, %v4794_v13, %v4790_v5  ;;  %v4177_v58 = vrot.slane %v2651_v27, %v15743_v19  ;;  %v4163_v4 = vsel %vm15909_vm7, %v4162_v12, %v4158_v28  ;;  %v15911_v5 = vld [vmem:[#allocation51_spill] sm:$0xff]  ;;  %v15912_v33 = vld [vmem:[#allocation26_spill] sm:$0xff]  ;;  %v6528_v21 = vsel %vm3673_vm10, %v6527_v9, %v14110_v11 }
 0x5b6   :  { %8078 = vmatprep.subr.bf16.mxu0 %v8077_v42  ;;  %v4257_v42 = vsel %vm3701_vm14, %v4256_v1, %v4252_v40  ;;  %v4800_v27 = vsel %vm3687_vm12, %v4799_v22, %v4795_v55  ;;  %v3120_v1 = vld [vmem:[%s14752_s1 + $0x108] sm:$0xff]  ;;  %v6645_v28 = vrot.slane %v15911_v5, %v15910_v38  ;;  %v4168_v63 = vsel %vm3687_vm12, %v4167_v57, %v4163_v4  ;;  %v3122_v55 = vld [vmem:[%s14752_s1 + $0x118] sm:$0xff]  ;;  %v15914_v9 = vld [vmem:[#allocation50_spill] sm:$0xff] }
 0x5b7   :  { %v3086_v51 = vpop.xlane.xlu1 %3085  ;;  %v4262_v34 = vsel %vm3708_vm15, %v4261_v7, %v4257_v42  ;;  %v4805_v12 = vsel %vm3694_vm13, %v4804_v60, %v4800_v27  ;;  %v3114_v7 = vld [vmem:[%s14752_s1 + $0xd8] sm:$0xff]  ;;  %v4173_v57 = vsel %vm3694_vm13, %v4172_v16, %v4168_v63  ;;  %v8087_v40 = vpack.c.bf16 %v3096_v43, %v3095_v62  ;;  %v3097_v16 = vld [vmem:[%s14752_s1 + $0x50] sm:$0xff]  ;;  %v3140_v4 = vld [vmem:[%s14752_s1 + $0x1a8] sm:$0xff] }
 0x5b8   :  { %v4893_v17 = vrot.slane %v3086_v51, %v15742_v15  ;;  %v3035_v25 = vpop.xlane.xlu0 %3034  ;;  %v6532_v60 = vrot.slane %v15912_v33, %v10041_v41  ;;  %v8103_v42 = vpack.c.bf16 %v3120_v1, %v3119_v6  ;;  %v6650_v62 = vrot.slane %v15914_v9, %v15799_v26  ;;  %v3099_v6 = vld [vmem:[%s14752_s1 + $0x60] sm:$0xff]  ;;  %v3100_v1 = vld [vmem:[%s14752_s1 + $0x68] sm:$0xff] }
 0x5b9   :  { %v4809_v23 = vrot.slane %v3035_v25, %v15743_v19  ;;  %8080 = vmatpush3.bf16.msra.mxu0 %v8079_v61  ;;  %v6636_v61 = vrot.slane %v15908_v48, %v15792_v39  ;;  %v3139_v48 = vld [vmem:[%s14752_s1 + $0x1a0] sm:$0xff]  ;;  %v15916_v5 = vrot.slane %v15895_v47, %v10041_v41  ;;  %v3124_v63 = vld [vmem:[%s14752_s1 + $0x128] sm:$0xff]  ;;  %v15918_v47 = vld [vmem:[#allocation28_spill] sm:$0xff]  ;;  %vm15934_vm0 = vcmask 523712  }
 0x5ba   :  { %8082 = vmatprep.subr.bf16.mxu0 %v8081_v59  ;;  %v4894_v2 = vsel %vm3708_vm15, %v4893_v17, %v4889_v14  ;;  %v4178_v17 = vsel %vm3701_vm14, %v4177_v58, %v4173_v57  ;;  %v3121_v14 = vld [vmem:[%s14752_s1 + $0x110] sm:$0xff]  ;;  %v3115_v58 = vld [vmem:[%s14752_s1 + $0xe0] sm:$0xff]  ;;  %v15921_v33 = vld [vmem:[#allocation55_spill] sm:$0xff]  ;;  %vm15935_vm7 = vcmask 589312  }
 0x5bb   :  { %v3038_v59 = vpop.xlane.xlu1 %3037  ;;  %v4903_v54 = vsel %vm4895_vm11, %v4894_v2, %v4262_v34  ;;  %v4810_v22 = vsel %vm3701_vm14, %v4809_v23, %v4805_v12  ;;  %v8105_v23 = vpack.c.bf16 %v3138_v18, %v3137_v29  ;;  %v3116_v34 = vld [vmem:[%s14752_s1 + $0xe8] sm:$0xff]  ;;  %v6537_v2 = vrot.slane %v15913_v3, %v10074_v50  ;;  %v3117_v12 = vld [vmem:[%s14752_s1 + $0xf0] sm:$0xff]  ;;  %v3167_v9 = vld [vmem:[%s14752_s1 + $0x280] sm:$0xff] }
 0x5bc   :  { %v4814_v45 = vrot.slane %v3038_v59, %v15742_v15  ;;  %v2654_v13 = vpop.xlane.xlu0 %2653  ;;  %5186 = vmatprep.mubr.f32.mxu1 %v4903_v54  ;;  %v6641_v11 = vsel %vm3610_vm1, %v6640_v32, %v6636_v61  ;;  %v15915_v59 = vld [vmem:[#allocation53_spill] sm:$0xff]  ;;  %v8107_v61 = vpack.c.bf16 %v3122_v55, %v3121_v14  ;;  %v8093_v54 = vpack.c.bf16 %v3116_v34, %v3115_v58  ;;  %v3141_v57 = vld [vmem:[%s14752_s1 + $0x1b0] sm:$0xff]  ;;  %v15924_v55 = vld [vmem:[#allocation2_spill] sm:$0xff] }
 0x5bd   :  { %v4182_v51 = vrot.slane %v2654_v13, %v15742_v15  ;;  %8084 = vmatpush3.bf16.msra.mxu0 %v8083_v30  ;;  %v3098_v30 = vld [vmem:[%s14752_s1 + $0x58] sm:$0xff]  ;;  %v6646_v27 = vsel %vm3617_vm2, %v6645_v28, %v6641_v11  ;;  %v6655_v31 = vrot.slane %v15915_v59, %v15804_v44  ;;  %v8109_v28 = vpack.c.bf16 %v3140_v4, %v3139_v48  ;;  %v3101_v14 = vld [vmem:[%s14752_s1 + $0x70] sm:$0xff]  ;;  %v15927_v4 = vld [vmem:[#allocation54_spill] sm:$0xff] }
 0x5be   :  { %v4815_v25 = vsel %vm3708_vm15, %v4814_v45, %v4810_v22  ;;  %8086 = vmatprep.subr.bf16.mxu0 %v8085_v10  ;;  %v8089_v10 = vpack.c.bf16 %v3114_v7, %v3113_v36  ;;  %v8091_v32 = vpack.c.bf16 %v3098_v30, %v3097_v16  ;;  %v3123_v36 = vld [vmem:[%s14752_s1 + $0x120] sm:$0xff]  ;;  %v3118_v45 = vld [vmem:[%s14752_s1 + $0xf8] sm:$0xff]  ;;  %v6542_v13 = vrot.slane %v15918_v47, %v10059_v52  ;;  %v15920_v7 = vld [vmem:[#allocation52_spill] sm:$0xff] }
 0x5bf   :  { %v4183_v24 = vsel %vm3708_vm15, %v4182_v51, %v4178_v17  ;;  %v6660_v29 = vrot.slane %v15920_v7, %v15810_v46  ;;  %v6651_v18 = vsel %vm3624_vm3, %v6650_v62, %v6646_v27  ;;  %v3142_v22 = vld [vmem:[%s14752_s1 + $0x1b8] sm:$0xff]  ;;  %v8095_v17 = vpack.c.bf16 %v3100_v1, %v3099_v6  ;;  %v3168_v62 = vld [vmem:[%s14752_s1 + $0x288] sm:$0xff]  ;;  %v3151_v47 = vld [vmem:[%s14752_s1 + $0x200] sm:$0xff] }
 0x5c0   :  { %v4902_v43 = vsel %vm4895_vm11, %v4815_v25, %v4183_v24  ;;  %v15922_v25 = vld [vmem:[#allocation31_spill] sm:$0xff]  ;;  %v8111_v16 = vpack.c.bf16 %v3124_v63, %v3123_v36  ;;  %v8097_v30 = vpack.c.bf16 %v3118_v45, %v3117_v12  ;;  %v3125_v24 = vld [vmem:[%s14752_s1 + $0x130] sm:$0xff]  ;;  %v6403_v58 = vrot.slane %v15924_v55, %v9916_v0  ;;  %v15925_v34 = vld [vmem:[#allocation177_spill] sm:$0xff] }
 0x5c1   :  { %5187 = vmatmul.mubr.f32.vlgmr.msra.gmra.mrb[2].mxu1 %v4902_v43  ;;  %8088 = vmatpush3.bf16.msra.mxu0 %v8087_v40  ;;  %v6656_v40 = vsel %vm3631_vm4, %v6655_v31, %v6651_v18  ;;  %v6399_v3 = vrot.slane %v15925_v34, %v15792_v39  ;;  %v3126_v11 = vld [vmem:[%s14752_s1 + $0x138] sm:$0xff]  ;;  %v15926_v43 = vld [vmem:[#allocation178_spill] sm:$0xff]  ;;  %v6670_v27 = vrot.slane %v15927_v4, %v9963_v37  ;;  %v15936_v55 = vld [vmem:[#allocation59_spill] sm:$0xff] }
 0x5c2   :  { %8104 = vmatpush3.bf16.msra.mxu1 %v8103_v42  ;;  %6862 = vmatprep.mubr.f32.mxu1 %v14126_v35  ;;  %v14311_v35 = vsel %vm15917_vm8, %v15916_v5, %v14107_v56  ;;  %v6533_v56 = vsel %vm15919_vm9, %v6532_v60, %v6528_v21  ;;  %v6665_v60 = vrot.slane %v15921_v33, %v15815_v49  ;;  %v3102_v21 = vld [vmem:[%s14752_s1 + $0x78] sm:$0xff]  ;;  %v3143_v31 = vld [vmem:[%s14752_s1 + $0x1c0] sm:$0xff]  ;;  %v3169_v33 = vld [vmem:[%s14752_s1 + $0x290] sm:$0xff]  ;;  %vm15940_vm8 = vcmask 654912  }
 0x5c3   :  { %8090 = vmatprep.subr.bf16.mxu0 %v8089_v10  ;;  %8106 = vmatprep.subr.bf16.mxu1 %v8105_v23  ;;  %v6538_v51 = vsel %vm3687_vm12, %v6537_v2, %v6533_v56  ;;  %v6547_v42 = vrot.slane %v15922_v25, %v15743_v19  ;;  %v15923_v10 = vld [vmem:[#allocation158_spill] sm:$0xff]  ;;  %v8113_v2 = vpack.c.bf16 %v3142_v22, %v3141_v57  ;;  %v15929_v36 = vld [vmem:[#allocation57_spill] sm:$0xff]  ;;  %v15931_v57 = vld [vmem:[#allocation4_spill] sm:$0xff] }
 0x5c4   :  { %v6300_v23 = vrot.slane %v15923_v10, %v10074_v50  ;;  %v6408_v48 = vrot.slane %v15926_v43, %v15910_v38  ;;  %v6661_v59 = vsel %vm3638_vm5, %v6660_v29, %v6656_v40  ;;  %v6675_v5 = vrot.slane %v15929_v36, %v10012_v53  ;;  %v3127_v45 = vld [vmem:[%s14752_s1 + $0x140] sm:$0xff]  ;;  %v15930_v7 = vld [vmem:[#allocation157_spill] sm:$0xff]  ;;  %v3128_v40 = vld [vmem:[%s14752_s1 + $0x148] sm:$0xff] }
 0x5c5   :  { %8092 = vmatpush3.bf16.msra.mxu0 %v8091_v32  ;;  %v3144_v32 = vld [vmem:[%s14752_s1 + $0x1c8] sm:$0xff]  ;;  %v6666_v1 = vsel %vm3645_vm6, %v6665_v60, %v6661_v59  ;;  %v8115_v63 = vpack.c.bf16 %v3126_v11, %v3125_v24  ;;  %v8133_v12 = vpack.c.bf16 %v3168_v62, %v3167_v9  ;;  %v6305_v29 = vrot.slane %v15930_v7, %v10059_v52  ;;  %v3170_v60 = vld [vmem:[%s14752_s1 + $0x298] sm:$0xff]  ;;  %v3129_v62 = vld [vmem:[%s14752_s1 + $0x150] sm:$0xff] }
 0x5c6   :  { %8108 = vmatpush3.bf16.msra.mxu1 %v8107_v61  ;;  %8094 = vmatprep.subr.bf16.mxu0 %v8093_v54  ;;  %v6543_v61 = vsel %vm3694_vm13, %v6542_v13, %v6538_v51  ;;  %v15928_v54 = vld [vmem:[#allocation30_spill] sm:$0xff]  ;;  %v3152_v13 = vld [vmem:[%s14752_s1 + $0x208] sm:$0xff]  ;;  %v6404_v18 = vsel %vm3610_vm1, %v6403_v58, %v6399_v3  ;;  %v6413_v22 = vrot.slane %v15931_v57, %v15799_v26  ;;  %v15932_v25 = vld [vmem:[#allocation5_spill] sm:$0xff] }
 0x5c7   :  { %8110 = vmatprep.subr.bf16.mxu1 %v8109_v28  ;;  %v6552_v6 = vrot.slane %v15928_v54, %v15742_v15  ;;  %v8099_v28 = vpack.c.bf16 %v3102_v21, %v3101_v14  ;;  %v6548_v56 = vsel %vm3701_vm14, %v6547_v42, %v6543_v61  ;;  %v8117_v51 = vpack.c.bf16 %v3144_v32, %v3143_v31  ;;  %v3145_v21 = vld [vmem:[%s14752_s1 + $0x1d0] sm:$0xff]  ;;  %v3146_v24 = vld [vmem:[%s14752_s1 + $0x1d8] sm:$0xff]  ;;  %v3171_v61 = vld [vmem:[%s14752_s1 + $0x2a0] sm:$0xff] }
 0x5c8   :  { %v6418_v42 = vrot.slane %v15932_v25, %v15804_v44  ;;  %v6671_v14 = vsel %vm15934_vm0, %v6670_v27, %v6666_v1  ;;  %v6685_v58 = vrot.slane %v15936_v55, %v10044_v8  ;;  %v8135_v34 = vpack.c.bf16 %v3152_v13, %v3151_v47  ;;  %v3153_v43 = vld [vmem:[%s14752_s1 + $0x210] sm:$0xff]  ;;  %v3130_v32 = vld [vmem:[%s14752_s1 + $0x158] sm:$0xff]  ;;  %v3172_v54 = vld [vmem:[%s14752_s1 + $0x2a8] sm:$0xff] }
 0x5c9   :  { %8096 = vmatpush3.bf16.msra.mxu0 %v8095_v17  ;;  %v6409_v17 = vsel %vm3617_vm2, %v6408_v48, %v6404_v18  ;;  %v6676_v10 = vsel %vm15935_vm7, %v6675_v5, %v6671_v14  ;;  %v6553_v3 = vsel %vm3708_vm15, %v6552_v6, %v6548_v56  ;;  %v8119_v11 = vpack.c.bf16 %v3128_v40, %v3127_v45  ;;  %v3154_v48 = vld [vmem:[%s14752_s1 + $0x218] sm:$0xff]  ;;  %v15937_v4 = vld [vmem:[#allocation160_spill] sm:$0xff]  ;;  %v15939_v1 = vld [vmem:[#allocation7_spill] sm:$0xff] }
 0x5ca   :  { %8112 = vmatpush3.bf16.msra.mxu1 %v8111_v16  ;;  %8098 = vmatprep.subr.bf16.mxu0 %v8097_v30  ;;  %v15933_v16 = vld [vmem:[#allocation56_spill] sm:$0xff]  ;;  %v8137_v9 = vpack.c.bf16 %v3170_v60, %v3169_v33  ;;  %v6310_v27 = vrot.slane %v15937_v4, %v15743_v19  ;;  %v6414_v59 = vsel %vm3624_vm3, %v6413_v22, %v6409_v17  ;;  %v3147_v45 = vld [vmem:[%s14752_s1 + $0x1e0] sm:$0xff]  ;;  %v3148_v47 = vld [vmem:[%s14752_s1 + $0x1e8] sm:$0xff] }
 0x5cb   :  { %8114 = vmatprep.subr.bf16.mxu1 %v8113_v2  ;;  %v6680_v30 = vrot.slane %v15933_v16, %v9997_v20  ;;  %v6301_v2 = vsel %vm3687_vm12, %v6300_v23, %v14311_v35  ;;  %v15938_v35 = vld [vmem:[#allocation3_spill] sm:$0xff]  ;;  %v8121_v31 = vpack.c.bf16 %v3146_v24, %v3145_v21  ;;  %v6419_v6 = vsel %vm3631_vm4, %v6418_v42, %v6414_v59  ;;  %v15943_v13 = vld [vmem:[#allocation58_spill] sm:$0xff]  ;;  %v15944_v57 = vld [vmem:[#allocation61_spill] sm:$0xff] }
 0x5cc   :  { %v6423_v23 = vrot.slane %v15938_v35, %v15810_v46  ;;  %v6428_v36 = vrot.slane %v15939_v1, %v15815_v49  ;;  %v6690_v56 = vrot.slane %v15943_v13, %v10041_v41  ;;  %v8139_v18 = vpack.c.bf16 %v3154_v48, %v3153_v43  ;;  %v3131_v33 = vld [vmem:[%s14752_s1 + $0x160] sm:$0xff]  ;;  %v3156_v17 = vld [vmem:[%s14752_s1 + $0x228] sm:$0xff]  ;;  %v3173_v14 = vld [vmem:[%s14752_s1 + $0x2b0] sm:$0xff] }
 0x5cd   :  { %8100 = vmatpush3.bf16.msra.mxu0 %v8099_v28  ;;  %v6681_v5 = vsel %vm15940_vm8, %v6680_v30, %v6676_v10  ;;  %v15941_v28 = vld [vmem:[#allocation144_spill] sm:$0xff]  ;;  %v6695_v22 = vrot.slane %v15944_v57, %v10074_v50  ;;  %v8141_v40 = vpack.c.bf16 %v3172_v54, %v3171_v61  ;;  %v3155_v60 = vld [vmem:[%s14752_s1 + $0x220] sm:$0xff]  ;;  %v6306_v25 = vsel %vm3694_vm13, %v6305_v29, %v6301_v2  ;;  %v3132_v30 = vld [vmem:[%s14752_s1 + $0x168] sm:$0xff] }
 0x5ce   :  { %8116 = vmatpush3.bf16.msra.mxu1 %v8115_v63  ;;  %8134 = vmatprep.subr.bf16.mxu0 %v8133_v12  ;;  %v15942_v63 = vld [vmem:[#allocation130_spill] sm:$0xff]  ;;  %v6686_v7 = vsel %vm3673_vm10, %v6685_v58, %v6681_v5  ;;  %v6424_v42 = vsel %vm3638_vm5, %v6423_v23, %v6419_v6  ;;  %v8125_v16 = vpack.c.bf16 %v3148_v47, %v3147_v45  ;;  %v3174_v21 = vld [vmem:[%s14752_s1 + $0x2b8] sm:$0xff]  ;;  %v15945_v24 = vld [vmem:[#allocation159_spill] sm:$0xff] }
 0x5cf   :  { %8118 = vmatprep.subr.bf16.mxu1 %v8117_v51  ;;  %v6717_v12 = vsel %vm4895_vm11, %v6553_v3, %v15942_v63  ;;  %v8123_v51 = vpack.c.bf16 %v3130_v32, %v3129_v62  ;;  %v6315_v10 = vrot.slane %v15945_v24, %v15742_v15  ;;  %v6311_v29 = vsel %vm3701_vm14, %v6310_v27, %v6306_v25  ;;  %v15946_v55 = vld [vmem:[#allocation6_spill] sm:$0xff]  ;;  %v3149_v3 = vld [vmem:[%s14752_s1 + $0x1f0] sm:$0xff]  ;;  %v3150_v2 = vld [vmem:[%s14752_s1 + $0x1f8] sm:$0xff] }
 0x5d0   :  { %6793 = vmatmul.mubr.f32.vlgmr.msra.gmra.mrb[4].mxu0 %v15941_v28  ;;  %v6433_v58 = vrot.slane %v15946_v55, %v9963_v37  ;;  %v15948_v62 = vld [vmem:[#allocation60_spill] sm:$0xff]  ;;  %v6691_v48 = vsel %vm15919_vm9, %v6690_v56, %v6686_v7  ;;  %v8143_v4 = vpack.c.bf16 %v3156_v17, %v3155_v60  ;;  %v8127_v35 = vpack.c.bf16 %v3132_v30, %v3131_v33  ;;  %v3158_v32 = vld [vmem:[%s14752_s1 + $0x238] sm:$0xff]  ;;  %v15949_v61 = vld [vmem:[#allocation63_spill] sm:$0xff] }
 0x5d1   :  { %8136 = vmatpush3.bf16.msra.mxu0 %v8135_v34  ;;  %6932 = vmatprep.mubr.f32.mxu0 %v6717_v12  ;;  %v6429_v34 = vsel %vm3645_vm6, %v6428_v36, %v6424_v42  ;;  %v6700_v43 = vrot.slane %v15948_v62, %v10059_v52  ;;  %v6696_v27 = vsel %vm3687_vm12, %v6695_v22, %v6691_v48  ;;  %v3133_v59 = vld [vmem:[%s14752_s1 + $0x170] sm:$0xff]  ;;  %v3134_v1 = vld [vmem:[%s14752_s1 + $0x178] sm:$0xff]  ;;  %v3175_v36 = vld [vmem:[%s14752_s1 + $0x2c0] sm:$0xff] }
 0x5d2   :  { %8120 = vmatpush3.bf16.msra.mxu1 %v8119_v11  ;;  %8138 = vmatprep.subr.bf16.mxu0 %v8137_v9  ;;  %v15947_v11 = vld [vmem:[#allocation9_spill] sm:$0xff]  ;;  %v8145_v23 = vpack.c.bf16 %v3174_v21, %v3173_v14  ;;  %v6705_v54 = vrot.slane %v15949_v61, %v15743_v19  ;;  %v8129_v6 = vpack.c.bf16 %v3150_v2, %v3149_v3  ;;  %v3176_v5 = vld [vmem:[%s14752_s1 + $0x2c8] sm:$0xff]  ;;  %v3199_v12 = vld [vmem:[%s14752_s1 + $0x380] sm:$0xff] }
 0x5d3   :  { %8122 = vmatprep.subr.bf16.mxu1 %v8121_v31  ;;  %v6438_v9 = vrot.slane %v15947_v11, %v10012_v53  ;;  %v3157_v31 = vld [vmem:[%s14752_s1 + $0x230] sm:$0xff]  ;;  %v6434_v28 = vsel %vm15934_vm0, %v6433_v58, %v6429_v34  ;;  %v6316_v63 = vsel %vm3708_vm15, %v6315_v10, %v6311_v29  ;;  %v3200_v45 = vld [vmem:[%s14752_s1 + $0x388] sm:$0xff]  ;;  %v15951_v57 = vld [vmem:[#allocation62_spill] sm:$0xff] }
 0x5d4   :  { %v15950_v47 = vld [vmem:[#allocation8_spill] sm:$0xff]  ;;  %v8147_v7 = vpack.c.bf16 %v3158_v32, %v3157_v31  ;;  %v6710_v22 = vrot.slane %v15951_v57, %v15742_v15  ;;  %v3159_v33 = vld [vmem:[%s14752_s1 + $0x240] sm:$0xff]  ;;  %v3160_v60 = vld [vmem:[%s14752_s1 + $0x248] sm:$0xff]  ;;  %v8165_v30 = vpack.c.bf16 %v3200_v45, %v3199_v12 }
 0x5d5   :  { %8140 = vmatpush3.bf16.msra.mxu0 %v8139_v18  ;;  %v6443_v13 = vrot.slane %v15950_v47, %v9997_v20  ;;  %v6439_v56 = vsel %vm15935_vm7, %v6438_v9, %v6434_v28  ;;  %v6701_v18 = vsel %vm3694_vm13, %v6700_v43, %v6696_v27  ;;  %v15952_v17 = vld [vmem:[#allocation32_spill] sm:$0xff]  ;;  %v15953_v42 = vld [vmem:[#allocation33_spill] sm:$0xff]  ;;  %v3183_v14 = vld [vmem:[%s14752_s1 + $0x300] sm:$0xff]  ;;  %v8151_v9 = vpack.c.bf16 %v3160_v60, %v3159_v33 }
 0x5d6   :  { %8124 = vmatpush3.bf16.msra.mxu1 %v8123_v51  ;;  %8142 = vmatprep.subr.bf16.mxu0 %v8141_v40  ;;  %v8131_v51 = vpack.c.bf16 %v3134_v1, %v3133_v59  ;;  %v8149_v40 = vpack.c.bf16 %v3176_v5, %v3175_v36  ;;  %v6561_v25 = vrot.slane %v15952_v17, %v9916_v0  ;;  %v3184_v21 = vld [vmem:[%s14752_s1 + $0x308] sm:$0xff]  ;;  %v3177_v10 = vld [vmem:[%s14752_s1 + $0x2d0] sm:$0xff]  ;;  %v3178_v58 = vld [vmem:[%s14752_s1 + $0x2d8] sm:$0xff] }
 0x5d7   :  { %8126 = vmatprep.subr.bf16.mxu1 %v8125_v16  ;;  %v6557_v16 = vrot.slane %v15953_v42, %v15792_v39  ;;  %v6706_v24 = vsel %vm3701_vm14, %v6705_v54, %v6701_v18  ;;  %v15954_v0 = vld [vmem:[#allocation11_spill] sm:$0xff]  ;;  %v3201_v34 = vld [vmem:[%s14752_s1 + $0x390] sm:$0xff]  ;;  %v3202_v3 = vld [vmem:[%s14752_s1 + $0x398] sm:$0xff]  ;;  %v6444_v62 = vsel %vm15940_vm8, %v6443_v13, %v6439_v56  ;;  %v8153_v31 = vpack.c.bf16 %v3178_v58, %v3177_v10 }
 0x5d8   :  { %v6448_v29 = vrot.slane %v15954_v0, %v10044_v8  ;;  %v15955_v39 = vld [vmem:[#allocation35_spill] sm:$0xff]  ;;  %v6711_v43 = vsel %vm3708_vm15, %v6710_v22, %v6706_v24  ;;  %v3161_v48 = vld [vmem:[%s14752_s1 + $0x250] sm:$0xff]  ;;  %v8169_v32 = vpack.c.bf16 %v3202_v3, %v3201_v34  ;;  %v3186_v61 = vld [vmem:[%s14752_s1 + $0x318] sm:$0xff] }
 0x5d9   :  { %8144 = vmatpush3.bf16.msra.mxu0 %v8143_v4  ;;  %v6566_v55 = vrot.slane %v15955_v39, %v15910_v38  ;;  %v15956_v2 = vld [vmem:[#allocation103_spill] sm:$0xff]  ;;  %v8167_v38 = vpack.c.bf16 %v3184_v21, %v3183_v14  ;;  %v3162_v4 = vld [vmem:[%s14752_s1 + $0x258] sm:$0xff]  ;;  %v3185_v27 = vld [vmem:[%s14752_s1 + $0x310] sm:$0xff]  ;;  %v6562_v59 = vsel %vm3610_vm1, %v6561_v25, %v6557_v16 }
 0x5da   :  { %8128 = vmatpush3.bf16.msra.mxu1 %v8127_v35  ;;  %8146 = vmatprep.subr.bf16.mxu0 %v8145_v23  ;;  %v6714_v11 = vsel %vm4895_vm11, %v6316_v63, %v15956_v2  ;;  %v15957_v35 = vld [vmem:[#allocation10_spill] sm:$0xff]  ;;  %v6449_v1 = vsel %vm3673_vm10, %v6448_v29, %v6444_v62  ;;  %v15958_v36 = vld [vmem:[#allocation13_spill] sm:$0xff]  ;;  %v3204_v47 = vld [vmem:[%s14752_s1 + $0x3a8] sm:$0xff]  ;;  %v8155_v57 = vpack.c.bf16 %v3162_v4, %v3161_v48 }
 0x5db   :  { %8130 = vmatprep.subr.bf16.mxu1 %v8129_v6  ;;  %v6453_v23 = vrot.slane %v15957_v35, %v10041_v41  ;;  %v3179_v54 = vld [vmem:[%s14752_s1 + $0x2e0] sm:$0xff]  ;;  %v3180_v6 = vld [vmem:[%s14752_s1 + $0x2e8] sm:$0xff]  ;;  %v6458_v5 = vrot.slane %v15958_v36, %v10074_v50  ;;  %v6567_v12 = vsel %vm3617_vm2, %v6566_v55, %v6562_v59  ;;  %v15960_v13 = vld [vmem:[#allocation37_spill] sm:$0xff] }
 0x5dc   :  { %v15959_v28 = vld [vmem:[#allocation34_spill] sm:$0xff]  ;;  %v6576_v56 = vrot.slane %v15960_v13, %v15804_v44  ;;  %v8157_v22 = vpack.c.bf16 %v3180_v6, %v3179_v54  ;;  %vm15962_vm1 = vmmov %vm15919_vm9  ;;  %v3188_v17 = vld [vmem:[%s14752_s1 + $0x328] sm:$0xff] }
 0x5dd   :  { %8148 = vmatpush3.bf16.msra.mxu0 %v8147_v7  ;;  %v6571_v63 = vrot.slane %v15959_v28, %v15799_v26  ;;  %v3203_v45 = vld [vmem:[%s14752_s1 + $0x3a0] sm:$0xff]  ;;  %v15961_v7 = vld [vmem:[#allocation143_spill] sm:$0xff]  ;;  %v8171_v26 = vpack.c.bf16 %v3186_v61, %v3185_v27  ;;  %v6454_v33 = vsel %vm15962_vm1, %v6453_v23, %v6449_v1  ;;  %v3181_v25 = vld [vmem:[%s14752_s1 + $0x2f0] sm:$0xff] }
 0x5de   :  { %8132 = vmatpush3.bf16.msra.mxu1 %v8131_v51  ;;  %8150 = vmatprep.subr.bf16.mxu0 %v8149_v40  ;;  %v6719_v18 = vsel %vm4895_vm11, %v6711_v43, %v15961_v7  ;;  %v3163_v51 = vld [vmem:[%s14752_s1 + $0x260] sm:$0xff]  ;;  %v3164_v40 = vld [vmem:[%s14752_s1 + $0x268] sm:$0xff]  ;;  %v8173_v60 = vpack.c.bf16 %v3204_v47, %v3203_v45  ;;  %v3182_v42 = vld [vmem:[%s14752_s1 + $0x2f8] sm:$0xff]  ;;  %v6459_v14 = vsel %vm3687_vm12, %v6458_v5, %v6454_v33 }
 0x5df   :  { %8166 = vmatprep.subr.bf16.mxu1 %v8165_v30  ;;  %v3187_v44 = vld [vmem:[%s14752_s1 + $0x320] sm:$0xff]  ;;  %v15963_v16 = vld [vmem:[#allocation12_spill] sm:$0xff]  ;;  %v6572_v21 = vsel %vm3624_vm3, %v6571_v63, %v6567_v12  ;;  %v3206_v10 = vld [vmem:[%s14752_s1 + $0x3b8] sm:$0xff]  ;;  %v8159_v34 = vpack.c.bf16 %v3164_v40, %v3163_v51 }
 0x5e0   :  { %v6463_v30 = vrot.slane %v15963_v16, %v10059_v52  ;;  %v3205_v24 = vld [vmem:[%s14752_s1 + $0x3b0] sm:$0xff]  ;;  %v15964_v0 = vld [vmem:[#allocation15_spill] sm:$0xff]  ;;  %v6577_v58 = vsel %vm3631_vm4, %v6576_v56, %v6572_v21  ;;  %v15967_v48 = vld [vmem:[#allocation14_spill] sm:$0xff] }
 0x5e1   :  { %6863 = vmatmul.mubr.f32.vlgmr.msra.gmra.mrb[4].mxu1 %v6714_v11  ;;  %8152 = vmatpush3.bf16.msra.mxu0 %v8151_v9  ;;  %v6468_v29 = vrot.slane %v15964_v0, %v15743_v19  ;;  %v15965_v39 = vld [vmem:[#allocation36_spill] sm:$0xff]  ;;  %v15966_v3 = vld [vmem:[#allocation39_spill] sm:$0xff]  ;;  %v8175_v11 = vpack.c.bf16 %v3188_v17, %v3187_v44  ;;  %v8161_v9 = vpack.c.bf16 %v3182_v42, %v3181_v25  ;;  %v3207_v35 = vld [vmem:[%s14752_s1 + $0x3c0] sm:$0xff] }
 0x5e2   :  { %8168 = vmatpush3.bf16.msra.mxu1 %v8167_v38  ;;  %7002 = vmatprep.mubr.f32.mxu1 %v6719_v18  ;;  %v6581_v55 = vrot.slane %v15965_v39, %v15810_v46  ;;  %v6586_v2 = vrot.slane %v15966_v3, %v15815_v49  ;;  %v3165_v62 = vld [vmem:[%s14752_s1 + $0x270] sm:$0xff]  ;;  %v3166_v38 = vld [vmem:[%s14752_s1 + $0x278] sm:$0xff]  ;;  %v8177_v46 = vpack.c.bf16 %v3206_v10, %v3205_v24  ;;  %v3208_v23 = vld [vmem:[%s14752_s1 + $0x3c8] sm:$0xff] }
 0x5e3   :  { %8154 = vmatprep.subr.bf16.mxu0 %v8153_v31  ;;  %8170 = vmatprep.subr.bf16.mxu1 %v8169_v32  ;;  %v3189_v43 = vld [vmem:[%s14752_s1 + $0x330] sm:$0xff]  ;;  %v3190_v49 = vld [vmem:[%s14752_s1 + $0x338] sm:$0xff]  ;;  %v6473_v4 = vrot.slane %v15967_v48, %v15742_v15  ;;  %v6464_v27 = vsel %vm3694_vm13, %v6463_v30, %v6459_v14  ;;  %v15968_v31 = vld [vmem:[#allocation38_spill] sm:$0xff]  ;;  %v8163_v54 = vpack.c.bf16 %v3166_v38, %v3165_v62 }
 0x5e4   :  { %v6469_v59 = vsel %vm3701_vm14, %v6468_v29, %v6464_v27  ;;  %v6591_v32 = vrot.slane %v15968_v31, %v9963_v37  ;;  %v6582_v61 = vsel %vm3638_vm5, %v6581_v55, %v6577_v58  ;;  %v15969_v1 = vld [vmem:[#allocation41_spill] sm:$0xff]  ;;  %v8179_v5 = vpack.c.bf16 %v3190_v49, %v3189_v43  ;;  %v3191_v63 = vld [vmem:[%s14752_s1 + $0x340] sm:$0xff]  ;;  %v3192_v37 = vld [vmem:[%s14752_s1 + $0x348] sm:$0xff] }
 0x5e5   :  { %8156 = vmatpush3.bf16.msra.mxu0 %v8155_v57  ;;  %v6587_v6 = vsel %vm3645_vm6, %v6586_v2, %v6582_v61  ;;  %v6596_v36 = vrot.slane %v15969_v1, %v10012_v53  ;;  %v8181_v28 = vpack.c.bf16 %v3208_v23, %v3207_v35  ;;  %v6474_v12 = vsel %vm3708_vm15, %v6473_v4, %v6469_v59  ;;  %v3209_v45 = vld [vmem:[%s14752_s1 + $0x3d0] sm:$0xff]  ;;  %v3210_v53 = vld [vmem:[%s14752_s1 + $0x3d8] sm:$0xff]  ;;  %vm15971_vm2 = vmmov %vm15934_vm0 }
 0x5e6   :  { %8172 = vmatpush3.bf16.msra.mxu1 %v8171_v26  ;;  %8158 = vmatprep.subr.bf16.mxu0 %v8157_v22  ;;  %v15970_v47 = vld [vmem:[#allocation40_spill] sm:$0xff]  ;;  %v6592_v56 = vsel %vm15971_vm2, %v6591_v32, %v6587_v6  ;;  %vm15972_vm3 = vmmov %vm15935_vm7  ;;  %v15973_v18 = vld [vmem:[#allocation43_spill] sm:$0xff]  ;;  %v8183_v26 = vpack.c.bf16 %v3192_v37, %v3191_v63  ;;  %v8185_v40 = vpack.c.bf16 %v3210_v53, %v3209_v45 }
 0x5e7   :  { %8174 = vmatprep.subr.bf16.mxu1 %v8173_v60  ;;  %v6601_v13 = vrot.slane %v15970_v47, %v9997_v20  ;;  %v6597_v7 = vsel %vm15972_vm3, %v6596_v36, %v6592_v56  ;;  %v6606_v57 = vrot.slane %v15973_v18, %v10044_v8  ;;  %v15974_v22 = vld [vmem:[#allocation121_spill] sm:$0xff]  ;;  %v3193_v44 = vld [vmem:[%s14752_s1 + $0x350] sm:$0xff]  ;;  %v3211_v8 = vld [vmem:[%s14752_s1 + $0x3e0] sm:$0xff] }
 0x5e8   :  { %v6716_v51 = vsel %vm4895_vm11, %v6474_v12, %v15974_v22  ;;  %v3194_v20 = vld [vmem:[%s14752_s1 + $0x358] sm:$0xff]  ;;  %v3212_v33 = vld [vmem:[%s14752_s1 + $0x3e8] sm:$0xff]  ;;  %v15975_v60 = vld [vmem:[#allocation42_spill] sm:$0xff] }
 0x5e9   :  { %8160 = vmatpush3.bf16.msra.mxu0 %v8159_v34  ;;  %v6611_v17 = vrot.slane %v15975_v60, %v10041_v41  ;;  %vm15976_vm4 = vmmov %vm15940_vm8  ;;  %v15977_v16 = vld [vmem:[#allocation45_spill] sm:$0xff]  ;;  %v8187_v14 = vpack.c.bf16 %v3194_v20, %v3193_v44  ;;  %v8189_v21 = vpack.c.bf16 %v3212_v33, %v3211_v8  ;;  %v3195_v24 = vld [vmem:[%s14752_s1 + $0x360] sm:$0xff] }
 0x5ea   :  { %8176 = vmatpush3.bf16.msra.mxu1 %v8175_v11  ;;  %8162 = vmatprep.subr.bf16.mxu0 %v8161_v9  ;;  %v6602_v25 = vsel %vm15976_vm4, %v6601_v13, %v6597_v7  ;;  %v6616_v30 = vrot.slane %v15977_v16, %v10074_v50  ;;  %v3196_v10 = vld [vmem:[%s14752_s1 + $0x368] sm:$0xff]  ;;  %v3213_v41 = vld [vmem:[%s14752_s1 + $0x3f0] sm:$0xff]  ;;  %v3214_v50 = vld [vmem:[%s14752_s1 + $0x3f8] sm:$0xff] }
 0x5eb   :  { %8178 = vmatprep.subr.bf16.mxu1 %v8177_v46  ;;  %v6607_v42 = vsel %vm3673_vm10, %v6606_v57, %v6602_v25  ;;  %v15978_v0 = vld [vmem:[#allocation44_spill] sm:$0xff]  ;;  %vm15979_vm5 = vmmov %vm15962_vm1  ;;  %v15980_v58 = vld [vmem:[#allocation47_spill] sm:$0xff]  ;;  %v8191_v3 = vpack.c.bf16 %v3196_v10, %v3195_v24  ;;  %v8193_v2 = vpack.c.bf16 %v3214_v50, %v3213_v41 }
 0x5ec   :  { %v6621_v29 = vrot.slane %v15978_v0, %v10059_v52  ;;  %v6612_v39 = vsel %vm15979_vm5, %v6611_v17, %v6607_v42  ;;  %v6626_v34 = vrot.slane %v15980_v58, %v15743_v19  ;;  %v3197_v11 = vld [vmem:[%s14752_s1 + $0x370] sm:$0xff]  ;;  %v3198_v9 = vld [vmem:[%s14752_s1 + $0x378] sm:$0xff]  ;;  %v15981_v52 = vld [vmem:[#allocation46_spill] sm:$0xff] }
 0x5ed   :  { %8164 = vmatpush3.bf16.msra.mxu0 %v8163_v54  ;;  %v6617_v55 = vsel %vm3687_vm12, %v6616_v30, %v6612_v39  ;;  %v6631_v62 = vrot.slane %v15981_v52, %v15742_v15  ;;  %v8195_v19 = vpack.c.bf16 %v3198_v9, %v3197_v11  ;;  %v15982_v49 = vld [vmem:[#allocation139_spill] sm:$0xff]  ;;  %v15983_v23 = vld [vmem:[#allocation142_spill] sm:$0xff] }
 0x5ee   :  { %8180 = vmatpush3.bf16.msra.mxu1 %v8179_v5  ;;  %v6622_v38 = vsel %vm3694_vm13, %v6621_v29, %v6617_v55  ;;  %v7021_v18 = vld [vmem:[%s14753_s2] ss:$0 sm:$0xff] }
 0x5ef   :  { %8182 = vmatprep.subr.bf16.mxu1 %v8181_v28  ;;  %v6627_v46 = vsel %vm3701_vm14, %v6626_v34, %v6622_v38 }
 0x5f0   :  { %6933 = vmatmul.mubr.f32.vlgmr.msra.gmra.mrb[6].mxu0 %v6716_v51  ;;  %v6632_v43 = vsel %vm3708_vm15, %v6631_v62, %v6627_v46 }
 0x5f1   :  { %v6718_v48 = vsel %vm4895_vm11, %v6632_v43, %v15982_v49 }
 0x5f2   :  { %8184 = vmatpush3.bf16.msra.mxu1 %v8183_v26 }
 0x5f3   :  { %8186 = vmatprep.subr.bf16.mxu1 %v8185_v40 }
 0x5f6   :  { %8188 = vmatpush3.bf16.msra.mxu1 %v8187_v14 }
 0x5f7   :  { %8190 = vmatprep.subr.bf16.mxu1 %v8189_v21 }
 0x5fa   :  { %8192 = vmatpush3.bf16.msra.mxu1 %v8191_v3 }
 0x5fb   :  { %8194 = vmatprep.subr.bf16.mxu1 %v8193_v2 }
 0x5fe   :  { %8196 = vmatpush3.bf16.msra.mxu1 %v8195_v19 }
 0x601   :  { %7003 = vmatmul.mubr.f32.vlgmr.msra.gmra.mrb[6].mxu1 %v6718_v48 }
 0x683   :  { %v7763_v4 = vpop.f32.mrb[2].mxu0 }
 0x684   :  { %v7764_v27 = vpop.f32.mrb[3].mxu0 }
 0x685   :  { %v7765_v35 = vadd.f32 %v7764_v27, %v7763_v4 }
 0x687   :  { %v5119_v59 = vadd.f32 %v7765_v35, %v15983_v23 }
 0x694   :  { %v7798_v15 = vpop.f32.mrb[2].mxu1 }
 0x695   :  { %v7799_v31 = vpop.f32.mrb[3].mxu1 }
 0x696   :  { %v7800_v32 = vadd.f32 %v7799_v31, %v7798_v15 }
 0x698   :  { %v5189_v61 = vadd.f32 %v7800_v32, %v5119_v59 }
 0x6a3   :  { %v7833_v54 = vpop.f32.mrb[4].mxu0 }
 0x6a4   :  { %v7834_v6 = vpop.f32.mrb[5].mxu0 }
 0x6a5   :  { %v7835_v1 = vadd.f32 %v7834_v6, %v7833_v54 }
 0x6a7   :  { %v6795_v36 = vadd.f32 %v7835_v1, %v5189_v61 }
 0x6b4   :  { %v7868_v5 = vpop.f32.mrb[4].mxu1 }
 0x6b5   :  { %v7869_v28 = vpop.f32.mrb[5].mxu1 }
 0x6b6   :  { %v7870_v63 = vadd.f32 %v7869_v28, %v7868_v5 }
 0x6b8   :  { %v6865_v37 = vadd.f32 %v7870_v63, %v6795_v36 }
 0x6c3   :  { %v7903_v12 = vpop.f32.mrb[6].mxu0 }
 0x6c4   :  { %v7904_v45 = vpop.f32.mrb[7].mxu0 }
 0x6c5   :  { %v7905_v53 = vadd.f32 %v7904_v45, %v7903_v12 }
 0x6c7   :  { %v6935_v47 = vadd.f32 %v7905_v53, %v6865_v37 }
 0x6d4   :  { %v7938_v13 = vpop.f32.mrb[6].mxu1 }
 0x6d5   :  { %v7939_v56 = vpop.f32.mrb[7].mxu1 }
 0x6d6   :  { %v7940_v7 = vadd.f32 %v7939_v56, %v7938_v13 }
 0x6d8   :  { %v7005_v57 = vadd.f32 %v7940_v7, %v6935_v47 }
 0x6da   :  { %v7015_v26 = vadd.f32 %v7021_v18, %v7005_v57 }
 0x6dc   :  { %7016 = vst [vmem:[%s14754_s3] sm:$0x3] %v7015_v26 }

</bundles_post_ra>
